<compile_context>
chip_gen: v6e
topology: v6e:2x2x1
jax: 0.10.0
libtpu: 0.0.40
codegen_flags: <defaults>
</compile_context>

<pallas_src>
import numpy as np
import jax
import jax.numpy as jnp
from jax.experimental import pallas as pl
from jax.experimental.pallas import tpu as pltpu

# ----------------------------- configuration --------------------------------
BATCH = 2
IMG_C, IMG_H, IMG_W = 3, 16, 16
# (c_in, c_out, kernel, stride, padding) for the 4 conv layers
CONV_PARAMS = [(3, 8, 3, 2, 1), (8, 8, 3, 2, 1), (8, 8, 3, 1, 1), (8, 8, 3, 1, 1)]
D = 4                               # conv output spatial size (16 -> 8 -> 4 -> 4 -> 4)
N_OBJ = D * D                       # d**2 objects
Q_DIM = 8                           # question vector size
C2 = CONV_PARAMS[-1][1] + 2         # conv channels + 2 coord dims = 10
G_IN = 2 * C2 + Q_DIM               # 28
G_PARAMS = [(G_IN, 32), (32, 32), (32, 32), (32, 32)]
F_PARAMS = [(32, 32), (32, 32), (32, 10)]
BN_EPS = 1e-5


# ------------------------------- Pallas kernel -------------------------------
def relation_network_kernel(
        x0_ref, q_ref,
        s1_ref, k1_ref, a1_ref,
        s2_ref, k2_ref, a2_ref,
        s3_ref, k3_ref, a3_ref,
        s4_ref, k4_ref, a4_ref,
        ti_ref, tj_ref, hic_ref, hjc_ref,
        w1af_ref, w1bf_ref, w1c_ref, b1_ref,
        gw2_ref, gb2_ref, gw3_ref, gb3_ref, gw4_ref, gb4_ref,
        fw1_ref, fb1_ref, fw2_ref, fb2_ref, fw3_ref, fb3_ref,
        out_ref):
    """One grid step == the full forward pass for one batch element."""

    def mm(a, b):
        return jnp.dot(a, b, preferred_element_type=jnp.float32)

    def conv_relu_bn(x, s_ref, k_ref, a_ref):
        # conv as a sum over the k*k kernel offsets:  out = sum_t S_t @ (x @ W_t)
        # (S_t are constant 0/1 shift+zero-pad matrices; everything rides the MXU).
        acc = mm(s_ref[0], mm(x, k_ref[0]))
        for t in range(1, s_ref.shape[0]):
            acc = acc + mm(s_ref[t], mm(x, k_ref[t]))
        y = jnp.maximum(acc + a_ref[0], 0.0)          # conv bias + ReLU (ReLU before BN)
        return y * a_ref[1] + a_ref[2]                # BatchNorm2d (eval): scale/shift
        # TODO(synk): BatchNorm2d reproduced in eval mode (running stats); train-mode
        #             batch statistics are not computed here.

    x = x0_ref[0]                                     # (H*W, Cin) rows of this batch
    x = conv_relu_bn(x, s1_ref, k1_ref, a1_ref)       # (64, 8)
    x = conv_relu_bn(x, s2_ref, k2_ref, a2_ref)       # (16, 8)
    x = conv_relu_bn(x, s3_ref, k3_ref, a3_ref)       # (16, 8)
    x = conv_relu_bn(x, s4_ref, k4_ref, a4_ref)       # (16, 8)  objects x channels

    qb = q_ref[0]                                     # (1, Q)

    # first g layer, split by linearity over [x_i | x_j | q]; the coord parts are
    # precomputed constants (hic / hjc), so they are never recomputed per pair.
    hi = mm(x, w1af_ref[...]) + hic_ref[...]          # (16, 32)  "i"-object term
    hj = mm(x, w1bf_ref[...]) + hjc_ref[...]          # (16, 32)  "j"-object term
    hq = mm(qb, w1c_ref[...]) + b1_ref[...]           # (1, 32)   question + bias

    # build all n^2 = 256 pair rows at once with constant replication matmuls (MXU),
    # then run the remaining g layers as one batched (256, 32) matmul chain.
    h = mm(ti_ref[...], hi) + mm(tj_ref[...], hj) + hq    # (256, 32)
    h = jnp.maximum(h, 0.0)
    h = jnp.maximum(mm(h, gw2_ref[...]) + gb2_ref[...], 0.0)
    h = jnp.maximum(mm(h, gw3_ref[...]) + gb3_ref[...], 0.0)
    h = mm(h, gw4_ref[...]) + gb4_ref[...]                # (256, 32)  no ReLU on last g layer

    ones = jnp.ones((1, h.shape[0]), jnp.float32)
    xg = mm(ones, h)                                      # (1, 32) sum over d^4 pairs (MXU)

    # f MLP head
    hf = jnp.maximum(mm(xg, fw1_ref[...]) + fb1_ref[...], 0.0)
    hf = mm(hf, fw2_ref[...]) + fb2_ref[...]
    # TODO(synk): nn.Dropout() treated as identity (eval mode).
    hf = jnp.maximum(hf, 0.0)
    out_ref[...] = (mm(hf, fw3_ref[...]) + fb3_ref[...])[None]   # (1, 1, num_classes)


# ----------------------- constant-matrix builders (host) ---------------------
def build_selection(H, W, k, s, p):
    """0/1 matrices S[t] with (S[t] @ x)[ho*Wo+wo] = x_padded[ho*s+kh, wo*s+kw] (t=kh*k+kw)."""
    Ho = (H + 2 * p - k) // s + 1
    Wo = (W + 2 * p - k) // s + 1
    S = np.zeros((k * k, Ho * Wo, H * W), np.float32)
    for kh in range(k):
        for kw in range(k):
            t = kh * k + kw
            for ho in range(Ho):
                ih = ho * s + kh - p
                if ih < 0 or ih >= H:
                    continue
                for wo in range(Wo):
                    iw = wo * s + kw - p
                    if 0 <= iw < W:
                        S[t, ho * Wo + wo, ih * W + iw] = 1.0
    return S, Ho, Wo


def build_pair_maps(n):
    """Replication maps: row r = a*n + i of (Ti @ H) is H[i], of (Tj @ H) is H[a]."""
    ti = np.zeros((n * n, n), np.float32)
    tj = np.zeros((n * n, n), np.float32)
    for a in range(n):
        for i in range(n):
            r = a * n + i
            ti[r, i] = 1.0
            tj[r, a] = 1.0
    return ti, tj


# ------------------------------ JAX wrapper ----------------------------------
def relation_network_forward(im, q, params):
    B = im.shape[0]
    num_classes = F_PARAMS[-1][1]
    # NCHW -> rows ordered (h*W + w), channels on lanes
    x0 = jnp.transpose(im, (0, 2, 3, 1)).reshape(B, IMG_H * IMG_W, IMG_C)
    q3 = q[:, None, :]                                               # (B, 1, Q)

    args = [x0, q3]
    in_specs = [
        pl.BlockSpec((1, IMG_H * IMG_W, IMG_C), lambda b: (b, 0, 0)),
        pl.BlockSpec((1, 1, Q_DIM), lambda b: (b, 0, 0)),
    ]

    def add_const(arr):
        args.append(arr)
        nd = arr.ndim
        in_specs.append(pl.BlockSpec(arr.shape, lambda b, _nd=nd: (0,) * _nd))

    for layer in params["conv"]:
        add_const(layer["sel"])
        add_const(layer["wk"])
        add_const(layer["affine"])
    add_const(params["ti"])
    add_const(params["tj"])
    g = params["g"]
    add_const(g["hic"])
    add_const(g["hjc"])
    for name in ("w1af", "w1bf", "w1c", "b1", "w2", "b2", "w3", "b3", "w4", "b4"):
        add_const(g[name])
    f = params["f"]
    for name in ("w1", "b1", "w2", "b2", "w3", "b3"):
        add_const(f[name])

    out = pl.pallas_call(
        relation_network_kernel,
        out_shape=jax.ShapeDtypeStruct((B, 1, num_classes), jnp.float32),
        grid=(B,),
        in_specs=in_specs,
        out_specs=pl.BlockSpec((1, 1, num_classes), lambda b: (b, 0, 0)),
        compiler_params=pltpu.CompilerParams(dimension_semantics=("parallel",)),
    )(*args)
    return out.reshape(B, num_classes)


# ------------------------------- parameter init -------------------------------
def init_params(key):
    params = {"conv": [], "g": {}, "f": {}}

    H, W = IMG_H, IMG_W
    for (cin, cout, k, s, p) in CONV_PARAMS:
        key, k1, k2 = jax.random.split(key, 3)
        fan_in = cin * k * k
        w = jax.random.normal(k1, (cout, cin, k, k), jnp.float32) / np.sqrt(fan_in)
        b = jax.random.normal(k2, (cout,), jnp.float32) * 0.05
        gamma = jnp.ones((cout,), jnp.float32)
        beta = jnp.zeros((cout,), jnp.float32)
        rm = jnp.zeros((cout,), jnp.float32)
        rv = jnp.ones((cout,), jnp.float32)

        sel, Ho, Wo = build_selection(H, W, k, s, p)
        # weight per kernel offset t = kh*k + kw, laid out (k*k, Cin, Cout)
        wk = jnp.transpose(w, (2, 3, 1, 0)).reshape(k * k, cin, cout)
        scale = gamma / jnp.sqrt(rv + BN_EPS)
        shift = beta - rm * scale
        affine = jnp.stack([b, scale, shift], axis=0).reshape(3, 1, cout)
        params["conv"].append(dict(sel=jnp.asarray(sel), wk=wk, affine=affine))
        H, W = Ho, Wo

    def lin(key, shape):
        k1, k2 = jax.random.split(key)
        w = jax.random.normal(k1, shape, jnp.float32) / np.sqrt(shape[0])
        b = jax.random.normal(k2, (1, shape[1]), jnp.float32) * 0.05
        return w, b

    gw, gb = [], []
    for shp in G_PARAMS:
        key, sub = jax.random.split(key)
        w_, b_ = lin(sub, shp)
        gw.append(w_)
        gb.append(b_)
    fw, fb = [], []
    for shp in F_PARAMS:
        key, sub = jax.random.split(key)
        w_, b_ = lin(sub, shp)
        fw.append(w_)
        fb.append(b_)

    # coord tensor: cvt_coord(i) = [(i / d - 2) / 2.0, (i % d - 2) / 2.0]
    idx = np.arange(N_OBJ, dtype=np.float64)
    coord = jnp.asarray(
        np.stack([(idx / D - 2.0) / 2.0, (idx % D - 2.0) / 2.0], axis=1), jnp.float32)

    cch = CONV_PARAMS[-1][1]                 # conv channels feeding x_flat (8)
    w1 = gw[0]                               # (2*C2 + Q, 32), feature order [x_i | x_j | q]
    w1a, w1b, w1c = w1[:C2], w1[C2:2 * C2], w1[2 * C2:]
    params["g"] = dict(
        w1af=w1a[:cch], w1bf=w1b[:cch], w1c=w1c, b1=gb[0],
        hic=jnp.dot(coord, w1a[cch:]),       # (d^2, 32) constant coord contribution (x_i)
        hjc=jnp.dot(coord, w1b[cch:]),       # (d^2, 32) constant coord contribution (x_j)
        w2=gw[1], b2=gb[1], w3=gw[2], b3=gb[2], w4=gw[3], b4=gb[3],
    )
    params["f"] = dict(w1=fw[0], b1=fb[0], w2=fw[1], b2=fb[1], w3=fw[2], b3=fb[2])

    ti, tj = build_pair_maps(N_OBJ)
    params["ti"] = jnp.asarray(ti)
    params["tj"] = jnp.asarray(tj)
    return params


# ------------------------------------ main ------------------------------------
if __name__ == "__main__":
    key = jax.random.PRNGKey(0)
    k_im, k_q, k_p = jax.random.split(key, 3)

    im = jax.random.normal(k_im, (BATCH, IMG_C, IMG_H, IMG_W), jnp.float32)   # NCHW
    q = jax.random.normal(k_q, (BATCH, Q_DIM), jnp.float32)
    params = init_params(k_p)

    fwd = jax.jit(relation_network_forward)
    out = fwd(im, q, params)
    out = jax.block_until_ready(out)

    assert out.shape == (BATCH, F_PARAMS[-1][1]), out.shape
    assert bool(jnp.all(jnp.isfinite(out)))
    print("KERNEL_OK")
</pallas_src>

<mosaic_0001>
module attributes {stable_mosaic.version = 11 : i64} {
  func.func @relation_network_kernel(%arg0: i32, %arg1: memref<1x256x3xf32, #tpu.memory_space<vmem>>, %arg2: memref<1x1x8xf32, #tpu.memory_space<vmem>>, %arg3: memref<9x64x256xf32, #tpu.memory_space<vmem>>, %arg4: memref<9x3x8xf32, #tpu.memory_space<vmem>>, %arg5: memref<3x1x8xf32, #tpu.memory_space<vmem>>, %arg6: memref<9x16x64xf32, #tpu.memory_space<vmem>>, %arg7: memref<9x8x8xf32, #tpu.memory_space<vmem>>, %arg8: memref<3x1x8xf32, #tpu.memory_space<vmem>>, %arg9: memref<9x16x16xf32, #tpu.memory_space<vmem>>, %arg10: memref<9x8x8xf32, #tpu.memory_space<vmem>>, %arg11: memref<3x1x8xf32, #tpu.memory_space<vmem>>, %arg12: memref<9x16x16xf32, #tpu.memory_space<vmem>>, %arg13: memref<9x8x8xf32, #tpu.memory_space<vmem>>, %arg14: memref<3x1x8xf32, #tpu.memory_space<vmem>>, %arg15: memref<256x16xf32, #tpu.memory_space<vmem>>, %arg16: memref<256x16xf32, #tpu.memory_space<vmem>>, %arg17: memref<16x32xf32, #tpu.memory_space<vmem>>, %arg18: memref<16x32xf32, #tpu.memory_space<vmem>>, %arg19: memref<8x32xf32, #tpu.memory_space<vmem>>, %arg20: memref<8x32xf32, #tpu.memory_space<vmem>>, %arg21: memref<8x32xf32, #tpu.memory_space<vmem>>, %arg22: memref<1x32xf32, #tpu.memory_space<vmem>>, %arg23: memref<32x32xf32, #tpu.memory_space<vmem>>, %arg24: memref<1x32xf32, #tpu.memory_space<vmem>>, %arg25: memref<32x32xf32, #tpu.memory_space<vmem>>, %arg26: memref<1x32xf32, #tpu.memory_space<vmem>>, %arg27: memref<32x32xf32, #tpu.memory_space<vmem>>, %arg28: memref<1x32xf32, #tpu.memory_space<vmem>>, %arg29: memref<32x32xf32, #tpu.memory_space<vmem>>, %arg30: memref<1x32xf32, #tpu.memory_space<vmem>>, %arg31: memref<32x32xf32, #tpu.memory_space<vmem>>, %arg32: memref<1x32xf32, #tpu.memory_space<vmem>>, %arg33: memref<32x10xf32, #tpu.memory_space<vmem>>, %arg34: memref<1x10xf32, #tpu.memory_space<vmem>>, %arg35: memref<1x1x10xf32, #tpu.memory_space<vmem>>) attributes {dimension_semantics = [#tpu.dimension_semantics<parallel>], iteration_bounds = array<i64: 2>, scalar_prefetch = 0 : i64, scratch_operands = 0 : i64, tpu.core_type = #tpu.core_type<tc>, window_params = [{transform_indices = @transform_0, window_bounds = array<i64: 1, 256, 3>}, {transform_indices = @transform_1, window_bounds = array<i64: 1, 1, 8>}, {pipeline_mode = #tpu.pipeline_mode<synchronous>, transform_indices = @transform_2, window_bounds = array<i64: 9, 64, 256>}, {pipeline_mode = #tpu.pipeline_mode<synchronous>, transform_indices = @transform_3, window_bounds = array<i64: 9, 3, 8>}, {pipeline_mode = #tpu.pipeline_mode<synchronous>, transform_indices = @transform_4, window_bounds = array<i64: 3, 1, 8>}, {pipeline_mode = #tpu.pipeline_mode<synchronous>, transform_indices = @transform_5, window_bounds = array<i64: 9, 16, 64>}, {pipeline_mode = #tpu.pipeline_mode<synchronous>, transform_indices = @transform_6, window_bounds = array<i64: 9, 8, 8>}, {pipeline_mode = #tpu.pipeline_mode<synchronous>, transform_indices = @transform_7, window_bounds = array<i64: 3, 1, 8>}, {pipeline_mode = #tpu.pipeline_mode<synchronous>, transform_indices = @transform_8, window_bounds = array<i64: 9, 16, 16>}, {pipeline_mode = #tpu.pipeline_mode<synchronous>, transform_indices = @transform_9, window_bounds = array<i64: 9, 8, 8>}, {pipeline_mode = #tpu.pipeline_mode<synchronous>, transform_indices = @transform_10, window_bounds = array<i64: 3, 1, 8>}, {pipeline_mode = #tpu.pipeline_mode<synchronous>, transform_indices = @transform_11, window_bounds = array<i64: 9, 16, 16>}, {pipeline_mode = #tpu.pipeline_mode<synchronous>, transform_indices = @transform_12, window_bounds = array<i64: 9, 8, 8>}, {pipeline_mode = #tpu.pipeline_mode<synchronous>, transform_indices = @transform_13, window_bounds = array<i64: 3, 1, 8>}, {pipeline_mode = #tpu.pipeline_mode<synchronous>, transform_indices = @transform_14, window_bounds = array<i64: 256, 16>}, {pipeline_mode = #tpu.pipeline_mode<synchronous>, transform_indices = @transform_15, window_bounds = array<i64: 256, 16>}, {pipeline_mode = #tpu.pipeline_mode<synchronous>, transform_indices = @transform_16, window_bounds = array<i64: 16, 32>}, {pipeline_mode = #tpu.pipeline_mode<synchronous>, transform_indices = @transform_17, window_bounds = array<i64: 16, 32>}, {pipeline_mode = #tpu.pipeline_mode<synchronous>, transform_indices = @transform_18, window_bounds = array<i64: 8, 32>}, {pipeline_mode = #tpu.pipeline_mode<synchronous>, transform_indices = @transform_19, window_bounds = array<i64: 8, 32>}, {pipeline_mode = #tpu.pipeline_mode<synchronous>, transform_indices = @transform_20, window_bounds = array<i64: 8, 32>}, {pipeline_mode = #tpu.pipeline_mode<synchronous>, transform_indices = @transform_21, window_bounds = array<i64: 1, 32>}, {pipeline_mode = #tpu.pipeline_mode<synchronous>, transform_indices = @transform_22, window_bounds = array<i64: 32, 32>}, {pipeline_mode = #tpu.pipeline_mode<synchronous>, transform_indices = @transform_23, window_bounds = array<i64: 1, 32>}, {pipeline_mode = #tpu.pipeline_mode<synchronous>, transform_indices = @transform_24, window_bounds = array<i64: 32, 32>}, {pipeline_mode = #tpu.pipeline_mode<synchronous>, transform_indices = @transform_25, window_bounds = array<i64: 1, 32>}, {pipeline_mode = #tpu.pipeline_mode<synchronous>, transform_indices = @transform_26, window_bounds = array<i64: 32, 32>}, {pipeline_mode = #tpu.pipeline_mode<synchronous>, transform_indices = @transform_27, window_bounds = array<i64: 1, 32>}, {pipeline_mode = #tpu.pipeline_mode<synchronous>, transform_indices = @transform_28, window_bounds = array<i64: 32, 32>}, {pipeline_mode = #tpu.pipeline_mode<synchronous>, transform_indices = @transform_29, window_bounds = array<i64: 1, 32>}, {pipeline_mode = #tpu.pipeline_mode<synchronous>, transform_indices = @transform_30, window_bounds = array<i64: 32, 32>}, {pipeline_mode = #tpu.pipeline_mode<synchronous>, transform_indices = @transform_31, window_bounds = array<i64: 1, 32>}, {pipeline_mode = #tpu.pipeline_mode<synchronous>, transform_indices = @transform_32, window_bounds = array<i64: 32, 10>}, {pipeline_mode = #tpu.pipeline_mode<synchronous>, transform_indices = @transform_33, window_bounds = array<i64: 1, 10>}, {transform_indices = @transform_34, window_bounds = array<i64: 1, 1, 10>}]} {
    %c0 = arith.constant 0 : index
    %c0_0 = arith.constant 0 : index
    %c0_1 = arith.constant 0 : index
    %0 = vector.load %arg1[%c0, %c0_0, %c0_1] : memref<1x256x3xf32, #tpu.memory_space<vmem>>, vector<1x256x3xf32>
    %1 = vector.shape_cast %0 : vector<1x256x3xf32> to vector<256x3xf32>
    %c0_2 = arith.constant 0 : index
    %c0_3 = arith.constant 0 : index
    %c0_4 = arith.constant 0 : index
    %2 = vector.load %arg3[%c0_2, %c0_3, %c0_4] : memref<9x64x256xf32, #tpu.memory_space<vmem>>, vector<1x64x256xf32>
    %3 = vector.shape_cast %2 : vector<1x64x256xf32> to vector<64x256xf32>
    %c0_5 = arith.constant 0 : index
    %c0_6 = arith.constant 0 : index
    %c0_7 = arith.constant 0 : index
    %4 = vector.load %arg4[%c0_5, %c0_6, %c0_7] : memref<9x3x8xf32, #tpu.memory_space<vmem>>, vector<1x3x8xf32>
    %5 = vector.shape_cast %4 : vector<1x3x8xf32> to vector<3x8xf32>
    %cst = arith.constant dense<0.000000e+00> : vector<256x8xf32>
    %6 = tpu.matmul %1, %5, %cst {dimension_numbers = #tpu.dot_dimension_numbers<[1], [0], [0], [1], [0, 0, 1, 1], [], []>} : vector<256x3xf32>, vector<3x8xf32>, vector<256x8xf32> -> vector<256x8xf32>
    %cst_8 = arith.constant dense<0.000000e+00> : vector<64x8xf32>
    %7 = tpu.matmul %3, %6, %cst_8 {dimension_numbers = #tpu.dot_dimension_numbers<[1], [0], [0], [1], [0, 0, 1, 1], [], []>} : vector<64x256xf32>, vector<256x8xf32>, vector<64x8xf32> -> vector<64x8xf32>
    %c1 = arith.constant 1 : index
    %c0_9 = arith.constant 0 : index
    %c0_10 = arith.constant 0 : index
    %8 = vector.load %arg3[%c1, %c0_9, %c0_10] : memref<9x64x256xf32, #tpu.memory_space<vmem>>, vector<1x64x256xf32>
    %9 = vector.shape_cast %8 : vector<1x64x256xf32> to vector<64x256xf32>
    %c1_11 = arith.constant 1 : index
    %c0_12 = arith.constant 0 : index
    %c0_13 = arith.constant 0 : index
    %10 = vector.load %arg4[%c1_11, %c0_12, %c0_13] : memref<9x3x8xf32, #tpu.memory_space<vmem>>, vector<1x3x8xf32>
    %11 = vector.shape_cast %10 : vector<1x3x8xf32> to vector<3x8xf32>
    %cst_14 = arith.constant dense<0.000000e+00> : vector<256x8xf32>
    %12 = tpu.matmul %1, %11, %cst_14 {dimension_numbers = #tpu.dot_dimension_numbers<[1], [0], [0], [1], [0, 0, 1, 1], [], []>} : vector<256x3xf32>, vector<3x8xf32>, vector<256x8xf32> -> vector<256x8xf32>
    %cst_15 = arith.constant dense<0.000000e+00> : vector<64x8xf32>
    %13 = tpu.matmul %9, %12, %cst_15 {dimension_numbers = #tpu.dot_dimension_numbers<[1], [0], [0], [1], [0, 0, 1, 1], [], []>} : vector<64x256xf32>, vector<256x8xf32>, vector<64x8xf32> -> vector<64x8xf32>
    %14 = arith.addf %7, %13 : vector<64x8xf32>
    %c2 = arith.constant 2 : index
    %c0_16 = arith.constant 0 : index
    %c0_17 = arith.constant 0 : index
    %15 = vector.load %arg3[%c2, %c0_16, %c0_17] : memref<9x64x256xf32, #tpu.memory_space<vmem>>, vector<1x64x256xf32>
    %16 = vector.shape_cast %15 : vector<1x64x256xf32> to vector<64x256xf32>
    %c2_18 = arith.constant 2 : index
    %c0_19 = arith.constant 0 : index
    %c0_20 = arith.constant 0 : index
    %17 = vector.load %arg4[%c2_18, %c0_19, %c0_20] : memref<9x3x8xf32, #tpu.memory_space<vmem>>, vector<1x3x8xf32>
    %18 = vector.shape_cast %17 : vector<1x3x8xf32> to vector<3x8xf32>
    %cst_21 = arith.constant dense<0.000000e+00> : vector<256x8xf32>
    %19 = tpu.matmul %1, %18, %cst_21 {dimension_numbers = #tpu.dot_dimension_numbers<[1], [0], [0], [1], [0, 0, 1, 1], [], []>} : vector<256x3xf32>, vector<3x8xf32>, vector<256x8xf32> -> vector<256x8xf32>
    %cst_22 = arith.constant dense<0.000000e+00> : vector<64x8xf32>
    %20 = tpu.matmul %16, %19, %cst_22 {dimension_numbers = #tpu.dot_dimension_numbers<[1], [0], [0], [1], [0, 0, 1, 1], [], []>} : vector<64x256xf32>, vector<256x8xf32>, vector<64x8xf32> -> vector<64x8xf32>
    %21 = arith.addf %14, %20 : vector<64x8xf32>
    %c3 = arith.constant 3 : index
    %c0_23 = arith.constant 0 : index
    %c0_24 = arith.constant 0 : index
    %22 = vector.load %arg3[%c3, %c0_23, %c0_24] : memref<9x64x256xf32, #tpu.memory_space<vmem>>, vector<1x64x256xf32>
    %23 = vector.shape_cast %22 : vector<1x64x256xf32> to vector<64x256xf32>
    %c3_25 = arith.constant 3 : index
    %c0_26 = arith.constant 0 : index
    %c0_27 = arith.constant 0 : index
    %24 = vector.load %arg4[%c3_25, %c0_26, %c0_27] : memref<9x3x8xf32, #tpu.memory_space<vmem>>, vector<1x3x8xf32>
    %25 = vector.shape_cast %24 : vector<1x3x8xf32> to vector<3x8xf32>
    %cst_28 = arith.constant dense<0.000000e+00> : vector<256x8xf32>
    %26 = tpu.matmul %1, %25, %cst_28 {dimension_numbers = #tpu.dot_dimension_numbers<[1], [0], [0], [1], [0, 0, 1, 1], [], []>} : vector<256x3xf32>, vector<3x8xf32>, vector<256x8xf32> -> vector<256x8xf32>
    %cst_29 = arith.constant dense<0.000000e+00> : vector<64x8xf32>
    %27 = tpu.matmul %23, %26, %cst_29 {dimension_numbers = #tpu.dot_dimension_numbers<[1], [0], [0], [1], [0, 0, 1, 1], [], []>} : vector<64x256xf32>, vector<256x8xf32>, vector<64x8xf32> -> vector<64x8xf32>
    %28 = arith.addf %21, %27 : vector<64x8xf32>
    %c4 = arith.constant 4 : index
    %c0_30 = arith.constant 0 : index
    %c0_31 = arith.constant 0 : index
    %29 = vector.load %arg3[%c4, %c0_30, %c0_31] : memref<9x64x256xf32, #tpu.memory_space<vmem>>, vector<1x64x256xf32>
    %30 = vector.shape_cast %29 : vector<1x64x256xf32> to vector<64x256xf32>
    %c4_32 = arith.constant 4 : index
    %c0_33 = arith.constant 0 : index
    %c0_34 = arith.constant 0 : index
    %31 = vector.load %arg4[%c4_32, %c0_33, %c0_34] : memref<9x3x8xf32, #tpu.memory_space<vmem>>, vector<1x3x8xf32>
    %32 = vector.shape_cast %31 : vector<1x3x8xf32> to vector<3x8xf32>
    %cst_35 = arith.constant dense<0.000000e+00> : vector<256x8xf32>
    %33 = tpu.matmul %1, %32, %cst_35 {dimension_numbers = #tpu.dot_dimension_numbers<[1], [0], [0], [1], [0, 0, 1, 1], [], []>} : vector<256x3xf32>, vector<3x8xf32>, vector<256x8xf32> -> vector<256x8xf32>
    %cst_36 = arith.constant dense<0.000000e+00> : vector<64x8xf32>
    %34 = tpu.matmul %30, %33, %cst_36 {dimension_numbers = #tpu.dot_dimension_numbers<[1], [0], [0], [1], [0, 0, 1, 1], [], []>} : vector<64x256xf32>, vector<256x8xf32>, vector<64x8xf32> -> vector<64x8xf32>
    %35 = arith.addf %28, %34 : vector<64x8xf32>
    %c5 = arith.constant 5 : index
    %c0_37 = arith.constant 0 : index
    %c0_38 = arith.constant 0 : index
    %36 = vector.load %arg3[%c5, %c0_37, %c0_38] : memref<9x64x256xf32, #tpu.memory_space<vmem>>, vector<1x64x256xf32>
    %37 = vector.shape_cast %36 : vector<1x64x256xf32> to vector<64x256xf32>
    %c5_39 = arith.constant 5 : index
    %c0_40 = arith.constant 0 : index
    %c0_41 = arith.constant 0 : index
    %38 = vector.load %arg4[%c5_39, %c0_40, %c0_41] : memref<9x3x8xf32, #tpu.memory_space<vmem>>, vector<1x3x8xf32>
    %39 = vector.shape_cast %38 : vector<1x3x8xf32> to vector<3x8xf32>
    %cst_42 = arith.constant dense<0.000000e+00> : vector<256x8xf32>
    %40 = tpu.matmul %1, %39, %cst_42 {dimension_numbers = #tpu.dot_dimension_numbers<[1], [0], [0], [1], [0, 0, 1, 1], [], []>} : vector<256x3xf32>, vector<3x8xf32>, vector<256x8xf32> -> vector<256x8xf32>
    %cst_43 = arith.constant dense<0.000000e+00> : vector<64x8xf32>
    %41 = tpu.matmul %37, %40, %cst_43 {dimension_numbers = #tpu.dot_dimension_numbers<[1], [0], [0], [1], [0, 0, 1, 1], [], []>} : vector<64x256xf32>, vector<256x8xf32>, vector<64x8xf32> -> vector<64x8xf32>
    %42 = arith.addf %35, %41 : vector<64x8xf32>
    %c6 = arith.constant 6 : index
    %c0_44 = arith.constant 0 : index
    %c0_45 = arith.constant 0 : index
    %43 = vector.load %arg3[%c6, %c0_44, %c0_45] : memref<9x64x256xf32, #tpu.memory_space<vmem>>, vector<1x64x256xf32>
    %44 = vector.shape_cast %43 : vector<1x64x256xf32> to vector<64x256xf32>
    %c6_46 = arith.constant 6 : index
    %c0_47 = arith.constant 0 : index
    %c0_48 = arith.constant 0 : index
    %45 = vector.load %arg4[%c6_46, %c0_47, %c0_48] : memref<9x3x8xf32, #tpu.memory_space<vmem>>, vector<1x3x8xf32>
    %46 = vector.shape_cast %45 : vector<1x3x8xf32> to vector<3x8xf32>
    %cst_49 = arith.constant dense<0.000000e+00> : vector<256x8xf32>
    %47 = tpu.matmul %1, %46, %cst_49 {dimension_numbers = #tpu.dot_dimension_numbers<[1], [0], [0], [1], [0, 0, 1, 1], [], []>} : vector<256x3xf32>, vector<3x8xf32>, vector<256x8xf32> -> vector<256x8xf32>
    %cst_50 = arith.constant dense<0.000000e+00> : vector<64x8xf32>
    %48 = tpu.matmul %44, %47, %cst_50 {dimension_numbers = #tpu.dot_dimension_numbers<[1], [0], [0], [1], [0, 0, 1, 1], [], []>} : vector<64x256xf32>, vector<256x8xf32>, vector<64x8xf32> -> vector<64x8xf32>
    %49 = arith.addf %42, %48 : vector<64x8xf32>
    %c7 = arith.constant 7 : index
    %c0_51 = arith.constant 0 : index
    %c0_52 = arith.constant 0 : index
    %50 = vector.load %arg3[%c7, %c0_51, %c0_52] : memref<9x64x256xf32, #tpu.memory_space<vmem>>, vector<1x64x256xf32>
    %51 = vector.shape_cast %50 : vector<1x64x256xf32> to vector<64x256xf32>
    %c7_53 = arith.constant 7 : index
    %c0_54 = arith.constant 0 : index
    %c0_55 = arith.constant 0 : index
    %52 = vector.load %arg4[%c7_53, %c0_54, %c0_55] : memref<9x3x8xf32, #tpu.memory_space<vmem>>, vector<1x3x8xf32>
    %53 = vector.shape_cast %52 : vector<1x3x8xf32> to vector<3x8xf32>
    %cst_56 = arith.constant dense<0.000000e+00> : vector<256x8xf32>
    %54 = tpu.matmul %1, %53, %cst_56 {dimension_numbers = #tpu.dot_dimension_numbers<[1], [0], [0], [1], [0, 0, 1, 1], [], []>} : vector<256x3xf32>, vector<3x8xf32>, vector<256x8xf32> -> vector<256x8xf32>
    %cst_57 = arith.constant dense<0.000000e+00> : vector<64x8xf32>
    %55 = tpu.matmul %51, %54, %cst_57 {dimension_numbers = #tpu.dot_dimension_numbers<[1], [0], [0], [1], [0, 0, 1, 1], [], []>} : vector<64x256xf32>, vector<256x8xf32>, vector<64x8xf32> -> vector<64x8xf32>
    %56 = arith.addf %49, %55 : vector<64x8xf32>
    %c8 = arith.constant 8 : index
    %c0_58 = arith.constant 0 : index
    %c0_59 = arith.constant 0 : index
    %57 = vector.load %arg3[%c8, %c0_58, %c0_59] : memref<9x64x256xf32, #tpu.memory_space<vmem>>, vector<1x64x256xf32>
    %58 = vector.shape_cast %57 : vector<1x64x256xf32> to vector<64x256xf32>
    %c8_60 = arith.constant 8 : index
    %c0_61 = arith.constant 0 : index
    %c0_62 = arith.constant 0 : index
    %59 = vector.load %arg4[%c8_60, %c0_61, %c0_62] : memref<9x3x8xf32, #tpu.memory_space<vmem>>, vector<1x3x8xf32>
    %60 = vector.shape_cast %59 : vector<1x3x8xf32> to vector<3x8xf32>
    %cst_63 = arith.constant dense<0.000000e+00> : vector<256x8xf32>
    %61 = tpu.matmul %1, %60, %cst_63 {dimension_numbers = #tpu.dot_dimension_numbers<[1], [0], [0], [1], [0, 0, 1, 1], [], []>} : vector<256x3xf32>, vector<3x8xf32>, vector<256x8xf32> -> vector<256x8xf32>
    %cst_64 = arith.constant dense<0.000000e+00> : vector<64x8xf32>
    %62 = tpu.matmul %58, %61, %cst_64 {dimension_numbers = #tpu.dot_dimension_numbers<[1], [0], [0], [1], [0, 0, 1, 1], [], []>} : vector<64x256xf32>, vector<256x8xf32>, vector<64x8xf32> -> vector<64x8xf32>
    %63 = arith.addf %56, %62 : vector<64x8xf32>
    %c0_65 = arith.constant 0 : index
    %c0_66 = arith.constant 0 : index
    %c0_67 = arith.constant 0 : index
    %64 = vector.load %arg5[%c0_65, %c0_66, %c0_67] : memref<3x1x8xf32, #tpu.memory_space<vmem>>, vector<1x1x8xf32>
    %65 = vector.shape_cast %64 : vector<1x1x8xf32> to vector<1x8xf32>
    %66 = vector.broadcast %65 : vector<1x8xf32> to vector<64x8xf32>
    %67 = arith.addf %63, %66 : vector<64x8xf32>
    %cst_68 = arith.constant 0.000000e+00 : f32
    %68 = vector.broadcast %cst_68 : f32 to vector<64x8xf32>
    %69 = arith.maximumf %67, %68 : vector<64x8xf32>
    %c1_69 = arith.constant 1 : index
    %c0_70 = arith.constant 0 : index
    %c0_71 = arith.constant 0 : index
    %70 = vector.load %arg5[%c1_69, %c0_70, %c0_71] : memref<3x1x8xf32, #tpu.memory_space<vmem>>, vector<1x1x8xf32>
    %71 = vector.shape_cast %70 : vector<1x1x8xf32> to vector<1x8xf32>
    %72 = vector.broadcast %71 : vector<1x8xf32> to vector<64x8xf32>
    %73 = arith.mulf %69, %72 : vector<64x8xf32>
    %c2_72 = arith.constant 2 : index
    %c0_73 = arith.constant 0 : index
    %c0_74 = arith.constant 0 : index
    %74 = vector.load %arg5[%c2_72, %c0_73, %c0_74] : memref<3x1x8xf32, #tpu.memory_space<vmem>>, vector<1x1x8xf32>
    %75 = vector.shape_cast %74 : vector<1x1x8xf32> to vector<1x8xf32>
    %76 = vector.broadcast %75 : vector<1x8xf32> to vector<64x8xf32>
    %77 = arith.addf %73, %76 : vector<64x8xf32>
    %c0_75 = arith.constant 0 : index
    %c0_76 = arith.constant 0 : index
    %c0_77 = arith.constant 0 : index
    %78 = vector.load %arg6[%c0_75, %c0_76, %c0_77] : memref<9x16x64xf32, #tpu.memory_space<vmem>>, vector<1x16x64xf32>
    %79 = vector.shape_cast %78 : vector<1x16x64xf32> to vector<16x64xf32>
    %c0_78 = arith.constant 0 : index
    %c0_79 = arith.constant 0 : index
    %c0_80 = arith.constant 0 : index
    %80 = vector.load %arg7[%c0_78, %c0_79, %c0_80] : memref<9x8x8xf32, #tpu.memory_space<vmem>>, vector<1x8x8xf32>
    %81 = vector.shape_cast %80 : vector<1x8x8xf32> to vector<8x8xf32>
    %cst_81 = arith.constant dense<0.000000e+00> : vector<64x8xf32>
    %82 = tpu.matmul %77, %81, %cst_81 {dimension_numbers = #tpu.dot_dimension_numbers<[1], [0], [0], [1], [0, 0, 1, 1], [], []>} : vector<64x8xf32>, vector<8x8xf32>, vector<64x8xf32> -> vector<64x8xf32>
    %cst_82 = arith.constant dense<0.000000e+00> : vector<16x8xf32>
    %83 = tpu.matmul %79, %82, %cst_82 {dimension_numbers = #tpu.dot_dimension_numbers<[1], [0], [0], [1], [0, 0, 1, 1], [], []>} : vector<16x64xf32>, vector<64x8xf32>, vector<16x8xf32> -> vector<16x8xf32>
    %c1_83 = arith.constant 1 : index
    %c0_84 = arith.constant 0 : index
    %c0_85 = arith.constant 0 : index
    %84 = vector.load %arg6[%c1_83, %c0_84, %c0_85] : memref<9x16x64xf32, #tpu.memory_space<vmem>>, vector<1x16x64xf32>
    %85 = vector.shape_cast %84 : vector<1x16x64xf32> to vector<16x64xf32>
    %c1_86 = arith.constant 1 : index
    %c0_87 = arith.constant 0 : index
    %c0_88 = arith.constant 0 : index
    %86 = vector.load %arg7[%c1_86, %c0_87, %c0_88] : memref<9x8x8xf32, #tpu.memory_space<vmem>>, vector<1x8x8xf32>
    %87 = vector.shape_cast %86 : vector<1x8x8xf32> to vector<8x8xf32>
    %cst_89 = arith.constant dense<0.000000e+00> : vector<64x8xf32>
    %88 = tpu.matmul %77, %87, %cst_89 {dimension_numbers = #tpu.dot_dimension_numbers<[1], [0], [0], [1], [0, 0, 1, 1], [], []>} : vector<64x8xf32>, vector<8x8xf32>, vector<64x8xf32> -> vector<64x8xf32>
    %cst_90 = arith.constant dense<0.000000e+00> : vector<16x8xf32>
    %89 = tpu.matmul %85, %88, %cst_90 {dimension_numbers = #tpu.dot_dimension_numbers<[1], [0], [0], [1], [0, 0, 1, 1], [], []>} : vector<16x64xf32>, vector<64x8xf32>, vector<16x8xf32> -> vector<16x8xf32>
    %90 = arith.addf %83, %89 : vector<16x8xf32>
    %c2_91 = arith.constant 2 : index
    %c0_92 = arith.constant 0 : index
    %c0_93 = arith.constant 0 : index
    %91 = vector.load %arg6[%c2_91, %c0_92, %c0_93] : memref<9x16x64xf32, #tpu.memory_space<vmem>>, vector<1x16x64xf32>
    %92 = vector.shape_cast %91 : vector<1x16x64xf32> to vector<16x64xf32>
    %c2_94 = arith.constant 2 : index
    %c0_95 = arith.constant 0 : index
    %c0_96 = arith.constant 0 : index
    %93 = vector.load %arg7[%c2_94, %c0_95, %c0_96] : memref<9x8x8xf32, #tpu.memory_space<vmem>>, vector<1x8x8xf32>
    %94 = vector.shape_cast %93 : vector<1x8x8xf32> to vector<8x8xf32>
    %cst_97 = arith.constant dense<0.000000e+00> : vector<64x8xf32>
    %95 = tpu.matmul %77, %94, %cst_97 {dimension_numbers = #tpu.dot_dimension_numbers<[1], [0], [0], [1], [0, 0, 1, 1], [], []>} : vector<64x8xf32>, vector<8x8xf32>, vector<64x8xf32> -> vector<64x8xf32>
    %cst_98 = arith.constant dense<0.000000e+00> : vector<16x8xf32>
    %96 = tpu.matmul %92, %95, %cst_98 {dimension_numbers = #tpu.dot_dimension_numbers<[1], [0], [0], [1], [0, 0, 1, 1], [], []>} : vector<16x64xf32>, vector<64x8xf32>, vector<16x8xf32> -> vector<16x8xf32>
    %97 = arith.addf %90, %96 : vector<16x8xf32>
    %c3_99 = arith.constant 3 : index
    %c0_100 = arith.constant 0 : index
    %c0_101 = arith.constant 0 : index
    %98 = vector.load %arg6[%c3_99, %c0_100, %c0_101] : memref<9x16x64xf32, #tpu.memory_space<vmem>>, vector<1x16x64xf32>
    %99 = vector.shape_cast %98 : vector<1x16x64xf32> to vector<16x64xf32>
    %c3_102 = arith.constant 3 : index
    %c0_103 = arith.constant 0 : index
    %c0_104 = arith.constant 0 : index
    %100 = vector.load %arg7[%c3_102, %c0_103, %c0_104] : memref<9x8x8xf32, #tpu.memory_space<vmem>>, vector<1x8x8xf32>
    %101 = vector.shape_cast %100 : vector<1x8x8xf32> to vector<8x8xf32>
    %cst_105 = arith.constant dense<0.000000e+00> : vector<64x8xf32>
    %102 = tpu.matmul %77, %101, %cst_105 {dimension_numbers = #tpu.dot_dimension_numbers<[1], [0], [0], [1], [0, 0, 1, 1], [], []>} : vector<64x8xf32>, vector<8x8xf32>, vector<64x8xf32> -> vector<64x8xf32>
    %cst_106 = arith.constant dense<0.000000e+00> : vector<16x8xf32>
    %103 = tpu.matmul %99, %102, %cst_106 {dimension_numbers = #tpu.dot_dimension_numbers<[1], [0], [0], [1], [0, 0, 1, 1], [], []>} : vector<16x64xf32>, vector<64x8xf32>, vector<16x8xf32> -> vector<16x8xf32>
    %104 = arith.addf %97, %103 : vector<16x8xf32>
    %c4_107 = arith.constant 4 : index
    %c0_108 = arith.constant 0 : index
    %c0_109 = arith.constant 0 : index
    %105 = vector.load %arg6[%c4_107, %c0_108, %c0_109] : memref<9x16x64xf32, #tpu.memory_space<vmem>>, vector<1x16x64xf32>
    %106 = vector.shape_cast %105 : vector<1x16x64xf32> to vector<16x64xf32>
    %c4_110 = arith.constant 4 : index
    %c0_111 = arith.constant 0 : index
    %c0_112 = arith.constant 0 : index
    %107 = vector.load %arg7[%c4_110, %c0_111, %c0_112] : memref<9x8x8xf32, #tpu.memory_space<vmem>>, vector<1x8x8xf32>
    %108 = vector.shape_cast %107 : vector<1x8x8xf32> to vector<8x8xf32>
    %cst_113 = arith.constant dense<0.000000e+00> : vector<64x8xf32>
    %109 = tpu.matmul %77, %108, %cst_113 {dimension_numbers = #tpu.dot_dimension_numbers<[1], [0], [0], [1], [0, 0, 1, 1], [], []>} : vector<64x8xf32>, vector<8x8xf32>, vector<64x8xf32> -> vector<64x8xf32>
    %cst_114 = arith.constant dense<0.000000e+00> : vector<16x8xf32>
    %110 = tpu.matmul %106, %109, %cst_114 {dimension_numbers = #tpu.dot_dimension_numbers<[1], [0], [0], [1], [0, 0, 1, 1], [], []>} : vector<16x64xf32>, vector<64x8xf32>, vector<16x8xf32> -> vector<16x8xf32>
    %111 = arith.addf %104, %110 : vector<16x8xf32>
    %c5_115 = arith.constant 5 : index
    %c0_116 = arith.constant 0 : index
    %c0_117 = arith.constant 0 : index
    %112 = vector.load %arg6[%c5_115, %c0_116, %c0_117] : memref<9x16x64xf32, #tpu.memory_space<vmem>>, vector<1x16x64xf32>
    %113 = vector.shape_cast %112 : vector<1x16x64xf32> to vector<16x64xf32>
    %c5_118 = arith.constant 5 : index
    %c0_119 = arith.constant 0 : index
    %c0_120 = arith.constant 0 : index
    %114 = vector.load %arg7[%c5_118, %c0_119, %c0_120] : memref<9x8x8xf32, #tpu.memory_space<vmem>>, vector<1x8x8xf32>
    %115 = vector.shape_cast %114 : vector<1x8x8xf32> to vector<8x8xf32>
    %cst_121 = arith.constant dense<0.000000e+00> : vector<64x8xf32>
    %116 = tpu.matmul %77, %115, %cst_121 {dimension_numbers = #tpu.dot_dimension_numbers<[1], [0], [0], [1], [0, 0, 1, 1], [], []>} : vector<64x8xf32>, vector<8x8xf32>, vector<64x8xf32> -> vector<64x8xf32>
    %cst_122 = arith.constant dense<0.000000e+00> : vector<16x8xf32>
    %117 = tpu.matmul %113, %116, %cst_122 {dimension_numbers = #tpu.dot_dimension_numbers<[1], [0], [0], [1], [0, 0, 1, 1], [], []>} : vector<16x64xf32>, vector<64x8xf32>, vector<16x8xf32> -> vector<16x8xf32>
    %118 = arith.addf %111, %117 : vector<16x8xf32>
    %c6_123 = arith.constant 6 : index
    %c0_124 = arith.constant 0 : index
    %c0_125 = arith.constant 0 : index
    %119 = vector.load %arg6[%c6_123, %c0_124, %c0_125] : memref<9x16x64xf32, #tpu.memory_space<vmem>>, vector<1x16x64xf32>
    %120 = vector.shape_cast %119 : vector<1x16x64xf32> to vector<16x64xf32>
    %c6_126 = arith.constant 6 : index
    %c0_127 = arith.constant 0 : index
    %c0_128 = arith.constant 0 : index
    %121 = vector.load %arg7[%c6_126, %c0_127, %c0_128] : memref<9x8x8xf32, #tpu.memory_space<vmem>>, vector<1x8x8xf32>
    %122 = vector.shape_cast %121 : vector<1x8x8xf32> to vector<8x8xf32>
    %cst_129 = arith.constant dense<0.000000e+00> : vector<64x8xf32>
    %123 = tpu.matmul %77, %122, %cst_129 {dimension_numbers = #tpu.dot_dimension_numbers<[1], [0], [0], [1], [0, 0, 1, 1], [], []>} : vector<64x8xf32>, vector<8x8xf32>, vector<64x8xf32> -> vector<64x8xf32>
    %cst_130 = arith.constant dense<0.000000e+00> : vector<16x8xf32>
    %124 = tpu.matmul %120, %123, %cst_130 {dimension_numbers = #tpu.dot_dimension_numbers<[1], [0], [0], [1], [0, 0, 1, 1], [], []>} : vector<16x64xf32>, vector<64x8xf32>, vector<16x8xf32> -> vector<16x8xf32>
    %125 = arith.addf %118, %124 : vector<16x8xf32>
    %c7_131 = arith.constant 7 : index
    %c0_132 = arith.constant 0 : index
    %c0_133 = arith.constant 0 : index
    %126 = vector.load %arg6[%c7_131, %c0_132, %c0_133] : memref<9x16x64xf32, #tpu.memory_space<vmem>>, vector<1x16x64xf32>
    %127 = vector.shape_cast %126 : vector<1x16x64xf32> to vector<16x64xf32>
    %c7_134 = arith.constant 7 : index
    %c0_135 = arith.constant 0 : index
    %c0_136 = arith.constant 0 : index
    %128 = vector.load %arg7[%c7_134, %c0_135, %c0_136] : memref<9x8x8xf32, #tpu.memory_space<vmem>>, vector<1x8x8xf32>
    %129 = vector.shape_cast %128 : vector<1x8x8xf32> to vector<8x8xf32>
    %cst_137 = arith.constant dense<0.000000e+00> : vector<64x8xf32>
    %130 = tpu.matmul %77, %129, %cst_137 {dimension_numbers = #tpu.dot_dimension_numbers<[1], [0], [0], [1], [0, 0, 1, 1], [], []>} : vector<64x8xf32>, vector<8x8xf32>, vector<64x8xf32> -> vector<64x8xf32>
    %cst_138 = arith.constant dense<0.000000e+00> : vector<16x8xf32>
    %131 = tpu.matmul %127, %130, %cst_138 {dimension_numbers = #tpu.dot_dimension_numbers<[1], [0], [0], [1], [0, 0, 1, 1], [], []>} : vector<16x64xf32>, vector<64x8xf32>, vector<16x8xf32> -> vector<16x8xf32>
    %132 = arith.addf %125, %131 : vector<16x8xf32>
    %c8_139 = arith.constant 8 : index
    %c0_140 = arith.constant 0 : index
    %c0_141 = arith.constant 0 : index
    %133 = vector.load %arg6[%c8_139, %c0_140, %c0_141] : memref<9x16x64xf32, #tpu.memory_space<vmem>>, vector<1x16x64xf32>
    %134 = vector.shape_cast %133 : vector<1x16x64xf32> to vector<16x64xf32>
    %c8_142 = arith.constant 8 : index
    %c0_143 = arith.constant 0 : index
    %c0_144 = arith.constant 0 : index
    %135 = vector.load %arg7[%c8_142, %c0_143, %c0_144] : memref<9x8x8xf32, #tpu.memory_space<vmem>>, vector<1x8x8xf32>
    %136 = vector.shape_cast %135 : vector<1x8x8xf32> to vector<8x8xf32>
    %cst_145 = arith.constant dense<0.000000e+00> : vector<64x8xf32>
    %137 = tpu.matmul %77, %136, %cst_145 {dimension_numbers = #tpu.dot_dimension_numbers<[1], [0], [0], [1], [0, 0, 1, 1], [], []>} : vector<64x8xf32>, vector<8x8xf32>, vector<64x8xf32> -> vector<64x8xf32>
    %cst_146 = arith.constant dense<0.000000e+00> : vector<16x8xf32>
    %138 = tpu.matmul %134, %137, %cst_146 {dimension_numbers = #tpu.dot_dimension_numbers<[1], [0], [0], [1], [0, 0, 1, 1], [], []>} : vector<16x64xf32>, vector<64x8xf32>, vector<16x8xf32> -> vector<16x8xf32>
    %139 = arith.addf %132, %138 : vector<16x8xf32>
    %c0_147 = arith.constant 0 : index
    %c0_148 = arith.constant 0 : index
    %c0_149 = arith.constant 0 : index
    %140 = vector.load %arg8[%c0_147, %c0_148, %c0_149] : memref<3x1x8xf32, #tpu.memory_space<vmem>>, vector<1x1x8xf32>
    %141 = vector.shape_cast %140 : vector<1x1x8xf32> to vector<1x8xf32>
    %142 = vector.broadcast %141 : vector<1x8xf32> to vector<16x8xf32>
    %143 = arith.addf %139, %142 : vector<16x8xf32>
    %cst_150 = arith.constant 0.000000e+00 : f32
    %144 = vector.broadcast %cst_150 : f32 to vector<16x8xf32>
    %145 = arith.maximumf %143, %144 : vector<16x8xf32>
    %c1_151 = arith.constant 1 : index
    %c0_152 = arith.constant 0 : index
    %c0_153 = arith.constant 0 : index
    %146 = vector.load %arg8[%c1_151, %c0_152, %c0_153] : memref<3x1x8xf32, #tpu.memory_space<vmem>>, vector<1x1x8xf32>
    %147 = vector.shape_cast %146 : vector<1x1x8xf32> to vector<1x8xf32>
    %148 = vector.broadcast %147 : vector<1x8xf32> to vector<16x8xf32>
    %149 = arith.mulf %145, %148 : vector<16x8xf32>
    %c2_154 = arith.constant 2 : index
    %c0_155 = arith.constant 0 : index
    %c0_156 = arith.constant 0 : index
    %150 = vector.load %arg8[%c2_154, %c0_155, %c0_156] : memref<3x1x8xf32, #tpu.memory_space<vmem>>, vector<1x1x8xf32>
    %151 = vector.shape_cast %150 : vector<1x1x8xf32> to vector<1x8xf32>
    %152 = vector.broadcast %151 : vector<1x8xf32> to vector<16x8xf32>
    %153 = arith.addf %149, %152 : vector<16x8xf32>
    %c0_157 = arith.constant 0 : index
    %c0_158 = arith.constant 0 : index
    %c0_159 = arith.constant 0 : index
    %154 = vector.load %arg9[%c0_157, %c0_158, %c0_159] : memref<9x16x16xf32, #tpu.memory_space<vmem>>, vector<1x16x16xf32>
    %155 = vector.shape_cast %154 : vector<1x16x16xf32> to vector<16x16xf32>
    %c0_160 = arith.constant 0 : index
    %c0_161 = arith.constant 0 : index
    %c0_162 = arith.constant 0 : index
    %156 = vector.load %arg10[%c0_160, %c0_161, %c0_162] : memref<9x8x8xf32, #tpu.memory_space<vmem>>, vector<1x8x8xf32>
    %157 = vector.shape_cast %156 : vector<1x8x8xf32> to vector<8x8xf32>
    %cst_163 = arith.constant dense<0.000000e+00> : vector<16x8xf32>
    %158 = tpu.matmul %153, %157, %cst_163 {dimension_numbers = #tpu.dot_dimension_numbers<[1], [0], [0], [1], [0, 0, 1, 1], [], []>} : vector<16x8xf32>, vector<8x8xf32>, vector<16x8xf32> -> vector<16x8xf32>
    %cst_164 = arith.constant dense<0.000000e+00> : vector<16x8xf32>
    %159 = tpu.matmul %155, %158, %cst_164 {dimension_numbers = #tpu.dot_dimension_numbers<[1], [0], [0], [1], [0, 0, 1, 1], [], []>} : vector<16x16xf32>, vector<16x8xf32>, vector<16x8xf32> -> vector<16x8xf32>
    %c1_165 = arith.constant 1 : index
    %c0_166 = arith.constant 0 : index
    %c0_167 = arith.constant 0 : index
    %160 = vector.load %arg9[%c1_165, %c0_166, %c0_167] : memref<9x16x16xf32, #tpu.memory_space<vmem>>, vector<1x16x16xf32>
    %161 = vector.shape_cast %160 : vector<1x16x16xf32> to vector<16x16xf32>
    %c1_168 = arith.constant 1 : index
    %c0_169 = arith.constant 0 : index
    %c0_170 = arith.constant 0 : index
    %162 = vector.load %arg10[%c1_168, %c0_169, %c0_170] : memref<9x8x8xf32, #tpu.memory_space<vmem>>, vector<1x8x8xf32>
    %163 = vector.shape_cast %162 : vector<1x8x8xf32> to vector<8x8xf32>
    %cst_171 = arith.constant dense<0.000000e+00> : vector<16x8xf32>
    %164 = tpu.matmul %153, %163, %cst_171 {dimension_numbers = #tpu.dot_dimension_numbers<[1], [0], [0], [1], [0, 0, 1, 1], [], []>} : vector<16x8xf32>, vector<8x8xf32>, vector<16x8xf32> -> vector<16x8xf32>
    %cst_172 = arith.constant dense<0.000000e+00> : vector<16x8xf32>
    %165 = tpu.matmul %161, %164, %cst_172 {dimension_numbers = #tpu.dot_dimension_numbers<[1], [0], [0], [1], [0, 0, 1, 1], [], []>} : vector<16x16xf32>, vector<16x8xf32>, vector<16x8xf32> -> vector<16x8xf32>
    %166 = arith.addf %159, %165 : vector<16x8xf32>
    %c2_173 = arith.constant 2 : index
    %c0_174 = arith.constant 0 : index
    %c0_175 = arith.constant 0 : index
    %167 = vector.load %arg9[%c2_173, %c0_174, %c0_175] : memref<9x16x16xf32, #tpu.memory_space<vmem>>, vector<1x16x16xf32>
    %168 = vector.shape_cast %167 : vector<1x16x16xf32> to vector<16x16xf32>
    %c2_176 = arith.constant 2 : index
    %c0_177 = arith.constant 0 : index
    %c0_178 = arith.constant 0 : index
    %169 = vector.load %arg10[%c2_176, %c0_177, %c0_178] : memref<9x8x8xf32, #tpu.memory_space<vmem>>, vector<1x8x8xf32>
    %170 = vector.shape_cast %169 : vector<1x8x8xf32> to vector<8x8xf32>
    %cst_179 = arith.constant dense<0.000000e+00> : vector<16x8xf32>
    %171 = tpu.matmul %153, %170, %cst_179 {dimension_numbers = #tpu.dot_dimension_numbers<[1], [0], [0], [1], [0, 0, 1, 1], [], []>} : vector<16x8xf32>, vector<8x8xf32>, vector<16x8xf32> -> vector<16x8xf32>
    %cst_180 = arith.constant dense<0.000000e+00> : vector<16x8xf32>
    %172 = tpu.matmul %168, %171, %cst_180 {dimension_numbers = #tpu.dot_dimension_numbers<[1], [0], [0], [1], [0, 0, 1, 1], [], []>} : vector<16x16xf32>, vector<16x8xf32>, vector<16x8xf32> -> vector<16x8xf32>
    %173 = arith.addf %166, %172 : vector<16x8xf32>
    %c3_181 = arith.constant 3 : index
    %c0_182 = arith.constant 0 : index
    %c0_183 = arith.constant 0 : index
    %174 = vector.load %arg9[%c3_181, %c0_182, %c0_183] : memref<9x16x16xf32, #tpu.memory_space<vmem>>, vector<1x16x16xf32>
    %175 = vector.shape_cast %174 : vector<1x16x16xf32> to vector<16x16xf32>
    %c3_184 = arith.constant 3 : index
    %c0_185 = arith.constant 0 : index
    %c0_186 = arith.constant 0 : index
    %176 = vector.load %arg10[%c3_184, %c0_185, %c0_186] : memref<9x8x8xf32, #tpu.memory_space<vmem>>, vector<1x8x8xf32>
    %177 = vector.shape_cast %176 : vector<1x8x8xf32> to vector<8x8xf32>
    %cst_187 = arith.constant dense<0.000000e+00> : vector<16x8xf32>
    %178 = tpu.matmul %153, %177, %cst_187 {dimension_numbers = #tpu.dot_dimension_numbers<[1], [0], [0], [1], [0, 0, 1, 1], [], []>} : vector<16x8xf32>, vector<8x8xf32>, vector<16x8xf32> -> vector<16x8xf32>
    %cst_188 = arith.constant dense<0.000000e+00> : vector<16x8xf32>
    %179 = tpu.matmul %175, %178, %cst_188 {dimension_numbers = #tpu.dot_dimension_numbers<[1], [0], [0], [1], [0, 0, 1, 1], [], []>} : vector<16x16xf32>, vector<16x8xf32>, vector<16x8xf32> -> vector<16x8xf32>
    %180 = arith.addf %173, %179 : vector<16x8xf32>
    %c4_189 = arith.constant 4 : index
    %c0_190 = arith.constant 0 : index
    %c0_191 = arith.constant 0 : index
    %181 = vector.load %arg9[%c4_189, %c0_190, %c0_191] : memref<9x16x16xf32, #tpu.memory_space<vmem>>, vector<1x16x16xf32>
    %182 = vector.shape_cast %181 : vector<1x16x16xf32> to vector<16x16xf32>
    %c4_192 = arith.constant 4 : index
    %c0_193 = arith.constant 0 : index
    %c0_194 = arith.constant 0 : index
    %183 = vector.load %arg10[%c4_192, %c0_193, %c0_194] : memref<9x8x8xf32, #tpu.memory_space<vmem>>, vector<1x8x8xf32>
    %184 = vector.shape_cast %183 : vector<1x8x8xf32> to vector<8x8xf32>
    %cst_195 = arith.constant dense<0.000000e+00> : vector<16x8xf32>
    %185 = tpu.matmul %153, %184, %cst_195 {dimension_numbers = #tpu.dot_dimension_numbers<[1], [0], [0], [1], [0, 0, 1, 1], [], []>} : vector<16x8xf32>, vector<8x8xf32>, vector<16x8xf32> -> vector<16x8xf32>
    %cst_196 = arith.constant dense<0.000000e+00> : vector<16x8xf32>
    %186 = tpu.matmul %182, %185, %cst_196 {dimension_numbers = #tpu.dot_dimension_numbers<[1], [0], [0], [1], [0, 0, 1, 1], [], []>} : vector<16x16xf32>, vector<16x8xf32>, vector<16x8xf32> -> vector<16x8xf32>
    %187 = arith.addf %180, %186 : vector<16x8xf32>
    %c5_197 = arith.constant 5 : index
    %c0_198 = arith.constant 0 : index
    %c0_199 = arith.constant 0 : index
    %188 = vector.load %arg9[%c5_197, %c0_198, %c0_199] : memref<9x16x16xf32, #tpu.memory_space<vmem>>, vector<1x16x16xf32>
    %189 = vector.shape_cast %188 : vector<1x16x16xf32> to vector<16x16xf32>
    %c5_200 = arith.constant 5 : index
    %c0_201 = arith.constant 0 : index
    %c0_202 = arith.constant 0 : index
    %190 = vector.load %arg10[%c5_200, %c0_201, %c0_202] : memref<9x8x8xf32, #tpu.memory_space<vmem>>, vector<1x8x8xf32>
    %191 = vector.shape_cast %190 : vector<1x8x8xf32> to vector<8x8xf32>
    %cst_203 = arith.constant dense<0.000000e+00> : vector<16x8xf32>
    %192 = tpu.matmul %153, %191, %cst_203 {dimension_numbers = #tpu.dot_dimension_numbers<[1], [0], [0], [1], [0, 0, 1, 1], [], []>} : vector<16x8xf32>, vector<8x8xf32>, vector<16x8xf32> -> vector<16x8xf32>
    %cst_204 = arith.constant dense<0.000000e+00> : vector<16x8xf32>
    %193 = tpu.matmul %189, %192, %cst_204 {dimension_numbers = #tpu.dot_dimension_numbers<[1], [0], [0], [1], [0, 0, 1, 1], [], []>} : vector<16x16xf32>, vector<16x8xf32>, vector<16x8xf32> -> vector<16x8xf32>
    %194 = arith.addf %187, %193 : vector<16x8xf32>
    %c6_205 = arith.constant 6 : index
    %c0_206 = arith.constant 0 : index
    %c0_207 = arith.constant 0 : index
    %195 = vector.load %arg9[%c6_205, %c0_206, %c0_207] : memref<9x16x16xf32, #tpu.memory_space<vmem>>, vector<1x16x16xf32>
    %196 = vector.shape_cast %195 : vector<1x16x16xf32> to vector<16x16xf32>
    %c6_208 = arith.constant 6 : index
    %c0_209 = arith.constant 0 : index
    %c0_210 = arith.constant 0 : index
    %197 = vector.load %arg10[%c6_208, %c0_209, %c0_210] : memref<9x8x8xf32, #tpu.memory_space<vmem>>, vector<1x8x8xf32>
    %198 = vector.shape_cast %197 : vector<1x8x8xf32> to vector<8x8xf32>
    %cst_211 = arith.constant dense<0.000000e+00> : vector<16x8xf32>
    %199 = tpu.matmul %153, %198, %cst_211 {dimension_numbers = #tpu.dot_dimension_numbers<[1], [0], [0], [1], [0, 0, 1, 1], [], []>} : vector<16x8xf32>, vector<8x8xf32>, vector<16x8xf32> -> vector<16x8xf32>
    %cst_212 = arith.constant dense<0.000000e+00> : vector<16x8xf32>
    %200 = tpu.matmul %196, %199, %cst_212 {dimension_numbers = #tpu.dot_dimension_numbers<[1], [0], [0], [1], [0, 0, 1, 1], [], []>} : vector<16x16xf32>, vector<16x8xf32>, vector<16x8xf32> -> vector<16x8xf32>
    %201 = arith.addf %194, %200 : vector<16x8xf32>
    %c7_213 = arith.constant 7 : index
    %c0_214 = arith.constant 0 : index
    %c0_215 = arith.constant 0 : index
    %202 = vector.load %arg9[%c7_213, %c0_214, %c0_215] : memref<9x16x16xf32, #tpu.memory_space<vmem>>, vector<1x16x16xf32>
    %203 = vector.shape_cast %202 : vector<1x16x16xf32> to vector<16x16xf32>
    %c7_216 = arith.constant 7 : index
    %c0_217 = arith.constant 0 : index
    %c0_218 = arith.constant 0 : index
    %204 = vector.load %arg10[%c7_216, %c0_217, %c0_218] : memref<9x8x8xf32, #tpu.memory_space<vmem>>, vector<1x8x8xf32>
    %205 = vector.shape_cast %204 : vector<1x8x8xf32> to vector<8x8xf32>
    %cst_219 = arith.constant dense<0.000000e+00> : vector<16x8xf32>
    %206 = tpu.matmul %153, %205, %cst_219 {dimension_numbers = #tpu.dot_dimension_numbers<[1], [0], [0], [1], [0, 0, 1, 1], [], []>} : vector<16x8xf32>, vector<8x8xf32>, vector<16x8xf32> -> vector<16x8xf32>
    %cst_220 = arith.constant dense<0.000000e+00> : vector<16x8xf32>
    %207 = tpu.matmul %203, %206, %cst_220 {dimension_numbers = #tpu.dot_dimension_numbers<[1], [0], [0], [1], [0, 0, 1, 1], [], []>} : vector<16x16xf32>, vector<16x8xf32>, vector<16x8xf32> -> vector<16x8xf32>
    %208 = arith.addf %201, %207 : vector<16x8xf32>
    %c8_221 = arith.constant 8 : index
    %c0_222 = arith.constant 0 : index
    %c0_223 = arith.constant 0 : index
    %209 = vector.load %arg9[%c8_221, %c0_222, %c0_223] : memref<9x16x16xf32, #tpu.memory_space<vmem>>, vector<1x16x16xf32>
    %210 = vector.shape_cast %209 : vector<1x16x16xf32> to vector<16x16xf32>
    %c8_224 = arith.constant 8 : index
    %c0_225 = arith.constant 0 : index
    %c0_226 = arith.constant 0 : index
    %211 = vector.load %arg10[%c8_224, %c0_225, %c0_226] : memref<9x8x8xf32, #tpu.memory_space<vmem>>, vector<1x8x8xf32>
    %212 = vector.shape_cast %211 : vector<1x8x8xf32> to vector<8x8xf32>
    %cst_227 = arith.constant dense<0.000000e+00> : vector<16x8xf32>
    %213 = tpu.matmul %153, %212, %cst_227 {dimension_numbers = #tpu.dot_dimension_numbers<[1], [0], [0], [1], [0, 0, 1, 1], [], []>} : vector<16x8xf32>, vector<8x8xf32>, vector<16x8xf32> -> vector<16x8xf32>
    %cst_228 = arith.constant dense<0.000000e+00> : vector<16x8xf32>
    %214 = tpu.matmul %210, %213, %cst_228 {dimension_numbers = #tpu.dot_dimension_numbers<[1], [0], [0], [1], [0, 0, 1, 1], [], []>} : vector<16x16xf32>, vector<16x8xf32>, vector<16x8xf32> -> vector<16x8xf32>
    %215 = arith.addf %208, %214 : vector<16x8xf32>
    %c0_229 = arith.constant 0 : index
    %c0_230 = arith.constant 0 : index
    %c0_231 = arith.constant 0 : index
    %216 = vector.load %arg11[%c0_229, %c0_230, %c0_231] : memref<3x1x8xf32, #tpu.memory_space<vmem>>, vector<1x1x8xf32>
    %217 = vector.shape_cast %216 : vector<1x1x8xf32> to vector<1x8xf32>
    %218 = vector.broadcast %217 : vector<1x8xf32> to vector<16x8xf32>
    %219 = arith.addf %215, %218 : vector<16x8xf32>
    %cst_232 = arith.constant 0.000000e+00 : f32
    %220 = vector.broadcast %cst_232 : f32 to vector<16x8xf32>
    %221 = arith.maximumf %219, %220 : vector<16x8xf32>
    %c1_233 = arith.constant 1 : index
    %c0_234 = arith.constant 0 : index
    %c0_235 = arith.constant 0 : index
    %222 = vector.load %arg11[%c1_233, %c0_234, %c0_235] : memref<3x1x8xf32, #tpu.memory_space<vmem>>, vector<1x1x8xf32>
    %223 = vector.shape_cast %222 : vector<1x1x8xf32> to vector<1x8xf32>
    %224 = vector.broadcast %223 : vector<1x8xf32> to vector<16x8xf32>
    %225 = arith.mulf %221, %224 : vector<16x8xf32>
    %c2_236 = arith.constant 2 : index
    %c0_237 = arith.constant 0 : index
    %c0_238 = arith.constant 0 : index
    %226 = vector.load %arg11[%c2_236, %c0_237, %c0_238] : memref<3x1x8xf32, #tpu.memory_space<vmem>>, vector<1x1x8xf32>
    %227 = vector.shape_cast %226 : vector<1x1x8xf32> to vector<1x8xf32>
    %228 = vector.broadcast %227 : vector<1x8xf32> to vector<16x8xf32>
    %229 = arith.addf %225, %228 : vector<16x8xf32>
    %c0_239 = arith.constant 0 : index
    %c0_240 = arith.constant 0 : index
    %c0_241 = arith.constant 0 : index
    %230 = vector.load %arg12[%c0_239, %c0_240, %c0_241] : memref<9x16x16xf32, #tpu.memory_space<vmem>>, vector<1x16x16xf32>
    %231 = vector.shape_cast %230 : vector<1x16x16xf32> to vector<16x16xf32>
    %c0_242 = arith.constant 0 : index
    %c0_243 = arith.constant 0 : index
    %c0_244 = arith.constant 0 : index
    %232 = vector.load %arg13[%c0_242, %c0_243, %c0_244] : memref<9x8x8xf32, #tpu.memory_space<vmem>>, vector<1x8x8xf32>
    %233 = vector.shape_cast %232 : vector<1x8x8xf32> to vector<8x8xf32>
    %cst_245 = arith.constant dense<0.000000e+00> : vector<16x8xf32>
    %234 = tpu.matmul %229, %233, %cst_245 {dimension_numbers = #tpu.dot_dimension_numbers<[1], [0], [0], [1], [0, 0, 1, 1], [], []>} : vector<16x8xf32>, vector<8x8xf32>, vector<16x8xf32> -> vector<16x8xf32>
    %cst_246 = arith.constant dense<0.000000e+00> : vector<16x8xf32>
    %235 = tpu.matmul %231, %234, %cst_246 {dimension_numbers = #tpu.dot_dimension_numbers<[1], [0], [0], [1], [0, 0, 1, 1], [], []>} : vector<16x16xf32>, vector<16x8xf32>, vector<16x8xf32> -> vector<16x8xf32>
    %c1_247 = arith.constant 1 : index
    %c0_248 = arith.constant 0 : index
    %c0_249 = arith.constant 0 : index
    %236 = vector.load %arg12[%c1_247, %c0_248, %c0_249] : memref<9x16x16xf32, #tpu.memory_space<vmem>>, vector<1x16x16xf32>
    %237 = vector.shape_cast %236 : vector<1x16x16xf32> to vector<16x16xf32>
    %c1_250 = arith.constant 1 : index
    %c0_251 = arith.constant 0 : index
    %c0_252 = arith.constant 0 : index
    %238 = vector.load %arg13[%c1_250, %c0_251, %c0_252] : memref<9x8x8xf32, #tpu.memory_space<vmem>>, vector<1x8x8xf32>
    %239 = vector.shape_cast %238 : vector<1x8x8xf32> to vector<8x8xf32>
    %cst_253 = arith.constant dense<0.000000e+00> : vector<16x8xf32>
    %240 = tpu.matmul %229, %239, %cst_253 {dimension_numbers = #tpu.dot_dimension_numbers<[1], [0], [0], [1], [0, 0, 1, 1], [], []>} : vector<16x8xf32>, vector<8x8xf32>, vector<16x8xf32> -> vector<16x8xf32>
    %cst_254 = arith.constant dense<0.000000e+00> : vector<16x8xf32>
    %241 = tpu.matmul %237, %240, %cst_254 {dimension_numbers = #tpu.dot_dimension_numbers<[1], [0], [0], [1], [0, 0, 1, 1], [], []>} : vector<16x16xf32>, vector<16x8xf32>, vector<16x8xf32> -> vector<16x8xf32>
    %242 = arith.addf %235, %241 : vector<16x8xf32>
    %c2_255 = arith.constant 2 : index
    %c0_256 = arith.constant 0 : index
    %c0_257 = arith.constant 0 : index
    %243 = vector.load %arg12[%c2_255, %c0_256, %c0_257] : memref<9x16x16xf32, #tpu.memory_space<vmem>>, vector<1x16x16xf32>
    %244 = vector.shape_cast %243 : vector<1x16x16xf32> to vector<16x16xf32>
    %c2_258 = arith.constant 2 : index
    %c0_259 = arith.constant 0 : index
    %c0_260 = arith.constant 0 : index
    %245 = vector.load %arg13[%c2_258, %c0_259, %c0_260] : memref<9x8x8xf32, #tpu.memory_space<vmem>>, vector<1x8x8xf32>
    %246 = vector.shape_cast %245 : vector<1x8x8xf32> to vector<8x8xf32>
    %cst_261 = arith.constant dense<0.000000e+00> : vector<16x8xf32>
    %247 = tpu.matmul %229, %246, %cst_261 {dimension_numbers = #tpu.dot_dimension_numbers<[1], [0], [0], [1], [0, 0, 1, 1], [], []>} : vector<16x8xf32>, vector<8x8xf32>, vector<16x8xf32> -> vector<16x8xf32>
    %cst_262 = arith.constant dense<0.000000e+00> : vector<16x8xf32>
    %248 = tpu.matmul %244, %247, %cst_262 {dimension_numbers = #tpu.dot_dimension_numbers<[1], [0], [0], [1], [0, 0, 1, 1], [], []>} : vector<16x16xf32>, vector<16x8xf32>, vector<16x8xf32> -> vector<16x8xf32>
    %249 = arith.addf %242, %248 : vector<16x8xf32>
    %c3_263 = arith.constant 3 : index
    %c0_264 = arith.constant 0 : index
    %c0_265 = arith.constant 0 : index
    %250 = vector.load %arg12[%c3_263, %c0_264, %c0_265] : memref<9x16x16xf32, #tpu.memory_space<vmem>>, vector<1x16x16xf32>
    %251 = vector.shape_cast %250 : vector<1x16x16xf32> to vector<16x16xf32>
    %c3_266 = arith.constant 3 : index
    %c0_267 = arith.constant 0 : index
    %c0_268 = arith.constant 0 : index
    %252 = vector.load %arg13[%c3_266, %c0_267, %c0_268] : memref<9x8x8xf32, #tpu.memory_space<vmem>>, vector<1x8x8xf32>
    %253 = vector.shape_cast %252 : vector<1x8x8xf32> to vector<8x8xf32>
    %cst_269 = arith.constant dense<0.000000e+00> : vector<16x8xf32>
    %254 = tpu.matmul %229, %253, %cst_269 {dimension_numbers = #tpu.dot_dimension_numbers<[1], [0], [0], [1], [0, 0, 1, 1], [], []>} : vector<16x8xf32>, vector<8x8xf32>, vector<16x8xf32> -> vector<16x8xf32>
    %cst_270 = arith.constant dense<0.000000e+00> : vector<16x8xf32>
    %255 = tpu.matmul %251, %254, %cst_270 {dimension_numbers = #tpu.dot_dimension_numbers<[1], [0], [0], [1], [0, 0, 1, 1], [], []>} : vector<16x16xf32>, vector<16x8xf32>, vector<16x8xf32> -> vector<16x8xf32>
    %256 = arith.addf %249, %255 : vector<16x8xf32>
    %c4_271 = arith.constant 4 : index
    %c0_272 = arith.constant 0 : index
    %c0_273 = arith.constant 0 : index
    %257 = vector.load %arg12[%c4_271, %c0_272, %c0_273] : memref<9x16x16xf32, #tpu.memory_space<vmem>>, vector<1x16x16xf32>
    %258 = vector.shape_cast %257 : vector<1x16x16xf32> to vector<16x16xf32>
    %c4_274 = arith.constant 4 : index
    %c0_275 = arith.constant 0 : index
    %c0_276 = arith.constant 0 : index
    %259 = vector.load %arg13[%c4_274, %c0_275, %c0_276] : memref<9x8x8xf32, #tpu.memory_space<vmem>>, vector<1x8x8xf32>
    %260 = vector.shape_cast %259 : vector<1x8x8xf32> to vector<8x8xf32>
    %cst_277 = arith.constant dense<0.000000e+00> : vector<16x8xf32>
    %261 = tpu.matmul %229, %260, %cst_277 {dimension_numbers = #tpu.dot_dimension_numbers<[1], [0], [0], [1], [0, 0, 1, 1], [], []>} : vector<16x8xf32>, vector<8x8xf32>, vector<16x8xf32> -> vector<16x8xf32>
    %cst_278 = arith.constant dense<0.000000e+00> : vector<16x8xf32>
    %262 = tpu.matmul %258, %261, %cst_278 {dimension_numbers = #tpu.dot_dimension_numbers<[1], [0], [0], [1], [0, 0, 1, 1], [], []>} : vector<16x16xf32>, vector<16x8xf32>, vector<16x8xf32> -> vector<16x8xf32>
    %263 = arith.addf %256, %262 : vector<16x8xf32>
    %c5_279 = arith.constant 5 : index
    %c0_280 = arith.constant 0 : index
    %c0_281 = arith.constant 0 : index
    %264 = vector.load %arg12[%c5_279, %c0_280, %c0_281] : memref<9x16x16xf32, #tpu.memory_space<vmem>>, vector<1x16x16xf32>
    %265 = vector.shape_cast %264 : vector<1x16x16xf32> to vector<16x16xf32>
    %c5_282 = arith.constant 5 : index
    %c0_283 = arith.constant 0 : index
    %c0_284 = arith.constant 0 : index
    %266 = vector.load %arg13[%c5_282, %c0_283, %c0_284] : memref<9x8x8xf32, #tpu.memory_space<vmem>>, vector<1x8x8xf32>
    %267 = vector.shape_cast %266 : vector<1x8x8xf32> to vector<8x8xf32>
    %cst_285 = arith.constant dense<0.000000e+00> : vector<16x8xf32>
    %268 = tpu.matmul %229, %267, %cst_285 {dimension_numbers = #tpu.dot_dimension_numbers<[1], [0], [0], [1], [0, 0, 1, 1], [], []>} : vector<16x8xf32>, vector<8x8xf32>, vector<16x8xf32> -> vector<16x8xf32>
    %cst_286 = arith.constant dense<0.000000e+00> : vector<16x8xf32>
    %269 = tpu.matmul %265, %268, %cst_286 {dimension_numbers = #tpu.dot_dimension_numbers<[1], [0], [0], [1], [0, 0, 1, 1], [], []>} : vector<16x16xf32>, vector<16x8xf32>, vector<16x8xf32> -> vector<16x8xf32>
    %270 = arith.addf %263, %269 : vector<16x8xf32>
    %c6_287 = arith.constant 6 : index
    %c0_288 = arith.constant 0 : index
    %c0_289 = arith.constant 0 : index
    %271 = vector.load %arg12[%c6_287, %c0_288, %c0_289] : memref<9x16x16xf32, #tpu.memory_space<vmem>>, vector<1x16x16xf32>
    %272 = vector.shape_cast %271 : vector<1x16x16xf32> to vector<16x16xf32>
    %c6_290 = arith.constant 6 : index
    %c0_291 = arith.constant 0 : index
    %c0_292 = arith.constant 0 : index
    %273 = vector.load %arg13[%c6_290, %c0_291, %c0_292] : memref<9x8x8xf32, #tpu.memory_space<vmem>>, vector<1x8x8xf32>
    %274 = vector.shape_cast %273 : vector<1x8x8xf32> to vector<8x8xf32>
    %cst_293 = arith.constant dense<0.000000e+00> : vector<16x8xf32>
    %275 = tpu.matmul %229, %274, %cst_293 {dimension_numbers = #tpu.dot_dimension_numbers<[1], [0], [0], [1], [0, 0, 1, 1], [], []>} : vector<16x8xf32>, vector<8x8xf32>, vector<16x8xf32> -> vector<16x8xf32>
    %cst_294 = arith.constant dense<0.000000e+00> : vector<16x8xf32>
    %276 = tpu.matmul %272, %275, %cst_294 {dimension_numbers = #tpu.dot_dimension_numbers<[1], [0], [0], [1], [0, 0, 1, 1], [], []>} : vector<16x16xf32>, vector<16x8xf32>, vector<16x8xf32> -> vector<16x8xf32>
    %277 = arith.addf %270, %276 : vector<16x8xf32>
    %c7_295 = arith.constant 7 : index
    %c0_296 = arith.constant 0 : index
    %c0_297 = arith.constant 0 : index
    %278 = vector.load %arg12[%c7_295, %c0_296, %c0_297] : memref<9x16x16xf32, #tpu.memory_space<vmem>>, vector<1x16x16xf32>
    %279 = vector.shape_cast %278 : vector<1x16x16xf32> to vector<16x16xf32>
    %c7_298 = arith.constant 7 : index
    %c0_299 = arith.constant 0 : index
    %c0_300 = arith.constant 0 : index
    %280 = vector.load %arg13[%c7_298, %c0_299, %c0_300] : memref<9x8x8xf32, #tpu.memory_space<vmem>>, vector<1x8x8xf32>
    %281 = vector.shape_cast %280 : vector<1x8x8xf32> to vector<8x8xf32>
    %cst_301 = arith.constant dense<0.000000e+00> : vector<16x8xf32>
    %282 = tpu.matmul %229, %281, %cst_301 {dimension_numbers = #tpu.dot_dimension_numbers<[1], [0], [0], [1], [0, 0, 1, 1], [], []>} : vector<16x8xf32>, vector<8x8xf32>, vector<16x8xf32> -> vector<16x8xf32>
    %cst_302 = arith.constant dense<0.000000e+00> : vector<16x8xf32>
    %283 = tpu.matmul %279, %282, %cst_302 {dimension_numbers = #tpu.dot_dimension_numbers<[1], [0], [0], [1], [0, 0, 1, 1], [], []>} : vector<16x16xf32>, vector<16x8xf32>, vector<16x8xf32> -> vector<16x8xf32>
    %284 = arith.addf %277, %283 : vector<16x8xf32>
    %c8_303 = arith.constant 8 : index
    %c0_304 = arith.constant 0 : index
    %c0_305 = arith.constant 0 : index
    %285 = vector.load %arg12[%c8_303, %c0_304, %c0_305] : memref<9x16x16xf32, #tpu.memory_space<vmem>>, vector<1x16x16xf32>
    %286 = vector.shape_cast %285 : vector<1x16x16xf32> to vector<16x16xf32>
    %c8_306 = arith.constant 8 : index
    %c0_307 = arith.constant 0 : index
    %c0_308 = arith.constant 0 : index
    %287 = vector.load %arg13[%c8_306, %c0_307, %c0_308] : memref<9x8x8xf32, #tpu.memory_space<vmem>>, vector<1x8x8xf32>
    %288 = vector.shape_cast %287 : vector<1x8x8xf32> to vector<8x8xf32>
    %cst_309 = arith.constant dense<0.000000e+00> : vector<16x8xf32>
    %289 = tpu.matmul %229, %288, %cst_309 {dimension_numbers = #tpu.dot_dimension_numbers<[1], [0], [0], [1], [0, 0, 1, 1], [], []>} : vector<16x8xf32>, vector<8x8xf32>, vector<16x8xf32> -> vector<16x8xf32>
    %cst_310 = arith.constant dense<0.000000e+00> : vector<16x8xf32>
    %290 = tpu.matmul %286, %289, %cst_310 {dimension_numbers = #tpu.dot_dimension_numbers<[1], [0], [0], [1], [0, 0, 1, 1], [], []>} : vector<16x16xf32>, vector<16x8xf32>, vector<16x8xf32> -> vector<16x8xf32>
    %291 = arith.addf %284, %290 : vector<16x8xf32>
    %c0_311 = arith.constant 0 : index
    %c0_312 = arith.constant 0 : index
    %c0_313 = arith.constant 0 : index
    %292 = vector.load %arg14[%c0_311, %c0_312, %c0_313] : memref<3x1x8xf32, #tpu.memory_space<vmem>>, vector<1x1x8xf32>
    %293 = vector.shape_cast %292 : vector<1x1x8xf32> to vector<1x8xf32>
    %294 = vector.broadcast %293 : vector<1x8xf32> to vector<16x8xf32>
    %295 = arith.addf %291, %294 : vector<16x8xf32>
    %cst_314 = arith.constant 0.000000e+00 : f32
    %296 = vector.broadcast %cst_314 : f32 to vector<16x8xf32>
    %297 = arith.maximumf %295, %296 : vector<16x8xf32>
    %c1_315 = arith.constant 1 : index
    %c0_316 = arith.constant 0 : index
    %c0_317 = arith.constant 0 : index
    %298 = vector.load %arg14[%c1_315, %c0_316, %c0_317] : memref<3x1x8xf32, #tpu.memory_space<vmem>>, vector<1x1x8xf32>
    %299 = vector.shape_cast %298 : vector<1x1x8xf32> to vector<1x8xf32>
    %300 = vector.broadcast %299 : vector<1x8xf32> to vector<16x8xf32>
    %301 = arith.mulf %297, %300 : vector<16x8xf32>
    %c2_318 = arith.constant 2 : index
    %c0_319 = arith.constant 0 : index
    %c0_320 = arith.constant 0 : index
    %302 = vector.load %arg14[%c2_318, %c0_319, %c0_320] : memref<3x1x8xf32, #tpu.memory_space<vmem>>, vector<1x1x8xf32>
    %303 = vector.shape_cast %302 : vector<1x1x8xf32> to vector<1x8xf32>
    %304 = vector.broadcast %303 : vector<1x8xf32> to vector<16x8xf32>
    %305 = arith.addf %301, %304 : vector<16x8xf32>
    %c0_321 = arith.constant 0 : index
    %c0_322 = arith.constant 0 : index
    %c0_323 = arith.constant 0 : index
    %306 = vector.load %arg2[%c0_321, %c0_322, %c0_323] : memref<1x1x8xf32, #tpu.memory_space<vmem>>, vector<1x1x8xf32>
    %307 = vector.shape_cast %306 : vector<1x1x8xf32> to vector<1x8xf32>
    %c0_324 = arith.constant 0 : index
    %c0_325 = arith.constant 0 : index
    %308 = vector.load %arg19[%c0_324, %c0_325] : memref<8x32xf32, #tpu.memory_space<vmem>>, vector<8x32xf32>
    %cst_326 = arith.constant dense<0.000000e+00> : vector<16x32xf32>
    %309 = tpu.matmul %305, %308, %cst_326 {dimension_numbers = #tpu.dot_dimension_numbers<[1], [0], [0], [1], [0, 0, 1, 1], [], []>} : vector<16x8xf32>, vector<8x32xf32>, vector<16x32xf32> -> vector<16x32xf32>
    %c0_327 = arith.constant 0 : index
    %c0_328 = arith.constant 0 : index
    %310 = vector.load %arg17[%c0_327, %c0_328] : memref<16x32xf32, #tpu.memory_space<vmem>>, vector<16x32xf32>
    %311 = arith.addf %309, %310 : vector<16x32xf32>
    %c0_329 = arith.constant 0 : index
    %c0_330 = arith.constant 0 : index
    %312 = vector.load %arg20[%c0_329, %c0_330] : memref<8x32xf32, #tpu.memory_space<vmem>>, vector<8x32xf32>
    %cst_331 = arith.constant dense<0.000000e+00> : vector<16x32xf32>
    %313 = tpu.matmul %305, %312, %cst_331 {dimension_numbers = #tpu.dot_dimension_numbers<[1], [0], [0], [1], [0, 0, 1, 1], [], []>} : vector<16x8xf32>, vector<8x32xf32>, vector<16x32xf32> -> vector<16x32xf32>
    %c0_332 = arith.constant 0 : index
    %c0_333 = arith.constant 0 : index
    %314 = vector.load %arg18[%c0_332, %c0_333] : memref<16x32xf32, #tpu.memory_space<vmem>>, vector<16x32xf32>
    %315 = arith.addf %313, %314 : vector<16x32xf32>
    %c0_334 = arith.constant 0 : index
    %c0_335 = arith.constant 0 : index
    %316 = vector.load %arg21[%c0_334, %c0_335] : memref<8x32xf32, #tpu.memory_space<vmem>>, vector<8x32xf32>
    %cst_336 = arith.constant dense<0.000000e+00> : vector<1x32xf32>
    %317 = tpu.matmul %307, %316, %cst_336 {dimension_numbers = #tpu.dot_dimension_numbers<[1], [0], [0], [1], [0, 0, 1, 1], [], []>} : vector<1x8xf32>, vector<8x32xf32>, vector<1x32xf32> -> vector<1x32xf32>
    %c0_337 = arith.constant 0 : index
    %c0_338 = arith.constant 0 : index
    %318 = vector.load %arg22[%c0_337, %c0_338] : memref<1x32xf32, #tpu.memory_space<vmem>>, vector<1x32xf32>
    %319 = arith.addf %317, %318 : vector<1x32xf32>
    %c0_339 = arith.constant 0 : index
    %c0_340 = arith.constant 0 : index
    %320 = vector.load %arg15[%c0_339, %c0_340] : memref<256x16xf32, #tpu.memory_space<vmem>>, vector<256x16xf32>
    %cst_341 = arith.constant dense<0.000000e+00> : vector<256x32xf32>
    %321 = tpu.matmul %320, %311, %cst_341 {dimension_numbers = #tpu.dot_dimension_numbers<[1], [0], [0], [1], [0, 0, 1, 1], [], []>} : vector<256x16xf32>, vector<16x32xf32>, vector<256x32xf32> -> vector<256x32xf32>
    %c0_342 = arith.constant 0 : index
    %c0_343 = arith.constant 0 : index
    %322 = vector.load %arg16[%c0_342, %c0_343] : memref<256x16xf32, #tpu.memory_space<vmem>>, vector<256x16xf32>
    %cst_344 = arith.constant dense<0.000000e+00> : vector<256x32xf32>
    %323 = tpu.matmul %322, %315, %cst_344 {dimension_numbers = #tpu.dot_dimension_numbers<[1], [0], [0], [1], [0, 0, 1, 1], [], []>} : vector<256x16xf32>, vector<16x32xf32>, vector<256x32xf32> -> vector<256x32xf32>
    %324 = arith.addf %321, %323 : vector<256x32xf32>
    %325 = vector.broadcast %319 : vector<1x32xf32> to vector<256x32xf32>
    %326 = arith.addf %324, %325 : vector<256x32xf32>
    %cst_345 = arith.constant 0.000000e+00 : f32
    %327 = vector.broadcast %cst_345 : f32 to vector<256x32xf32>
    %328 = arith.maximumf %326, %327 : vector<256x32xf32>
    %c0_346 = arith.constant 0 : index
    %c0_347 = arith.constant 0 : index
    %329 = vector.load %arg23[%c0_346, %c0_347] : memref<32x32xf32, #tpu.memory_space<vmem>>, vector<32x32xf32>
    %cst_348 = arith.constant dense<0.000000e+00> : vector<256x32xf32>
    %330 = tpu.matmul %328, %329, %cst_348 {dimension_numbers = #tpu.dot_dimension_numbers<[1], [0], [0], [1], [0, 0, 1, 1], [], []>} : vector<256x32xf32>, vector<32x32xf32>, vector<256x32xf32> -> vector<256x32xf32>
    %c0_349 = arith.constant 0 : index
    %c0_350 = arith.constant 0 : index
    %331 = vector.load %arg24[%c0_349, %c0_350] : memref<1x32xf32, #tpu.memory_space<vmem>>, vector<1x32xf32>
    %332 = vector.broadcast %331 : vector<1x32xf32> to vector<256x32xf32>
    %333 = arith.addf %330, %332 : vector<256x32xf32>
    %cst_351 = arith.constant 0.000000e+00 : f32
    %334 = vector.broadcast %cst_351 : f32 to vector<256x32xf32>
    %335 = arith.maximumf %333, %334 : vector<256x32xf32>
    %c0_352 = arith.constant 0 : index
    %c0_353 = arith.constant 0 : index
    %336 = vector.load %arg25[%c0_352, %c0_353] : memref<32x32xf32, #tpu.memory_space<vmem>>, vector<32x32xf32>
    %cst_354 = arith.constant dense<0.000000e+00> : vector<256x32xf32>
    %337 = tpu.matmul %335, %336, %cst_354 {dimension_numbers = #tpu.dot_dimension_numbers<[1], [0], [0], [1], [0, 0, 1, 1], [], []>} : vector<256x32xf32>, vector<32x32xf32>, vector<256x32xf32> -> vector<256x32xf32>
    %c0_355 = arith.constant 0 : index
    %c0_356 = arith.constant 0 : index
    %338 = vector.load %arg26[%c0_355, %c0_356] : memref<1x32xf32, #tpu.memory_space<vmem>>, vector<1x32xf32>
    %339 = vector.broadcast %338 : vector<1x32xf32> to vector<256x32xf32>
    %340 = arith.addf %337, %339 : vector<256x32xf32>
    %cst_357 = arith.constant 0.000000e+00 : f32
    %341 = vector.broadcast %cst_357 : f32 to vector<256x32xf32>
    %342 = arith.maximumf %340, %341 : vector<256x32xf32>
    %c0_358 = arith.constant 0 : index
    %c0_359 = arith.constant 0 : index
    %343 = vector.load %arg27[%c0_358, %c0_359] : memref<32x32xf32, #tpu.memory_space<vmem>>, vector<32x32xf32>
    %cst_360 = arith.constant dense<0.000000e+00> : vector<256x32xf32>
    %344 = tpu.matmul %342, %343, %cst_360 {dimension_numbers = #tpu.dot_dimension_numbers<[1], [0], [0], [1], [0, 0, 1, 1], [], []>} : vector<256x32xf32>, vector<32x32xf32>, vector<256x32xf32> -> vector<256x32xf32>
    %c0_361 = arith.constant 0 : index
    %c0_362 = arith.constant 0 : index
    %345 = vector.load %arg28[%c0_361, %c0_362] : memref<1x32xf32, #tpu.memory_space<vmem>>, vector<1x32xf32>
    %346 = vector.broadcast %345 : vector<1x32xf32> to vector<256x32xf32>
    %347 = arith.addf %344, %346 : vector<256x32xf32>
    %cst_363 = arith.constant 1.000000e+00 : f32
    %348 = vector.broadcast %cst_363 : f32 to vector<1x256xf32>
    %cst_364 = arith.constant dense<0.000000e+00> : vector<1x32xf32>
    %349 = tpu.matmul %348, %347, %cst_364 {dimension_numbers = #tpu.dot_dimension_numbers<[1], [0], [0], [1], [0, 0, 1, 1], [], []>} : vector<1x256xf32>, vector<256x32xf32>, vector<1x32xf32> -> vector<1x32xf32>
    %c0_365 = arith.constant 0 : index
    %c0_366 = arith.constant 0 : index
    %350 = vector.load %arg29[%c0_365, %c0_366] : memref<32x32xf32, #tpu.memory_space<vmem>>, vector<32x32xf32>
    %cst_367 = arith.constant dense<0.000000e+00> : vector<1x32xf32>
    %351 = tpu.matmul %349, %350, %cst_367 {dimension_numbers = #tpu.dot_dimension_numbers<[1], [0], [0], [1], [0, 0, 1, 1], [], []>} : vector<1x32xf32>, vector<32x32xf32>, vector<1x32xf32> -> vector<1x32xf32>
    %c0_368 = arith.constant 0 : index
    %c0_369 = arith.constant 0 : index
    %352 = vector.load %arg30[%c0_368, %c0_369] : memref<1x32xf32, #tpu.memory_space<vmem>>, vector<1x32xf32>
    %353 = arith.addf %351, %352 : vector<1x32xf32>
    %cst_370 = arith.constant 0.000000e+00 : f32
    %354 = vector.broadcast %cst_370 : f32 to vector<1x32xf32>
    %355 = arith.maximumf %353, %354 : vector<1x32xf32>
    %c0_371 = arith.constant 0 : index
    %c0_372 = arith.constant 0 : index
    %356 = vector.load %arg31[%c0_371, %c0_372] : memref<32x32xf32, #tpu.memory_space<vmem>>, vector<32x32xf32>
    %cst_373 = arith.constant dense<0.000000e+00> : vector<1x32xf32>
    %357 = tpu.matmul %355, %356, %cst_373 {dimension_numbers = #tpu.dot_dimension_numbers<[1], [0], [0], [1], [0, 0, 1, 1], [], []>} : vector<1x32xf32>, vector<32x32xf32>, vector<1x32xf32> -> vector<1x32xf32>
    %c0_374 = arith.constant 0 : index
    %c0_375 = arith.constant 0 : index
    %358 = vector.load %arg32[%c0_374, %c0_375] : memref<1x32xf32, #tpu.memory_space<vmem>>, vector<1x32xf32>
    %359 = arith.addf %357, %358 : vector<1x32xf32>
    %cst_376 = arith.constant 0.000000e+00 : f32
    %360 = vector.broadcast %cst_376 : f32 to vector<1x32xf32>
    %361 = arith.maximumf %359, %360 : vector<1x32xf32>
    %c0_377 = arith.constant 0 : index
    %c0_378 = arith.constant 0 : index
    %362 = vector.load %arg33[%c0_377, %c0_378] : memref<32x10xf32, #tpu.memory_space<vmem>>, vector<32x10xf32>
    %cst_379 = arith.constant dense<0.000000e+00> : vector<1x10xf32>
    %363 = tpu.matmul %361, %362, %cst_379 {dimension_numbers = #tpu.dot_dimension_numbers<[1], [0], [0], [1], [0, 0, 1, 1], [], []>} : vector<1x32xf32>, vector<32x10xf32>, vector<1x10xf32> -> vector<1x10xf32>
    %c0_380 = arith.constant 0 : index
    %c0_381 = arith.constant 0 : index
    %364 = vector.load %arg34[%c0_380, %c0_381] : memref<1x10xf32, #tpu.memory_space<vmem>>, vector<1x10xf32>
    %365 = arith.addf %363, %364 : vector<1x10xf32>
    %366 = vector.shape_cast %365 : vector<1x10xf32> to vector<1x1x10xf32>
    %c0_382 = arith.constant 0 : index
    %c0_383 = arith.constant 0 : index
    %c0_384 = arith.constant 0 : index
    %367 = vector.load %arg35[%c0_382, %c0_383, %c0_384] : memref<1x1x10xf32, #tpu.memory_space<vmem>>, vector<1x1x10xf32>
    tpu.vector_store %arg35[%c0_382, %c0_383, %c0_384], %366 {strides = array<i32>} : memref<1x1x10xf32, #tpu.memory_space<vmem>>, vector<1x1x10xf32>,
    return
  }
  func.func @transform_0(%arg0: i32) -> (i32, i32, i32) {
    %c0_i32 = arith.constant 0 : i32
    %c0_i32_0 = arith.constant 0 : i32
    %c0_i32_1 = arith.constant 0 : i32
    return %arg0, %c0_i32, %c0_i32_0 : i32, i32, i32
  }
  func.func @transform_1(%arg0: i32) -> (i32, i32, i32) {
    %c0_i32 = arith.constant 0 : i32
    %c0_i32_0 = arith.constant 0 : i32
    %c0_i32_1 = arith.constant 0 : i32
    return %arg0, %c0_i32, %c0_i32_0 : i32, i32, i32
  }
  func.func @transform_2(%arg0: i32) -> (i32, i32, i32) {
    %c0_i32 = arith.constant 0 : i32
    %c0_i32_0 = arith.constant 0 : i32
    %c0_i32_1 = arith.constant 0 : i32
    %c0_i32_2 = arith.constant 0 : i32
    return %c0_i32, %c0_i32_0, %c0_i32_1 : i32, i32, i32
  }
  func.func @transform_3(%arg0: i32) -> (i32, i32, i32) {
    %c0_i32 = arith.constant 0 : i32
    %c0_i32_0 = arith.constant 0 : i32
    %c0_i32_1 = arith.constant 0 : i32
    %c0_i32_2 = arith.constant 0 : i32
    return %c0_i32, %c0_i32_0, %c0_i32_1 : i32, i32, i32
  }
  func.func @transform_4(%arg0: i32) -> (i32, i32, i32) {
    %c0_i32 = arith.constant 0 : i32
    %c0_i32_0 = arith.constant 0 : i32
    %c0_i32_1 = arith.constant 0 : i32
    %c0_i32_2 = arith.constant 0 : i32
    return %c0_i32, %c0_i32_0, %c0_i32_1 : i32, i32, i32
  }
  func.func @transform_5(%arg0: i32) -> (i32, i32, i32) {
    %c0_i32 = arith.constant 0 : i32
    %c0_i32_0 = arith.constant 0 : i32
    %c0_i32_1 = arith.constant 0 : i32
    %c0_i32_2 = arith.constant 0 : i32
    return %c0_i32, %c0_i32_0, %c0_i32_1 : i32, i32, i32
  }
  func.func @transform_6(%arg0: i32) -> (i32, i32, i32) {
    %c0_i32 = arith.constant 0 : i32
    %c0_i32_0 = arith.constant 0 : i32
    %c0_i32_1 = arith.constant 0 : i32
    %c0_i32_2 = arith.constant 0 : i32
    return %c0_i32, %c0_i32_0, %c0_i32_1 : i32, i32, i32
  }
  func.func @transform_7(%arg0: i32) -> (i32, i32, i32) {
    %c0_i32 = arith.constant 0 : i32
    %c0_i32_0 = arith.constant 0 : i32
    %c0_i32_1 = arith.constant 0 : i32
    %c0_i32_2 = arith.constant 0 : i32
    return %c0_i32, %c0_i32_0, %c0_i32_1 : i32, i32, i32
  }
  func.func @transform_8(%arg0: i32) -> (i32, i32, i32) {
    %c0_i32 = arith.constant 0 : i32
    %c0_i32_0 = arith.constant 0 : i32
    %c0_i32_1 = arith.constant 0 : i32
    %c0_i32_2 = arith.constant 0 : i32
    return %c0_i32, %c0_i32_0, %c0_i32_1 : i32, i32, i32
  }
  func.func @transform_9(%arg0: i32) -> (i32, i32, i32) {
    %c0_i32 = arith.constant 0 : i32
    %c0_i32_0 = arith.constant 0 : i32
    %c0_i32_1 = arith.constant 0 : i32
    %c0_i32_2 = arith.constant 0 : i32
    return %c0_i32, %c0_i32_0, %c0_i32_1 : i32, i32, i32
  }
  func.func @transform_10(%arg0: i32) -> (i32, i32, i32) {
    %c0_i32 = arith.constant 0 : i32
    %c0_i32_0 = arith.constant 0 : i32
    %c0_i32_1 = arith.constant 0 : i32
    %c0_i32_2 = arith.constant 0 : i32
    return %c0_i32, %c0_i32_0, %c0_i32_1 : i32, i32, i32
  }
  func.func @transform_11(%arg0: i32) -> (i32, i32, i32) {
    %c0_i32 = arith.constant 0 : i32
    %c0_i32_0 = arith.constant 0 : i32
    %c0_i32_1 = arith.constant 0 : i32
    %c0_i32_2 = arith.constant 0 : i32
    return %c0_i32, %c0_i32_0, %c0_i32_1 : i32, i32, i32
  }
  func.func @transform_12(%arg0: i32) -> (i32, i32, i32) {
    %c0_i32 = arith.constant 0 : i32
    %c0_i32_0 = arith.constant 0 : i32
    %c0_i32_1 = arith.constant 0 : i32
    %c0_i32_2 = arith.constant 0 : i32
    return %c0_i32, %c0_i32_0, %c0_i32_1 : i32, i32, i32
  }
  func.func @transform_13(%arg0: i32) -> (i32, i32, i32) {
    %c0_i32 = arith.constant 0 : i32
    %c0_i32_0 = arith.constant 0 : i32
    %c0_i32_1 = arith.constant 0 : i32
    %c0_i32_2 = arith.constant 0 : i32
    return %c0_i32, %c0_i32_0, %c0_i32_1 : i32, i32, i32
  }
  func.func @transform_14(%arg0: i32) -> (i32, i32) {
    %c0_i32 = arith.constant 0 : i32
    %c0_i32_0 = arith.constant 0 : i32
    %c0_i32_1 = arith.constant 0 : i32
    return %c0_i32, %c0_i32_0 : i32, i32
  }
  func.func @transform_15(%arg0: i32) -> (i32, i32) {
    %c0_i32 = arith.constant 0 : i32
    %c0_i32_0 = arith.constant 0 : i32
    %c0_i32_1 = arith.constant 0 : i32
    return %c0_i32, %c0_i32_0 : i32, i32
  }
  func.func @transform_16(%arg0: i32) -> (i32, i32) {
    %c0_i32 = arith.constant 0 : i32
    %c0_i32_0 = arith.constant 0 : i32
    %c0_i32_1 = arith.constant 0 : i32
    return %c0_i32, %c0_i32_0 : i32, i32
  }
  func.func @transform_17(%arg0: i32) -> (i32, i32) {
    %c0_i32 = arith.constant 0 : i32
    %c0_i32_0 = arith.constant 0 : i32
    %c0_i32_1 = arith.constant 0 : i32
    return %c0_i32, %c0_i32_0 : i32, i32
  }
  func.func @transform_18(%arg0: i32) -> (i32, i32) {
    %c0_i32 = arith.constant 0 : i32
    %c0_i32_0 = arith.constant 0 : i32
    %c0_i32_1 = arith.constant 0 : i32
    return %c0_i32, %c0_i32_0 : i32, i32
  }
  func.func @transform_19(%arg0: i32) -> (i32, i32) {
    %c0_i32 = arith.constant 0 : i32
    %c0_i32_0 = arith.constant 0 : i32
    %c0_i32_1 = arith.constant 0 : i32
    return %c0_i32, %c0_i32_0 : i32, i32
  }
  func.func @transform_20(%arg0: i32) -> (i32, i32) {
    %c0_i32 = arith.constant 0 : i32
    %c0_i32_0 = arith.constant 0 : i32
    %c0_i32_1 = arith.constant 0 : i32
    return %c0_i32, %c0_i32_0 : i32, i32
  }
  func.func @transform_21(%arg0: i32) -> (i32, i32) {
    %c0_i32 = arith.constant 0 : i32
    %c0_i32_0 = arith.constant 0 : i32
    %c0_i32_1 = arith.constant 0 : i32
    return %c0_i32, %c0_i32_0 : i32, i32
  }
  func.func @transform_22(%arg0: i32) -> (i32, i32) {
    %c0_i32 = arith.constant 0 : i32
    %c0_i32_0 = arith.constant 0 : i32
    %c0_i32_1 = arith.constant 0 : i32
    return %c0_i32, %c0_i32_0 : i32, i32
  }
  func.func @transform_23(%arg0: i32) -> (i32, i32) {
    %c0_i32 = arith.constant 0 : i32
    %c0_i32_0 = arith.constant 0 : i32
    %c0_i32_1 = arith.constant 0 : i32
    return %c0_i32, %c0_i32_0 : i32, i32
  }
  func.func @transform_24(%arg0: i32) -> (i32, i32) {
    %c0_i32 = arith.constant 0 : i32
    %c0_i32_0 = arith.constant 0 : i32
    %c0_i32_1 = arith.constant 0 : i32
    return %c0_i32, %c0_i32_0 : i32, i32
  }
  func.func @transform_25(%arg0: i32) -> (i32, i32) {
    %c0_i32 = arith.constant 0 : i32
    %c0_i32_0 = arith.constant 0 : i32
    %c0_i32_1 = arith.constant 0 : i32
    return %c0_i32, %c0_i32_0 : i32, i32
  }
  func.func @transform_26(%arg0: i32) -> (i32, i32) {
    %c0_i32 = arith.constant 0 : i32
    %c0_i32_0 = arith.constant 0 : i32
    %c0_i32_1 = arith.constant 0 : i32
    return %c0_i32, %c0_i32_0 : i32, i32
  }
  func.func @transform_27(%arg0: i32) -> (i32, i32) {
    %c0_i32 = arith.constant 0 : i32
    %c0_i32_0 = arith.constant 0 : i32
    %c0_i32_1 = arith.constant 0 : i32
    return %c0_i32, %c0_i32_0 : i32, i32
  }
  func.func @transform_28(%arg0: i32) -> (i32, i32) {
    %c0_i32 = arith.constant 0 : i32
    %c0_i32_0 = arith.constant 0 : i32
    %c0_i32_1 = arith.constant 0 : i32
    return %c0_i32, %c0_i32_0 : i32, i32
  }
  func.func @transform_29(%arg0: i32) -> (i32, i32) {
    %c0_i32 = arith.constant 0 : i32
    %c0_i32_0 = arith.constant 0 : i32
    %c0_i32_1 = arith.constant 0 : i32
    return %c0_i32, %c0_i32_0 : i32, i32
  }
  func.func @transform_30(%arg0: i32) -> (i32, i32) {
    %c0_i32 = arith.constant 0 : i32
    %c0_i32_0 = arith.constant 0 : i32
    %c0_i32_1 = arith.constant 0 : i32
    return %c0_i32, %c0_i32_0 : i32, i32
  }
  func.func @transform_31(%arg0: i32) -> (i32, i32) {
    %c0_i32 = arith.constant 0 : i32
    %c0_i32_0 = arith.constant 0 : i32
    %c0_i32_1 = arith.constant 0 : i32
    return %c0_i32, %c0_i32_0 : i32, i32
  }
  func.func @transform_32(%arg0: i32) -> (i32, i32) {
    %c0_i32 = arith.constant 0 : i32
    %c0_i32_0 = arith.constant 0 : i32
    %c0_i32_1 = arith.constant 0 : i32
    return %c0_i32, %c0_i32_0 : i32, i32
  }
  func.func @transform_33(%arg0: i32) -> (i32, i32) {
    %c0_i32 = arith.constant 0 : i32
    %c0_i32_0 = arith.constant 0 : i32
    %c0_i32_1 = arith.constant 0 : i32
    return %c0_i32, %c0_i32_0 : i32, i32
  }
  func.func @transform_34(%arg0: i32) -> (i32, i32, i32) {
    %c0_i32 = arith.constant 0 : i32
    %c0_i32_0 = arith.constant 0 : i32
    %c0_i32_1 = arith.constant 0 : i32
    return %arg0, %c0_i32, %c0_i32_0 : i32, i32, i32
  }
}

</mosaic_0001>

<bundles_post_ra>
// kernel: relation_network_forward.1
= control target key start
LH: loop header
LB: loop body
LE: loop exit
PB: predicated region body
PF: predicated region fallthrough
CT: control target
= control target key end

     0   :  { %s16726_s6 = smov 1   ;;  %s16727_s10 = smov 2   ;;  %s19334_s0 = inlined_call_operand.smem [shape: u32[35], index: -1, kind: input, shape index: {}] }
   0x1   :  { %s16796_s5 = sld [smem:[%s19334_s0]]   ;;  %s16728_s14 = smov 3  }
   0x2   :  { %s16801_s9 = sld [smem:[%s19334_s0 + %s16726_s6]]   ;;  %s16729_s18 = smov 4  }
   0x3   :  { %s16806_s13 = sld [smem:[%s19334_s0 + %s16727_s10]]   ;;  %s16730_s22 = smov 5  }
   0x4   :  { %s16811_s17 = sld [smem:[%s19334_s0 + %s16728_s14]]   ;;  %s16731_s26 = smov 6  }
   0x5   :  { %s16816_s21 = sld [smem:[%s19334_s0 + %s16729_s18]]   ;;  %s16732_s30 = smov 7  }
   0x6   :  { %s16821_s25 = sld [smem:[%s19334_s0 + %s16730_s22]]   ;;  %s16733_s4 = smov 8  }
   0x7   :  { %19433 = sst [smem:[#allocation47_spill]] %s16796_s5  ;;  %s16734_s10 = smov 9  }
   0x8   :  { %19434 = sst [smem:[#allocation48_spill]] %s16801_s9  ;;  %s16735_s15 = smov 10  }
   0x9   :  { %19435 = sst [smem:[#allocation49_spill]] %s16806_s13  ;;  %s16736_s20 = smov 11  }
   0xa   :  { %19436 = sst [smem:[#allocation50_spill]] %s16811_s17  ;;  %s16738_s1 = smov 13  }
   0xb   :  { %s16826_s29 = sld [smem:[%s19334_s0 + %s16731_s26]]   ;;  %s16737_s26 = smov 12  }
   0xc   :  { %19437 = sst [smem:[#allocation51_spill]] %s16821_s25  ;;  %s16739_s7 = smov 14  }
   0xd   :  { %s16831_s3 = sld [smem:[%s19334_s0 + %s16732_s30]]   ;;  %s16741_s22 = smov 16  }
   0xe   :  { %s16836_s8 = sld [smem:[%s19334_s0 + %s16733_s4]]   ;;  %s16742_s28 = smov 17  }
   0xf   :  { %s16841_s14 = sld [smem:[%s19334_s0 + %s16734_s10]]  }
  0x10   :  { %s16846_s19 = sld [smem:[%s19334_s0 + %s16735_s15]]   ;;  %s16740_s15 = smov 15  }
  0x11   :  { %19438 = sst [smem:[#allocation52_spill]] %s16826_s29 }
  0x12   :  { %s16851_s24 = sld [smem:[%s19334_s0 + %s16736_s20]]  }
  0x13   :  { %19439 = sst [smem:[#allocation53_spill]] %s16831_s3 }
  0x14   :  { %19440 = sst [smem:[#allocation54_spill]] %s16836_s8 }
  0x15   :  { %19441 = sst [smem:[#allocation55_spill]] %s16841_s14 }
  0x16   :  { %s16856_s30 = sld [smem:[%s19334_s0 + %s16737_s26]]  }
  0x17   :  { %s16861_s6 = sld [smem:[%s19334_s0 + %s16738_s1]]  }
  0x18   :  { %19442 = sst [smem:[#allocation56_spill]] %s16851_s24 }
  0x19   :  { %s16866_s12 = sld [smem:[%s19334_s0 + %s16739_s7]]   ;;  %s16743_s7 = smov 18  }
  0x1a   :  { %s16871_s20 = sld [smem:[%s19334_s0 + %s16740_s15]]   ;;  %s16744_s15 = smov 19  }
  0x1b   :  { %s16876_s27 = sld [smem:[%s19334_s0 + %s16741_s22]]   ;;  %s16745_s22 = smov 20  }
  0x1c   :  { %19443 = sst [smem:[#allocation57_spill]] %s16856_s30 }
  0x1d   :  { %19444 = sst [smem:[#allocation58_spill]] %s16861_s6 }
  0x1e   :  { %s16881_s4 = sld [smem:[%s19334_s0 + %s16742_s28]]   ;;  %s16746_s28 = smov 21  }
  0x1f   :  { %19445 = sst [smem:[#allocation59_spill]] %s16866_s12 }
  0x20   :  { %19446 = sst [smem:[#allocation60_spill]] %s16871_s20 }
  0x21   :  { %s16886_s12 = sld [smem:[%s19334_s0 + %s16743_s7]]   ;;  %s16747_s7 = smov 22  }
  0x22   :  { %s16891_s20 = sld [smem:[%s19334_s0 + %s16744_s15]]   ;;  %s16748_s15 = smov 23  }
  0x23   :  { %s16896_s24 = sld [smem:[%s19334_s0 + %s16745_s22]]   ;;  %s16749_s22 = smov 24  }
  0x24   :  { %19447 = sst [smem:[#allocation61_spill]] %s16881_s4 }
  0x25   :  { %s16901_s30 = sld [smem:[%s19334_s0 + %s16746_s28]]   ;;  %s16750_s28 = smov 25  }
  0x26   :  { %s16906_s8 = sld [smem:[%s19334_s0 + %s16747_s7]]   ;;  %s16751_s7 = smov 26  }
  0x27   :  { %19448 = sst [smem:[#allocation62_spill]] %s16886_s12 }
  0x28   :  { %s16911_s14 = sld [smem:[%s19334_s0 + %s16748_s15]]   ;;  %s16752_s15 = smov 27  }
  0x29   :  { %19449 = sst [smem:[#allocation63_spill]] %s16896_s24 }
  0x2a   :  { %s16916_s24 = sld [smem:[%s19334_s0 + %s16749_s22]]   ;;  %s16753_s22 = smov 28  }
  0x2b   :  { %19450 = sst [smem:[#allocation64_spill]] %s16901_s30 }
  0x2c   :  { %19451 = sst [smem:[#allocation65_spill]] %s16906_s8 }
  0x2d   :  { %s16921_s30 = sld [smem:[%s19334_s0 + %s16750_s28]]   ;;  %s16754_s28 = smov 29  }
  0x2e   :  { %s16926_s25 = sld [smem:[%s19334_s0 + %s16751_s7]]   ;;  %s16755_s7 = smov 30  }
  0x2f   :  { %s16931_s29 = sld [smem:[%s19334_s0 + %s16752_s15]]   ;;  %s16756_s15 = smov 31  }
  0x30   :  { %s16936_s13 = sld [smem:[%s19334_s0 + %s16753_s22]]   ;;  %s16757_s22 = smov 32  }
  0x31   :  { %s16941_s17 = sld [smem:[%s19334_s0 + %s16754_s28]]   ;;  %s16758_s28 = smov 33  }
  0x32   :  { %s16946_s5 = sld [smem:[%s19334_s0 + %s16755_s7]]   ;;  %s16759_s7 = smov 34  }
  0x33   :  { %19452 = sst [smem:[#allocation66_spill]] %s16921_s30 }
  0x34   :  { %s16951_s9 = sld [smem:[%s19334_s0 + %s16756_s15]]  }
  0x35   :  { %19453 = sst [smem:[#allocation67_spill]] %s16931_s29 }
  0x36   :  { %s16956_s29 = sld [smem:[%s19334_s0 + %s16757_s22]]  }
  0x37   :  { %19454 = sst [smem:[#allocation68_spill]] %s16941_s17 }
  0x38   :  { %19455 = sst [smem:[#allocation69_spill]] %s16946_s5 }
  0x39   :  { %s16961_s17 = sld [smem:[%s19334_s0 + %s16758_s28]]  }
  0x3a   :  { %19456 = sst [smem:[#allocation70_spill]] %s16951_s9 }
  0x3b   :  { %s16966_s30 = sld [smem:[%s19334_s0 + %s16759_s7]]  }
  0x3c   :  { %19457 = sst [smem:[#allocation71_spill]] %s16956_s29 }
  0x41   :  { %19458 = sst [smem:[#allocation72_spill]] %s16966_s30 }
  0x42   :  { %74 = vsyncpa [#allocation3], 0 }
  0x43   :  { %76 = vsyncpa [#allocation3 + $0x1], 0 }
  0x44   :  { %77 = vsyncpa [#allocation6], 0 }
  0x45   :  { %78 = vsyncpa [#allocation9], 0 }
  0x46   :  { %79 = vsyncpa [#allocation12], 0 }
  0x47   :  { %80 = vsyncpa [#allocation15], 0 }
  0x48   :  { %81 = vsyncpa [#allocation18], 0 }
  0x49   :  { %82 = vsyncpa [#allocation21], 0 }
  0x4a   :  { %83 = vsyncpa [#allocation24], 0 }
  0x4b   :  { %84 = vsyncpa [#allocation27], 0 }
  0x4c   :  { %85 = vsyncpa [#allocation30], 0 }
  0x4d   :  { %86 = vsyncpa [#allocation33], 0 }
  0x4e   :  { %87 = vsyncpa [#allocation4], 0 }
  0x4f   :  { %89 = vsyncpa [#allocation4 + $0x1], 0  ;;  %s16968_s15 = smov 0   ;;  %s16970_s16 = smov 0  }
  0x50   :  { %s16972_s0 = smov 0   ;;  %s16974_s18 = smov 0  }
  0x51 LB: > { %s16760_s22 = smov [#allocation5]   ;;  %s16989_s26 = sadd.s32 4294967295, %s16724_s18   ;;  %s16724_s18 = sphi %s16974_s18, %s19657_s18   ;;  %s16720_s0 = sphi %s16972_s0, %s19656_s0   ;;  %s16716_s16 = sphi %s16970_s16, %s19655_s16   ;;  %s16712_s15 = sphi %s16968_s15, %s19654_s15  }
  0x52   : > { %s868_s23 = sshll.u32 %s16760_s22, 4  ;;  %p12211_p0 = scmp.ge.s32.totalorder %s16724_s18, 1  ;;  %s869_s23 = int_to_ptr.vmem [resolvable:$true] %s868_s23 }
  0x53   : > { %p19353_p1 = scmp.eq.s32.totalorder %s16989_s26, 0  ;;  %p850_p2 = scmp.lt.s32.totalorder %s16724_s18, 3 }
  0x54   : > { %s16761_s1 = smov [#allocation8]   ;;  %s16762_s10 = smov [#allocation11]  }
  0x55   : > { %p16994_p3 = pnand %p12211_p0, %p850_p2  ;;  %s906_s2 = sshll.u32 %s16761_s1, 4  ;;  %s17007_s2 = int_to_ptr.vmem [resolvable:$true] %s906_s2 }
  0x56   : > { %s944_s11 = sshll.u32 %s16762_s10, 4  ;;  %s16109_s30 = scalar_lea.vmem %s869_s23, 48  ;;  %s17009_s11 = int_to_ptr.vmem [resolvable:$true] %s944_s11 }
  0x57   : > { %s19459_s28 = scalar_select %p16994_p3, 1, 0 }
  0x58   : > { %p15836_p5 = pneg %p16994_p3  ;;  %p16110_p8 = scmp.ne.s32.totalorder %s869_s23, %s16109_s30 }
  0x59   : > { %19460 = sst [smem:[#allocation73_spill]] %s19459_s28  ;;  %s16116_s1 = scalar_lea.vmem %s869_s23, 64 }
  0x5a   : > { %p17003_p6 = pnand %p15836_p5, %p19353_p1  ;;  %p16117_p11 = scmp.lt.s32.totalorder %s869_s23, %s869_s23 }
  0x5b   : > { %p16118_p12 = scmp.lt.s32.totalorder %s16116_s1, %s16109_s30 }
  0x5c   : > { %p17013_p7 = pneg %p17003_p6 }
  0x5d   : > { %p16119_p13 = por %p16118_p12, %p16117_p11 }
  0x5e   : > { %p16112_p9 = pnand %p16110_p8, %p17013_p7 }
  0x60   : > { %p16113_p10 = pneg %p16112_p9 }
  0x62   : > { %p16120_p0 = pnand %p16119_p13, %p16113_p10 }
  0x64   : > { %16123 = shalt.err (!%p16120_p0)
}
  0x65   : > { %s19349_s10 = smov 16   ;;  %s19351_s29 = smov 1  }
  0x66   : > { %15839 = dma.hbm_to_vmem [thread:$0]  (!%p17003_p6), %s16816_s21, 48, %s869_s23, [#allocation6], %s19349_s10, %s19349_s10, %s19351_s29  }
  0x67   : > { %s16135_s28 = scalar_lea.vmem %s17007_s2, 48  ;;  %s16142_s30 = scalar_lea.vmem %s17007_s2, 64 }
  0x68   : > { %p16136_p2 = scmp.ne.s32.totalorder %s17007_s2, %s16135_s28  ;;  %p16143_p9 = scmp.lt.s32.totalorder %s17007_s2, %s17007_s2 }
  0x69   : > { %p16144_p10 = scmp.lt.s32.totalorder %s16142_s30, %s16135_s28 }
  0x6a   : > { %p16138_p5 = pnand %p16136_p2, %p17013_p7 }
  0x6b   : > { %p16145_p11 = por %p16144_p10, %p16143_p9 }
  0x6c   : > { %p16139_p8 = pneg %p16138_p5 }
  0x6e   : > { %p16146_p12 = pnand %p16145_p11, %p16139_p8 }
  0x70   : > { %16149 = shalt.err (!%p16146_p12)
}
  0x71   : > { %15845 = dma.hbm_to_vmem [thread:$0]  (!%p17003_p6), %s16846_s19, 48, %s17007_s2, [#allocation9], %s19349_s10, %s19349_s10, %s19351_s29  }
  0x72   : > { %s16161_s23 = scalar_lea.vmem %s17009_s11, 256  ;;  %p16169_p5 = scmp.lt.s32.totalorder %s17009_s11, %s17009_s11 }
  0x73   : > { %p16162_p13 = scmp.ne.s32.totalorder %s17009_s11, %s16161_s23  ;;  %p16170_p8 = scmp.lt.s32.totalorder %s16161_s23, %s16161_s23 }
  0x75   : > { %p16164_p0 = pnand %p16162_p13, %p17013_p7  ;;  %p16171_p9 = por %p16170_p8, %p16169_p5 }
  0x77   : > { %p16165_p2 = pneg %p16164_p0 }
  0x79   : > { %p16172_p10 = pnand %p16171_p9, %p16165_p2 }
  0x7b   : > { %16175 = shalt.err (!%p16172_p10)
}
  0x7c   : > { %s19355_s28 = smov 128   ;;  %s19356_s1 = smov 8  }
  0x7d   : > { %15851 = dma.hbm_to_vmem [thread:$0]  (!%p17003_p6), %s16876_s27, 256, %s17009_s11, [#allocation12], %s19355_s28, %s19355_s28, %s19356_s1  }
  0x7e   : > { %s16767_s2 = smov [#allocation14]   ;;  %s16768_s10 = smov [#allocation17]  }
  0x7f   : > { %s971_s30 = sshll.u32 %s16767_s2, 4  ;;  %s998_s29 = sshll.u32 %s16768_s10, 4  ;;  %s972_s30 = int_to_ptr.vmem [resolvable:$true] %s971_s30  ;;  %s999_s29 = int_to_ptr.vmem [resolvable:$true] %s998_s29 }
  0x80   : > { %s16187_s23 = scalar_lea.vmem %s972_s30, 128  ;;  %p16195_p0 = scmp.lt.s32.totalorder %s972_s30, %s972_s30 }
  0x81   : > { %p16188_p11 = scmp.ne.s32.totalorder %s972_s30, %s16187_s23  ;;  %p16196_p2 = scmp.lt.s32.totalorder %s16187_s23, %s16187_s23 }
  0x83   : > { %p16190_p12 = pnand %p16188_p11, %p17013_p7  ;;  %p16197_p5 = por %p16196_p2, %p16195_p0 }
  0x85   : > { %p16191_p13 = pneg %p16190_p12 }
  0x87   : > { %p16198_p8 = pnand %p16197_p5, %p16191_p13 }
  0x89   : > { %16201 = shalt.err (!%p16198_p8)
}
  0x8a   : > { %s19463_s12 = sld [smem:[#allocation62_spill]]  ;;  %s16213_s11 = scalar_lea.vmem %s999_s29, 512 }
  0x8b   : > { %p16214_p9 = scmp.ne.s32.totalorder %s999_s29, %s16213_s11  ;;  %p16221_p1 = scmp.lt.s32.totalorder %s999_s29, %s999_s29 }
  0x8c   : > { %p16222_p3 = scmp.lt.s32.totalorder %s16213_s11, %s16213_s11 }
  0x8d   : > { %p16216_p10 = pnand %p16214_p9, %p17013_p7 }
  0x8e   : > { %p16223_p11 = por %p16222_p3, %p16221_p1 }
  0x8f   : > { %p16217_p4 = pneg %p16216_p10 }
  0x90   : > { %15857 = dma.hbm_to_vmem [thread:$0]  (!%p17003_p6), %s19463_s12, 128, %s972_s30, [#allocation15]  }
  0x91   : > { %p16224_p12 = pnand %p16223_p11, %p16217_p4 }
  0x93   : > { %16227 = shalt.err (!%p16224_p12)
}
  0x94   : > { %s19464_s8 = sld [smem:[#allocation65_spill]]  ;;  %s16769_s10 = smov [#allocation20]  }
  0x95   : > { %s1022_s2 = sshll.u32 %s16769_s10, 4  ;;  %s16770_s30 = smov [#allocation23]   ;;  %s1023_s2 = int_to_ptr.vmem [resolvable:$true] %s1022_s2 }
  0x96   : > { %s1046_s23 = sshll.u32 %s16770_s30, 4  ;;  %s16239_s12 = scalar_lea.vmem %s1023_s2, 512  ;;  %s1047_s23 = int_to_ptr.vmem [resolvable:$true] %s1046_s23 }
  0x97   : > { %p16240_p13 = scmp.ne.s32.totalorder %s1023_s2, %s16239_s12  ;;  %p16247_p3 = scmp.lt.s32.totalorder %s1023_s2, %s1023_s2 }
  0x98   : > { %p16248_p4 = scmp.lt.s32.totalorder %s16239_s12, %s16239_s12 }
  0x99   : > { %p16242_p0 = pnand %p16240_p13, %p17013_p7 }
  0x9a   : > { %15863 = dma.hbm_to_vmem [thread:$0]  (!%p17003_p6), %s19464_s8, 512, %s999_s29, [#allocation18], %s19355_s28, %s19355_s28, %s19356_s1  }
  0x9b   : > { %p16243_p1 = pneg %p16242_p0  ;;  %p16249_p2 = por %p16248_p4, %p16247_p3 }
  0x9d   : > { %p16250_p5 = pnand %p16249_p2, %p16243_p1 }
  0x9f   : > { %16253 = shalt.err (!%p16250_p5)
}
  0xa0   : > { %15869 = dma.hbm_to_vmem [thread:$0]  (!%p17003_p6), %s16916_s24, 512, %s1023_s2, [#allocation21], %s19355_s28, %s19355_s28, %s19356_s1  }
  0xa1   : > { %s16265_s29 = scalar_lea.vmem %s1047_s23, 512  ;;  %p16273_p11 = scmp.lt.s32.totalorder %s1047_s23, %s1047_s23 }
  0xa2   : > { %p16266_p8 = scmp.ne.s32.totalorder %s1047_s23, %s16265_s29  ;;  %p16274_p12 = scmp.lt.s32.totalorder %s16265_s29, %s16265_s29 }
  0xa4   : > { %p16268_p9 = pnand %p16266_p8, %p17013_p7  ;;  %p16275_p13 = por %p16274_p12, %p16273_p11 }
  0xa6   : > { %p16269_p10 = pneg %p16268_p9 }
  0xa8   : > { %p16276_p0 = pnand %p16275_p13, %p16269_p10 }
  0xaa   : > { %16279 = shalt.err (!%p16276_p0)
}
  0xab   : > { %15875 = dma.hbm_to_vmem [thread:$0]  (!%p17003_p6), %s16926_s25, 512, %s1047_s23, [#allocation24], %s19355_s28, %s19355_s28, %s19356_s1  }
  0xac   : > { %s16771_s12 = smov [#allocation26]   ;;  %s16772_s10 = smov [#allocation29]  }
  0xad   : > { %s1070_s11 = sshll.u32 %s16771_s12, 4  ;;  %s1094_s2 = sshll.u32 %s16772_s10, 4  ;;  %s1071_s11 = int_to_ptr.vmem [resolvable:$true] %s1070_s11  ;;  %s1095_s2 = int_to_ptr.vmem [resolvable:$true] %s1094_s2 }
  0xae   : > { %s16291_s30 = scalar_lea.vmem %s1071_s11, 512  ;;  %p16299_p2 = scmp.lt.s32.totalorder %s1071_s11, %s1071_s11 }
  0xaf   : > { %p16292_p1 = scmp.ne.s32.totalorder %s1071_s11, %s16291_s30  ;;  %p16300_p5 = scmp.lt.s32.totalorder %s16291_s30, %s16291_s30 }
  0xb1   : > { %p16294_p3 = pnand %p16292_p1, %p17013_p7  ;;  %p16301_p8 = por %p16300_p5, %p16299_p2 }
  0xb3   : > { %p16295_p4 = pneg %p16294_p3 }
  0xb5   : > { %p16302_p9 = pnand %p16301_p8, %p16295_p4 }
  0xb7   : > { %16305 = shalt.err (!%p16302_p9)
}
  0xb8   : > { %15881 = dma.hbm_to_vmem [thread:$0]  (!%p17003_p6), %s16936_s13, 512, %s1071_s11, [#allocation27], %s19355_s28, %s19355_s28, %s19356_s1  }
  0xb9   : > { %s16317_s23 = scalar_lea.vmem %s1095_s2, 512  ;;  %p16325_p13 = scmp.lt.s32.totalorder %s1095_s2, %s1095_s2 }
  0xba   : > { %p16318_p10 = scmp.ne.s32.totalorder %s1095_s2, %s16317_s23  ;;  %p16326_p0 = scmp.lt.s32.totalorder %s16317_s23, %s16317_s23 }
  0xbc   : > { %p16320_p11 = pnand %p16318_p10, %p17013_p7  ;;  %p16327_p1 = por %p16326_p0, %p16325_p13 }
  0xbe   : > { %p16321_p12 = pneg %p16320_p11 }
  0xc0   : > { %p16328_p3 = pnand %p16327_p1, %p16321_p12 }
  0xc2   : > { %16331 = shalt.err (!%p16328_p3)
}
  0xc3   : > { %s19465_s5 = sld [smem:[#allocation69_spill]]  ;;  %s16773_s29 = smov [#allocation7]  }
  0xc4   : > { %s887_s12 = sshll.u32 %s16773_s29, 4  ;;  %s16774_s11 = smov [#allocation10]   ;;  %s888_s12 = int_to_ptr.vmem [resolvable:$true] %s887_s12 }
  0xc5   : > { %s925_s10 = sshll.u32 %s16774_s11, 4  ;;  %s16343_s30 = scalar_lea.vmem %s888_s12, 48  ;;  %s926_s10 = int_to_ptr.vmem [resolvable:$true] %s925_s10 }
  0xc6   : > { %p16344_p4 = scmp.ne.s32.totalorder %s888_s12, %s16343_s30  ;;  %s16350_s23 = scalar_lea.vmem %s888_s12, 64 }
  0xc7   : > { %p16351_p8 = scmp.lt.s32.totalorder %s888_s12, %s888_s12  ;;  %p16352_p9 = scmp.lt.s32.totalorder %s16350_s23, %s16343_s30 }
  0xc8   : > { %p16346_p2 = pnand %p16344_p4, %p17013_p7 }
  0xc9   : > { %15887 = dma.hbm_to_vmem [thread:$0]  (!%p17003_p6), %s19465_s5, 512, %s1095_s2, [#allocation30], %s19355_s28, %s19355_s28, %s19356_s1  }
  0xca   : > { %p16347_p5 = pneg %p16346_p2  ;;  %p16353_p10 = por %p16352_p9, %p16351_p8 }
  0xcc   : > { %p16354_p11 = pnand %p16353_p10, %p16347_p5 }
  0xce   : > { %16357 = shalt.err (!%p16354_p11)
}
  0xcf   : > { %s19466_s8 = smov 1   ;;  %s19467_s2 = smov 16  }
  0xd0   : > { %s19468_s3 = sld [smem:[#allocation53_spill]]  ;;  %s16369_s29 = scalar_lea.vmem %s926_s10, 48 }
  0xd1   : > { %p16370_p12 = scmp.ne.s32.totalorder %s926_s10, %s16369_s29  ;;  %s16376_s11 = scalar_lea.vmem %s926_s10, 64 }
  0xd2   : > { %p16377_p1 = scmp.lt.s32.totalorder %s926_s10, %s926_s10  ;;  %p16378_p3 = scmp.lt.s32.totalorder %s16376_s11, %s16369_s29 }
  0xd3   : > { %p16372_p13 = pnand %p16370_p12, %p17013_p7 }
  0xd4   : > { %p16379_p4 = por %p16378_p3, %p16377_p1 }
  0xd5   : > { %p16373_p0 = pneg %p16372_p13 }
  0xd6   : > { %15842 = dma.hbm_to_vmem [thread:$0]  (!%p17003_p6), %s19468_s3, 48, %s888_s12, [#allocation6], %s19467_s2, %s19467_s2, %s19466_s8  }
  0xd7   : > { %p16380_p2 = pnand %p16379_p4, %p16373_p0 }
  0xd9   : > { %16383 = shalt.err (!%p16380_p2)
}
  0xda   : > { %s19469_s6 = sld [smem:[#allocation58_spill]]  ;;  %s16775_s12 = smov [#allocation13]  }
  0xdb   : > { %s957_s30 = sshll.u32 %s16775_s12, 4  ;;  %s16776_s23 = smov [#allocation16]   ;;  %s958_s30 = int_to_ptr.vmem [resolvable:$true] %s957_s30 }
  0xdc   : > { %s982_s28 = sshll.u32 %s16776_s23, 4  ;;  %s16395_s1 = scalar_lea.vmem %s958_s30, 256  ;;  %s983_s28 = int_to_ptr.vmem [resolvable:$true] %s982_s28 }
  0xdd   : > { %p16396_p5 = scmp.ne.s32.totalorder %s958_s30, %s16395_s1  ;;  %p16403_p10 = scmp.lt.s32.totalorder %s958_s30, %s958_s30 }
  0xde   : > { %p16404_p11 = scmp.lt.s32.totalorder %s16395_s1, %s16395_s1 }
  0xdf   : > { %p16398_p8 = pnand %p16396_p5, %p17013_p7 }
  0xe0   : > { %15848 = dma.hbm_to_vmem [thread:$0]  (!%p17003_p6), %s19469_s6, 48, %s926_s10, [#allocation9], %s19467_s2, %s19467_s2, %s19466_s8  }
  0xe1   : > { %p16399_p9 = pneg %p16398_p8  ;;  %p16405_p12 = por %p16404_p11, %p16403_p10 }
  0xe3   : > { %p16406_p13 = pnand %p16405_p12, %p16399_p9 }
  0xe5   : > { %16409 = shalt.err (!%p16406_p13)
}
  0xe6   : > { %s19470_s29 = smov 8   ;;  %s19471_s11 = smov 128  }
  0xe7   : > { %s19472_s4 = sld [smem:[#allocation61_spill]]  ;;  %s16421_s8 = scalar_lea.vmem %s983_s28, 128 }
  0xe8   : > { %p16422_p0 = scmp.ne.s32.totalorder %s983_s28, %s16421_s8  ;;  %p16429_p4 = scmp.lt.s32.totalorder %s983_s28, %s983_s28 }
  0xe9   : > { %p16430_p2 = scmp.lt.s32.totalorder %s16421_s8, %s16421_s8 }
  0xea   : > { %p16424_p1 = pnand %p16422_p0, %p17013_p7 }
  0xeb   : > { %p16431_p5 = por %p16430_p2, %p16429_p4 }
  0xec   : > { %p16425_p3 = pneg %p16424_p1 }
  0xed   : > { %15854 = dma.hbm_to_vmem [thread:$0]  (!%p17003_p6), %s19472_s4, 256, %s958_s30, [#allocation12], %s19471_s11, %s19471_s11, %s19470_s29  }
  0xee   : > { %p16432_p8 = pnand %p16431_p5, %p16425_p3 }
  0xf0   : > { %16435 = shalt.err (!%p16432_p8)
}
  0xf1   : > { %15860 = dma.hbm_to_vmem [thread:$0]  (!%p17003_p6), %s16891_s20, 128, %s983_s28, [#allocation15]  }
  0xf2   : > { %s16777_s1 = smov [#allocation19]   ;;  %s16778_s2 = smov [#allocation22]  }
  0xf3   : > { %s1012_s10 = sshll.u32 %s16777_s1, 4  ;;  %s1036_s12 = sshll.u32 %s16778_s2, 4  ;;  %s1013_s10 = int_to_ptr.vmem [resolvable:$true] %s1012_s10  ;;  %s1037_s12 = int_to_ptr.vmem [resolvable:$true] %s1036_s12 }
  0xf4   : > { %s16447_s30 = scalar_lea.vmem %s1013_s10, 16  ;;  %s16454_s23 = scalar_lea.vmem %s1013_s10, 32 }
  0xf5   : > { %p16448_p9 = scmp.ne.s32.totalorder %s1013_s10, %s16447_s30  ;;  %p16455_p12 = scmp.lt.s32.totalorder %s1013_s10, %s1013_s10 }
  0xf6   : > { %p16456_p13 = scmp.lt.s32.totalorder %s16454_s23, %s16447_s30 }
  0xf7   : > { %p16450_p10 = pnand %p16448_p9, %p17013_p7 }
  0xf8   : > { %p16457_p0 = por %p16456_p13, %p16455_p12 }
  0xf9   : > { %p16451_p11 = pneg %p16450_p10 }
  0xfb   : > { %p16458_p1 = pnand %p16457_p0, %p16451_p11 }
  0xfd   : > { %16461 = shalt.err (!%p16458_p1)
}
  0xfe   : > { %15866 = dma.hbm_to_vmem [thread:$0]  (!%p17003_p6), %s16911_s14, 16, %s1013_s10, [#allocation18]  }
  0xff   : > { %s16473_s28 = scalar_lea.vmem %s1037_s12, 16  ;;  %s16480_s29 = scalar_lea.vmem %s1037_s12, 32 }
 0x100   : > { %p16474_p3 = scmp.ne.s32.totalorder %s1037_s12, %s16473_s28  ;;  %p16481_p5 = scmp.lt.s32.totalorder %s1037_s12, %s1037_s12 }
 0x101   : > { %p16482_p8 = scmp.lt.s32.totalorder %s16480_s29, %s16473_s28 }
 0x102   : > { %p16476_p4 = pnand %p16474_p3, %p17013_p7 }
 0x103   : > { %p16483_p9 = por %p16482_p8, %p16481_p5 }
 0x104   : > { %p16477_p2 = pneg %p16476_p4 }
 0x106   : > { %p16484_p10 = pnand %p16483_p9, %p16477_p2 }
 0x108   : > { %16487 = shalt.err (!%p16484_p10)
}
 0x109   : > { %s19473_s11 = sld [smem:[#allocation66_spill]]  ;;  %s16779_s8 = smov [#allocation25]  }
 0x10a   : > { %s1060_s1 = sshll.u32 %s16779_s8, 4  ;;  %s16780_s10 = smov [#allocation28]   ;;  %s1061_s1 = int_to_ptr.vmem [resolvable:$true] %s1060_s1 }
 0x10b   : > { %s1084_s2 = sshll.u32 %s16780_s10, 4  ;;  %s16499_s30 = scalar_lea.vmem %s1061_s1, 16  ;;  %s1085_s2 = int_to_ptr.vmem [resolvable:$true] %s1084_s2 }
 0x10c   : > { %p16500_p11 = scmp.ne.s32.totalorder %s1061_s1, %s16499_s30  ;;  %s16506_s23 = scalar_lea.vmem %s1061_s1, 32 }
 0x10d   : > { %p16507_p0 = scmp.lt.s32.totalorder %s1061_s1, %s1061_s1  ;;  %p16508_p1 = scmp.lt.s32.totalorder %s16506_s23, %s16499_s30 }
 0x10e   : > { %p16502_p12 = pnand %p16500_p11, %p17013_p7 }
 0x10f   : > { %15872 = dma.hbm_to_vmem [thread:$0]  (!%p17003_p6), %s19473_s11, 16, %s1037_s12, [#allocation21]  }
 0x110   : > { %p16503_p13 = pneg %p16502_p12  ;;  %p16509_p3 = por %p16508_p1, %p16507_p0 }
 0x112   : > { %p16510_p4 = pnand %p16509_p3, %p16503_p13 }
 0x114   : > { %16513 = shalt.err (!%p16510_p4)
}
 0x115   : > { %s19474_s28 = sld [smem:[#allocation67_spill]]  ;;  %s16525_s12 = scalar_lea.vmem %s1085_s2, 16 }
 0x116   : > { %p16526_p2 = scmp.ne.s32.totalorder %s1085_s2, %s16525_s12  ;;  %s16532_s29 = scalar_lea.vmem %s1085_s2, 32 }
 0x117   : > { %p16533_p9 = scmp.lt.s32.totalorder %s1085_s2, %s1085_s2  ;;  %p16534_p10 = scmp.lt.s32.totalorder %s16532_s29, %s16525_s12 }
 0x118   : > { %p16528_p5 = pnand %p16526_p2, %p17013_p7 }
 0x119   : > { %p16535_p11 = por %p16534_p10, %p16533_p9 }
 0x11a   : > { %p16529_p8 = pneg %p16528_p5 }
 0x11b   : > { %15878 = dma.hbm_to_vmem [thread:$0]  (!%p17003_p6), %s19474_s28, 16, %s1061_s1, [#allocation24]  }
 0x11c   : > { %p16536_p12 = pnand %p16535_p11, %p16529_p8 }
 0x11e   : > { %16539 = shalt.err (!%p16536_p12)
}
 0x11f   : > { %s19475_s11 = sld [smem:[#allocation68_spill]]  ;;  %s16781_s8 = smov [#allocation31]  }
 0x120   : > { %s1108_s10 = sshll.u32 %s16781_s8, 4  ;;  %s16782_s1 = smov [#allocation32]   ;;  %s1109_s10 = int_to_ptr.vmem [resolvable:$true] %s1108_s10 }
 0x121   : > { %s1122_s30 = sshll.u32 %s16782_s1, 4  ;;  %s16551_s23 = scalar_lea.vmem %s1109_s10, 16  ;;  %s1123_s30 = int_to_ptr.vmem [resolvable:$true] %s1122_s30 }
 0x122   : > { %p16552_p13 = scmp.ne.s32.totalorder %s1109_s10, %s16551_s23  ;;  %s16558_s28 = scalar_lea.vmem %s1109_s10, 32 }
 0x123   : > { %p16559_p3 = scmp.lt.s32.totalorder %s1109_s10, %s1109_s10  ;;  %p16560_p4 = scmp.lt.s32.totalorder %s16558_s28, %s16551_s23 }
 0x124   : > { %p16554_p0 = pnand %p16552_p13, %p17013_p7 }
 0x125   : > { %15884 = dma.hbm_to_vmem [thread:$0]  (!%p17003_p6), %s19475_s11, 16, %s1085_s2, [#allocation27]  }
 0x126   : > { %p16555_p1 = pneg %p16554_p0  ;;  %p16561_p2 = por %p16560_p4, %p16559_p3 }
 0x128   : > { %p16562_p5 = pnand %p16561_p2, %p16555_p1 }
 0x12a   : > { %16565 = shalt.err (!%p16562_p5)
}
 0x12b   : > { %s19476_s9 = sld [smem:[#allocation70_spill]]  ;;  %s16577_s2 = scalar_lea.vmem %s1123_s30, 16 }
 0x12c   : > { %p16578_p8 = scmp.ne.s32.totalorder %s1123_s30, %s16577_s2  ;;  %s16584_s12 = scalar_lea.vmem %s1123_s30, 32 }
 0x12d   : > { %p16585_p11 = scmp.lt.s32.totalorder %s1123_s30, %s1123_s30  ;;  %p16586_p12 = scmp.lt.s32.totalorder %s16584_s12, %s16577_s2 }
 0x12e   : > { %p16580_p9 = pnand %p16578_p8, %p17013_p7 }
 0x12f   : > { %p16587_p13 = por %p16586_p12, %p16585_p11 }
 0x130   : > { %p16581_p10 = pneg %p16580_p9 }
 0x131   : > { %15890 = dma.hbm_to_vmem [thread:$0]  (!%p17003_p6), %s19476_s9, 16, %s1109_s10, [#allocation30]  }
 0x132   : > { %p16588_p0 = pnand %p16587_p13, %p16581_p10 }
 0x134   : > { %16591 = shalt.err (!%p16588_p0)
}
 0x135   : > { %15893 = dma.hbm_to_vmem [thread:$0]  (!%p17003_p6), %s16961_s17, 16, %s1123_s30, [#allocation33]  }
 0x136   : > { %s12210_s22 = sadd.s32 4294967294, %s16724_s18   ;;  %s17158_s29 = sadd.s32 1, %s16724_s18  }
 0x137   : > { %s128_s7 = sadd.s32 1, %s16720_s0  ;;  %s19477_s11 = sld [smem:[#allocation48_spill]] }
 0x138   : > { %s125_s8 = ssub.s32 %s16724_s18, %s17158_s29  ;;  %p135_p7 = scmp.ne.s32.totalorder %s16720_s0, %s16716_s16 }
 0x139   : > { %p126_p1 = scmp.eq.s32.totalorder %s125_s8, 0  ;;  %p136_p3 = scmp.eq.s32.totalorder %s16724_s18, 0 }
 0x13a   : > { %p141_p4 = scmp.ne.s32.totalorder %s16716_s16, %s16712_s15  ;;  %p837_p2 = scmp.eq.s32.totalorder %s16989_s26, 1 }
 0x13b   : > { %s17170_s10 = scalar_select %p126_p1, %s16720_s0, %s128_s7  }
 0x13c   : > { %p137_p5 = por %p136_p3, %p135_p7  ;;  %p19478_p8 = scmp.eq.s32.totalorder %s16989_s26, 0 }
 0x13d   : > { %p17178_p6 = por %p837_p2, %p135_p7  ;;  %p843_p10 = scmp.eq.s32.totalorder %s12210_s22, 1 }
 0x13e   : > { %p17174_p9 = por %p19478_p8, %p141_p4  ;;  %p15921_p11 = scmp.lt.s32.totalorder %s16724_s18, 2 }
 0x13f   : > { %s19480_s30 = scalar_select %p17178_p6, 1, 0 }
 0x140   : > { %s19479_s1 = scalar_select %p17174_p9, 1, 0 }
 0x141   : > { %s1141_s23 = sand.u32 1, %s16720_s0   ;;  %p17184_p12 = por %p843_p10, %p141_p4 }
 0x142   : > { %s12232_s2 = sshll.u32 %s16724_s18, 4  ;;  %s1144_s7 = scalar_lea.vmem [#allocation2], %s1141_s23 }
 0x143   : > { %s19481_s28 = scalar_select %p17184_p12, 1, 0 }
 0x144   : > { %s17190_s12 = scalar_lea.hbm %s19477_s11, %s12232_s2  ;;  %s1151_s8 = sshll.u32 %s1144_s7, 4  ;;  %s1152_s8 = int_to_ptr.vmem [resolvable:$true] %s1151_s8 }
 0x145   : > { %p17192_p13 = pnand %p15921_p11, %p137_p5  ;;  %s1142_s22 = scalar_lea.sflag [#allocation3], %s1141_s23 }
 0x146   : > { %s16592_s4 = scalar_lea.hbm %s17190_s12, 16  ;;  %s16597_s2 = scalar_lea.hbm %s19477_s11, 32 }
 0x147   : > { %s19482_s3 = scalar_select %p17192_p13, 1, 0 }
 0x148   : > { %p16593_p0 = scmp.ne.s32.totalorder %s17190_s12, %s16592_s4  ;;  %p16594_p7 = pneg %p17192_p13 }
 0x149   : > { %p16598_p4 = scmp.lt.s32.totalorder %s17190_s12, %s19477_s11  ;;  %p16599_p2 = scmp.lt.s32.totalorder %s16597_s2, %s16592_s4 }
 0x14a   : > { %p16595_p1 = pnand %p16594_p7, %p16593_p0 }
 0x14b   : > { %p16600_p8 = por %p16599_p2, %p16598_p4 }
 0x14c   : > { %p16596_p3 = pneg %p16595_p1 }
 0x14e   : > { %p16601_p10 = pnand %p16600_p8, %p16596_p3 }
 0x150   : > { %16604 = shalt.err (!%p16601_p10)
}
 0x151   : > { %s16605_s7 = scalar_lea.vmem %s1152_s8, 16  ;;  %s16783_s5 = smov [#allocation2]  }
 0x152   : > { %p16606_p12 = scmp.ne.s32.totalorder %s1152_s8, %s16605_s7  ;;  %s16610_s6 = sshll.u32 %s16783_s5, 4  ;;  %s16611_s6 = int_to_ptr.vmem [resolvable:$false] %s16610_s6 }
 0x153   : > { %s16612_s23 = scalar_lea.vmem %s16611_s6, 32  ;;  %p16613_p6 = scmp.lt.s32.totalorder %s1152_s8, %s16611_s6 }
 0x154   : > { %p16608_p5 = pnand %p16606_p12, %p16594_p7  ;;  %p16614_p9 = scmp.lt.s32.totalorder %s16612_s23, %s16605_s7 }
 0x156   : > { %p16609_p11 = pneg %p16608_p5  ;;  %p16615_p13 = por %p16614_p9, %p16613_p6 }
 0x158   : > { %p16616_p0 = pnand %p16615_p13, %p16609_p11 }
 0x15a   : > { %16619 = shalt.err (!%p16616_p0)
}
 0x15b   : > { %p19483_p1 = scmp.ne.s32.totalorder %s19482_s3, 0  ;;  %s19484_s4 = sld [smem:[#allocation73_spill]] }
 0x15d   : > { %15897 = dma.hbm_to_vmem [thread:$0]  (!%p19483_p1), %s17190_s12, 16, %s1152_s8, %s1142_s22  }
 0x161   : > { %p19485_p3 = scmp.ne.s32.totalorder %s19484_s4, 0 }
 0x163   : > { %1160 = sbr.rel (%p19485_p3) target bundleno = 7032 (0x1b78), region = 156 }
 0x168   : > { %s17209_s2 = sand.u32 1, %s16716_s16   ;;  %p19486_p12 = scmp.ne.s32.totalorder %s19479_s1, 0 }
 0x169   : > { %s1163_s5 = scalar_lea.sflag [#allocation3], %s17209_s2 }
 0x16a   : > { %16663 = dma.done.wait (%p19486_p12), %s1163_s5, 16  }
 0x16b   : > { %16665 = vsyncadd (%p19486_p12), %s1163_s5, 4294967280  ;;  %p19487_p9 = scmp.eq.s32.totalorder %s16989_s26, 0 }
 0x16d   : > { %16667 = dma.done.wait (%p19487_p9), [#allocation6], 96   ;;  %p19488_p6 = pmov %p19487_p9 }
 0x16f   : > { %16669 = vsyncadd (%p19488_p6), [#allocation6], 4294967200  ;;  %p19489_p13 = pmov %p19488_p6 }
 0x170   : > { %p19490_p7 = pmov %p19488_p6 }
 0x171   : > { %16671 = dma.done.wait (%p19489_p13), [#allocation9], 96  }
 0x172   : > { %16673 = vsyncadd (%p19490_p7), [#allocation9], 4294967200  ;;  %p19491_p4 = pmov %p19488_p6 }
 0x174   : > { %16675 = dma.done.wait (%p19491_p4), [#allocation12], 512   ;;  %p19492_p2 = pmov %p19491_p4 }
 0x176   : > { %16677 = vsyncadd (%p19492_p2), [#allocation12], 4294966784  ;;  %p19493_p8 = pmov %p19492_p2 }
 0x177   : > { %p19494_p10 = pmov %p19492_p2 }
 0x178   : > { %16679 = dma.done.wait (%p19493_p8), [#allocation15], 256  }
 0x179   : > { %16681 = vsyncadd (%p19494_p10), [#allocation15], 4294967040  ;;  %p19495_p5 = pmov %p19492_p2 }
 0x17a   : > { %p19496_p11 = pmov %p19492_p2 }
 0x17b   : > { %16683 = dma.done.wait (%p19495_p5), [#allocation18], 528  }
 0x17c   : > { %16685 = vsyncadd (%p19496_p11), [#allocation18], 4294966768  ;;  %p19497_p0 = pmov %p19492_p2 }
 0x17e   : > { %16687 = dma.done.wait (%p19497_p0), [#allocation21], 528   ;;  %p19498_p1 = pmov %p19497_p0 }
 0x17f   : > { %p19499_p3 = pmov %p19497_p0 }
 0x180   : > { %16689 = vsyncadd (%p19498_p1), [#allocation21], 4294966768 }
 0x181   : > { %16691 = dma.done.wait (%p19499_p3), [#allocation24], 528   ;;  %p19500_p12 = pmov %p19497_p0 }
 0x182   : > { %p19501_p9 = pmov %p19497_p0 }
 0x183   : > { %16693 = vsyncadd (%p19500_p12), [#allocation24], 4294966768 }
 0x184   : > { %16695 = dma.done.wait (%p19501_p9), [#allocation27], 528   ;;  %p19502_p6 = pmov %p19497_p0 }
 0x185   : > { %p19503_p13 = pmov %p19497_p0 }
 0x186   : > { %16697 = vsyncadd (%p19502_p6), [#allocation27], 4294966768 }
 0x187   : > { %16699 = dma.done.wait (%p19503_p13), [#allocation30], 528   ;;  %p19504_p7 = pmov %p19497_p0 }
 0x188   : > { %p19505_p4 = pmov %p19497_p0 }
 0x189   : > { %16701 = vsyncadd (%p19504_p7), [#allocation30], 4294966768 }
 0x18a   : > { %16703 = dma.done.wait (%p19505_p4), [#allocation33], 16   ;;  %p19506_p2 = pmov %p19497_p0 }
 0x18b   : > { %s19507_s3 = sld [smem:[#allocation47_spill]]  ;;  %p1329_p8 = scmp.lt.s32.totalorder %s16989_s26, 1  ;;  %vm1480_vm0 = vcmask 1042432   ;;  %vm1383_vm1 = vcmask 23552   ;;  %vm4744_vm2 = vcmask 64512   ;;  %vm4984_vm3 = vcmask 523264  }
 0x18c   : > { %16705 = vsyncadd (%p19506_p2), [#allocation33], 4294967280  ;;  %s19508_s6 = sld [smem:[#allocation50_spill]]  ;;  %vm6693_vm4 = vcmask 130048   ;;  %vm16785_vm5 = vmmov 0   ;;  %vm10549_vm6 = vcmask 261120  }
 0x18d   : > { %s1330_s1 = scalar_select %p1329_p8, %s16989_s26, 1  ;;  %vm11905_vm7 = vcmask 73728  }
 0x18e   : > { %s19536_s22 = sld [smem:[#allocation49_spill]]  ;;  %p19651_p5 = scmp.ne.s32.totalorder %s19480_s30, 0 }
 0x18f   : > { %s13108_s12 = sshll.u32 %s1330_s1, 8  ;;  %s19638_s7 = sld [smem:[#allocation52_spill]] }
 0x190   : > { %s19639_s23 = sld [smem:[#allocation51_spill]] }
 0x191   : > { %s17260_s8 = scalar_lea.vmem %s19507_s3, %s13108_s12  ;;  %s19640_s4 = sld [smem:[#allocation55_spill]] }
 0x192   : > { %v1382_v0 = vld [vmem:[%s19508_s6] sm:$0x7]  ;;  %v12304_v1 = vld [vmem:[%s19508_s6 + $0x4] sm:$0x7]  ;;  %v17270_v3 = vld [vmem:[%s17260_s8 + $0x8] sm:$0xff]  ;;  %s19641_s5 = sld [smem:[#allocation54_spill]] }
 0x193   : > { %v17265_v2 = vld [vmem:[%s17260_s8] sm:$0xff]  ;;  %14441 = vmatprep.subr.msk.mxu0 %vm1480_vm0, %v1382_v0  ;;  %14491 = vmatprep.subr.msk.mxu1 %vm1480_vm0, %v12304_v1  ;;  %19510 = vst [vmem:[#allocation75_spill] sm:$0xff] %v17270_v3  ;;  %v17276_v4 = vld [vmem:[%s17260_s8 + $0x10] sm:$0xff]  ;;  %v17290_v5 = vld [vmem:[%s17260_s8 + $0x18] sm:$0xff]  ;;  %s19642_s3 = sld [smem:[#allocation57_spill]] }
 0x194   : > { %19509 = vst [vmem:[#allocation74_spill] sm:$0xff] %v17265_v2  ;;  %14442 = vmatpush3.msk.msra.mxu0 %vm1480_vm0, %v1382_v0  ;;  %14443 = vmatprep.mubr.msk.f32.mxu0 %vm1383_vm1, %v17265_v2  ;;  %19511 = vst [vmem:[#allocation76_spill] sm:$0xff] %v17276_v4  ;;  %v17293_v6 = vld [vmem:[%s17260_s8 + $0x20] sm:$0xff]  ;;  %v17304_v7 = vld [vmem:[%s17260_s8 + $0x28] sm:$0xff]  ;;  %s19643_s1 = sld [smem:[#allocation56_spill]] }
 0x195   : > { %14492 = vmatpush3.msk.msra.mxu1 %vm1480_vm0, %v12304_v1  ;;  %14493 = vmatprep.mubr.msk.f32.mxu1 %vm1383_vm1, %v17265_v2  ;;  %19512 = vst [vmem:[#allocation77_spill] sm:$0xff] %v17290_v5  ;;  %19513 = vst [vmem:[#allocation78_spill] sm:$0xff] %v17293_v6  ;;  %v17307_v8 = vld [vmem:[%s17260_s8 + $0x30] sm:$0xff]  ;;  %v17318_v9 = vld [vmem:[%s17260_s8 + $0x38] sm:$0xff]  ;;  %s19644_s12 = sld [smem:[#allocation63_spill]] }
 0x196   : > { %14444 = vmatmul.mubr.msk.f32.vlgmr.msra.gmra.mxu0 %vm1383_vm1, %v17270_v3  ;;  %14494 = vmatmul.mubr.msk.f32.vlgmr.msra.gmra.mxu1 %vm1383_vm1, %v17270_v3  ;;  %19514 = vst [vmem:[#allocation79_spill] sm:$0xff] %v17304_v7  ;;  %19515 = vst [vmem:[#allocation80_spill] sm:$0xff] %v17307_v8  ;;  %v17321_v10 = vld [vmem:[%s17260_s8 + $0x40] sm:$0xff]  ;;  %v17332_v11 = vld [vmem:[%s17260_s8 + $0x48] sm:$0xff]  ;;  %s19646_s9 = sld [smem:[#allocation59_spill]] }
 0x197   : > { %14446 = vmatprep.mubr.msk.f32.mxu0 %vm1383_vm1, %v17276_v4  ;;  %14496 = vmatprep.mubr.msk.f32.mxu1 %vm1383_vm1, %v17276_v4  ;;  %19516 = vst [vmem:[#allocation81_spill] sm:$0xff] %v17318_v9  ;;  %19517 = vst [vmem:[#allocation82_spill] sm:$0xff] %v17321_v10  ;;  %v17335_v12 = vld [vmem:[%s17260_s8 + $0x50] sm:$0xff]  ;;  %v17346_v13 = vld [vmem:[%s17260_s8 + $0x58] sm:$0xff] }
 0x198   : > { %19518 = vst [vmem:[#allocation83_spill] sm:$0xff] %v17332_v11  ;;  %19519 = vst [vmem:[#allocation84_spill] sm:$0xff] %v17335_v12  ;;  %v17349_v14 = vld [vmem:[%s17260_s8 + $0x60] sm:$0xff]  ;;  %v17360_v15 = vld [vmem:[%s17260_s8 + $0x68] sm:$0xff] }
 0x199   : > { %19520 = vst [vmem:[#allocation85_spill] sm:$0xff] %v17346_v13  ;;  %19521 = vst [vmem:[#allocation86_spill] sm:$0xff] %v17349_v14  ;;  %v17363_v16 = vld [vmem:[%s17260_s8 + $0x70] sm:$0xff]  ;;  %v17374_v17 = vld [vmem:[%s17260_s8 + $0x78] sm:$0xff] }
 0x19a   : > { %14447 = vmatmul.mubr.msk.f32.gmra.mxu0 %vm1383_vm1, %v17290_v5  ;;  %14497 = vmatmul.mubr.msk.f32.gmra.mxu1 %vm1383_vm1, %v17290_v5  ;;  %19522 = vst [vmem:[#allocation87_spill] sm:$0xff] %v17360_v15  ;;  %19523 = vst [vmem:[#allocation88_spill] sm:$0xff] %v17363_v16  ;;  %v17377_v18 = vld [vmem:[%s17260_s8 + $0x80] sm:$0xff]  ;;  %v17388_v19 = vld [vmem:[%s17260_s8 + $0x88] sm:$0xff] }
 0x19b   : > { %14449 = vmatprep.mubr.msk.f32.mxu0 %vm1383_vm1, %v17293_v6  ;;  %14499 = vmatprep.mubr.msk.f32.mxu1 %vm1383_vm1, %v17293_v6  ;;  %19524 = vst [vmem:[#allocation89_spill] sm:$0xff] %v17374_v17  ;;  %19525 = vst [vmem:[#allocation90_spill] sm:$0xff] %v17377_v18  ;;  %v17391_v20 = vld [vmem:[%s17260_s8 + $0x90] sm:$0xff]  ;;  %v17402_v21 = vld [vmem:[%s17260_s8 + $0x98] sm:$0xff] }
 0x19c   : > { %19526 = vst [vmem:[#allocation91_spill] sm:$0xff] %v17388_v19  ;;  %19527 = vst [vmem:[#allocation92_spill] sm:$0xff] %v17391_v20  ;;  %v17405_v22 = vld [vmem:[%s17260_s8 + $0xa0] sm:$0xff]  ;;  %v17416_v23 = vld [vmem:[%s17260_s8 + $0xa8] sm:$0xff] }
 0x19d   : > { %19528 = vst [vmem:[#allocation93_spill] sm:$0xff] %v17402_v21  ;;  %19529 = vst [vmem:[#allocation94_spill] sm:$0xff] %v17405_v22  ;;  %v17419_v24 = vld [vmem:[%s17260_s8 + $0xb0] sm:$0xff]  ;;  %v17430_v25 = vld [vmem:[%s17260_s8 + $0xb8] sm:$0xff] }
 0x19e   : > { %14450 = vmatmul.mubr.msk.f32.gmra.mxu0 %vm1383_vm1, %v17304_v7  ;;  %14500 = vmatmul.mubr.msk.f32.gmra.mxu1 %vm1383_vm1, %v17304_v7  ;;  %19530 = vst [vmem:[#allocation95_spill] sm:$0xff] %v17416_v23  ;;  %19531 = vst [vmem:[#allocation96_spill] sm:$0xff] %v17419_v24  ;;  %v17433_v26 = vld [vmem:[%s17260_s8 + $0xc0] sm:$0xff]  ;;  %v17444_v27 = vld [vmem:[%s17260_s8 + $0xc8] sm:$0xff] }
 0x19f   : > { %14452 = vmatprep.mubr.msk.f32.mxu0 %vm1383_vm1, %v17307_v8  ;;  %14502 = vmatprep.mubr.msk.f32.mxu1 %vm1383_vm1, %v17307_v8  ;;  %19532 = vst [vmem:[#allocation97_spill] sm:$0xff] %v17430_v25  ;;  %19533 = vst [vmem:[#allocation98_spill] sm:$0xff] %v17433_v26  ;;  %v17447_v28 = vld [vmem:[%s17260_s8 + $0xd0] sm:$0xff]  ;;  %v17458_v29 = vld [vmem:[%s17260_s8 + $0xd8] sm:$0xff] }
 0x1a0   : > { %19534 = vst [vmem:[#allocation99_spill] sm:$0xff] %v17444_v27  ;;  %19535 = vst [vmem:[#allocation100_spill] sm:$0xff] %v17447_v28  ;;  %v17461_v30 = vld [vmem:[%s17260_s8 + $0xe0] sm:$0xff]  ;;  %v17472_v31 = vld [vmem:[%s17260_s8 + $0xe8] sm:$0xff] }
 0x1a1   : > { %19537 = vst [vmem:[#allocation101_spill] sm:$0xff] %v17458_v29  ;;  %19538 = vst [vmem:[#allocation102_spill] sm:$0xff] %v17461_v30  ;;  %v17475_v32 = vld [vmem:[%s17260_s8 + $0xf0] sm:$0xff]  ;;  %v17486_v33 = vld [vmem:[%s17260_s8 + $0xf8] sm:$0xff] }
 0x1a2   : > { %14453 = vmatmul.mubr.msk.f32.gmra.mxu0 %vm1383_vm1, %v17318_v9  ;;  %14503 = vmatmul.mubr.msk.f32.gmra.mxu1 %vm1383_vm1, %v17318_v9  ;;  %19539 = vst [vmem:[#allocation103_spill] sm:$0xff] %v17472_v31  ;;  %19540 = vst [vmem:[#allocation104_spill] sm:$0xff] %v17475_v32  ;;  %v12289_v34 = vld [vmem:[%s19536_s22 + $0x88] sm:$0xff] }
 0x1a3   : > { %14455 = vmatprep.mubr.msk.f32.mxu0 %vm1383_vm1, %v17321_v10  ;;  %14505 = vmatprep.mubr.msk.f32.mxu1 %vm1383_vm1, %v17321_v10  ;;  %19541 = vst [vmem:[#allocation105_spill] sm:$0xff] %v17486_v33  ;;  %v1367_v35 = vld [vmem:[%s19536_s22 + $0x8] sm:$0xff] }
 0x1a6   : > { %14456 = vmatmul.mubr.msk.f32.gmra.mxu0 %vm1383_vm1, %v17332_v11  ;;  %14506 = vmatmul.mubr.msk.f32.gmra.mxu1 %vm1383_vm1, %v17332_v11 }
 0x1a7   : > { %14458 = vmatprep.mubr.msk.f32.mxu0 %vm1383_vm1, %v17335_v12  ;;  %14508 = vmatprep.mubr.msk.f32.mxu1 %vm1383_vm1, %v17335_v12 }
 0x1aa   : > { %14459 = vmatmul.mubr.msk.f32.gmra.mxu0 %vm1383_vm1, %v17346_v13  ;;  %14509 = vmatmul.mubr.msk.f32.gmra.mxu1 %vm1383_vm1, %v17346_v13 }
 0x1ab   : > { %14461 = vmatprep.mubr.msk.f32.mxu0 %vm1383_vm1, %v17349_v14  ;;  %14511 = vmatprep.mubr.msk.f32.mxu1 %vm1383_vm1, %v17349_v14 }
 0x1ae   : > { %14462 = vmatmul.mubr.msk.f32.gmra.mxu0 %vm1383_vm1, %v17360_v15  ;;  %14512 = vmatmul.mubr.msk.f32.gmra.mxu1 %vm1383_vm1, %v17360_v15 }
 0x1af   : > { %14464 = vmatprep.mubr.msk.f32.mxu0 %vm1383_vm1, %v17363_v16  ;;  %14514 = vmatprep.mubr.msk.f32.mxu1 %vm1383_vm1, %v17363_v16 }
 0x1b2   : > { %14465 = vmatmul.mubr.msk.f32.gmra.mxu0 %vm1383_vm1, %v17374_v17  ;;  %14515 = vmatmul.mubr.msk.f32.gmra.mxu1 %vm1383_vm1, %v17374_v17 }
 0x1b3   : > { %14467 = vmatprep.mubr.msk.f32.mxu0 %vm1383_vm1, %v17377_v18  ;;  %14517 = vmatprep.mubr.msk.f32.mxu1 %vm1383_vm1, %v17377_v18 }
 0x1b6   : > { %14468 = vmatmul.mubr.msk.f32.gmra.mxu0 %vm1383_vm1, %v17388_v19  ;;  %14518 = vmatmul.mubr.msk.f32.gmra.mxu1 %vm1383_vm1, %v17388_v19 }
 0x1b7   : > { %14470 = vmatprep.mubr.msk.f32.mxu0 %vm1383_vm1, %v17391_v20  ;;  %14520 = vmatprep.mubr.msk.f32.mxu1 %vm1383_vm1, %v17391_v20 }
 0x1ba   : > { %14471 = vmatmul.mubr.msk.f32.gmra.mxu0 %vm1383_vm1, %v17402_v21  ;;  %14521 = vmatmul.mubr.msk.f32.gmra.mxu1 %vm1383_vm1, %v17402_v21 }
 0x1bb   : > { %14473 = vmatprep.mubr.msk.f32.mxu0 %vm1383_vm1, %v17405_v22  ;;  %14523 = vmatprep.mubr.msk.f32.mxu1 %vm1383_vm1, %v17405_v22 }
 0x1be   : > { %14474 = vmatmul.mubr.msk.f32.gmra.mxu0 %vm1383_vm1, %v17416_v23  ;;  %14524 = vmatmul.mubr.msk.f32.gmra.mxu1 %vm1383_vm1, %v17416_v23 }
 0x1bf   : > { %14476 = vmatprep.mubr.msk.f32.mxu0 %vm1383_vm1, %v17419_v24  ;;  %14526 = vmatprep.mubr.msk.f32.mxu1 %vm1383_vm1, %v17419_v24 }
 0x1c2   : > { %14477 = vmatmul.mubr.msk.f32.gmra.mxu0 %vm1383_vm1, %v17430_v25  ;;  %14527 = vmatmul.mubr.msk.f32.gmra.mxu1 %vm1383_vm1, %v17430_v25 }
 0x1c3   : > { %14479 = vmatprep.mubr.msk.f32.mxu0 %vm1383_vm1, %v17433_v26  ;;  %14529 = vmatprep.mubr.msk.f32.mxu1 %vm1383_vm1, %v17433_v26 }
 0x1c6   : > { %14480 = vmatmul.mubr.msk.f32.gmra.mxu0 %vm1383_vm1, %v17444_v27  ;;  %14530 = vmatmul.mubr.msk.f32.gmra.mxu1 %vm1383_vm1, %v17444_v27 }
 0x1c7   : > { %14482 = vmatprep.mubr.msk.f32.mxu0 %vm1383_vm1, %v17447_v28  ;;  %14532 = vmatprep.mubr.msk.f32.mxu1 %vm1383_vm1, %v17447_v28 }
 0x1ca   : > { %14483 = vmatmul.mubr.msk.f32.gmra.mxu0 %vm1383_vm1, %v17458_v29  ;;  %14533 = vmatmul.mubr.msk.f32.gmra.mxu1 %vm1383_vm1, %v17458_v29 }
 0x1cb   : > { %14485 = vmatprep.mubr.msk.f32.mxu0 %vm1383_vm1, %v17461_v30  ;;  %14535 = vmatprep.mubr.msk.f32.mxu1 %vm1383_vm1, %v17461_v30 }
 0x1ce   : > { %14486 = vmatmul.mubr.msk.f32.gmra.mxu0 %vm1383_vm1, %v17472_v31  ;;  %14536 = vmatmul.mubr.msk.f32.gmra.mxu1 %vm1383_vm1, %v17472_v31 }
 0x1cf   : > { %14488 = vmatprep.mubr.msk.f32.mxu0 %vm1383_vm1, %v17475_v32  ;;  %14538 = vmatprep.mubr.msk.f32.mxu1 %vm1383_vm1, %v17475_v32 }
 0x1d2   : > { %14489 = vmatmul.mubr.msk.f32.gmra.mxu0 %vm1383_vm1, %v17486_v33  ;;  %14539 = vmatmul.mubr.msk.f32.gmra.mxu1 %vm1383_vm1, %v17486_v33 }
 0x1d3   : > { %2020 = vmatprep.mubr.f32.mxu0 %v12289_v34  ;;  %2125 = vmatprep.mubr.f32.mxu1 %v1367_v35 }
 0x256   : > { %v17494_v36 = vpop.f32.mrf.mxu0  ;;  %v17496_v37 = vpop.f32.mrf.mxu1 }
 0x258   : > { %v17498_v38 = vpop.f32.mrf.mxu0  ;;  %v17500_v39 = vpop.f32.mrf.mxu1 }
 0x25a   : > { %v17502_v40 = vpop.f32.mrf.mxu0  ;;  %v17504_v41 = vpop.f32.mrf.mxu1 }
 0x25c   : > { %v17506_v42 = vpop.f32.mrf.mxu0  ;;  %v17508_v43 = vpop.f32.mrf.mxu1 }
 0x25e   : > { %v17510_v44 = vpop.f32.mrf.mxu0  ;;  %v17512_v45 = vpop.f32.mrf.mxu1 }
 0x260   : > { %v17514_v46 = vpop.f32.mrf.mxu0  ;;  %v17516_v47 = vpop.f32.mrf.mxu1 }
 0x262   : > { %v17518_v48 = vpop.f32.mrf.mxu0  ;;  %v17520_v49 = vpop.f32.mrf.mxu1 }
 0x264   : > { %v17522_v50 = vpop.f32.mrf.mxu0  ;;  %v17524_v51 = vpop.f32.mrf.mxu1 }
 0x266   : > { %v17526_v52 = vpop.f32.mrf.mxu0  ;;  %v17528_v53 = vpop.f32.mrf.mxu1 }
 0x268   : > { %v17530_v54 = vpop.f32.mrf.mxu0  ;;  %v17532_v55 = vpop.f32.mrf.mxu1 }
 0x26a   : > { %v14460_v56 = vpop.f32.mrf.mxu0  ;;  %v14510_v57 = vpop.f32.mrf.mxu1 }
 0x26c   : > { %v17534_v58 = vpop.f32.mrf.mxu0  ;;  %v1847_v59 = vpop.f32.mrf.mxu1 }
 0x26e   : > { %v14463_v60 = vpop.f32.mrf.mxu0  ;;  %v14513_v61 = vpop.f32.mrf.mxu1 }
 0x270   : > { %v1610_v62 = vpop.f32.mrf.mxu0  ;;  %v1857_v63 = vpop.f32.mrf.mxu1 }
 0x272   : > { %v14466_v0 = vpop.f32.mrf.mxu0  ;;  %v14516_v1 = vpop.f32.mrf.mxu1 }
 0x274   : > { %v1620_v34 = vpop.f32.mrf.mxu0  ;;  %v1867_v35 = vpop.f32.mrf.mxu1 }
 0x276   : > { %v17536_v33 = vpop.f32.mrf.mxu0  ;;  %v17538_v32 = vpop.f32.mrf.mxu1 }
 0x278   : > { %v17540_v31 = vpop.f32.mrf.mxu0  ;;  %v17542_v30 = vpop.f32.mrf.mxu1 }
 0x27a   : > { %v17544_v29 = vpop.f32.mrf.mxu0  ;;  %v17546_v28 = vpop.f32.mrf.mxu1 }
 0x27c   : > { %v17548_v27 = vpop.f32.mrf.mxu0  ;;  %v17550_v26 = vpop.f32.mrf.mxu1 }
 0x27e   : > { %v17552_v25 = vpop.f32.mrf.mxu0  ;;  %v14525_v24 = vpop.f32.mrf.mxu1 }
 0x280   : > { %v17554_v23 = vpop.f32.mrf.mxu0  ;;  %v17556_v22 = vpop.f32.mrf.mxu1 }
 0x282   : > { %v14478_v21 = vpop.f32.mrf.mxu0  ;;  %v14528_v20 = vpop.f32.mrf.mxu1 }
 0x284   : > { %v1660_v19 = vpop.f32.mrf.mxu0  ;;  %v1907_v18 = vpop.f32.mrf.mxu1 }
 0x286   : > { %v14481_v17 = vpop.f32.mrf.mxu0  ;;  %v14531_v16 = vpop.f32.mrf.mxu1 }
 0x288   : > { %v1670_v15 = vpop.f32.mrf.mxu0  ;;  %v1917_v14 = vpop.f32.mrf.mxu1 }
 0x28a   : > { %v14484_v13 = vpop.f32.mrf.mxu0  ;;  %v14534_v12 = vpop.f32.mrf.mxu1 }
 0x28c   : > { %v1680_v11 = vpop.f32.mrf.mxu0  ;;  %v1927_v10 = vpop.f32.mrf.mxu1 }
 0x28e   : > { %v14487_v9 = vpop.f32.mrf.mxu0  ;;  %v14537_v8 = vpop.f32.mrf.mxu1 }
 0x290   : > { %v1690_v7 = vpop.f32.mrf.mxu0  ;;  %v1937_v6 = vpop.f32.mrf.mxu1 }
 0x292   : > { %v14490_v5 = vpop.f32.mrf.mxu0  ;;  %v14540_v4 = vpop.f32.mrf.mxu1 }
 0x293   : > { %13175 = vmatprep.subr.mxu0 %v14540_v4  ;;  %13231 = vmatprep.subr.mxu1 %v14490_v5  ;;  %v12291_v4 = vld [vmem:[%s19536_s22 + $0x98] sm:$0xff] }
 0x294   : > { %v1700_v3 = vpop.f32.mrf.mxu0  ;;  %v1947_v2 = vpop.f32.mrf.mxu1  ;;  %13176 = vmatpush3.msra.mxu0 %v14516_v1  ;;  %13232 = vmatpush3.msra.mxu1 %v14466_v0  ;;  %v1369_v5 = vld [vmem:[%s19536_s22 + $0x18] sm:$0xff]  ;;  %v19572_v1 = vld [vmem:[#allocation104_spill] sm:$0xff] }
 0x295   : > { %13177 = vmatprep.subr.mxu0 %v1947_v2  ;;  %13233 = vmatprep.subr.mxu1 %v1700_v3  ;;  %v12288_v2 = vld [vmem:[%s19536_s22 + $0x80] sm:$0xff]  ;;  %v19571_v0 = vld [vmem:[#allocation103_spill] sm:$0xff] }
 0x296   : > { %13178 = vmatpush3.msra.mxu0 %v1867_v35  ;;  %13234 = vmatpush3.msra.mxu1 %v1620_v34  ;;  %v1366_v3 = vld [vmem:[%s19536_s22] sm:$0xff]  ;;  %v19573_v34 = vld [vmem:[#allocation105_spill] sm:$0xff] }
 0x297   : > { %13179 = vmatprep.subr.mxu0 %v14537_v8  ;;  %13235 = vmatprep.subr.mxu1 %v14487_v9  ;;  %v1368_v8 = vld [vmem:[%s19536_s22 + $0x10] sm:$0xff]  ;;  %v12293_v9 = vld [vmem:[%s19536_s22 + $0xa8] sm:$0xff] }
 0x298   : > { %13180 = vmatpush3.msra.mxu0 %v14513_v61  ;;  %13236 = vmatpush3.msra.mxu1 %v14463_v60  ;;  %v19567_v60 = vld [vmem:[#allocation99_spill] sm:$0xff]  ;;  %v19568_v61 = vld [vmem:[#allocation100_spill] sm:$0xff]  ;;  %v12339_v35 = vld [vmem:[%s19536_s22 + $0x108] sm:$0xff] }
 0x299   : > { %13181 = vmatprep.subr.mxu0 %v1937_v6  ;;  %13237 = vmatprep.subr.mxu1 %v1690_v7  ;;  %v12354_v6 = vld [vmem:[%s19508_s6 + $0x8] sm:$0x7]  ;;  %v12290_v7 = vld [vmem:[%s19536_s22 + $0x90] sm:$0xff] }
 0x29a   : > { %13182 = vmatpush3.msra.mxu0 %v1857_v63  ;;  %13238 = vmatpush3.msra.mxu1 %v1610_v62  ;;  %v19569_v62 = vld [vmem:[#allocation101_spill] sm:$0xff]  ;;  %v19570_v63 = vld [vmem:[#allocation102_spill] sm:$0xff] }
 0x29b   : > { %13183 = vmatprep.subr.mxu0 %v14534_v12  ;;  %13239 = vmatprep.subr.mxu1 %v14484_v13  ;;  %v1370_v12 = vld [vmem:[%s19536_s22 + $0x20] sm:$0xff]  ;;  %v12295_v13 = vld [vmem:[%s19536_s22 + $0xb8] sm:$0xff] }
 0x29c   : > { %13184 = vmatpush3.msra.mxu0 %v14510_v57  ;;  %13240 = vmatpush3.msra.mxu1 %v14460_v56  ;;  %v19563_v56 = vld [vmem:[#allocation95_spill] sm:$0xff]  ;;  %v19564_v57 = vld [vmem:[#allocation96_spill] sm:$0xff] }
 0x29d   : > { %13185 = vmatprep.subr.mxu0 %v1927_v10  ;;  %13241 = vmatprep.subr.mxu1 %v1680_v11  ;;  %v1371_v10 = vld [vmem:[%s19536_s22 + $0x28] sm:$0xff]  ;;  %v12292_v11 = vld [vmem:[%s19536_s22 + $0xa0] sm:$0xff] }
 0x29e   : > { %13186 = vmatpush3.msra.mxu0 %v1847_v59  ;;  %13242 = vmatpush3.msra.mxu1 %v17534_v58  ;;  %v19565_v58 = vld [vmem:[#allocation97_spill] sm:$0xff]  ;;  %v19566_v59 = vld [vmem:[#allocation98_spill] sm:$0xff] }
 0x29f   : > { %13187 = vmatprep.subr.mxu0 %v14531_v16  ;;  %13243 = vmatprep.subr.mxu1 %v14481_v17  ;;  %v1372_v16 = vld [vmem:[%s19536_s22 + $0x30] sm:$0xff]  ;;  %v12297_v17 = vld [vmem:[%s19536_s22 + $0xc8] sm:$0xff] }
 0x2a0   : > { %13188 = vmatpush3.msra.mxu0 %v17528_v53  ;;  %13244 = vmatpush3.msra.mxu1 %v17526_v52  ;;  %v19559_v52 = vld [vmem:[#allocation91_spill] sm:$0xff]  ;;  %v19560_v53 = vld [vmem:[#allocation92_spill] sm:$0xff] }
 0x2a1   : > { %13189 = vmatprep.subr.mxu0 %v1917_v14  ;;  %13245 = vmatprep.subr.mxu1 %v1670_v15  ;;  %v1373_v14 = vld [vmem:[%s19536_s22 + $0x38] sm:$0xff]  ;;  %v12294_v15 = vld [vmem:[%s19536_s22 + $0xb0] sm:$0xff] }
 0x2a2   : > { %13190 = vmatpush3.msra.mxu0 %v17532_v55  ;;  %13246 = vmatpush3.msra.mxu1 %v17530_v54  ;;  %v19561_v54 = vld [vmem:[#allocation93_spill] sm:$0xff]  ;;  %v19562_v55 = vld [vmem:[#allocation94_spill] sm:$0xff] }
 0x2a3   : > { %13191 = vmatprep.subr.mxu0 %v14528_v20  ;;  %13247 = vmatprep.subr.mxu1 %v14478_v21  ;;  %v1374_v20 = vld [vmem:[%s19536_s22 + $0x40] sm:$0xff]  ;;  %v12299_v21 = vld [vmem:[%s19536_s22 + $0xd8] sm:$0xff] }
 0x2a4   : > { %13192 = vmatpush3.msra.mxu0 %v17520_v49  ;;  %13248 = vmatpush3.msra.mxu1 %v17518_v48  ;;  %v19555_v48 = vld [vmem:[#allocation87_spill] sm:$0xff]  ;;  %v19556_v49 = vld [vmem:[#allocation88_spill] sm:$0xff] }
 0x2a5   : > { %13193 = vmatprep.subr.mxu0 %v1907_v18  ;;  %13249 = vmatprep.subr.mxu1 %v1660_v19  ;;  %v1375_v18 = vld [vmem:[%s19536_s22 + $0x48] sm:$0xff]  ;;  %v12296_v19 = vld [vmem:[%s19536_s22 + $0xc0] sm:$0xff] }
 0x2a6   : > { %13194 = vmatpush3.msra.mxu0 %v17524_v51  ;;  %13250 = vmatpush3.msra.mxu1 %v17522_v50  ;;  %v19557_v50 = vld [vmem:[#allocation89_spill] sm:$0xff]  ;;  %v19558_v51 = vld [vmem:[#allocation90_spill] sm:$0xff] }
 0x2a7   : > { %13195 = vmatprep.subr.mxu0 %v14525_v24  ;;  %13251 = vmatprep.subr.mxu1 %v17552_v25  ;;  %v1376_v24 = vld [vmem:[%s19536_s22 + $0x50] sm:$0xff]  ;;  %v12301_v25 = vld [vmem:[%s19536_s22 + $0xe8] sm:$0xff] }
 0x2a8   : > { %13196 = vmatpush3.msra.mxu0 %v17512_v45  ;;  %13252 = vmatpush3.msra.mxu1 %v17510_v44  ;;  %v19551_v44 = vld [vmem:[#allocation83_spill] sm:$0xff]  ;;  %v19552_v45 = vld [vmem:[#allocation84_spill] sm:$0xff] }
 0x2a9   : > { %13197 = vmatprep.subr.mxu0 %v17556_v22  ;;  %13253 = vmatprep.subr.mxu1 %v17554_v23  ;;  %v1377_v22 = vld [vmem:[%s19536_s22 + $0x58] sm:$0xff]  ;;  %v12298_v23 = vld [vmem:[%s19536_s22 + $0xd0] sm:$0xff] }
 0x2aa   : > { %13198 = vmatpush3.msra.mxu0 %v17516_v47  ;;  %13254 = vmatpush3.msra.mxu1 %v17514_v46  ;;  %v19553_v46 = vld [vmem:[#allocation85_spill] sm:$0xff]  ;;  %v19554_v47 = vld [vmem:[#allocation86_spill] sm:$0xff] }
 0x2ab   : > { %13199 = vmatprep.subr.mxu0 %v17546_v28  ;;  %13255 = vmatprep.subr.mxu1 %v17544_v29  ;;  %v1378_v28 = vld [vmem:[%s19536_s22 + $0x60] sm:$0xff]  ;;  %v12303_v29 = vld [vmem:[%s19536_s22 + $0xf8] sm:$0xff] }
 0x2ac   : > { %13200 = vmatpush3.msra.mxu0 %v17504_v41  ;;  %13256 = vmatpush3.msra.mxu1 %v17502_v40  ;;  %v19547_v40 = vld [vmem:[#allocation79_spill] sm:$0xff]  ;;  %v19548_v41 = vld [vmem:[#allocation80_spill] sm:$0xff] }
 0x2ad   : > { %13201 = vmatprep.subr.mxu0 %v17550_v26  ;;  %13257 = vmatprep.subr.mxu1 %v17548_v27  ;;  %v1379_v26 = vld [vmem:[%s19536_s22 + $0x68] sm:$0xff]  ;;  %v12300_v27 = vld [vmem:[%s19536_s22 + $0xe0] sm:$0xff] }
 0x2ae   : > { %13202 = vmatpush3.msra.mxu0 %v17508_v43  ;;  %13258 = vmatpush3.msra.mxu1 %v17506_v42  ;;  %v19549_v42 = vld [vmem:[#allocation81_spill] sm:$0xff]  ;;  %v19550_v43 = vld [vmem:[#allocation82_spill] sm:$0xff] }
 0x2af   : > { %13203 = vmatprep.subr.mxu0 %v17538_v32  ;;  %13259 = vmatprep.subr.mxu1 %v17536_v33  ;;  %v1380_v32 = vld [vmem:[%s19536_s22 + $0x70] sm:$0xff] }
 0x2b0   : > { %13204 = vmatpush3.msra.mxu0 %v17496_v37  ;;  %13260 = vmatpush3.msra.mxu1 %v17494_v36  ;;  %v19542_v33 = vld [vmem:[#allocation74_spill] sm:$0xff]  ;;  %v19543_v36 = vld [vmem:[#allocation75_spill] sm:$0xff]  ;;  %v19544_v37 = vld [vmem:[#allocation76_spill] sm:$0xff] }
 0x2b1   : > { %13205 = vmatprep.subr.mxu0 %v17542_v30  ;;  %13261 = vmatprep.subr.mxu1 %v17540_v31  ;;  %v1381_v30 = vld [vmem:[%s19536_s22 + $0x78] sm:$0xff]  ;;  %v12302_v31 = vld [vmem:[%s19536_s22 + $0xf0] sm:$0xff] }
 0x2b2   : > { %13206 = vmatpush3.msra.mxu0 %v17500_v39  ;;  %13262 = vmatpush3.msra.mxu1 %v17498_v38  ;;  %v19545_v38 = vld [vmem:[#allocation77_spill] sm:$0xff]  ;;  %v19546_v39 = vld [vmem:[#allocation78_spill] sm:$0xff] }
 0x2b3   : > { %2021 = vmatmul.mubr.f32.vlgmr.msra.gmra.mxu0 %v12288_v2  ;;  %2126 = vmatmul.mubr.f32.vlgmr.msra.gmra.mxu1 %v1366_v3 }
 0x2b4   : > { %2025 = vmatprep.mubr.f32.mxu0 %v12291_v4  ;;  %2130 = vmatprep.mubr.f32.mxu1 %v1369_v5 }
 0x2b5   : > { %14541 = vmatprep.subr.msk.mxu0 %vm1480_vm0, %v12354_v6 }
 0x2b6   : > { %14542 = vmatpush3.msk.msra.mxu0 %vm1480_vm0, %v12354_v6 }
 0x2b7   : > { %2026 = vmatmul.mubr.f32.gmra.mxu0 %v12290_v7  ;;  %2131 = vmatmul.mubr.f32.gmra.mxu1 %v1368_v8 }
 0x2b8   : > { %2030 = vmatprep.mubr.f32.mxu0 %v12293_v9  ;;  %2135 = vmatprep.mubr.f32.mxu1 %v1371_v10 }
 0x2bb   : > { %2031 = vmatmul.mubr.f32.gmra.mxu0 %v12292_v11  ;;  %2136 = vmatmul.mubr.f32.gmra.mxu1 %v1370_v12 }
 0x2bc   : > { %2035 = vmatprep.mubr.f32.mxu0 %v12295_v13  ;;  %2140 = vmatprep.mubr.f32.mxu1 %v1373_v14 }
 0x2bf   : > { %2036 = vmatmul.mubr.f32.gmra.mxu0 %v12294_v15  ;;  %2141 = vmatmul.mubr.f32.gmra.mxu1 %v1372_v16 }
 0x2c0   : > { %2040 = vmatprep.mubr.f32.mxu0 %v12297_v17  ;;  %2145 = vmatprep.mubr.f32.mxu1 %v1375_v18 }
 0x2c3   : > { %2041 = vmatmul.mubr.f32.gmra.mxu0 %v12296_v19  ;;  %2146 = vmatmul.mubr.f32.gmra.mxu1 %v1374_v20 }
 0x2c4   : > { %2045 = vmatprep.mubr.f32.mxu0 %v12299_v21  ;;  %2150 = vmatprep.mubr.f32.mxu1 %v1377_v22 }
 0x2c7   : > { %2046 = vmatmul.mubr.f32.gmra.mxu0 %v12298_v23  ;;  %2151 = vmatmul.mubr.f32.gmra.mxu1 %v1376_v24 }
 0x2c8   : > { %2050 = vmatprep.mubr.f32.mxu0 %v12301_v25  ;;  %2155 = vmatprep.mubr.f32.mxu1 %v1379_v26 }
 0x2cb   : > { %2051 = vmatmul.mubr.f32.gmra.mxu0 %v12300_v27  ;;  %2156 = vmatmul.mubr.f32.gmra.mxu1 %v1378_v28 }
 0x2cc   : > { %2055 = vmatprep.mubr.f32.mxu0 %v12303_v29  ;;  %2160 = vmatprep.mubr.f32.mxu1 %v1381_v30 }
 0x2cf   : > { %2056 = vmatmul.mubr.f32.gmra.mxu0 %v12302_v31  ;;  %2161 = vmatmul.mubr.f32.gmra.mxu1 %v1380_v32 }
 0x2d0   : > { %14543 = vmatprep.mubr.msk.f32.mxu0 %vm1383_vm1, %v19542_v33  ;;  %2477 = vmatprep.mubr.f32.mxu1 %v12339_v35 }
 0x2d3   : > { %14544 = vmatmul.mubr.msk.f32.vlgmr.msra.gmra.mxu0 %vm1383_vm1, %v19543_v36 }
 0x2d4   : > { %14546 = vmatprep.mubr.msk.f32.mxu0 %vm1383_vm1, %v19544_v37 }
 0x2d7   : > { %14547 = vmatmul.mubr.msk.f32.gmra.mxu0 %vm1383_vm1, %v19545_v38 }
 0x2d8   : > { %14549 = vmatprep.mubr.msk.f32.mxu0 %vm1383_vm1, %v19546_v39 }
 0x2db   : > { %14550 = vmatmul.mubr.msk.f32.gmra.mxu0 %vm1383_vm1, %v19547_v40 }
 0x2dc   : > { %14552 = vmatprep.mubr.msk.f32.mxu0 %vm1383_vm1, %v19548_v41 }
 0x2df   : > { %14553 = vmatmul.mubr.msk.f32.gmra.mxu0 %vm1383_vm1, %v19549_v42 }
 0x2e0   : > { %14555 = vmatprep.mubr.msk.f32.mxu0 %vm1383_vm1, %v19550_v43 }
 0x2e3   : > { %14556 = vmatmul.mubr.msk.f32.gmra.mxu0 %vm1383_vm1, %v19551_v44 }
 0x2e4   : > { %14558 = vmatprep.mubr.msk.f32.mxu0 %vm1383_vm1, %v19552_v45 }
 0x2e7   : > { %14559 = vmatmul.mubr.msk.f32.gmra.mxu0 %vm1383_vm1, %v19553_v46 }
 0x2e8   : > { %14561 = vmatprep.mubr.msk.f32.mxu0 %vm1383_vm1, %v19554_v47 }
 0x2eb   : > { %14562 = vmatmul.mubr.msk.f32.gmra.mxu0 %vm1383_vm1, %v19555_v48 }
 0x2ec   : > { %14564 = vmatprep.mubr.msk.f32.mxu0 %vm1383_vm1, %v19556_v49 }
 0x2ef   : > { %14565 = vmatmul.mubr.msk.f32.gmra.mxu0 %vm1383_vm1, %v19557_v50 }
 0x2f0   : > { %14567 = vmatprep.mubr.msk.f32.mxu0 %vm1383_vm1, %v19558_v51 }
 0x2f3   : > { %14568 = vmatmul.mubr.msk.f32.gmra.mxu0 %vm1383_vm1, %v19559_v52 }
 0x2f4   : > { %14570 = vmatprep.mubr.msk.f32.mxu0 %vm1383_vm1, %v19560_v53 }
 0x2f7   : > { %14571 = vmatmul.mubr.msk.f32.gmra.mxu0 %vm1383_vm1, %v19561_v54 }
 0x2f8   : > { %14573 = vmatprep.mubr.msk.f32.mxu0 %vm1383_vm1, %v19562_v55 }
 0x2fb   : > { %14574 = vmatmul.mubr.msk.f32.gmra.mxu0 %vm1383_vm1, %v19563_v56 }
 0x2fc   : > { %14576 = vmatprep.mubr.msk.f32.mxu0 %vm1383_vm1, %v19564_v57 }
 0x2ff   : > { %14577 = vmatmul.mubr.msk.f32.gmra.mxu0 %vm1383_vm1, %v19565_v58 }
 0x300   : > { %14579 = vmatprep.mubr.msk.f32.mxu0 %vm1383_vm1, %v19566_v59 }
 0x303   : > { %14580 = vmatmul.mubr.msk.f32.gmra.mxu0 %vm1383_vm1, %v19567_v60 }
 0x304   : > { %14582 = vmatprep.mubr.msk.f32.mxu0 %vm1383_vm1, %v19568_v61 }
 0x307   : > { %14583 = vmatmul.mubr.msk.f32.gmra.mxu0 %vm1383_vm1, %v19569_v62 }
 0x308   : > { %14585 = vmatprep.mubr.msk.f32.mxu0 %vm1383_vm1, %v19570_v63 }
 0x30b   : > { %14586 = vmatmul.mubr.msk.f32.gmra.mxu0 %vm1383_vm1, %v19571_v0 }
 0x30c   : > { %14588 = vmatprep.mubr.msk.f32.mxu0 %vm1383_vm1, %v19572_v1 }
 0x30f   : > { %14589 = vmatmul.mubr.msk.f32.gmra.mxu0 %vm1383_vm1, %v19573_v34 }
 0x373   : > { %v13207_v2 = vpop.f32.mrf.mxu0  ;;  %v13263_v3 = vpop.f32.mrf.mxu1 }
 0x375   : > { %v13208_v4 = vpop.f32.mrf.mxu0  ;;  %v13264_v5 = vpop.f32.mrf.mxu1 }
 0x376   : > { %v13209_v6 = vadd.f32 %v13208_v4, %v13207_v2  ;;  %v13265_v7 = vadd.f32 %v13264_v5, %v13263_v3 }
 0x377   : > { %v13210_v8 = vpop.f32.mrf.mxu0  ;;  %v13266_v9 = vpop.f32.mrf.mxu1 }
 0x378   : > { %v17688_v10 = vadd.f32 %v13265_v7, %v13209_v6 }
 0x379   : > { %v13211_v11 = vpop.f32.mrf.mxu0  ;;  %v13267_v12 = vpop.f32.mrf.mxu1 }
 0x37a   : > { %19574 = vst [vmem:[#allocation74_spill] sm:$0xff] %v17688_v10  ;;  %v13212_v13 = vadd.f32 %v13211_v11, %v13210_v8  ;;  %v13268_v14 = vadd.f32 %v13267_v12, %v13266_v9 }
 0x37b   : > { %v13213_v15 = vpop.f32.mrf.mxu0  ;;  %v13269_v16 = vpop.f32.mrf.mxu1 }
 0x37c   : > { %v17690_v17 = vadd.f32 %v13268_v14, %v13212_v13 }
 0x37d   : > { %v13214_v18 = vpop.f32.mrf.mxu0  ;;  %v13270_v19 = vpop.f32.mrf.mxu1 }
 0x37e   : > { %19575 = vst [vmem:[#allocation75_spill] sm:$0xff] %v17690_v17  ;;  %v13215_v20 = vadd.f32 %v13214_v18, %v13213_v15  ;;  %v13271_v21 = vadd.f32 %v13270_v19, %v13269_v16 }
 0x37f   : > { %v13216_v22 = vpop.f32.mrf.mxu0  ;;  %v13272_v23 = vpop.f32.mrf.mxu1 }
 0x380   : > { %v17692_v24 = vadd.f32 %v13271_v21, %v13215_v20 }
 0x381   : > { %v13217_v25 = vpop.f32.mrf.mxu0  ;;  %v13273_v26 = vpop.f32.mrf.mxu1 }
 0x382   : > { %19576 = vst [vmem:[#allocation76_spill] sm:$0xff] %v17692_v24  ;;  %v13218_v27 = vadd.f32 %v13217_v25, %v13216_v22  ;;  %v13274_v28 = vadd.f32 %v13273_v26, %v13272_v23 }
 0x383   : > { %v13219_v29 = vpop.f32.mrf.mxu0  ;;  %v13275_v30 = vpop.f32.mrf.mxu1 }
 0x384   : > { %v17694_v31 = vadd.f32 %v13274_v28, %v13218_v27 }
 0x385   : > { %v13220_v32 = vpop.f32.mrf.mxu0  ;;  %v13276_v35 = vpop.f32.mrf.mxu1 }
 0x386   : > { %19577 = vst [vmem:[#allocation77_spill] sm:$0xff] %v17694_v31  ;;  %v13221_v2 = vadd.f32 %v13220_v32, %v13219_v29  ;;  %v13277_v3 = vadd.f32 %v13276_v35, %v13275_v30 }
 0x387   : > { %v13222_v4 = vpop.f32.mrf.mxu0  ;;  %v13278_v5 = vpop.f32.mrf.mxu1 }
 0x388   : > { %v17696_v6 = vadd.f32 %v13277_v3, %v13221_v2 }
 0x389   : > { %v13223_v7 = vpop.f32.mrf.mxu0  ;;  %v13279_v8 = vpop.f32.mrf.mxu1 }
 0x38a   : > { %19578 = vst [vmem:[#allocation78_spill] sm:$0xff] %v17696_v6  ;;  %v13224_v9 = vadd.f32 %v13223_v7, %v13222_v4  ;;  %v13280_v11 = vadd.f32 %v13279_v8, %v13278_v5 }
 0x38b   : > { %v13225_v12 = vpop.f32.mrf.mxu0  ;;  %v13281_v13 = vpop.f32.mrf.mxu1 }
 0x38c   : > { %v17698_v14 = vadd.f32 %v13280_v11, %v13224_v9 }
 0x38d   : > { %v13226_v15 = vpop.f32.mrf.mxu0  ;;  %v13282_v16 = vpop.f32.mrf.mxu1 }
 0x38e   : > { %19579 = vst [vmem:[#allocation79_spill] sm:$0xff] %v17698_v14  ;;  %v13227_v18 = vadd.f32 %v13226_v15, %v13225_v12  ;;  %v13283_v19 = vadd.f32 %v13282_v16, %v13281_v13 }
 0x38f   : > { %v13228_v20 = vpop.f32.mrf.mxu0  ;;  %v13284_v21 = vpop.f32.mrf.mxu1 }
 0x390   : > { %v17700_v22 = vadd.f32 %v13283_v19, %v13227_v18 }
 0x391   : > { %v13229_v23 = vpop.f32.mrf.mxu0  ;;  %v13285_v25 = vpop.f32.mrf.mxu1 }
 0x392   : > { %19580 = vst [vmem:[#allocation80_spill] sm:$0xff] %v17700_v22  ;;  %v13230_v26 = vadd.f32 %v13229_v23, %v13228_v20  ;;  %v13286_v27 = vadd.f32 %v13285_v25, %v13284_v21 }
 0x393   : > { %v14545_v28 = vpop.f32.mrf.mxu0 }
 0x394   : > { %v17702_v29 = vadd.f32 %v13286_v27, %v13230_v26 }
 0x395   : > { %v17704_v30 = vpop.f32.mrf.mxu0 }
 0x396   : > { %19581 = vst [vmem:[#allocation81_spill] sm:$0xff] %v17702_v29 }
 0x397   : > { %v14548_v32 = vpop.f32.mrf.mxu0 }
 0x399   : > { %v2264_v35 = vpop.f32.mrf.mxu0 }
 0x39b   : > { %v14551_v2 = vpop.f32.mrf.mxu0 }
 0x39d   : > { %v2274_v3 = vpop.f32.mrf.mxu0 }
 0x39f   : > { %v14554_v4 = vpop.f32.mrf.mxu0 }
 0x3a1   : > { %v2284_v5 = vpop.f32.mrf.mxu0 }
 0x3a3   : > { %v14557_v7 = vpop.f32.mrf.mxu0 }
 0x3a5   : > { %v2294_v8 = vpop.f32.mrf.mxu0 }
 0x3a7   : > { %v14560_v9 = vpop.f32.mrf.mxu0 }
 0x3a9   : > { %v2304_v11 = vpop.f32.mrf.mxu0 }
 0x3ab   : > { %v14563_v12 = vpop.f32.mrf.mxu0 }
 0x3ad   : > { %v2314_v13 = vpop.f32.mrf.mxu0 }
 0x3af   : > { %v14566_v15 = vpop.f32.mrf.mxu0 }
 0x3b1   : > { %v2324_v16 = vpop.f32.mrf.mxu0 }
 0x3b3   : > { %v14569_v18 = vpop.f32.mrf.mxu0 }
 0x3b5   : > { %v2334_v19 = vpop.f32.mrf.mxu0 }
 0x3b7   : > { %v14572_v20 = vpop.f32.mrf.mxu0 }
 0x3b9   : > { %v2344_v21 = vpop.f32.mrf.mxu0 }
 0x3bb   : > { %v14575_v23 = vpop.f32.mrf.mxu0 }
 0x3bd   : > { %v2354_v25 = vpop.f32.mrf.mxu0 }
 0x3bf   : > { %v14578_v26 = vpop.f32.mrf.mxu0 }
 0x3c1   : > { %v2364_v27 = vpop.f32.mrf.mxu0 }
 0x3c3   : > { %v14581_v29 = vpop.f32.mrf.mxu0 }
 0x3c5   : > { %v2374_v22 = vpop.f32.mrf.mxu0 }
 0x3c7   : > { %v14584_v14 = vpop.f32.mrf.mxu0 }
 0x3c9   : > { %v2384_v6 = vpop.f32.mrf.mxu0 }
 0x3cb   : > { %v14587_v31 = vpop.f32.mrf.mxu0 }
 0x3cd   : > { %v2394_v24 = vpop.f32.mrf.mxu0 }
 0x3cf   : > { %v14590_v17 = vpop.f32.mrf.mxu0 }
 0x3d0   : > { %13320 = vmatprep.subr.mxu1 %v14590_v17  ;;  %v12404_v17 = vld [vmem:[%s19508_s6 + $0xc] sm:$0x7] }
 0x3d1   : > { %v2404_v10 = vpop.f32.mrf.mxu0  ;;  %13321 = vmatpush3.msra.mxu1 %v14566_v15 }
 0x3d2   : > { %13322 = vmatprep.subr.mxu1 %v2404_v10  ;;  %v12338_v10 = vld [vmem:[%s19536_s22 + $0x100] sm:$0xff] }
 0x3d3   : > { %13323 = vmatpush3.msra.mxu1 %v2324_v16 }
 0x3d4   : > { %13324 = vmatprep.subr.mxu1 %v14587_v31  ;;  %v12340_v31 = vld [vmem:[%s19536_s22 + $0x110] sm:$0xff] }
 0x3d5   : > { %13325 = vmatpush3.msra.mxu1 %v14563_v12 }
 0x3d6   : > { %13326 = vmatprep.subr.mxu1 %v2394_v24  ;;  %v12341_v24 = vld [vmem:[%s19536_s22 + $0x118] sm:$0xff] }
 0x3d7   : > { %13327 = vmatpush3.msra.mxu1 %v2314_v13 }
 0x3d8   : > { %13328 = vmatprep.subr.mxu1 %v14584_v14  ;;  %v12342_v14 = vld [vmem:[%s19536_s22 + $0x120] sm:$0xff] }
 0x3d9   : > { %13329 = vmatpush3.msra.mxu1 %v14560_v9 }
 0x3da   : > { %13330 = vmatprep.subr.mxu1 %v2384_v6  ;;  %v12343_v6 = vld [vmem:[%s19536_s22 + $0x128] sm:$0xff] }
 0x3db   : > { %13331 = vmatpush3.msra.mxu1 %v2304_v11  ;;  %v19588_v11 = vld [vmem:[#allocation80_spill] sm:$0xff] }
 0x3dc   : > { %13332 = vmatprep.subr.mxu1 %v14581_v29  ;;  %v12347_v29 = vld [vmem:[%s19536_s22 + $0x148] sm:$0xff] }
 0x3dd   : > { %13333 = vmatpush3.msra.mxu1 %v14557_v7 }
 0x3de   : > { %13334 = vmatprep.subr.mxu1 %v2374_v22  ;;  %v12345_v22 = vld [vmem:[%s19536_s22 + $0x138] sm:$0xff] }
 0x3df   : > { %13335 = vmatpush3.msra.mxu1 %v2294_v8 }
 0x3e0   : > { %13336 = vmatprep.subr.mxu1 %v14578_v26 }
 0x3e1   : > { %13337 = vmatpush3.msra.mxu1 %v14554_v4  ;;  %v12353_v4 = vld [vmem:[%s19536_s22 + $0x178] sm:$0xff] }
 0x3e2   : > { %13338 = vmatprep.subr.mxu1 %v2364_v27 }
 0x3e3   : > { %13339 = vmatpush3.msra.mxu1 %v2284_v5  ;;  %v12352_v5 = vld [vmem:[%s19536_s22 + $0x170] sm:$0xff] }
 0x3e4   : > { %13340 = vmatprep.subr.mxu1 %v14575_v23 }
 0x3e5   : > { %13341 = vmatpush3.msra.mxu1 %v14551_v2  ;;  %v12351_v2 = vld [vmem:[%s19536_s22 + $0x168] sm:$0xff] }
 0x3e6   : > { %13342 = vmatprep.subr.mxu1 %v2354_v25 }
 0x3e7   : > { %13343 = vmatpush3.msra.mxu1 %v2274_v3  ;;  %v12350_v3 = vld [vmem:[%s19536_s22 + $0x160] sm:$0xff] }
 0x3e8   : > { %13344 = vmatprep.subr.mxu1 %v14572_v20 }
 0x3e9   : > { %13345 = vmatpush3.msra.mxu1 %v14548_v32  ;;  %v12349_v32 = vld [vmem:[%s19536_s22 + $0x158] sm:$0xff] }
 0x3ea   : > { %13346 = vmatprep.subr.mxu1 %v2344_v21 }
 0x3eb   : > { %13347 = vmatpush3.msra.mxu1 %v2264_v35  ;;  %v12348_v35 = vld [vmem:[%s19536_s22 + $0x150] sm:$0xff] }
 0x3ec   : > { %13348 = vmatprep.subr.mxu1 %v14569_v18  ;;  %v19589_v18 = vld [vmem:[#allocation81_spill] sm:$0xff] }
 0x3ed   : > { %13349 = vmatpush3.msra.mxu1 %v14545_v28  ;;  %v12344_v28 = vld [vmem:[%s19536_s22 + $0x130] sm:$0xff] }
 0x3ee   : > { %13350 = vmatprep.subr.mxu1 %v2334_v19 }
 0x3ef   : > { %13351 = vmatpush3.msra.mxu1 %v17704_v30  ;;  %v12346_v30 = vld [vmem:[%s19536_s22 + $0x140] sm:$0xff] }
 0x3f0   : > { %2478 = vmatmul.mubr.f32.vlgmr.msra.gmra.mxu1 %v12338_v10  ;;  %14591 = vmatprep.subr.msk.mxu1 %vm1480_vm0, %v12404_v17 }
 0x3f1   : > { %2482 = vmatprep.mubr.f32.mxu1 %v12341_v24  ;;  %14592 = vmatpush3.msk.msra.mxu1 %vm1480_vm0, %v12404_v17 }
 0x3f4   : > { %2483 = vmatmul.mubr.f32.gmra.mxu1 %v12340_v31 }
 0x3f5   : > { %2487 = vmatprep.mubr.f32.mxu1 %v12343_v6 }
 0x3f8   : > { %2488 = vmatmul.mubr.f32.gmra.mxu1 %v12342_v14 }
 0x3f9   : > { %2492 = vmatprep.mubr.f32.mxu1 %v12345_v22 }
 0x3fc   : > { %2493 = vmatmul.mubr.f32.gmra.mxu1 %v12344_v28 }
 0x3fd   : > { %2497 = vmatprep.mubr.f32.mxu1 %v12347_v29 }
 0x400   : > { %2498 = vmatmul.mubr.f32.gmra.mxu1 %v12346_v30 }
 0x401   : > { %2502 = vmatprep.mubr.f32.mxu1 %v12349_v32 }
 0x404   : > { %2503 = vmatmul.mubr.f32.gmra.mxu1 %v12348_v35 }
 0x405   : > { %2507 = vmatprep.mubr.f32.mxu1 %v12351_v2 }
 0x408   : > { %2508 = vmatmul.mubr.f32.gmra.mxu1 %v12350_v3 }
 0x409   : > { %2512 = vmatprep.mubr.f32.mxu1 %v12353_v4 }
 0x40c   : > { %2513 = vmatmul.mubr.f32.gmra.mxu1 %v12352_v5 }
 0x40d   : > { %14593 = vmatprep.mubr.msk.f32.mxu1 %vm1383_vm1, %v19542_v33  ;;  %v12389_v33 = vld [vmem:[%s19536_s22 + $0x188] sm:$0xff] }
 0x40e   : > { %2837 = vmatprep.mubr.f32.mxu0 %v12389_v33 }
 0x410   : > { %14594 = vmatmul.mubr.msk.f32.vlgmr.msra.gmra.mxu1 %vm1383_vm1, %v19543_v36 }
 0x411   : > { %14596 = vmatprep.mubr.msk.f32.mxu1 %vm1383_vm1, %v19544_v37 }
 0x414   : > { %14597 = vmatmul.mubr.msk.f32.gmra.mxu1 %vm1383_vm1, %v19545_v38 }
 0x415   : > { %14599 = vmatprep.mubr.msk.f32.mxu1 %vm1383_vm1, %v19546_v39 }
 0x418   : > { %14600 = vmatmul.mubr.msk.f32.gmra.mxu1 %vm1383_vm1, %v19547_v40  ;;  %v19582_v40 = vld [vmem:[#allocation74_spill] sm:$0xff] }
 0x419   : > { %14602 = vmatprep.mubr.msk.f32.mxu1 %vm1383_vm1, %v19548_v41 }
 0x41c   : > { %14603 = vmatmul.mubr.msk.f32.gmra.mxu1 %vm1383_vm1, %v19549_v42 }
 0x41d   : > { %14605 = vmatprep.mubr.msk.f32.mxu1 %vm1383_vm1, %v19550_v43 }
 0x420   : > { %14606 = vmatmul.mubr.msk.f32.gmra.mxu1 %vm1383_vm1, %v19551_v44 }
 0x421   : > { %14608 = vmatprep.mubr.msk.f32.mxu1 %vm1383_vm1, %v19552_v45  ;;  %v19583_v45 = vld [vmem:[#allocation75_spill] sm:$0xff] }
 0x424   : > { %14609 = vmatmul.mubr.msk.f32.gmra.mxu1 %vm1383_vm1, %v19553_v46 }
 0x425   : > { %14611 = vmatprep.mubr.msk.f32.mxu1 %vm1383_vm1, %v19554_v47 }
 0x428   : > { %14612 = vmatmul.mubr.msk.f32.gmra.mxu1 %vm1383_vm1, %v19555_v48 }
 0x429   : > { %14614 = vmatprep.mubr.msk.f32.mxu1 %vm1383_vm1, %v19556_v49 }
 0x42c   : > { %14615 = vmatmul.mubr.msk.f32.gmra.mxu1 %vm1383_vm1, %v19557_v50  ;;  %v19584_v50 = vld [vmem:[#allocation76_spill] sm:$0xff] }
 0x42d   : > { %14617 = vmatprep.mubr.msk.f32.mxu1 %vm1383_vm1, %v19558_v51 }
 0x430   : > { %14618 = vmatmul.mubr.msk.f32.gmra.mxu1 %vm1383_vm1, %v19559_v52 }
 0x431   : > { %14620 = vmatprep.mubr.msk.f32.mxu1 %vm1383_vm1, %v19560_v53 }
 0x434   : > { %14621 = vmatmul.mubr.msk.f32.gmra.mxu1 %vm1383_vm1, %v19561_v54 }
 0x435   : > { %14623 = vmatprep.mubr.msk.f32.mxu1 %vm1383_vm1, %v19562_v55  ;;  %v19585_v55 = vld [vmem:[#allocation77_spill] sm:$0xff] }
 0x438   : > { %14624 = vmatmul.mubr.msk.f32.gmra.mxu1 %vm1383_vm1, %v19563_v56 }
 0x439   : > { %14626 = vmatprep.mubr.msk.f32.mxu1 %vm1383_vm1, %v19564_v57 }
 0x43c   : > { %14627 = vmatmul.mubr.msk.f32.gmra.mxu1 %vm1383_vm1, %v19565_v58 }
 0x43d   : > { %14629 = vmatprep.mubr.msk.f32.mxu1 %vm1383_vm1, %v19566_v59 }
 0x440   : > { %14630 = vmatmul.mubr.msk.f32.gmra.mxu1 %vm1383_vm1, %v19567_v60  ;;  %v19586_v60 = vld [vmem:[#allocation78_spill] sm:$0xff] }
 0x441   : > { %14632 = vmatprep.mubr.msk.f32.mxu1 %vm1383_vm1, %v19568_v61 }
 0x444   : > { %14633 = vmatmul.mubr.msk.f32.gmra.mxu1 %vm1383_vm1, %v19569_v62 }
 0x445   : > { %14635 = vmatprep.mubr.msk.f32.mxu1 %vm1383_vm1, %v19570_v63 }
 0x448   : > { %14636 = vmatmul.mubr.msk.f32.gmra.mxu1 %vm1383_vm1, %v19571_v0 }
 0x449   : > { %14638 = vmatprep.mubr.msk.f32.mxu1 %vm1383_vm1, %v19572_v1  ;;  %v19587_v1 = vld [vmem:[#allocation79_spill] sm:$0xff] }
 0x44c   : > { %14639 = vmatmul.mubr.msk.f32.gmra.mxu1 %vm1383_vm1, %v19573_v34 }
 0x4b0   : > { %v13352_v36 = vpop.f32.mrf.mxu1 }
 0x4b2   : > { %v13353_v37 = vpop.f32.mrf.mxu1 }
 0x4b3   : > { %v13354_v38 = vadd.f32 %v13353_v37, %v13352_v36 }
 0x4b4   : > { %v13355_v39 = vpop.f32.mrf.mxu1 }
 0x4b5   : > { %v17791_v41 = vadd.f32 %v13354_v38, %v19582_v40 }
 0x4b6   : > { %v13356_v42 = vpop.f32.mrf.mxu1 }
 0x4b7   : > { %v13357_v43 = vadd.f32 %v13356_v42, %v13355_v39 }
 0x4b8   : > { %v13358_v44 = vpop.f32.mrf.mxu1 }
 0x4b9   : > { %v17794_v46 = vadd.f32 %v13357_v43, %v19583_v45  ;;  %v12388_v45 = vld [vmem:[%s19536_s22 + $0x180] sm:$0xff] }
 0x4ba   : > { %v13359_v47 = vpop.f32.mrf.mxu1 }
 0x4bb   : > { %v13360_v48 = vadd.f32 %v13359_v47, %v13358_v44  ;;  %v12454_v47 = vld [vmem:[%s19508_s6 + $0x10] sm:$0x7] }
 0x4bc   : > { %v13361_v49 = vpop.f32.mrf.mxu1 }
 0x4bd   : > { %v17797_v51 = vadd.f32 %v13360_v48, %v19584_v50  ;;  %v12391_v48 = vld [vmem:[%s19536_s22 + $0x198] sm:$0xff]  ;;  %v12393_v50 = vld [vmem:[%s19536_s22 + $0x1a8] sm:$0xff] }
 0x4be   : > { %v13362_v52 = vpop.f32.mrf.mxu1 }
 0x4bf   : > { %v13363_v53 = vadd.f32 %v13362_v52, %v13361_v49  ;;  %v12390_v49 = vld [vmem:[%s19536_s22 + $0x190] sm:$0xff]  ;;  %v12392_v52 = vld [vmem:[%s19536_s22 + $0x1a0] sm:$0xff] }
 0x4c0   : > { %v13364_v54 = vpop.f32.mrf.mxu1 }
 0x4c1   : > { %v17800_v56 = vadd.f32 %v13363_v53, %v19585_v55  ;;  %v12395_v53 = vld [vmem:[%s19536_s22 + $0x1b8] sm:$0xff]  ;;  %v12397_v55 = vld [vmem:[%s19536_s22 + $0x1c8] sm:$0xff] }
 0x4c2   : > { %v13365_v57 = vpop.f32.mrf.mxu1 }
 0x4c3   : > { %v13366_v58 = vadd.f32 %v13365_v57, %v13364_v54  ;;  %v12394_v54 = vld [vmem:[%s19536_s22 + $0x1b0] sm:$0xff]  ;;  %v12396_v57 = vld [vmem:[%s19536_s22 + $0x1c0] sm:$0xff] }
 0x4c4   : > { %v13367_v59 = vpop.f32.mrf.mxu1 }
 0x4c5   : > { %v17803_v61 = vadd.f32 %v13366_v58, %v19586_v60  ;;  %v12399_v58 = vld [vmem:[%s19536_s22 + $0x1d8] sm:$0xff]  ;;  %v12401_v60 = vld [vmem:[%s19536_s22 + $0x1e8] sm:$0xff] }
 0x4c6   : > { %v13368_v62 = vpop.f32.mrf.mxu1 }
 0x4c7   : > { %v13369_v63 = vadd.f32 %v13368_v62, %v13367_v59  ;;  %v12398_v59 = vld [vmem:[%s19536_s22 + $0x1d0] sm:$0xff]  ;;  %v12400_v62 = vld [vmem:[%s19536_s22 + $0x1e0] sm:$0xff] }
 0x4c8   : > { %v13370_v0 = vpop.f32.mrf.mxu1 }
 0x4c9   : > { %v17806_v34 = vadd.f32 %v13369_v63, %v19587_v1  ;;  %v12403_v63 = vld [vmem:[%s19536_s22 + $0x1f8] sm:$0xff]  ;;  %v17836_v1 = vld [vmem:[%s17260_s8] sm:$0xff] }
 0x4ca   : > { %v13371_v7 = vpop.f32.mrf.mxu1 }
 0x4cb   : > { %v13372_v8 = vadd.f32 %v13371_v7, %v13370_v0  ;;  %v12402_v0 = vld [vmem:[%s19536_s22 + $0x1f0] sm:$0xff]  ;;  %v17841_v7 = vld [vmem:[%s17260_s8 + $0x8] sm:$0xff] }
 0x4cc   : > { %v13373_v9 = vpop.f32.mrf.mxu1 }
 0x4cd   : > { %v17809_v12 = vadd.f32 %v13372_v8, %v19588_v11  ;;  %v17846_v8 = vld [vmem:[%s17260_s8 + $0x10] sm:$0xff]  ;;  %v17856_v11 = vld [vmem:[%s17260_s8 + $0x20] sm:$0xff] }
 0x4ce   : > { %v13374_v13 = vpop.f32.mrf.mxu1 }
 0x4cf   : > { %v13375_v15 = vadd.f32 %v13374_v13, %v13373_v9  ;;  %v17851_v9 = vld [vmem:[%s17260_s8 + $0x18] sm:$0xff]  ;;  %v17861_v13 = vld [vmem:[%s17260_s8 + $0x28] sm:$0xff] }
 0x4d0   : > { %v14595_v16 = vpop.f32.mrf.mxu1 }
 0x4d1   : > { %v17812_v19 = vadd.f32 %v13375_v15, %v19589_v18  ;;  %v17866_v15 = vld [vmem:[%s17260_s8 + $0x30] sm:$0xff]  ;;  %v17876_v18 = vld [vmem:[%s17260_s8 + $0x40] sm:$0xff] }
 0x4d2   : > { %v17814_v20 = vpop.f32.mrf.mxu1 }
 0x4d4   : > { %v14598_v21 = vpop.f32.mrf.mxu1 }
 0x4d6   : > { %v2624_v23 = vpop.f32.mrf.mxu1 }
 0x4d8   : > { %v14601_v25 = vpop.f32.mrf.mxu1 }
 0x4da   : > { %v2634_v26 = vpop.f32.mrf.mxu1 }
 0x4dc   : > { %v14604_v27 = vpop.f32.mrf.mxu1 }
 0x4de   : > { %v2644_v10 = vpop.f32.mrf.mxu1 }
 0x4e0   : > { %v14607_v17 = vpop.f32.mrf.mxu1 }
 0x4e2   : > { %v2654_v24 = vpop.f32.mrf.mxu1 }
 0x4e4   : > { %v14610_v31 = vpop.f32.mrf.mxu1 }
 0x4e6   : > { %v2664_v6 = vpop.f32.mrf.mxu1 }
 0x4e8   : > { %v14613_v14 = vpop.f32.mrf.mxu1 }
 0x4ea   : > { %v2674_v22 = vpop.f32.mrf.mxu1 }
 0x4ec   : > { %v14616_v28 = vpop.f32.mrf.mxu1 }
 0x4ee   : > { %v2684_v29 = vpop.f32.mrf.mxu1 }
 0x4f0   : > { %v14619_v30 = vpop.f32.mrf.mxu1 }
 0x4f2   : > { %v2694_v32 = vpop.f32.mrf.mxu1 }
 0x4f4   : > { %v14622_v35 = vpop.f32.mrf.mxu1 }
 0x4f6   : > { %v2704_v2 = vpop.f32.mrf.mxu1 }
 0x4f8   : > { %v14625_v3 = vpop.f32.mrf.mxu1 }
 0x4fa   : > { %v2714_v4 = vpop.f32.mrf.mxu1 }
 0x4fc   : > { %v14628_v5 = vpop.f32.mrf.mxu1 }
 0x4fe   : > { %v2724_v33 = vpop.f32.mrf.mxu1 }
 0x500   : > { %v14631_v36 = vpop.f32.mrf.mxu1 }
 0x502   : > { %v2734_v37 = vpop.f32.mrf.mxu1 }
 0x504   : > { %v14634_v38 = vpop.f32.mrf.mxu1 }
 0x506   : > { %v2744_v39 = vpop.f32.mrf.mxu1 }
 0x508   : > { %v14637_v40 = vpop.f32.mrf.mxu1 }
 0x50a   : > { %v2754_v42 = vpop.f32.mrf.mxu1 }
 0x50c   : > { %v14640_v43 = vpop.f32.mrf.mxu1 }
 0x50d   : > { %13409 = vmatprep.subr.mxu0 %v14640_v43 }
 0x50e   : > { %v2764_v44 = vpop.f32.mrf.mxu1  ;;  %13410 = vmatpush3.msra.mxu0 %v14616_v28  ;;  %v17946_v28 = vld [vmem:[%s17260_s8 + $0xb0] sm:$0xff] }
 0x50f   : > { %13411 = vmatprep.subr.mxu0 %v2764_v44 }
 0x510   : > { %13412 = vmatpush3.msra.mxu0 %v2684_v29  ;;  %v17951_v29 = vld [vmem:[%s17260_s8 + $0xb8] sm:$0xff] }
 0x511   : > { %13413 = vmatprep.subr.mxu0 %v14637_v40 }
 0x512   : > { %13414 = vmatpush3.msra.mxu0 %v14613_v14  ;;  %v17936_v14 = vld [vmem:[%s17260_s8 + $0xa0] sm:$0xff] }
 0x513   : > { %13415 = vmatprep.subr.mxu0 %v2754_v42 }
 0x514   : > { %13416 = vmatpush3.msra.mxu0 %v2674_v22  ;;  %v17941_v22 = vld [vmem:[%s17260_s8 + $0xa8] sm:$0xff] }
 0x515   : > { %13417 = vmatprep.subr.mxu0 %v14634_v38 }
 0x516   : > { %13418 = vmatpush3.msra.mxu0 %v14610_v31  ;;  %v17926_v31 = vld [vmem:[%s17260_s8 + $0x90] sm:$0xff] }
 0x517   : > { %13419 = vmatprep.subr.mxu0 %v2744_v39 }
 0x518   : > { %13420 = vmatpush3.msra.mxu0 %v2664_v6  ;;  %v17931_v6 = vld [vmem:[%s17260_s8 + $0x98] sm:$0xff] }
 0x519   : > { %13421 = vmatprep.subr.mxu0 %v14631_v36  ;;  %v12439_v36 = vld [vmem:[%s19536_s22 + $0x208] sm:$0xff] }
 0x51a   : > { %13422 = vmatpush3.msra.mxu0 %v14607_v17  ;;  %v17916_v17 = vld [vmem:[%s17260_s8 + $0x80] sm:$0xff]  ;;  %3197 = vmatprep.mubr.f32.mxu1 %v12439_v36 }
 0x51b   : > { %13423 = vmatprep.subr.mxu0 %v2734_v37 }
 0x51c   : > { %13424 = vmatpush3.msra.mxu0 %v2654_v24  ;;  %v17921_v24 = vld [vmem:[%s17260_s8 + $0x88] sm:$0xff] }
 0x51d   : > { %13425 = vmatprep.subr.mxu0 %v14628_v5  ;;  %v17986_v5 = vld [vmem:[%s17260_s8 + $0xf0] sm:$0xff] }
 0x51e   : > { %13426 = vmatpush3.msra.mxu0 %v14604_v27  ;;  %v17906_v27 = vld [vmem:[%s17260_s8 + $0x70] sm:$0xff] }
 0x51f   : > { %13427 = vmatprep.subr.mxu0 %v2724_v33  ;;  %v17991_v33 = vld [vmem:[%s17260_s8 + $0xf8] sm:$0xff] }
 0x520   : > { %13428 = vmatpush3.msra.mxu0 %v2644_v10  ;;  %v17911_v10 = vld [vmem:[%s17260_s8 + $0x78] sm:$0xff] }
 0x521   : > { %13429 = vmatprep.subr.mxu0 %v14625_v3  ;;  %v17976_v3 = vld [vmem:[%s17260_s8 + $0xe0] sm:$0xff] }
 0x522   : > { %13430 = vmatpush3.msra.mxu0 %v14601_v25  ;;  %v17896_v25 = vld [vmem:[%s17260_s8 + $0x60] sm:$0xff] }
 0x523   : > { %13431 = vmatprep.subr.mxu0 %v2714_v4  ;;  %v17981_v4 = vld [vmem:[%s17260_s8 + $0xe8] sm:$0xff] }
 0x524   : > { %13432 = vmatpush3.msra.mxu0 %v2634_v26  ;;  %v17901_v26 = vld [vmem:[%s17260_s8 + $0x68] sm:$0xff] }
 0x525   : > { %13433 = vmatprep.subr.mxu0 %v14622_v35  ;;  %v17966_v35 = vld [vmem:[%s17260_s8 + $0xd0] sm:$0xff] }
 0x526   : > { %13434 = vmatpush3.msra.mxu0 %v14598_v21  ;;  %v17886_v21 = vld [vmem:[%s17260_s8 + $0x50] sm:$0xff] }
 0x527   : > { %13435 = vmatprep.subr.mxu0 %v2704_v2  ;;  %v17971_v2 = vld [vmem:[%s17260_s8 + $0xd8] sm:$0xff] }
 0x528   : > { %13436 = vmatpush3.msra.mxu0 %v2624_v23  ;;  %v17891_v23 = vld [vmem:[%s17260_s8 + $0x58] sm:$0xff] }
 0x529   : > { %13437 = vmatprep.subr.mxu0 %v14619_v30  ;;  %v17956_v30 = vld [vmem:[%s17260_s8 + $0xc0] sm:$0xff] }
 0x52a   : > { %13438 = vmatpush3.msra.mxu0 %v14595_v16  ;;  %v17871_v16 = vld [vmem:[%s17260_s8 + $0x38] sm:$0xff] }
 0x52b   : > { %13439 = vmatprep.subr.mxu0 %v2694_v32  ;;  %v17961_v32 = vld [vmem:[%s17260_s8 + $0xc8] sm:$0xff] }
 0x52c   : > { %13440 = vmatpush3.msra.mxu0 %v17814_v20  ;;  %v17881_v20 = vld [vmem:[%s17260_s8 + $0x48] sm:$0xff] }
 0x52d   : > { %2838 = vmatmul.mubr.f32.vlgmr.msra.gmra.mxu0 %v12388_v45  ;;  %14641 = vmatprep.subr.msk.mxu0 %vm1480_vm0, %v12454_v47 }
 0x52e   : > { %2842 = vmatprep.mubr.f32.mxu0 %v12391_v48  ;;  %14642 = vmatpush3.msk.msra.mxu0 %vm1480_vm0, %v12454_v47 }
 0x531   : > { %2843 = vmatmul.mubr.f32.gmra.mxu0 %v12390_v49 }
 0x532   : > { %2847 = vmatprep.mubr.f32.mxu0 %v12393_v50 }
 0x535   : > { %2848 = vmatmul.mubr.f32.gmra.mxu0 %v12392_v52 }
 0x536   : > { %2852 = vmatprep.mubr.f32.mxu0 %v12395_v53 }
 0x539   : > { %2853 = vmatmul.mubr.f32.gmra.mxu0 %v12394_v54 }
 0x53a   : > { %2857 = vmatprep.mubr.f32.mxu0 %v12397_v55 }
 0x53d   : > { %2858 = vmatmul.mubr.f32.gmra.mxu0 %v12396_v57 }
 0x53e   : > { %2862 = vmatprep.mubr.f32.mxu0 %v12399_v58 }
 0x541   : > { %2863 = vmatmul.mubr.f32.gmra.mxu0 %v12398_v59 }
 0x542   : > { %2867 = vmatprep.mubr.f32.mxu0 %v12401_v60 }
 0x545   : > { %2868 = vmatmul.mubr.f32.gmra.mxu0 %v12400_v62 }
 0x546   : > { %2872 = vmatprep.mubr.f32.mxu0 %v12403_v63 }
 0x549   : > { %2873 = vmatmul.mubr.f32.gmra.mxu0 %v12402_v0 }
 0x54a   : > { %14643 = vmatprep.mubr.msk.f32.mxu0 %vm1383_vm1, %v17836_v1 }
 0x54d   : > { %14644 = vmatmul.mubr.msk.f32.vlgmr.msra.gmra.mxu0 %vm1383_vm1, %v17841_v7 }
 0x54e   : > { %14646 = vmatprep.mubr.msk.f32.mxu0 %vm1383_vm1, %v17846_v8 }
 0x551   : > { %14647 = vmatmul.mubr.msk.f32.gmra.mxu0 %vm1383_vm1, %v17851_v9 }
 0x552   : > { %14649 = vmatprep.mubr.msk.f32.mxu0 %vm1383_vm1, %v17856_v11 }
 0x555   : > { %14650 = vmatmul.mubr.msk.f32.gmra.mxu0 %vm1383_vm1, %v17861_v13 }
 0x556   : > { %14652 = vmatprep.mubr.msk.f32.mxu0 %vm1383_vm1, %v17866_v15 }
 0x559   : > { %14653 = vmatmul.mubr.msk.f32.gmra.mxu0 %vm1383_vm1, %v17871_v16 }
 0x55a   : > { %14655 = vmatprep.mubr.msk.f32.mxu0 %vm1383_vm1, %v17876_v18 }
 0x55d   : > { %14656 = vmatmul.mubr.msk.f32.gmra.mxu0 %vm1383_vm1, %v17881_v20 }
 0x55e   : > { %14658 = vmatprep.mubr.msk.f32.mxu0 %vm1383_vm1, %v17886_v21 }
 0x561   : > { %14659 = vmatmul.mubr.msk.f32.gmra.mxu0 %vm1383_vm1, %v17891_v23 }
 0x562   : > { %14661 = vmatprep.mubr.msk.f32.mxu0 %vm1383_vm1, %v17896_v25 }
 0x565   : > { %14662 = vmatmul.mubr.msk.f32.gmra.mxu0 %vm1383_vm1, %v17901_v26 }
 0x566   : > { %14664 = vmatprep.mubr.msk.f32.mxu0 %vm1383_vm1, %v17906_v27 }
 0x569   : > { %14665 = vmatmul.mubr.msk.f32.gmra.mxu0 %vm1383_vm1, %v17911_v10 }
 0x56a   : > { %14667 = vmatprep.mubr.msk.f32.mxu0 %vm1383_vm1, %v17916_v17 }
 0x56d   : > { %14668 = vmatmul.mubr.msk.f32.gmra.mxu0 %vm1383_vm1, %v17921_v24 }
 0x56e   : > { %14670 = vmatprep.mubr.msk.f32.mxu0 %vm1383_vm1, %v17926_v31 }
 0x571   : > { %14671 = vmatmul.mubr.msk.f32.gmra.mxu0 %vm1383_vm1, %v17931_v6 }
 0x572   : > { %14673 = vmatprep.mubr.msk.f32.mxu0 %vm1383_vm1, %v17936_v14 }
 0x575   : > { %14674 = vmatmul.mubr.msk.f32.gmra.mxu0 %vm1383_vm1, %v17941_v22 }
 0x576   : > { %14676 = vmatprep.mubr.msk.f32.mxu0 %vm1383_vm1, %v17946_v28 }
 0x579   : > { %14677 = vmatmul.mubr.msk.f32.gmra.mxu0 %vm1383_vm1, %v17951_v29 }
 0x57a   : > { %14679 = vmatprep.mubr.msk.f32.mxu0 %vm1383_vm1, %v17956_v30 }
 0x57d   : > { %14680 = vmatmul.mubr.msk.f32.gmra.mxu0 %vm1383_vm1, %v17961_v32 }
 0x57e   : > { %14682 = vmatprep.mubr.msk.f32.mxu0 %vm1383_vm1, %v17966_v35 }
 0x581   : > { %14683 = vmatmul.mubr.msk.f32.gmra.mxu0 %vm1383_vm1, %v17971_v2 }
 0x582   : > { %14685 = vmatprep.mubr.msk.f32.mxu0 %vm1383_vm1, %v17976_v3 }
 0x585   : > { %14686 = vmatmul.mubr.msk.f32.gmra.mxu0 %vm1383_vm1, %v17981_v4 }
 0x586   : > { %14688 = vmatprep.mubr.msk.f32.mxu0 %vm1383_vm1, %v17986_v5 }
 0x589   : > { %14689 = vmatmul.mubr.msk.f32.gmra.mxu0 %vm1383_vm1, %v17991_v33 }
 0x5ed   : > { %v13441_v37 = vpop.f32.mrf.mxu0 }
 0x5ef   : > { %v13442_v38 = vpop.f32.mrf.mxu0 }
 0x5f0   : > { %v13443_v39 = vadd.f32 %v13442_v38, %v13441_v37 }
 0x5f1   : > { %v13444_v40 = vpop.f32.mrf.mxu0 }
 0x5f2   : > { %v17997_v42 = vadd.f32 %v13443_v39, %v17791_v41 }
 0x5f3   : > { %v13445_v43 = vpop.f32.mrf.mxu0 }
 0x5f4   : > { %19590 = vst [vmem:[#allocation82_spill] sm:$0xff] %v17997_v42  ;;  %v13446_v44 = vadd.f32 %v13445_v43, %v13444_v40 }
 0x5f5   : > { %v13447_v45 = vpop.f32.mrf.mxu0 }
 0x5f6   : > { %v18000_v47 = vadd.f32 %v13446_v44, %v17794_v46 }
 0x5f7   : > { %v13448_v48 = vpop.f32.mrf.mxu0 }
 0x5f8   : > { %19591 = vst [vmem:[#allocation83_spill] sm:$0xff] %v18000_v47  ;;  %v13449_v49 = vadd.f32 %v13448_v48, %v13447_v45 }
 0x5f9   : > { %v13450_v50 = vpop.f32.mrf.mxu0 }
 0x5fa   : > { %v18003_v52 = vadd.f32 %v13449_v49, %v17797_v51 }
 0x5fb   : > { %v13451_v53 = vpop.f32.mrf.mxu0 }
 0x5fc   : > { %19592 = vst [vmem:[#allocation84_spill] sm:$0xff] %v18003_v52  ;;  %v13452_v54 = vadd.f32 %v13451_v53, %v13450_v50 }
 0x5fd   : > { %v13453_v55 = vpop.f32.mrf.mxu0 }
 0x5fe   : > { %v18006_v57 = vadd.f32 %v13452_v54, %v17800_v56 }
 0x5ff   : > { %v13454_v41 = vpop.f32.mrf.mxu0 }
 0x600   : > { %19593 = vst [vmem:[#allocation85_spill] sm:$0xff] %v18006_v57  ;;  %v13455_v58 = vadd.f32 %v13454_v41, %v13453_v55 }
 0x601   : > { %v13456_v59 = vpop.f32.mrf.mxu0 }
 0x602   : > { %v18009_v60 = vadd.f32 %v13455_v58, %v17803_v61 }
 0x603   : > { %v13457_v46 = vpop.f32.mrf.mxu0 }
 0x604   : > { %19594 = vst [vmem:[#allocation86_spill] sm:$0xff] %v18009_v60  ;;  %v13458_v62 = vadd.f32 %v13457_v46, %v13456_v59 }
 0x605   : > { %v13459_v63 = vpop.f32.mrf.mxu0 }
 0x606   : > { %v18012_v0 = vadd.f32 %v13458_v62, %v17806_v34 }
 0x607   : > { %v13460_v51 = vpop.f32.mrf.mxu0 }
 0x608   : > { %19595 = vst [vmem:[#allocation87_spill] sm:$0xff] %v18012_v0  ;;  %v13461_v36 = vadd.f32 %v13460_v51, %v13459_v63 }
 0x609   : > { %v13462_v37 = vpop.f32.mrf.mxu0 }
 0x60a   : > { %v18015_v38 = vadd.f32 %v13461_v36, %v17809_v12 }
 0x60b   : > { %v13463_v56 = vpop.f32.mrf.mxu0 }
 0x60c   : > { %19596 = vst [vmem:[#allocation88_spill] sm:$0xff] %v18015_v38  ;;  %v13464_v39 = vadd.f32 %v13463_v56, %v13462_v37 }
 0x60d   : > { %v14645_v40 = vpop.f32.mrf.mxu0 }
 0x60e   : > { %v18018_v43 = vadd.f32 %v13464_v39, %v17812_v19 }
 0x60f   : > { %v18020_v61 = vpop.f32.mrf.mxu0 }
 0x610   : > { %19597 = vst [vmem:[#allocation89_spill] sm:$0xff] %v18018_v43 }
 0x611   : > { %v14648_v44 = vpop.f32.mrf.mxu0 }
 0x613   : > { %v2984_v45 = vpop.f32.mrf.mxu0 }
 0x615   : > { %v14651_v48 = vpop.f32.mrf.mxu0 }
 0x617   : > { %v2994_v49 = vpop.f32.mrf.mxu0 }
 0x619   : > { %v14654_v34 = vpop.f32.mrf.mxu0 }
 0x61b   : > { %v3004_v50 = vpop.f32.mrf.mxu0 }
 0x61d   : > { %v14657_v53 = vpop.f32.mrf.mxu0 }
 0x61f   : > { %v3014_v54 = vpop.f32.mrf.mxu0 }
 0x621   : > { %v14660_v55 = vpop.f32.mrf.mxu0 }
 0x623   : > { %v3024_v41 = vpop.f32.mrf.mxu0 }
 0x625   : > { %v14663_v12 = vpop.f32.mrf.mxu0 }
 0x627   : > { %v3034_v58 = vpop.f32.mrf.mxu0 }
 0x629   : > { %v14666_v59 = vpop.f32.mrf.mxu0 }
 0x62b   : > { %v3044_v46 = vpop.f32.mrf.mxu0 }
 0x62d   : > { %v14669_v62 = vpop.f32.mrf.mxu0 }
 0x62f   : > { %v3054_v63 = vpop.f32.mrf.mxu0 }
 0x631   : > { %v14672_v19 = vpop.f32.mrf.mxu0 }
 0x633   : > { %v3064_v51 = vpop.f32.mrf.mxu0 }
 0x635   : > { %v14675_v36 = vpop.f32.mrf.mxu0 }
 0x637   : > { %v3074_v37 = vpop.f32.mrf.mxu0 }
 0x639   : > { %v14678_v56 = vpop.f32.mrf.mxu0 }
 0x63b   : > { %v3084_v39 = vpop.f32.mrf.mxu0 }
 0x63d   : > { %v14681_v43 = vpop.f32.mrf.mxu0 }
 0x63f   : > { %v3094_v38 = vpop.f32.mrf.mxu0 }
 0x641   : > { %v14684_v0 = vpop.f32.mrf.mxu0 }
 0x643   : > { %v3104_v60 = vpop.f32.mrf.mxu0 }
 0x645   : > { %v14687_v57 = vpop.f32.mrf.mxu0 }
 0x647   : > { %v3114_v52 = vpop.f32.mrf.mxu0 }
 0x649   : > { %v14690_v47 = vpop.f32.mrf.mxu0 }
 0x64a   : > { %13498 = vmatprep.subr.mxu1 %v14690_v47  ;;  %v12504_v47 = vld [vmem:[%s19508_s6 + $0x14] sm:$0x7] }
 0x64b   : > { %v3124_v42 = vpop.f32.mrf.mxu0  ;;  %13499 = vmatpush3.msra.mxu1 %v14666_v59 }
 0x64c   : > { %13500 = vmatprep.subr.mxu1 %v3124_v42  ;;  %v12438_v42 = vld [vmem:[%s19536_s22 + $0x200] sm:$0xff] }
 0x64d   : > { %13501 = vmatpush3.msra.mxu1 %v3044_v46 }
 0x64e   : > { %13502 = vmatprep.subr.mxu1 %v14687_v57  ;;  %v12440_v57 = vld [vmem:[%s19536_s22 + $0x210] sm:$0xff] }
 0x64f   : > { %13503 = vmatpush3.msra.mxu1 %v14663_v12 }
 0x650   : > { %13504 = vmatprep.subr.mxu1 %v3114_v52  ;;  %v12441_v52 = vld [vmem:[%s19536_s22 + $0x218] sm:$0xff] }
 0x651   : > { %13505 = vmatpush3.msra.mxu1 %v3034_v58  ;;  %v19598_v58 = vld [vmem:[#allocation82_spill] sm:$0xff] }
 0x652   : > { %13506 = vmatprep.subr.mxu1 %v14684_v0  ;;  %v12442_v0 = vld [vmem:[%s19536_s22 + $0x220] sm:$0xff] }
 0x653   : > { %13507 = vmatpush3.msra.mxu1 %v14660_v55 }
 0x654   : > { %13508 = vmatprep.subr.mxu1 %v3104_v60  ;;  %v12443_v60 = vld [vmem:[%s19536_s22 + $0x228] sm:$0xff] }
 0x655   : > { %13509 = vmatpush3.msra.mxu1 %v3024_v41 }
 0x656   : > { %13510 = vmatprep.subr.mxu1 %v14681_v43  ;;  %v12447_v43 = vld [vmem:[%s19536_s22 + $0x248] sm:$0xff] }
 0x657   : > { %13511 = vmatpush3.msra.mxu1 %v14657_v53  ;;  %v12489_v53 = vld [vmem:[%s19536_s22 + $0x288] sm:$0xff] }
 0x658   : > { %13512 = vmatprep.subr.mxu1 %v3094_v38  ;;  %v12445_v38 = vld [vmem:[%s19536_s22 + $0x238] sm:$0xff]  ;;  %3557 = vmatprep.mubr.f32.mxu0 %v12489_v53 }
 0x659   : > { %13513 = vmatpush3.msra.mxu1 %v3014_v54 }
 0x65a   : > { %13514 = vmatprep.subr.mxu1 %v14678_v56 }
 0x65b   : > { %13515 = vmatpush3.msra.mxu1 %v14654_v34  ;;  %v12453_v34 = vld [vmem:[%s19536_s22 + $0x278] sm:$0xff] }
 0x65c   : > { %13516 = vmatprep.subr.mxu1 %v3084_v39  ;;  %v19602_v39 = vld [vmem:[#allocation84_spill] sm:$0xff] }
 0x65d   : > { %13517 = vmatpush3.msra.mxu1 %v3004_v50  ;;  %v12452_v50 = vld [vmem:[%s19536_s22 + $0x270] sm:$0xff] }
 0x65e   : > { %13518 = vmatprep.subr.mxu1 %v14675_v36 }
 0x65f   : > { %13519 = vmatpush3.msra.mxu1 %v14651_v48  ;;  %v12451_v48 = vld [vmem:[%s19536_s22 + $0x268] sm:$0xff] }
 0x660   : > { %13520 = vmatprep.subr.mxu1 %v3074_v37 }
 0x661   : > { %13521 = vmatpush3.msra.mxu1 %v2994_v49  ;;  %v12450_v49 = vld [vmem:[%s19536_s22 + $0x260] sm:$0xff] }
 0x662   : > { %13522 = vmatprep.subr.mxu1 %v14672_v19  ;;  %v19600_v19 = vld [vmem:[#allocation83_spill] sm:$0xff] }
 0x663   : > { %13523 = vmatpush3.msra.mxu1 %v14648_v44  ;;  %v12449_v44 = vld [vmem:[%s19536_s22 + $0x258] sm:$0xff] }
 0x664   : > { %13524 = vmatprep.subr.mxu1 %v3064_v51 }
 0x665   : > { %13525 = vmatpush3.msra.mxu1 %v2984_v45  ;;  %v12448_v45 = vld [vmem:[%s19536_s22 + $0x250] sm:$0xff] }
 0x666   : > { %13526 = vmatprep.subr.mxu1 %v14669_v62 }
 0x667   : > { %13527 = vmatpush3.msra.mxu1 %v14645_v40  ;;  %v12444_v40 = vld [vmem:[%s19536_s22 + $0x230] sm:$0xff] }
 0x668   : > { %13528 = vmatprep.subr.mxu1 %v3054_v63 }
 0x669   : > { %13529 = vmatpush3.msra.mxu1 %v18020_v61  ;;  %v12446_v61 = vld [vmem:[%s19536_s22 + $0x240] sm:$0xff] }
 0x66a   : > { %3198 = vmatmul.mubr.f32.vlgmr.msra.gmra.mxu1 %v12438_v42  ;;  %14691 = vmatprep.subr.msk.mxu1 %vm1480_vm0, %v12504_v47 }
 0x66b   : > { %3202 = vmatprep.mubr.f32.mxu1 %v12441_v52  ;;  %14692 = vmatpush3.msk.msra.mxu1 %vm1480_vm0, %v12504_v47 }
 0x66e   : > { %3203 = vmatmul.mubr.f32.gmra.mxu1 %v12440_v57 }
 0x66f   : > { %3207 = vmatprep.mubr.f32.mxu1 %v12443_v60  ;;  %v19604_v60 = vld [vmem:[#allocation85_spill] sm:$0xff] }
 0x672   : > { %3208 = vmatmul.mubr.f32.gmra.mxu1 %v12442_v0 }
 0x673   : > { %3212 = vmatprep.mubr.f32.mxu1 %v12445_v38 }
 0x676   : > { %3213 = vmatmul.mubr.f32.gmra.mxu1 %v12444_v40 }
 0x677   : > { %3217 = vmatprep.mubr.f32.mxu1 %v12447_v43 }
 0x67a   : > { %3218 = vmatmul.mubr.f32.gmra.mxu1 %v12446_v61  ;;  %v19606_v61 = vld [vmem:[#allocation86_spill] sm:$0xff] }
 0x67b   : > { %3222 = vmatprep.mubr.f32.mxu1 %v12449_v44 }
 0x67e   : > { %3223 = vmatmul.mubr.f32.gmra.mxu1 %v12448_v45 }
 0x67f   : > { %3227 = vmatprep.mubr.f32.mxu1 %v12451_v48 }
 0x682   : > { %3228 = vmatmul.mubr.f32.gmra.mxu1 %v12450_v49 }
 0x683   : > { %3232 = vmatprep.mubr.f32.mxu1 %v12453_v34  ;;  %v19608_v34 = vld [vmem:[#allocation87_spill] sm:$0xff] }
 0x686   : > { %3233 = vmatmul.mubr.f32.gmra.mxu1 %v12452_v50 }
 0x687   : > { %14693 = vmatprep.mubr.msk.f32.mxu1 %vm1383_vm1, %v17836_v1 }
 0x68a   : > { %14694 = vmatmul.mubr.msk.f32.vlgmr.msra.gmra.mxu1 %vm1383_vm1, %v17841_v7 }
 0x68b   : > { %14696 = vmatprep.mubr.msk.f32.mxu1 %vm1383_vm1, %v17846_v8 }
 0x68e   : > { %14697 = vmatmul.mubr.msk.f32.gmra.mxu1 %vm1383_vm1, %v17851_v9 }
 0x68f   : > { %14699 = vmatprep.mubr.msk.f32.mxu1 %vm1383_vm1, %v17856_v11 }
 0x692   : > { %14700 = vmatmul.mubr.msk.f32.gmra.mxu1 %vm1383_vm1, %v17861_v13 }
 0x693   : > { %14702 = vmatprep.mubr.msk.f32.mxu1 %vm1383_vm1, %v17866_v15 }
 0x696   : > { %14703 = vmatmul.mubr.msk.f32.gmra.mxu1 %vm1383_vm1, %v17871_v16 }
 0x697   : > { %14705 = vmatprep.mubr.msk.f32.mxu1 %vm1383_vm1, %v17876_v18 }
 0x69a   : > { %14706 = vmatmul.mubr.msk.f32.gmra.mxu1 %vm1383_vm1, %v17881_v20 }
 0x69b   : > { %14708 = vmatprep.mubr.msk.f32.mxu1 %vm1383_vm1, %v17886_v21 }
 0x69e   : > { %14709 = vmatmul.mubr.msk.f32.gmra.mxu1 %vm1383_vm1, %v17891_v23 }
 0x69f   : > { %14711 = vmatprep.mubr.msk.f32.mxu1 %vm1383_vm1, %v17896_v25 }
 0x6a2   : > { %14712 = vmatmul.mubr.msk.f32.gmra.mxu1 %vm1383_vm1, %v17901_v26 }
 0x6a3   : > { %14714 = vmatprep.mubr.msk.f32.mxu1 %vm1383_vm1, %v17906_v27 }
 0x6a6   : > { %14715 = vmatmul.mubr.msk.f32.gmra.mxu1 %vm1383_vm1, %v17911_v10 }
 0x6a7   : > { %14717 = vmatprep.mubr.msk.f32.mxu1 %vm1383_vm1, %v17916_v17 }
 0x6aa   : > { %14718 = vmatmul.mubr.msk.f32.gmra.mxu1 %vm1383_vm1, %v17921_v24 }
 0x6ab   : > { %14720 = vmatprep.mubr.msk.f32.mxu1 %vm1383_vm1, %v17926_v31 }
 0x6ae   : > { %14721 = vmatmul.mubr.msk.f32.gmra.mxu1 %vm1383_vm1, %v17931_v6 }
 0x6af   : > { %14723 = vmatprep.mubr.msk.f32.mxu1 %vm1383_vm1, %v17936_v14 }
 0x6b2   : > { %14724 = vmatmul.mubr.msk.f32.gmra.mxu1 %vm1383_vm1, %v17941_v22 }
 0x6b3   : > { %14726 = vmatprep.mubr.msk.f32.mxu1 %vm1383_vm1, %v17946_v28 }
 0x6b6   : > { %14727 = vmatmul.mubr.msk.f32.gmra.mxu1 %vm1383_vm1, %v17951_v29 }
 0x6b7   : > { %14729 = vmatprep.mubr.msk.f32.mxu1 %vm1383_vm1, %v17956_v30 }
 0x6ba   : > { %14730 = vmatmul.mubr.msk.f32.gmra.mxu1 %vm1383_vm1, %v17961_v32 }
 0x6bb   : > { %14732 = vmatprep.mubr.msk.f32.mxu1 %vm1383_vm1, %v17966_v35 }
 0x6be   : > { %14733 = vmatmul.mubr.msk.f32.gmra.mxu1 %vm1383_vm1, %v17971_v2 }
 0x6bf   : > { %14735 = vmatprep.mubr.msk.f32.mxu1 %vm1383_vm1, %v17976_v3 }
 0x6c2   : > { %14736 = vmatmul.mubr.msk.f32.gmra.mxu1 %vm1383_vm1, %v17981_v4 }
 0x6c3   : > { %14738 = vmatprep.mubr.msk.f32.mxu1 %vm1383_vm1, %v17986_v5 }
 0x6c6   : > { %14739 = vmatmul.mubr.msk.f32.gmra.mxu1 %vm1383_vm1, %v17991_v33 }
 0x72a   : > { %v13530_v54 = vpop.f32.mrf.mxu1 }
 0x72c   : > { %v13531_v55 = vpop.f32.mrf.mxu1 }
 0x72d   : > { %v13532_v41 = vadd.f32 %v13531_v55, %v13530_v54 }
 0x72e   : > { %v13533_v12 = vpop.f32.mrf.mxu1 }
 0x72f   : > { %v18107_v59 = vadd.f32 %v13532_v41, %v19598_v58  ;;  %v19610_v41 = vld [vmem:[#allocation88_spill] sm:$0xff] }
 0x730   : > { %v13534_v46 = vpop.f32.mrf.mxu1 }
 0x731   : > { %19599 = vst [vmem:[#allocation90_spill] sm:$0xff] %v18107_v59  ;;  %v13535_v62 = vadd.f32 %v13534_v46, %v13533_v12 }
 0x732   : > { %v13536_v63 = vpop.f32.mrf.mxu1 }
 0x733   : > { %v18110_v51 = vadd.f32 %v13535_v62, %v19600_v19 }
 0x734   : > { %v13537_v36 = vpop.f32.mrf.mxu1 }
 0x735   : > { %19601 = vst [vmem:[#allocation91_spill] sm:$0xff] %v18110_v51  ;;  %v13538_v37 = vadd.f32 %v13537_v36, %v13536_v63  ;;  %v19612_v63 = vld [vmem:[#allocation89_spill] sm:$0xff] }
 0x736   : > { %v13539_v56 = vpop.f32.mrf.mxu1 }
 0x737   : > { %v18113_v42 = vadd.f32 %v13538_v37, %v19602_v39 }
 0x738   : > { %v13540_v47 = vpop.f32.mrf.mxu1 }
 0x739   : > { %19603 = vst [vmem:[#allocation92_spill] sm:$0xff] %v18113_v42  ;;  %v13541_v52 = vadd.f32 %v13540_v47, %v13539_v56 }
 0x73a   : > { %v13542_v57 = vpop.f32.mrf.mxu1 }
 0x73b   : > { %v18116_v0 = vadd.f32 %v13541_v52, %v19604_v60 }
 0x73c   : > { %v13543_v38 = vpop.f32.mrf.mxu1 }
 0x73d   : > { %19605 = vst [vmem:[#allocation93_spill] sm:$0xff] %v18116_v0  ;;  %v13544_v40 = vadd.f32 %v13543_v38, %v13542_v57 }
 0x73e   : > { %v13545_v43 = vpop.f32.mrf.mxu1 }
 0x73f   : > { %v18119_v44 = vadd.f32 %v13544_v40, %v19606_v61 }
 0x740   : > { %v13546_v45 = vpop.f32.mrf.mxu1 }
 0x741   : > { %19607 = vst [vmem:[#allocation94_spill] sm:$0xff] %v18119_v44  ;;  %v13547_v48 = vadd.f32 %v13546_v45, %v13545_v43 }
 0x742   : > { %v13548_v49 = vpop.f32.mrf.mxu1 }
 0x743   : > { %v18122_v50 = vadd.f32 %v13547_v48, %v19608_v34 }
 0x744   : > { %v13549_v53 = vpop.f32.mrf.mxu1 }
 0x745   : > { %19609 = vst [vmem:[#allocation95_spill] sm:$0xff] %v18122_v50  ;;  %v13550_v54 = vadd.f32 %v13549_v53, %v13548_v49 }
 0x746   : > { %v13551_v55 = vpop.f32.mrf.mxu1 }
 0x747   : > { %v18125_v12 = vadd.f32 %v13550_v54, %v19610_v41 }
 0x748   : > { %v13552_v58 = vpop.f32.mrf.mxu1 }
 0x749   : > { %19611 = vst [vmem:[#allocation96_spill] sm:$0xff] %v18125_v12  ;;  %v13553_v46 = vadd.f32 %v13552_v58, %v13551_v55 }
 0x74a   : > { %v14695_v62 = vpop.f32.mrf.mxu1 }
 0x74b   : > { %v18128_v19 = vadd.f32 %v13553_v46, %v19612_v63 }
 0x74c   : > { %v18130_v36 = vpop.f32.mrf.mxu1 }
 0x74d   : > { %19613 = vst [vmem:[#allocation97_spill] sm:$0xff] %v18128_v19 }
 0x74e   : > { %v14698_v37 = vpop.f32.mrf.mxu1 }
 0x750   : > { %v3344_v56 = vpop.f32.mrf.mxu1 }
 0x752   : > { %v14701_v39 = vpop.f32.mrf.mxu1 }
 0x754   : > { %v3354_v47 = vpop.f32.mrf.mxu1 }
 0x756   : > { %v14704_v52 = vpop.f32.mrf.mxu1 }
 0x758   : > { %v3364_v57 = vpop.f32.mrf.mxu1 }
 0x75a   : > { %v14707_v60 = vpop.f32.mrf.mxu1 }
 0x75c   : > { %v3374_v38 = vpop.f32.mrf.mxu1 }
 0x75e   : > { %v14710_v40 = vpop.f32.mrf.mxu1 }
 0x760   : > { %v3384_v43 = vpop.f32.mrf.mxu1 }
 0x762   : > { %v14713_v61 = vpop.f32.mrf.mxu1 }
 0x764   : > { %v3394_v45 = vpop.f32.mrf.mxu1 }
 0x766   : > { %v14716_v48 = vpop.f32.mrf.mxu1 }
 0x768   : > { %v3404_v49 = vpop.f32.mrf.mxu1 }
 0x76a   : > { %v14719_v34 = vpop.f32.mrf.mxu1 }
 0x76c   : > { %v3414_v53 = vpop.f32.mrf.mxu1 }
 0x76e   : > { %v14722_v54 = vpop.f32.mrf.mxu1 }
 0x770   : > { %v3424_v55 = vpop.f32.mrf.mxu1 }
 0x772   : > { %v14725_v41 = vpop.f32.mrf.mxu1 }
 0x774   : > { %v3434_v58 = vpop.f32.mrf.mxu1 }
 0x776   : > { %v14728_v46 = vpop.f32.mrf.mxu1 }
 0x778   : > { %v3444_v63 = vpop.f32.mrf.mxu1 }
 0x77a   : > { %v14731_v19 = vpop.f32.mrf.mxu1 }
 0x77c   : > { %v3454_v12 = vpop.f32.mrf.mxu1 }
 0x77e   : > { %v14734_v50 = vpop.f32.mrf.mxu1 }
 0x780   : > { %v3464_v44 = vpop.f32.mrf.mxu1 }
 0x782   : > { %v14737_v0 = vpop.f32.mrf.mxu1 }
 0x784   : > { %v3474_v42 = vpop.f32.mrf.mxu1 }
 0x786   : > { %v14740_v51 = vpop.f32.mrf.mxu1 }
 0x787   : > { %13587 = vmatprep.subr.mxu0 %v14740_v51  ;;  %v12554_v51 = vld [vmem:[%s19508_s6 + $0x18] sm:$0x7] }
 0x788   : > { %v3484_v59 = vpop.f32.mrf.mxu1  ;;  %13588 = vmatpush3.msra.mxu0 %v14716_v48 }
 0x789   : > { %13589 = vmatprep.subr.mxu0 %v3484_v59  ;;  %v12488_v59 = vld [vmem:[%s19536_s22 + $0x280] sm:$0xff] }
 0x78a   : > { %13590 = vmatpush3.msra.mxu0 %v3404_v49 }
 0x78b   : > { %13591 = vmatprep.subr.mxu0 %v14737_v0  ;;  %v12490_v0 = vld [vmem:[%s19536_s22 + $0x290] sm:$0xff] }
 0x78c   : > { %13592 = vmatpush3.msra.mxu0 %v14713_v61 }
 0x78d   : > { %13593 = vmatprep.subr.mxu0 %v3474_v42  ;;  %v12491_v42 = vld [vmem:[%s19536_s22 + $0x298] sm:$0xff] }
 0x78e   : > { %13594 = vmatpush3.msra.mxu0 %v3394_v45  ;;  %v19614_v45 = vld [vmem:[#allocation90_spill] sm:$0xff] }
 0x78f   : > { %13595 = vmatprep.subr.mxu0 %v14734_v50  ;;  %v12492_v50 = vld [vmem:[%s19536_s22 + $0x2a0] sm:$0xff] }
 0x790   : > { %13596 = vmatpush3.msra.mxu0 %v14710_v40 }
 0x791   : > { %13597 = vmatprep.subr.mxu0 %v3464_v44  ;;  %v12493_v44 = vld [vmem:[%s19536_s22 + $0x2a8] sm:$0xff] }
 0x792   : > { %13598 = vmatpush3.msra.mxu0 %v3384_v43 }
 0x793   : > { %13599 = vmatprep.subr.mxu0 %v14731_v19  ;;  %v12497_v19 = vld [vmem:[%s19536_s22 + $0x2c8] sm:$0xff] }
 0x794   : > { %13600 = vmatpush3.msra.mxu0 %v14707_v60  ;;  %v12539_v60 = vld [vmem:[%s19536_s22 + $0x308] sm:$0xff] }
 0x795   : > { %13601 = vmatprep.subr.mxu0 %v3454_v12  ;;  %v12495_v12 = vld [vmem:[%s19536_s22 + $0x2b8] sm:$0xff]  ;;  %3917 = vmatprep.mubr.f32.mxu1 %v12539_v60 }
 0x796   : > { %13602 = vmatpush3.msra.mxu0 %v3374_v38 }
 0x797   : > { %13603 = vmatprep.subr.mxu0 %v14728_v46 }
 0x798   : > { %13604 = vmatpush3.msra.mxu0 %v14704_v52  ;;  %v12503_v52 = vld [vmem:[%s19536_s22 + $0x2f8] sm:$0xff] }
 0x799   : > { %13605 = vmatprep.subr.mxu0 %v3444_v63  ;;  %v19618_v63 = vld [vmem:[#allocation92_spill] sm:$0xff] }
 0x79a   : > { %13606 = vmatpush3.msra.mxu0 %v3364_v57  ;;  %v12502_v57 = vld [vmem:[%s19536_s22 + $0x2f0] sm:$0xff] }
 0x79b   : > { %13607 = vmatprep.subr.mxu0 %v14725_v41 }
 0x79c   : > { %13608 = vmatpush3.msra.mxu0 %v14701_v39  ;;  %v12501_v39 = vld [vmem:[%s19536_s22 + $0x2e8] sm:$0xff] }
 0x79d   : > { %13609 = vmatprep.subr.mxu0 %v3434_v58 }
 0x79e   : > { %13610 = vmatpush3.msra.mxu0 %v3354_v47  ;;  %v12500_v47 = vld [vmem:[%s19536_s22 + $0x2e0] sm:$0xff] }
 0x79f   : > { %13611 = vmatprep.subr.mxu0 %v14722_v54  ;;  %v19616_v54 = vld [vmem:[#allocation91_spill] sm:$0xff] }
 0x7a0   : > { %13612 = vmatpush3.msra.mxu0 %v14698_v37  ;;  %v12499_v37 = vld [vmem:[%s19536_s22 + $0x2d8] sm:$0xff] }
 0x7a1   : > { %13613 = vmatprep.subr.mxu0 %v3424_v55 }
 0x7a2   : > { %13614 = vmatpush3.msra.mxu0 %v3344_v56  ;;  %v12498_v56 = vld [vmem:[%s19536_s22 + $0x2d0] sm:$0xff] }
 0x7a3   : > { %13615 = vmatprep.subr.mxu0 %v14719_v34 }
 0x7a4   : > { %13616 = vmatpush3.msra.mxu0 %v14695_v62  ;;  %v12494_v62 = vld [vmem:[%s19536_s22 + $0x2b0] sm:$0xff] }
 0x7a5   : > { %13617 = vmatprep.subr.mxu0 %v3414_v53 }
 0x7a6   : > { %13618 = vmatpush3.msra.mxu0 %v18130_v36  ;;  %v12496_v36 = vld [vmem:[%s19536_s22 + $0x2c0] sm:$0xff] }
 0x7a7   : > { %3558 = vmatmul.mubr.f32.vlgmr.msra.gmra.mxu0 %v12488_v59  ;;  %14741 = vmatprep.subr.msk.mxu0 %vm1480_vm0, %v12554_v51 }
 0x7a8   : > { %3562 = vmatprep.mubr.f32.mxu0 %v12491_v42  ;;  %14742 = vmatpush3.msk.msra.mxu0 %vm1480_vm0, %v12554_v51 }
 0x7ab   : > { %3563 = vmatmul.mubr.f32.gmra.mxu0 %v12490_v0 }
 0x7ac   : > { %3567 = vmatprep.mubr.f32.mxu0 %v12493_v44  ;;  %v19620_v44 = vld [vmem:[#allocation93_spill] sm:$0xff] }
 0x7af   : > { %3568 = vmatmul.mubr.f32.gmra.mxu0 %v12492_v50 }
 0x7b0   : > { %3572 = vmatprep.mubr.f32.mxu0 %v12495_v12 }
 0x7b3   : > { %3573 = vmatmul.mubr.f32.gmra.mxu0 %v12494_v62 }
 0x7b4   : > { %3577 = vmatprep.mubr.f32.mxu0 %v12497_v19 }
 0x7b7   : > { %3578 = vmatmul.mubr.f32.gmra.mxu0 %v12496_v36  ;;  %v19622_v36 = vld [vmem:[#allocation94_spill] sm:$0xff] }
 0x7b8   : > { %3582 = vmatprep.mubr.f32.mxu0 %v12499_v37 }
 0x7bb   : > { %3583 = vmatmul.mubr.f32.gmra.mxu0 %v12498_v56 }
 0x7bc   : > { %3587 = vmatprep.mubr.f32.mxu0 %v12501_v39 }
 0x7bf   : > { %3588 = vmatmul.mubr.f32.gmra.mxu0 %v12500_v47 }
 0x7c0   : > { %3592 = vmatprep.mubr.f32.mxu0 %v12503_v52  ;;  %v19624_v52 = vld [vmem:[#allocation95_spill] sm:$0xff] }
 0x7c3   : > { %3593 = vmatmul.mubr.f32.gmra.mxu0 %v12502_v57 }
 0x7c4   : > { %14743 = vmatprep.mubr.msk.f32.mxu0 %vm1383_vm1, %v17836_v1 }
 0x7c7   : > { %14744 = vmatmul.mubr.msk.f32.vlgmr.msra.gmra.mxu0 %vm1383_vm1, %v17841_v7 }
 0x7c8   : > { %14746 = vmatprep.mubr.msk.f32.mxu0 %vm1383_vm1, %v17846_v8 }
 0x7cb   : > { %14747 = vmatmul.mubr.msk.f32.gmra.mxu0 %vm1383_vm1, %v17851_v9 }
 0x7cc   : > { %14749 = vmatprep.mubr.msk.f32.mxu0 %vm1383_vm1, %v17856_v11 }
 0x7cf   : > { %14750 = vmatmul.mubr.msk.f32.gmra.mxu0 %vm1383_vm1, %v17861_v13 }
 0x7d0   : > { %14752 = vmatprep.mubr.msk.f32.mxu0 %vm1383_vm1, %v17866_v15 }
 0x7d3   : > { %14753 = vmatmul.mubr.msk.f32.gmra.mxu0 %vm1383_vm1, %v17871_v16 }
 0x7d4   : > { %14755 = vmatprep.mubr.msk.f32.mxu0 %vm1383_vm1, %v17876_v18 }
 0x7d7   : > { %14756 = vmatmul.mubr.msk.f32.gmra.mxu0 %vm1383_vm1, %v17881_v20 }
 0x7d8   : > { %14758 = vmatprep.mubr.msk.f32.mxu0 %vm1383_vm1, %v17886_v21 }
 0x7db   : > { %14759 = vmatmul.mubr.msk.f32.gmra.mxu0 %vm1383_vm1, %v17891_v23 }
 0x7dc   : > { %14761 = vmatprep.mubr.msk.f32.mxu0 %vm1383_vm1, %v17896_v25 }
 0x7df   : > { %14762 = vmatmul.mubr.msk.f32.gmra.mxu0 %vm1383_vm1, %v17901_v26 }
 0x7e0   : > { %14764 = vmatprep.mubr.msk.f32.mxu0 %vm1383_vm1, %v17906_v27 }
 0x7e3   : > { %14765 = vmatmul.mubr.msk.f32.gmra.mxu0 %vm1383_vm1, %v17911_v10 }
 0x7e4   : > { %14767 = vmatprep.mubr.msk.f32.mxu0 %vm1383_vm1, %v17916_v17 }
 0x7e7   : > { %14768 = vmatmul.mubr.msk.f32.gmra.mxu0 %vm1383_vm1, %v17921_v24 }
 0x7e8   : > { %14770 = vmatprep.mubr.msk.f32.mxu0 %vm1383_vm1, %v17926_v31 }
 0x7eb   : > { %14771 = vmatmul.mubr.msk.f32.gmra.mxu0 %vm1383_vm1, %v17931_v6 }
 0x7ec   : > { %14773 = vmatprep.mubr.msk.f32.mxu0 %vm1383_vm1, %v17936_v14 }
 0x7ef   : > { %14774 = vmatmul.mubr.msk.f32.gmra.mxu0 %vm1383_vm1, %v17941_v22 }
 0x7f0   : > { %14776 = vmatprep.mubr.msk.f32.mxu0 %vm1383_vm1, %v17946_v28 }
 0x7f3   : > { %14777 = vmatmul.mubr.msk.f32.gmra.mxu0 %vm1383_vm1, %v17951_v29 }
 0x7f4   : > { %14779 = vmatprep.mubr.msk.f32.mxu0 %vm1383_vm1, %v17956_v30 }
 0x7f7   : > { %14780 = vmatmul.mubr.msk.f32.gmra.mxu0 %vm1383_vm1, %v17961_v32 }
 0x7f8   : > { %14782 = vmatprep.mubr.msk.f32.mxu0 %vm1383_vm1, %v17966_v35 }
 0x7fb   : > { %14783 = vmatmul.mubr.msk.f32.gmra.mxu0 %vm1383_vm1, %v17971_v2 }
 0x7fc   : > { %14785 = vmatprep.mubr.msk.f32.mxu0 %vm1383_vm1, %v17976_v3 }
 0x7ff   : > { %14786 = vmatmul.mubr.msk.f32.gmra.mxu0 %vm1383_vm1, %v17981_v4 }
 0x800   : > { %14788 = vmatprep.mubr.msk.f32.mxu0 %vm1383_vm1, %v17986_v5 }
 0x803   : > { %14789 = vmatmul.mubr.msk.f32.gmra.mxu0 %vm1383_vm1, %v17991_v33 }
 0x867   : > { %v13619_v38 = vpop.f32.mrf.mxu0 }
 0x869   : > { %v13620_v40 = vpop.f32.mrf.mxu0 }
 0x86a   : > { %v13621_v43 = vadd.f32 %v13620_v40, %v13619_v38 }
 0x86b   : > { %v13622_v61 = vpop.f32.mrf.mxu0 }
 0x86c   : > { %v18217_v48 = vadd.f32 %v13621_v43, %v19614_v45  ;;  %v19626_v43 = vld [vmem:[#allocation96_spill] sm:$0xff] }
 0x86d   : > { %v13623_v49 = vpop.f32.mrf.mxu0 }
 0x86e   : > { %19615 = vst [vmem:[#allocation98_spill] sm:$0xff] %v18217_v48  ;;  %v13624_v34 = vadd.f32 %v13623_v49, %v13622_v61 }
 0x86f   : > { %v13625_v53 = vpop.f32.mrf.mxu0 }
 0x870   : > { %v18220_v55 = vadd.f32 %v13624_v34, %v19616_v54 }
 0x871   : > { %v13626_v41 = vpop.f32.mrf.mxu0 }
 0x872   : > { %19617 = vst [vmem:[#allocation99_spill] sm:$0xff] %v18220_v55  ;;  %v13627_v58 = vadd.f32 %v13626_v41, %v13625_v53  ;;  %v19628_v53 = vld [vmem:[#allocation97_spill] sm:$0xff] }
 0x873   : > { %v13628_v46 = vpop.f32.mrf.mxu0 }
 0x874   : > { %v18223_v59 = vadd.f32 %v13627_v58, %v19618_v63 }
 0x875   : > { %v13629_v51 = vpop.f32.mrf.mxu0 }
 0x876   : > { %19619 = vst [vmem:[#allocation100_spill] sm:$0xff] %v18223_v59  ;;  %v13630_v42 = vadd.f32 %v13629_v51, %v13628_v46 }
 0x877   : > { %v13631_v0 = vpop.f32.mrf.mxu0 }
 0x878   : > { %v18226_v50 = vadd.f32 %v13630_v42, %v19620_v44 }
 0x879   : > { %v13632_v12 = vpop.f32.mrf.mxu0 }
 0x87a   : > { %19621 = vst [vmem:[#allocation101_spill] sm:$0xff] %v18226_v50  ;;  %v13633_v62 = vadd.f32 %v13632_v12, %v13631_v0 }
 0x87b   : > { %v13634_v19 = vpop.f32.mrf.mxu0 }
 0x87c   : > { %v18229_v37 = vadd.f32 %v13633_v62, %v19622_v36 }
 0x87d   : > { %v13635_v56 = vpop.f32.mrf.mxu0 }
 0x87e   : > { %19623 = vst [vmem:[#allocation102_spill] sm:$0xff] %v18229_v37  ;;  %v13636_v39 = vadd.f32 %v13635_v56, %v13634_v19 }
 0x87f   : > { %v13637_v47 = vpop.f32.mrf.mxu0 }
 0x880   : > { %v18232_v57 = vadd.f32 %v13636_v39, %v19624_v52 }
 0x881   : > { %v13638_v60 = vpop.f32.mrf.mxu0 }
 0x882   : > { %19625 = vst [vmem:[#allocation103_spill] sm:$0xff] %v18232_v57  ;;  %v13639_v38 = vadd.f32 %v13638_v60, %v13637_v47 }
 0x883   : > { %v13640_v40 = vpop.f32.mrf.mxu0 }
 0x884   : > { %v18235_v61 = vadd.f32 %v13639_v38, %v19626_v43 }
 0x885   : > { %v13641_v45 = vpop.f32.mrf.mxu0 }
 0x886   : > { %19627 = vst [vmem:[#allocation104_spill] sm:$0xff] %v18235_v61  ;;  %v13642_v49 = vadd.f32 %v13641_v45, %v13640_v40 }
 0x887   : > { %v14745_v34 = vpop.f32.mrf.mxu0 }
 0x888   : > { %v18238_v54 = vadd.f32 %v13642_v49, %v19628_v53 }
 0x889   : > { %v18240_v41 = vpop.f32.mrf.mxu0 }
 0x88a   : > { %19629 = vst [vmem:[#allocation105_spill] sm:$0xff] %v18238_v54 }
 0x88b   : > { %v14748_v58 = vpop.f32.mrf.mxu0 }
 0x88d   : > { %v3704_v46 = vpop.f32.mrf.mxu0 }
 0x88f   : > { %v14751_v63 = vpop.f32.mrf.mxu0 }
 0x891   : > { %v3714_v51 = vpop.f32.mrf.mxu0 }
 0x893   : > { %v14754_v42 = vpop.f32.mrf.mxu0 }
 0x895   : > { %v3724_v0 = vpop.f32.mrf.mxu0 }
 0x897   : > { %v14757_v44 = vpop.f32.mrf.mxu0 }
 0x899   : > { %v3734_v12 = vpop.f32.mrf.mxu0 }
 0x89b   : > { %v14760_v62 = vpop.f32.mrf.mxu0 }
 0x89d   : > { %v3744_v19 = vpop.f32.mrf.mxu0 }
 0x89f   : > { %v14763_v36 = vpop.f32.mrf.mxu0 }
 0x8a1   : > { %v3754_v56 = vpop.f32.mrf.mxu0 }
 0x8a3   : > { %v14766_v39 = vpop.f32.mrf.mxu0 }
 0x8a5   : > { %v3764_v47 = vpop.f32.mrf.mxu0 }
 0x8a7   : > { %v14769_v52 = vpop.f32.mrf.mxu0 }
 0x8a9   : > { %v3774_v60 = vpop.f32.mrf.mxu0 }
 0x8ab   : > { %v14772_v38 = vpop.f32.mrf.mxu0 }
 0x8ad   : > { %v3784_v40 = vpop.f32.mrf.mxu0 }
 0x8af   : > { %v14775_v43 = vpop.f32.mrf.mxu0 }
 0x8b1   : > { %v3794_v45 = vpop.f32.mrf.mxu0 }
 0x8b3   : > { %v14778_v49 = vpop.f32.mrf.mxu0 }
 0x8b5   : > { %v3804_v53 = vpop.f32.mrf.mxu0 }
 0x8b7   : > { %v14781_v54 = vpop.f32.mrf.mxu0 }
 0x8b9   : > { %v3814_v61 = vpop.f32.mrf.mxu0 }
 0x8bb   : > { %v14784_v57 = vpop.f32.mrf.mxu0 }
 0x8bd   : > { %v3824_v37 = vpop.f32.mrf.mxu0 }
 0x8bf   : > { %v14787_v50 = vpop.f32.mrf.mxu0 }
 0x8c1   : > { %v3834_v59 = vpop.f32.mrf.mxu0 }
 0x8c3   : > { %v14790_v55 = vpop.f32.mrf.mxu0 }
 0x8c4   : > { %13676 = vmatprep.subr.mxu1 %v14790_v55  ;;  %v12604_v55 = vld [vmem:[%s19508_s6 + $0x1c] sm:$0x7] }
 0x8c5   : > { %v3844_v48 = vpop.f32.mrf.mxu0  ;;  %13677 = vmatpush3.msra.mxu1 %v14766_v39 }
 0x8c6   : > { %13678 = vmatprep.subr.mxu1 %v3844_v48  ;;  %v12538_v48 = vld [vmem:[%s19536_s22 + $0x300] sm:$0xff] }
 0x8c7   : > { %13679 = vmatpush3.msra.mxu1 %v3764_v47 }
 0x8c8   : > { %13680 = vmatprep.subr.mxu1 %v14787_v50  ;;  %v12540_v50 = vld [vmem:[%s19536_s22 + $0x310] sm:$0xff] }
 0x8c9   : > { %13681 = vmatpush3.msra.mxu1 %v14763_v36 }
 0x8ca   : > { %13682 = vmatprep.subr.mxu1 %v3834_v59  ;;  %v12541_v59 = vld [vmem:[%s19536_s22 + $0x318] sm:$0xff] }
 0x8cb   : > { %13683 = vmatpush3.msra.mxu1 %v3754_v56 }
 0x8cc   : > { %13684 = vmatprep.subr.mxu1 %v14784_v57  ;;  %v12542_v57 = vld [vmem:[%s19536_s22 + $0x320] sm:$0xff] }
 0x8cd   : > { %13685 = vmatpush3.msra.mxu1 %v14760_v62 }
 0x8ce   : > { %13686 = vmatprep.subr.mxu1 %v3824_v37  ;;  %v12543_v37 = vld [vmem:[%s19536_s22 + $0x328] sm:$0xff] }
 0x8cf   : > { %13687 = vmatpush3.msra.mxu1 %v3744_v19  ;;  %v19636_v19 = vld [vmem:[#allocation104_spill] sm:$0xff] }
 0x8d0   : > { %13688 = vmatprep.subr.mxu1 %v14781_v54  ;;  %v12547_v54 = vld [vmem:[%s19536_s22 + $0x348] sm:$0xff] }
 0x8d1   : > { %13689 = vmatpush3.msra.mxu1 %v14757_v44 }
 0x8d2   : > { %13690 = vmatprep.subr.mxu1 %v3814_v61  ;;  %v12545_v61 = vld [vmem:[%s19536_s22 + $0x338] sm:$0xff] }
 0x8d3   : > { %13691 = vmatpush3.msra.mxu1 %v3734_v12 }
 0x8d4   : > { %13692 = vmatprep.subr.mxu1 %v14778_v49 }
 0x8d5   : > { %13693 = vmatpush3.msra.mxu1 %v14754_v42  ;;  %v12553_v42 = vld [vmem:[%s19536_s22 + $0x378] sm:$0xff] }
 0x8d6   : > { %13694 = vmatprep.subr.mxu1 %v3804_v53 }
 0x8d7   : > { %13695 = vmatpush3.msra.mxu1 %v3724_v0  ;;  %v12552_v0 = vld [vmem:[%s19536_s22 + $0x370] sm:$0xff] }
 0x8d8   : > { %13696 = vmatprep.subr.mxu1 %v14775_v43 }
 0x8d9   : > { %13697 = vmatpush3.msra.mxu1 %v14751_v63  ;;  %v12551_v63 = vld [vmem:[%s19536_s22 + $0x368] sm:$0xff] }
 0x8da   : > { %13698 = vmatprep.subr.mxu1 %v3794_v45 }
 0x8db   : > { %13699 = vmatpush3.msra.mxu1 %v3714_v51  ;;  %v12550_v51 = vld [vmem:[%s19536_s22 + $0x360] sm:$0xff] }
 0x8dc   : > { %13700 = vmatprep.subr.mxu1 %v14772_v38 }
 0x8dd   : > { %13701 = vmatpush3.msra.mxu1 %v14748_v58  ;;  %v12549_v58 = vld [vmem:[%s19536_s22 + $0x358] sm:$0xff] }
 0x8de   : > { %13702 = vmatprep.subr.mxu1 %v3784_v40 }
 0x8df   : > { %13703 = vmatpush3.msra.mxu1 %v3704_v46  ;;  %v12548_v46 = vld [vmem:[%s19536_s22 + $0x350] sm:$0xff] }
 0x8e0   : > { %13704 = vmatprep.subr.mxu1 %v14769_v52  ;;  %v19637_v52 = vld [vmem:[#allocation105_spill] sm:$0xff] }
 0x8e1   : > { %13705 = vmatpush3.msra.mxu1 %v14745_v34  ;;  %v12544_v34 = vld [vmem:[%s19536_s22 + $0x330] sm:$0xff] }
 0x8e2   : > { %13706 = vmatprep.subr.mxu1 %v3774_v60 }
 0x8e3   : > { %13707 = vmatpush3.msra.mxu1 %v18240_v41  ;;  %v12546_v41 = vld [vmem:[%s19536_s22 + $0x340] sm:$0xff] }
 0x8e4   : > { %3918 = vmatmul.mubr.f32.vlgmr.msra.gmra.mxu1 %v12538_v48  ;;  %14791 = vmatprep.subr.msk.mxu1 %vm1480_vm0, %v12604_v55 }
 0x8e5   : > { %3922 = vmatprep.mubr.f32.mxu1 %v12541_v59  ;;  %14792 = vmatpush3.msk.msra.mxu1 %vm1480_vm0, %v12604_v55 }
 0x8e8   : > { %3923 = vmatmul.mubr.f32.gmra.mxu1 %v12540_v50 }
 0x8e9   : > { %3927 = vmatprep.mubr.f32.mxu1 %v12543_v37 }
 0x8ec   : > { %3928 = vmatmul.mubr.f32.gmra.mxu1 %v12542_v57 }
 0x8ed   : > { %3932 = vmatprep.mubr.f32.mxu1 %v12545_v61 }
 0x8f0   : > { %3933 = vmatmul.mubr.f32.gmra.mxu1 %v12544_v34 }
 0x8f1   : > { %3937 = vmatprep.mubr.f32.mxu1 %v12547_v54 }
 0x8f4   : > { %3938 = vmatmul.mubr.f32.gmra.mxu1 %v12546_v41 }
 0x8f5   : > { %3942 = vmatprep.mubr.f32.mxu1 %v12549_v58 }
 0x8f8   : > { %3943 = vmatmul.mubr.f32.gmra.mxu1 %v12548_v46 }
 0x8f9   : > { %3947 = vmatprep.mubr.f32.mxu1 %v12551_v63 }
 0x8fc   : > { %3948 = vmatmul.mubr.f32.gmra.mxu1 %v12550_v51 }
 0x8fd   : > { %3952 = vmatprep.mubr.f32.mxu1 %v12553_v42 }
 0x900   : > { %3953 = vmatmul.mubr.f32.gmra.mxu1 %v12552_v0 }
 0x901   : > { %14793 = vmatprep.mubr.msk.f32.mxu1 %vm1383_vm1, %v17836_v1  ;;  %v12589_v1 = vld [vmem:[%s19536_s22 + $0x388] sm:$0xff] }
 0x902   : > { %4277 = vmatprep.mubr.f32.mxu0 %v12589_v1 }
 0x904   : > { %14794 = vmatmul.mubr.msk.f32.vlgmr.msra.gmra.mxu1 %vm1383_vm1, %v17841_v7 }
 0x905   : > { %14796 = vmatprep.mubr.msk.f32.mxu1 %vm1383_vm1, %v17846_v8 }
 0x908   : > { %14797 = vmatmul.mubr.msk.f32.gmra.mxu1 %vm1383_vm1, %v17851_v9 }
 0x909   : > { %14799 = vmatprep.mubr.msk.f32.mxu1 %vm1383_vm1, %v17856_v11 }
 0x90c   : > { %14800 = vmatmul.mubr.msk.f32.gmra.mxu1 %vm1383_vm1, %v17861_v13  ;;  %v19630_v13 = vld [vmem:[#allocation98_spill] sm:$0xff] }
 0x90d   : > { %14802 = vmatprep.mubr.msk.f32.mxu1 %vm1383_vm1, %v17866_v15 }
 0x910   : > { %14803 = vmatmul.mubr.msk.f32.gmra.mxu1 %vm1383_vm1, %v17871_v16 }
 0x911   : > { %14805 = vmatprep.mubr.msk.f32.mxu1 %vm1383_vm1, %v17876_v18 }
 0x914   : > { %14806 = vmatmul.mubr.msk.f32.gmra.mxu1 %vm1383_vm1, %v17881_v20 }
 0x915   : > { %14808 = vmatprep.mubr.msk.f32.mxu1 %vm1383_vm1, %v17886_v21  ;;  %v19631_v21 = vld [vmem:[#allocation99_spill] sm:$0xff] }
 0x918   : > { %14809 = vmatmul.mubr.msk.f32.gmra.mxu1 %vm1383_vm1, %v17891_v23 }
 0x919   : > { %14811 = vmatprep.mubr.msk.f32.mxu1 %vm1383_vm1, %v17896_v25 }
 0x91c   : > { %14812 = vmatmul.mubr.msk.f32.gmra.mxu1 %vm1383_vm1, %v17901_v26 }
 0x91d   : > { %14814 = vmatprep.mubr.msk.f32.mxu1 %vm1383_vm1, %v17906_v27 }
 0x920   : > { %14815 = vmatmul.mubr.msk.f32.gmra.mxu1 %vm1383_vm1, %v17911_v10  ;;  %v19632_v10 = vld [vmem:[#allocation100_spill] sm:$0xff] }
 0x921   : > { %14817 = vmatprep.mubr.msk.f32.mxu1 %vm1383_vm1, %v17916_v17 }
 0x924   : > { %14818 = vmatmul.mubr.msk.f32.gmra.mxu1 %vm1383_vm1, %v17921_v24 }
 0x925   : > { %14820 = vmatprep.mubr.msk.f32.mxu1 %vm1383_vm1, %v17926_v31 }
 0x928   : > { %14821 = vmatmul.mubr.msk.f32.gmra.mxu1 %vm1383_vm1, %v17931_v6 }
 0x929   : > { %14823 = vmatprep.mubr.msk.f32.mxu1 %vm1383_vm1, %v17936_v14  ;;  %v19633_v14 = vld [vmem:[#allocation101_spill] sm:$0xff] }
 0x92c   : > { %14824 = vmatmul.mubr.msk.f32.gmra.mxu1 %vm1383_vm1, %v17941_v22 }
 0x92d   : > { %14826 = vmatprep.mubr.msk.f32.mxu1 %vm1383_vm1, %v17946_v28 }
 0x930   : > { %14827 = vmatmul.mubr.msk.f32.gmra.mxu1 %vm1383_vm1, %v17951_v29 }
 0x931   : > { %14829 = vmatprep.mubr.msk.f32.mxu1 %vm1383_vm1, %v17956_v30 }
 0x934   : > { %14830 = vmatmul.mubr.msk.f32.gmra.mxu1 %vm1383_vm1, %v17961_v32  ;;  %v19634_v32 = vld [vmem:[#allocation102_spill] sm:$0xff] }
 0x935   : > { %14832 = vmatprep.mubr.msk.f32.mxu1 %vm1383_vm1, %v17966_v35 }
 0x938   : > { %14833 = vmatmul.mubr.msk.f32.gmra.mxu1 %vm1383_vm1, %v17971_v2 }
 0x939   : > { %14835 = vmatprep.mubr.msk.f32.mxu1 %vm1383_vm1, %v17976_v3 }
 0x93c   : > { %14836 = vmatmul.mubr.msk.f32.gmra.mxu1 %vm1383_vm1, %v17981_v4 }
 0x93d   : > { %14838 = vmatprep.mubr.msk.f32.mxu1 %vm1383_vm1, %v17986_v5  ;;  %v19635_v5 = vld [vmem:[#allocation103_spill] sm:$0xff] }
 0x940   : > { %14839 = vmatmul.mubr.msk.f32.gmra.mxu1 %vm1383_vm1, %v17991_v33 }
 0x9a4   : > { %v13708_v7 = vpop.f32.mrf.mxu1 }
 0x9a6   : > { %v13709_v8 = vpop.f32.mrf.mxu1 }
 0x9a7   : > { %v13710_v9 = vadd.f32 %v13709_v8, %v13708_v7 }
 0x9a8   : > { %v13711_v11 = vpop.f32.mrf.mxu1 }
 0x9a9   : > { %v18327_v15 = vadd.f32 %v13710_v9, %v19630_v13 }
 0x9aa   : > { %v13712_v16 = vpop.f32.mrf.mxu1 }
 0x9ab   : > { %v13713_v18 = vadd.f32 %v13712_v16, %v13711_v11 }
 0x9ac   : > { %v13714_v20 = vpop.f32.mrf.mxu1 }
 0x9ad   : > { %v18330_v23 = vadd.f32 %v13713_v18, %v19631_v21  ;;  %v12588_v21 = vld [vmem:[%s19536_s22 + $0x380] sm:$0xff] }
 0x9ae   : > { %v13715_v25 = vpop.f32.mrf.mxu1 }
 0x9af   : > { %v13716_v26 = vadd.f32 %v13715_v25, %v13714_v20  ;;  %v12654_v25 = vld [vmem:[%s19508_s6 + $0x20] sm:$0x7] }
 0x9b0   : > { %v13717_v27 = vpop.f32.mrf.mxu1 }
 0x9b1   : > { %v18333_v17 = vadd.f32 %v13716_v26, %v19632_v10  ;;  %v12591_v26 = vld [vmem:[%s19536_s22 + $0x398] sm:$0xff]  ;;  %v12593_v10 = vld [vmem:[%s19536_s22 + $0x3a8] sm:$0xff] }
 0x9b2   : > { %v13718_v24 = vpop.f32.mrf.mxu1 }
 0x9b3   : > { %v13719_v31 = vadd.f32 %v13718_v24, %v13717_v27  ;;  %v12590_v27 = vld [vmem:[%s19536_s22 + $0x390] sm:$0xff]  ;;  %v12592_v24 = vld [vmem:[%s19536_s22 + $0x3a0] sm:$0xff] }
 0x9b4   : > { %v13720_v6 = vpop.f32.mrf.mxu1 }
 0x9b5   : > { %v18336_v22 = vadd.f32 %v13719_v31, %v19633_v14  ;;  %v12595_v31 = vld [vmem:[%s19536_s22 + $0x3b8] sm:$0xff]  ;;  %v12597_v14 = vld [vmem:[%s19536_s22 + $0x3c8] sm:$0xff] }
 0x9b6   : > { %v13721_v28 = vpop.f32.mrf.mxu1 }
 0x9b7   : > { %v13722_v29 = vadd.f32 %v13721_v28, %v13720_v6  ;;  %v12594_v6 = vld [vmem:[%s19536_s22 + $0x3b0] sm:$0xff]  ;;  %v12596_v28 = vld [vmem:[%s19536_s22 + $0x3c0] sm:$0xff] }
 0x9b8   : > { %v13723_v30 = vpop.f32.mrf.mxu1 }
 0x9b9   : > { %v18339_v35 = vadd.f32 %v13722_v29, %v19634_v32  ;;  %v12599_v29 = vld [vmem:[%s19536_s22 + $0x3d8] sm:$0xff]  ;;  %v12601_v32 = vld [vmem:[%s19536_s22 + $0x3e8] sm:$0xff] }
 0x9ba   : > { %v13724_v2 = vpop.f32.mrf.mxu1 }
 0x9bb   : > { %v13725_v3 = vadd.f32 %v13724_v2, %v13723_v30  ;;  %v12598_v30 = vld [vmem:[%s19536_s22 + $0x3d0] sm:$0xff]  ;;  %v12600_v2 = vld [vmem:[%s19536_s22 + $0x3e0] sm:$0xff] }
 0x9bc   : > { %v13726_v4 = vpop.f32.mrf.mxu1 }
 0x9bd   : > { %v18342_v33 = vadd.f32 %v13725_v3, %v19635_v5  ;;  %v12603_v3 = vld [vmem:[%s19536_s22 + $0x3f8] sm:$0xff]  ;;  %v16066_v5 = vld [vmem:[%s17260_s8] sm:$0xff] }
 0x9be   : > { %v13727_v44 = vpop.f32.mrf.mxu1 }
 0x9bf   : > { %v13728_v12 = vadd.f32 %v13727_v44, %v13726_v4  ;;  %v12602_v4 = vld [vmem:[%s19536_s22 + $0x3f0] sm:$0xff]  ;;  %v16067_v44 = vld [vmem:[%s17260_s8 + $0x8] sm:$0xff] }
 0x9c0   : > { %v13729_v62 = vpop.f32.mrf.mxu1 }
 0x9c1   : > { %v18345_v36 = vadd.f32 %v13728_v12, %v19636_v19  ;;  %v16068_v12 = vld [vmem:[%s17260_s8 + $0x10] sm:$0xff]  ;;  %v16070_v19 = vld [vmem:[%s17260_s8 + $0x20] sm:$0xff] }
 0x9c2   : > { %v13730_v56 = vpop.f32.mrf.mxu1 }
 0x9c3   : > { %v13731_v39 = vadd.f32 %v13730_v56, %v13729_v62  ;;  %v16069_v62 = vld [vmem:[%s17260_s8 + $0x18] sm:$0xff]  ;;  %v16071_v56 = vld [vmem:[%s17260_s8 + $0x28] sm:$0xff] }
 0x9c4   : > { %v14795_v47 = vpop.f32.mrf.mxu1 }
 0x9c5   : > { %v18348_v60 = vadd.f32 %v13731_v39, %v19637_v52  ;;  %v16072_v39 = vld [vmem:[%s17260_s8 + $0x30] sm:$0xff]  ;;  %v16074_v52 = vld [vmem:[%s17260_s8 + $0x40] sm:$0xff] }
 0x9c6   : > { %v18350_v38 = vpop.f32.mrf.mxu1 }
 0x9c8   : > { %v14798_v40 = vpop.f32.mrf.mxu1 }
 0x9ca   : > { %v4064_v43 = vpop.f32.mrf.mxu1 }
 0x9cc   : > { %v14801_v45 = vpop.f32.mrf.mxu1 }
 0x9ce   : > { %v4074_v49 = vpop.f32.mrf.mxu1 }
 0x9d0   : > { %v14804_v53 = vpop.f32.mrf.mxu1 }
 0x9d2   : > { %v4084_v48 = vpop.f32.mrf.mxu1 }
 0x9d4   : > { %v14807_v55 = vpop.f32.mrf.mxu1 }
 0x9d6   : > { %v4094_v59 = vpop.f32.mrf.mxu1 }
 0x9d8   : > { %v14810_v50 = vpop.f32.mrf.mxu1 }
 0x9da   : > { %v4104_v37 = vpop.f32.mrf.mxu1 }
 0x9dc   : > { %v14813_v57 = vpop.f32.mrf.mxu1 }
 0x9de   : > { %v4114_v61 = vpop.f32.mrf.mxu1 }
 0x9e0   : > { %v14816_v34 = vpop.f32.mrf.mxu1 }
 0x9e2   : > { %v4124_v54 = vpop.f32.mrf.mxu1 }
 0x9e4   : > { %v14819_v41 = vpop.f32.mrf.mxu1 }
 0x9e6   : > { %v4134_v58 = vpop.f32.mrf.mxu1 }
 0x9e8   : > { %v14822_v46 = vpop.f32.mrf.mxu1 }
 0x9ea   : > { %v4144_v63 = vpop.f32.mrf.mxu1 }
 0x9ec   : > { %v14825_v51 = vpop.f32.mrf.mxu1 }
 0x9ee   : > { %v4154_v42 = vpop.f32.mrf.mxu1 }
 0x9f0   : > { %v14828_v0 = vpop.f32.mrf.mxu1 }
 0x9f2   : > { %v4164_v1 = vpop.f32.mrf.mxu1 }
 0x9f4   : > { %v14831_v7 = vpop.f32.mrf.mxu1 }
 0x9f6   : > { %v4174_v8 = vpop.f32.mrf.mxu1 }
 0x9f8   : > { %v14834_v9 = vpop.f32.mrf.mxu1 }
 0x9fa   : > { %v4184_v11 = vpop.f32.mrf.mxu1 }
 0x9fc   : > { %v14837_v13 = vpop.f32.mrf.mxu1 }
 0x9fe   : > { %v4194_v16 = vpop.f32.mrf.mxu1 }
 0xa00   : > { %v14840_v18 = vpop.f32.mrf.mxu1 }
 0xa01   : > { %13765 = vmatprep.subr.mxu0 %v14840_v18 }
 0xa02   : > { %v4204_v20 = vpop.f32.mrf.mxu1  ;;  %13766 = vmatpush3.msra.mxu0 %v14816_v34  ;;  %v16088_v34 = vld [vmem:[%s17260_s8 + $0xb0] sm:$0xff] }
 0xa03   : > { %13767 = vmatprep.subr.mxu0 %v4204_v20 }
 0xa04   : > { %13768 = vmatpush3.msra.mxu0 %v4124_v54  ;;  %v16089_v54 = vld [vmem:[%s17260_s8 + $0xb8] sm:$0xff] }
 0xa05   : > { %13769 = vmatprep.subr.mxu0 %v14837_v13 }
 0xa06   : > { %13770 = vmatpush3.msra.mxu0 %v14813_v57  ;;  %v16086_v57 = vld [vmem:[%s17260_s8 + $0xa0] sm:$0xff] }
 0xa07   : > { %13771 = vmatprep.subr.mxu0 %v4194_v16 }
 0xa08   : > { %13772 = vmatpush3.msra.mxu0 %v4114_v61  ;;  %v16087_v61 = vld [vmem:[%s17260_s8 + $0xa8] sm:$0xff] }
 0xa09   : > { %13773 = vmatprep.subr.mxu0 %v14834_v9 }
 0xa0a   : > { %13774 = vmatpush3.msra.mxu0 %v14810_v50  ;;  %v16084_v50 = vld [vmem:[%s17260_s8 + $0x90] sm:$0xff] }
 0xa0b   : > { %13775 = vmatprep.subr.mxu0 %v4184_v11 }
 0xa0c   : > { %13776 = vmatpush3.msra.mxu0 %v4104_v37  ;;  %v16085_v37 = vld [vmem:[%s17260_s8 + $0x98] sm:$0xff] }
 0xa0d   : > { %13777 = vmatprep.subr.mxu0 %v14831_v7  ;;  %v12639_v7 = vld [vmem:[%s19536_s22 + $0x408] sm:$0xff] }
 0xa0e   : > { %13778 = vmatpush3.msra.mxu0 %v14807_v55  ;;  %v16082_v55 = vld [vmem:[%s17260_s8 + $0x80] sm:$0xff] }
 0xa0f   : > { %13779 = vmatprep.subr.mxu0 %v4174_v8  ;;  %v12647_v8 = vld [vmem:[%s19536_s22 + $0x448] sm:$0xff] }
 0xa10   : > { %13780 = vmatpush3.msra.mxu0 %v4094_v59  ;;  %v16083_v59 = vld [vmem:[%s17260_s8 + $0x88] sm:$0xff]  ;;  %4657 = vmatprep.mubr.f32.mxu1 %v12647_v8 }
 0xa11   : > { %13781 = vmatprep.subr.mxu0 %v14828_v0  ;;  %v16096_v0 = vld [vmem:[%s17260_s8 + $0xf0] sm:$0xff] }
 0xa12   : > { %13782 = vmatpush3.msra.mxu0 %v14804_v53  ;;  %v16080_v53 = vld [vmem:[%s17260_s8 + $0x70] sm:$0xff] }
 0xa13   : > { %13783 = vmatprep.subr.mxu0 %v4164_v1  ;;  %v16097_v1 = vld [vmem:[%s17260_s8 + $0xf8] sm:$0xff] }
 0xa14   : > { %13784 = vmatpush3.msra.mxu0 %v4084_v48  ;;  %v16081_v48 = vld [vmem:[%s17260_s8 + $0x78] sm:$0xff] }
 0xa15   : > { %13785 = vmatprep.subr.mxu0 %v14825_v51  ;;  %v16094_v51 = vld [vmem:[%s17260_s8 + $0xe0] sm:$0xff] }
 0xa16   : > { %13786 = vmatpush3.msra.mxu0 %v14801_v45  ;;  %v16078_v45 = vld [vmem:[%s17260_s8 + $0x60] sm:$0xff] }
 0xa17   : > { %13787 = vmatprep.subr.mxu0 %v4154_v42  ;;  %v16095_v42 = vld [vmem:[%s17260_s8 + $0xe8] sm:$0xff] }
 0xa18   : > { %13788 = vmatpush3.msra.mxu0 %v4074_v49  ;;  %v16079_v49 = vld [vmem:[%s17260_s8 + $0x68] sm:$0xff] }
 0xa19   : > { %13789 = vmatprep.subr.mxu0 %v14822_v46  ;;  %v16092_v46 = vld [vmem:[%s17260_s8 + $0xd0] sm:$0xff] }
 0xa1a   : > { %13790 = vmatpush3.msra.mxu0 %v14798_v40  ;;  %v16076_v40 = vld [vmem:[%s17260_s8 + $0x50] sm:$0xff] }
 0xa1b   : > { %13791 = vmatprep.subr.mxu0 %v4144_v63  ;;  %v16093_v63 = vld [vmem:[%s17260_s8 + $0xd8] sm:$0xff] }
 0xa1c   : > { %13792 = vmatpush3.msra.mxu0 %v4064_v43  ;;  %v16077_v43 = vld [vmem:[%s17260_s8 + $0x58] sm:$0xff] }
 0xa1d   : > { %13793 = vmatprep.subr.mxu0 %v14819_v41  ;;  %v16090_v41 = vld [vmem:[%s17260_s8 + $0xc0] sm:$0xff] }
 0xa1e   : > { %13794 = vmatpush3.msra.mxu0 %v14795_v47  ;;  %v16073_v47 = vld [vmem:[%s17260_s8 + $0x38] sm:$0xff] }
 0xa1f   : > { %13795 = vmatprep.subr.mxu0 %v4134_v58  ;;  %v16091_v58 = vld [vmem:[%s17260_s8 + $0xc8] sm:$0xff] }
 0xa20   : > { %13796 = vmatpush3.msra.mxu0 %v18350_v38  ;;  %v16075_v38 = vld [vmem:[%s17260_s8 + $0x48] sm:$0xff]  ;;  %s19645_s8 = sld [smem:[#allocation60_spill]] }
 0xa21   : > { %4278 = vmatmul.mubr.f32.vlgmr.msra.gmra.mxu0 %v12588_v21  ;;  %14841 = vmatprep.subr.msk.mxu0 %vm1480_vm0, %v12654_v25 }
 0xa22   : > { %4282 = vmatprep.mubr.f32.mxu0 %v12591_v26  ;;  %14842 = vmatpush3.msk.msra.mxu0 %vm1480_vm0, %v12654_v25 }
 0xa25   : > { %4283 = vmatmul.mubr.f32.gmra.mxu0 %v12590_v27 }
 0xa26   : > { %4287 = vmatprep.mubr.f32.mxu0 %v12593_v10 }
 0xa29   : > { %4288 = vmatmul.mubr.f32.gmra.mxu0 %v12592_v24 }
 0xa2a   : > { %4292 = vmatprep.mubr.f32.mxu0 %v12595_v31 }
 0xa2d   : > { %4293 = vmatmul.mubr.f32.gmra.mxu0 %v12594_v6 }
 0xa2e   : > { %4297 = vmatprep.mubr.f32.mxu0 %v12597_v14 }
 0xa31   : > { %4298 = vmatmul.mubr.f32.gmra.mxu0 %v12596_v28 }
 0xa32   : > { %4302 = vmatprep.mubr.f32.mxu0 %v12599_v29 }
 0xa35   : > { %4303 = vmatmul.mubr.f32.gmra.mxu0 %v12598_v30 }
 0xa36   : > { %4307 = vmatprep.mubr.f32.mxu0 %v12601_v32 }
 0xa39   : > { %4308 = vmatmul.mubr.f32.gmra.mxu0 %v12600_v2 }
 0xa3a   : > { %4312 = vmatprep.mubr.f32.mxu0 %v12603_v3 }
 0xa3d   : > { %4313 = vmatmul.mubr.f32.gmra.mxu0 %v12602_v4 }
 0xa3e   : > { %14843 = vmatprep.mubr.msk.f32.mxu0 %vm1383_vm1, %v16066_v5 }
 0xa41   : > { %14844 = vmatmul.mubr.msk.f32.vlgmr.msra.gmra.mxu0 %vm1383_vm1, %v16067_v44 }
 0xa42   : > { %14846 = vmatprep.mubr.msk.f32.mxu0 %vm1383_vm1, %v16068_v12 }
 0xa45   : > { %14847 = vmatmul.mubr.msk.f32.gmra.mxu0 %vm1383_vm1, %v16069_v62 }
 0xa46   : > { %14849 = vmatprep.mubr.msk.f32.mxu0 %vm1383_vm1, %v16070_v19 }
 0xa49   : > { %14850 = vmatmul.mubr.msk.f32.gmra.mxu0 %vm1383_vm1, %v16071_v56 }
 0xa4a   : > { %14852 = vmatprep.mubr.msk.f32.mxu0 %vm1383_vm1, %v16072_v39 }
 0xa4d   : > { %14853 = vmatmul.mubr.msk.f32.gmra.mxu0 %vm1383_vm1, %v16073_v47 }
 0xa4e   : > { %14855 = vmatprep.mubr.msk.f32.mxu0 %vm1383_vm1, %v16074_v52 }
 0xa51   : > { %14856 = vmatmul.mubr.msk.f32.gmra.mxu0 %vm1383_vm1, %v16075_v38 }
 0xa52   : > { %14858 = vmatprep.mubr.msk.f32.mxu0 %vm1383_vm1, %v16076_v40 }
 0xa55   : > { %14859 = vmatmul.mubr.msk.f32.gmra.mxu0 %vm1383_vm1, %v16077_v43 }
 0xa56   : > { %14861 = vmatprep.mubr.msk.f32.mxu0 %vm1383_vm1, %v16078_v45 }
 0xa59   : > { %14862 = vmatmul.mubr.msk.f32.gmra.mxu0 %vm1383_vm1, %v16079_v49 }
 0xa5a   : > { %14864 = vmatprep.mubr.msk.f32.mxu0 %vm1383_vm1, %v16080_v53 }
 0xa5d   : > { %14865 = vmatmul.mubr.msk.f32.gmra.mxu0 %vm1383_vm1, %v16081_v48 }
 0xa5e   : > { %14867 = vmatprep.mubr.msk.f32.mxu0 %vm1383_vm1, %v16082_v55 }
 0xa61   : > { %14868 = vmatmul.mubr.msk.f32.gmra.mxu0 %vm1383_vm1, %v16083_v59 }
 0xa62   : > { %14870 = vmatprep.mubr.msk.f32.mxu0 %vm1383_vm1, %v16084_v50 }
 0xa65   : > { %14871 = vmatmul.mubr.msk.f32.gmra.mxu0 %vm1383_vm1, %v16085_v37 }
 0xa66   : > { %14873 = vmatprep.mubr.msk.f32.mxu0 %vm1383_vm1, %v16086_v57 }
 0xa69   : > { %14874 = vmatmul.mubr.msk.f32.gmra.mxu0 %vm1383_vm1, %v16087_v61 }
 0xa6a   : > { %14876 = vmatprep.mubr.msk.f32.mxu0 %vm1383_vm1, %v16088_v34 }
 0xa6d   : > { %14877 = vmatmul.mubr.msk.f32.gmra.mxu0 %vm1383_vm1, %v16089_v54 }
 0xa6e   : > { %14879 = vmatprep.mubr.msk.f32.mxu0 %vm1383_vm1, %v16090_v41 }
 0xa71   : > { %14880 = vmatmul.mubr.msk.f32.gmra.mxu0 %vm1383_vm1, %v16091_v58 }
 0xa72   : > { %14882 = vmatprep.mubr.msk.f32.mxu0 %vm1383_vm1, %v16092_v46 }
 0xa75   : > { %14883 = vmatmul.mubr.msk.f32.gmra.mxu0 %vm1383_vm1, %v16093_v63 }
 0xa76   : > { %14885 = vmatprep.mubr.msk.f32.mxu0 %vm1383_vm1, %v16094_v51 }
 0xa79   : > { %14886 = vmatmul.mubr.msk.f32.gmra.mxu0 %vm1383_vm1, %v16095_v42 }
 0xa7a   : > { %14888 = vmatprep.mubr.msk.f32.mxu0 %vm1383_vm1, %v16096_v0 }
 0xa7d   : > { %14889 = vmatmul.mubr.msk.f32.gmra.mxu0 %vm1383_vm1, %v16097_v1 }
 0xa7e   : > { %4637 = vmatprep.mubr.f32.mxu0 %v12639_v7 }
 0xae1   : > { %v13797_v9 = vpop.f32.mrf.mxu0 }
 0xae3   : > { %v13798_v11 = vpop.f32.mrf.mxu0 }
 0xae4   : > { %v13799_v13 = vadd.f32 %v13798_v11, %v13797_v9  ;;  %v12638_v9 = vld [vmem:[%s19536_s22 + $0x400] sm:$0xff] }
 0xae5   : > { %v13800_v16 = vpop.f32.mrf.mxu0  ;;  %v12646_v11 = vld [vmem:[%s19536_s22 + $0x440] sm:$0xff] }
 0xae6   : > { %v18438_v18 = vadd.f32 %v13799_v13, %v18327_v15  ;;  %v12641_v13 = vld [vmem:[%s19536_s22 + $0x418] sm:$0xff] }
 0xae7   : > { %v13801_v20 = vpop.f32.mrf.mxu0 }
 0xae8   : > { %v13802_v21 = vadd.f32 %v13801_v20, %v13800_v16  ;;  %v12649_v16 = vld [vmem:[%s19536_s22 + $0x458] sm:$0xff]  ;;  %v12640_v20 = vld [vmem:[%s19536_s22 + $0x410] sm:$0xff] }
 0xae9   : > { %v13803_v25 = vpop.f32.mrf.mxu0 }
 0xaea   : > { %v18441_v26 = vadd.f32 %v13802_v21, %v18330_v23  ;;  %v12648_v21 = vld [vmem:[%s19536_s22 + $0x450] sm:$0xff] }
 0xaeb   : > { %v13804_v27 = vpop.f32.mrf.mxu0 }
 0xaec   : > { %v13805_v10 = vadd.f32 %v13804_v27, %v13803_v25  ;;  %v12643_v25 = vld [vmem:[%s19536_s22 + $0x428] sm:$0xff] }
 0xaed   : > { %v13806_v24 = vpop.f32.mrf.mxu0  ;;  %v12651_v27 = vld [vmem:[%s19536_s22 + $0x468] sm:$0xff] }
 0xaee   : > { %v18444_v31 = vadd.f32 %v13805_v10, %v18333_v17  ;;  %v12642_v10 = vld [vmem:[%s19536_s22 + $0x420] sm:$0xff] }
 0xaef   : > { %v13807_v6 = vpop.f32.mrf.mxu0 }
 0xaf0   : > { %v13808_v14 = vadd.f32 %v13807_v6, %v13806_v24  ;;  %v12650_v24 = vld [vmem:[%s19536_s22 + $0x460] sm:$0xff]  ;;  %v12645_v6 = vld [vmem:[%s19536_s22 + $0x438] sm:$0xff] }
 0xaf1   : > { %v13809_v28 = vpop.f32.mrf.mxu0 }
 0xaf2   : > { %v18447_v29 = vadd.f32 %v13808_v14, %v18336_v22  ;;  %v12653_v14 = vld [vmem:[%s19536_s22 + $0x478] sm:$0xff] }
 0xaf3   : > { %v13810_v15 = vpop.f32.mrf.mxu0 }
 0xaf4   : > { %v13811_v30 = vadd.f32 %v13810_v15, %v13809_v28  ;;  %v12644_v28 = vld [vmem:[%s19536_s22 + $0x430] sm:$0xff] }
 0xaf5   : > { %v13812_v32 = vpop.f32.mrf.mxu0  ;;  %v12652_v15 = vld [vmem:[%s19536_s22 + $0x470] sm:$0xff] }
 0xaf6   : > { %v18450_v2 = vadd.f32 %v13811_v30, %v18339_v35  ;;  %v4743_v30 = vld [vmem:[%s19638_s7] sm:$0xff] }
 0xaf7   : > { %v13813_v23 = vpop.f32.mrf.mxu0 }
 0xaf8   : > { %v13814_v3 = vadd.f32 %v13813_v23, %v13812_v32  ;;  %v12701_v32 = vld [vmem:[%s19638_s7 + $0x8] sm:$0xff] }
 0xaf9   : > { %v13815_v4 = vpop.f32.mrf.mxu0 }
 0xafa   : > { %v18453_v5 = vadd.f32 %v13814_v3, %v18342_v33 }
 0xafb   : > { %v13816_v17 = vpop.f32.mrf.mxu0 }
 0xafc   : > { %v13817_v44 = vadd.f32 %v13816_v17, %v13815_v4 }
 0xafd   : > { %v13818_v12 = vpop.f32.mrf.mxu0 }
 0xafe   : > { %v18456_v62 = vadd.f32 %v13817_v44, %v18345_v36 }
 0xaff   : > { %v13819_v22 = vpop.f32.mrf.mxu0 }
 0xb00   : > { %v13820_v19 = vadd.f32 %v13819_v22, %v13818_v12  ;;  %v12688_v12 = vld [vmem:[#allocation5] ss:$0 sm:$0xff] }
 0xb01   : > { %v18458_v56 = vpop.f32.mrf.mxu0 }
 0xb02   : > { %v18461_v39 = vadd.f32 %v13820_v19, %v18348_v60 }
 0xb03   : > { %v18463_v35 = vpop.f32.mrf.mxu0 }
 0xb05   : > { %v18465_v47 = vpop.f32.mrf.mxu0 }
 0xb07   : > { %v18467_v52 = vpop.f32.mrf.mxu0 }
 0xb09   : > { %v18469_v33 = vpop.f32.mrf.mxu0 }
 0xb0b   : > { %v18471_v38 = vpop.f32.mrf.mxu0 }
 0xb0d   : > { %v14854_v40 = vpop.f32.mrf.mxu0 }
 0xb0f   : > { %v18473_v36 = vpop.f32.mrf.mxu0 }
 0xb11   : > { %v14857_v43 = vpop.f32.mrf.mxu0 }
 0xb13   : > { %v4454_v45 = vpop.f32.mrf.mxu0 }
 0xb15   : > { %v14860_v49 = vpop.f32.mrf.mxu0 }
 0xb17   : > { %v4464_v53 = vpop.f32.mrf.mxu0 }
 0xb19   : > { %v14863_v48 = vpop.f32.mrf.mxu0 }
 0xb1b   : > { %v4474_v60 = vpop.f32.mrf.mxu0 }
 0xb1d   : > { %v14866_v55 = vpop.f32.mrf.mxu0 }
 0xb1f   : > { %v4484_v59 = vpop.f32.mrf.mxu0 }
 0xb21   : > { %v18475_v50 = vpop.f32.mrf.mxu0 }
 0xb23   : > { %v18477_v37 = vpop.f32.mrf.mxu0 }
 0xb25   : > { %v14872_v57 = vpop.f32.mrf.mxu0 }
 0xb27   : > { %v18479_v61 = vpop.f32.mrf.mxu0 }
 0xb29   : > { %v14875_v34 = vpop.f32.mrf.mxu0 }
 0xb2b   : > { %v4514_v54 = vpop.f32.mrf.mxu0 }
 0xb2d   : > { %v14878_v41 = vpop.f32.mrf.mxu0 }
 0xb2f   : > { %v4524_v58 = vpop.f32.mrf.mxu0 }
 0xb31   : > { %v14881_v46 = vpop.f32.mrf.mxu0 }
 0xb33   : > { %v4534_v63 = vpop.f32.mrf.mxu0 }
 0xb35   : > { %v14884_v51 = vpop.f32.mrf.mxu0 }
 0xb37   : > { %v4544_v42 = vpop.f32.mrf.mxu0 }
 0xb39   : > { %v14887_v0 = vpop.f32.mrf.mxu0 }
 0xb3b   : > { %v4554_v1 = vpop.f32.mrf.mxu0 }
 0xb3d   : > { %v14890_v7 = vpop.f32.mrf.mxu0 }
 0xb3e   : > { %13854 = vmatprep.subr.mxu0 %v14890_v7  ;;  %15724 = vmatprep.subr.mxu1 %v14890_v7 }
 0xb3f   : > { %v4564_v8 = vpop.f32.mrf.mxu0  ;;  %13855 = vmatpush3.msra.mxu0 %v14866_v55  ;;  %15740 = vmatpush3.msra.mxu1 %v14866_v55 }
 0xb40   : > { %13856 = vmatprep.subr.mxu0 %v4564_v8  ;;  %15725 = vmatprep.subr.mxu1 %v4564_v8 }
 0xb41   : > { %13857 = vmatpush3.msra.mxu0 %v4484_v59  ;;  %15741 = vmatpush3.msra.mxu1 %v4484_v59 }
 0xb42   : > { %13858 = vmatprep.subr.mxu0 %v14887_v0  ;;  %15726 = vmatprep.subr.mxu1 %v14887_v0 }
 0xb43   : > { %13859 = vmatpush3.msra.mxu0 %v14863_v48  ;;  %15742 = vmatpush3.msra.mxu1 %v14863_v48  ;;  %v12690_v48 = vld [vmem:[#allocation5 + $0x2] ss:$0 sm:$0xff] }
 0xb44   : > { %13860 = vmatprep.subr.mxu0 %v4554_v1  ;;  %15727 = vmatprep.subr.mxu1 %v4554_v1 }
 0xb45   : > { %13861 = vmatpush3.msra.mxu0 %v4474_v60  ;;  %15743 = vmatpush3.msra.mxu1 %v4474_v60 }
 0xb46   : > { %13862 = vmatprep.subr.mxu0 %v14884_v51  ;;  %15728 = vmatprep.subr.mxu1 %v14884_v51 }
 0xb47   : > { %13863 = vmatpush3.msra.mxu0 %v14860_v49  ;;  %15744 = vmatpush3.msra.mxu1 %v14860_v49 }
 0xb48   : > { %13864 = vmatprep.subr.mxu0 %v4544_v42  ;;  %15729 = vmatprep.subr.mxu1 %v4544_v42 }
 0xb49   : > { %13865 = vmatpush3.msra.mxu0 %v4464_v53  ;;  %15745 = vmatpush3.msra.mxu1 %v4464_v53 }
 0xb4a   : > { %13866 = vmatprep.subr.mxu0 %v14881_v46  ;;  %15730 = vmatprep.subr.mxu1 %v14881_v46 }
 0xb4b   : > { %13867 = vmatpush3.msra.mxu0 %v14857_v43  ;;  %15746 = vmatpush3.msra.mxu1 %v14857_v43 }
 0xb4c   : > { %13868 = vmatprep.subr.mxu0 %v4534_v63  ;;  %15731 = vmatprep.subr.mxu1 %v4534_v63 }
 0xb4d   : > { %13869 = vmatpush3.msra.mxu0 %v4454_v45  ;;  %15747 = vmatpush3.msra.mxu1 %v4454_v45 }
 0xb4e   : > { %13870 = vmatprep.subr.mxu0 %v14878_v41  ;;  %15732 = vmatprep.subr.mxu1 %v14878_v41 }
 0xb4f   : > { %13871 = vmatpush3.msra.mxu0 %v14854_v40  ;;  %15748 = vmatpush3.msra.mxu1 %v14854_v40  ;;  %v12689_v40 = vld [vmem:[#allocation5 + $0x1] ss:$0 sm:$0xff] }
 0xb50   : > { %13872 = vmatprep.subr.mxu0 %v4524_v58  ;;  %15733 = vmatprep.subr.mxu1 %v4524_v58 }
 0xb51   : > { %13873 = vmatpush3.msra.mxu0 %v18473_v36  ;;  %15749 = vmatpush3.msra.mxu1 %v18473_v36 }
 0xb52   : > { %13874 = vmatprep.subr.mxu0 %v14875_v34  ;;  %15734 = vmatprep.subr.mxu1 %v14875_v34 }
 0xb53   : > { %13875 = vmatpush3.msra.mxu0 %v18469_v33  ;;  %15750 = vmatpush3.msra.mxu1 %v18469_v33 }
 0xb54   : > { %13876 = vmatprep.subr.mxu0 %v4514_v54  ;;  %15735 = vmatprep.subr.mxu1 %v4514_v54 }
 0xb55   : > { %13877 = vmatpush3.msra.mxu0 %v18471_v38  ;;  %15751 = vmatpush3.msra.mxu1 %v18471_v38 }
 0xb56   : > { %13878 = vmatprep.subr.mxu0 %v14872_v57  ;;  %15736 = vmatprep.subr.mxu1 %v14872_v57 }
 0xb57   : > { %13879 = vmatpush3.msra.mxu0 %v18465_v47  ;;  %15752 = vmatpush3.msra.mxu1 %v18465_v47 }
 0xb58   : > { %13880 = vmatprep.subr.mxu0 %v18479_v61  ;;  %15737 = vmatprep.subr.mxu1 %v18479_v61 }
 0xb59   : > { %13881 = vmatpush3.msra.mxu0 %v18467_v52  ;;  %15753 = vmatpush3.msra.mxu1 %v18467_v52 }
 0xb5a   : > { %13882 = vmatprep.subr.mxu0 %v18475_v50  ;;  %15738 = vmatprep.subr.mxu1 %v18475_v50 }
 0xb5b   : > { %13883 = vmatpush3.msra.mxu0 %v18458_v56  ;;  %15754 = vmatpush3.msra.mxu1 %v18458_v56 }
 0xb5c   : > { %13884 = vmatprep.subr.mxu0 %v18477_v37  ;;  %15739 = vmatprep.subr.mxu1 %v18477_v37 }
 0xb5d   : > { %13885 = vmatpush3.msra.mxu0 %v18463_v35  ;;  %15755 = vmatpush3.msra.mxu1 %v18463_v35 }
 0xb5e   : > { %4638 = vmatmul.mubr.f32.vlgmr.msra.gmra.mxu0 %v12638_v9  ;;  %4658 = vmatmul.mubr.f32.vlgmr.msra.gmra.mxu1 %v12646_v11 }
 0xb5f   : > { %4642 = vmatprep.mubr.f32.mxu0 %v12641_v13  ;;  %4662 = vmatprep.mubr.f32.mxu1 %v12649_v16 }
 0xb60   : > { %14891 = vmatprep.subr.mxu1 %v4743_v30 }
 0xb61   : > { %14892 = vmatpush3.msra.mxu1 %v4743_v30 }
 0xb62   : > { %4643 = vmatmul.mubr.f32.gmra.mxu0 %v12640_v20  ;;  %4663 = vmatmul.mubr.f32.gmra.mxu1 %v12648_v21 }
 0xb63   : > { %4647 = vmatprep.mubr.f32.mxu0 %v12643_v25  ;;  %4667 = vmatprep.mubr.f32.mxu1 %v12651_v27 }
 0xb64   : > { %14905 = vmatprep.subr.mxu1 %v12701_v32 }
 0xb66   : > { %4648 = vmatmul.mubr.f32.gmra.mxu0 %v12642_v10  ;;  %4668 = vmatmul.mubr.f32.gmra.mxu1 %v12650_v24 }
 0xb67   : > { %4652 = vmatprep.mubr.f32.mxu0 %v12645_v6  ;;  %4672 = vmatprep.mubr.f32.mxu1 %v12653_v14 }
 0xb6a   : > { %4653 = vmatmul.mubr.f32.gmra.mxu0 %v12644_v28  ;;  %4673 = vmatmul.mubr.f32.gmra.mxu1 %v12652_v15 }
 0xc1e   : > { %v13886_v23 = vpop.f32.mrf.mxu0  ;;  %v13898_v3 = vpop.f32.mrf.mxu1 }
 0xc20   : > { %v13887_v4 = vpop.f32.mrf.mxu0  ;;  %v13899_v17 = vpop.f32.mrf.mxu1 }
 0xc21   : > { %v13888_v44 = vadd.f32 %v13887_v4, %v13886_v23  ;;  %v13900_v35 = vadd.f32 %v13899_v17, %v13898_v3  ;;  %v12699_v17 = vld [vmem:[%s19639_s23 + $0x10] sm:$0xff] }
 0xc22   : > { %v13889_v22 = vpop.f32.mrf.mxu0  ;;  %v13901_v19 = vpop.f32.mrf.mxu1  ;;  %14935 = vmatprep.mubr.msk.f32.mxu0 %vm4984_vm3, %v12699_v17  ;;  %v12741_v17 = vld [vmem:[%s19639_s23 + $0x48] sm:$0xff] }
 0xc23   : > { %v4678_v56 = vadd.f32 %v13888_v44, %v18438_v18  ;;  %v4682_v60 = vadd.f32 %v13900_v35, %v18450_v2  ;;  %v4741_v44 = vld [vmem:[%s19639_s23] sm:$0xff] }
 0xc24   : > { %v13890_v47 = vpop.f32.mrf.mxu0  ;;  %v13902_v52 = vpop.f32.mrf.mxu1 }
 0xc25   : > { %v4693_v33 = vadd.f32 %v12688_v12, %v4678_v56  ;;  %v13891_v38 = vadd.f32 %v13890_v47, %v13889_v22  ;;  %v13903_v53 = vadd.f32 %v13902_v52, %v13901_v19  ;;  %v4697_v46 = vadd.f32 %v12688_v12, %v4682_v60 }
 0xc26   : > { %v13892_v36 = vpop.f32.mrf.mxu0  ;;  %v13904_v43 = vpop.f32.mrf.mxu1 }
 0xc27   : > { %v4701_v45 = vmax.f32 %v4693_v33, 0.0  ;;  %v4679_v49 = vadd.f32 %v13891_v38, %v18441_v26  ;;  %v4683_v58 = vadd.f32 %v13903_v53, %v18453_v5  ;;  %v4705_v13 = vmax.f32 %v4697_v46, 0.0  ;;  %v4742_v53 = vld [vmem:[%s19639_s23 + $0x8] sm:$0xff] }
 0xc28   : > { %v13893_v55 = vpop.f32.mrf.mxu0  ;;  %v13905_v59 = vpop.f32.mrf.mxu1 }
 0xc29   : > { %v4717_v50 = vmul.f32 %v12689_v40, %v4701_v45  ;;  %v4694_v37 = vadd.f32 %v12688_v12, %v4679_v49  ;;  %v13894_v18 = vadd.f32 %v13893_v55, %v13892_v36  ;;  %v13906_v57 = vadd.f32 %v13905_v59, %v13904_v43  ;;  %v12700_v55 = vld [vmem:[%s19639_s23 + $0x18] sm:$0xff]  ;;  %v12716_v59 = vld [vmem:[%s19638_s7 + $0x10] sm:$0xff] }
 0xc2a   : > { %v13895_v61 = vpop.f32.mrf.mxu0  ;;  %v13907_v34 = vpop.f32.mrf.mxu1  ;;  %v4698_v9 = vadd.f32 %v12688_v12, %v4683_v58  ;;  %v4721_v10 = vmul.f32 %v12689_v40, %v4705_v13 }
 0xc2b   : > { %v18520_v54 = vadd.f32 %v12690_v48, %v4717_v50  ;;  %v4702_v41 = vmax.f32 %v4694_v37, 0.0  ;;  %v4680_v26 = vadd.f32 %v13894_v18, %v18444_v31  ;;  %v4684_v63 = vadd.f32 %v13906_v57, %v18456_v62  ;;  %v12729_v50 = vld [vmem:[%s19638_s7 + $0x18] sm:$0xff]  ;;  %v12742_v37 = vld [vmem:[%s19638_s7 + $0x20] sm:$0xff]  ;;  %v12755_v18 = vld [vmem:[%s19638_s7 + $0x28] sm:$0xff] }
 0xc2c   : > { %v13896_v2 = vpop.f32.mrf.mxu0  ;;  %v13908_v51 = vpop.f32.mrf.mxu1  ;;  %v4706_v21 = vmax.f32 %v4698_v9, 0.0  ;;  %v18539_v15 = vadd.f32 %v12690_v48, %v4721_v10  ;;  %v12768_v57 = vld [vmem:[%s19638_s7 + $0x30] sm:$0xff] }
 0xc2d   : > { %v4718_v42 = vmul.f32 %v12689_v40, %v4702_v41  ;;  %v13897_v0 = vadd.f32 %v13896_v2, %v13895_v61  ;;  %v13909_v1 = vadd.f32 %v13908_v51, %v13907_v34  ;;  %14893 = vmatprep.mubr.msk.f32.mxu1 %vm4744_vm2, %v18520_v54  ;;  %v4695_v7 = vadd.f32 %v12688_v12, %v4680_v26  ;;  %v12781_v61 = vld [vmem:[%s19638_s7 + $0x38] sm:$0xff]  ;;  %v12794_v34 = vld [vmem:[%s19638_s7 + $0x40] sm:$0xff]  ;;  %s11908_s7 = scalar_lea.sflag [#allocation4], %s17209_s2 }
 0xc2e   : > { %v4699_v16 = vadd.f32 %v12688_v12, %v4684_v63  ;;  %v12714_v41 = vld [vmem:[%s19639_s23 + $0x20] sm:$0xff] }
 0xc2f   : > { %v18527_v8 = vadd.f32 %v12690_v48, %v4718_v42  ;;  %v4681_v11 = vadd.f32 %v13897_v0, %v18447_v29  ;;  %v4685_v5 = vadd.f32 %v13909_v1, %v18461_v39  ;;  %v4703_v31 = vmax.f32 %v4695_v7, 0.0 }
 0xc30   : > { %v4707_v6 = vmax.f32 %v4699_v16, 0.0  ;;  %v4722_v29 = vmul.f32 %v12689_v40, %v4706_v21  ;;  %v12727_v16 = vld [vmem:[%s19639_s23 + $0x30] sm:$0xff] }
 0xc31   : > { %v4696_v62 = vadd.f32 %v12688_v12, %v4681_v11  ;;  %14894 = vmatmul.mubr.msk.f32.vlgmr.msra.gmra.mxu1 %vm4744_vm2, %v18527_v8  ;;  %v4719_v20 = vmul.f32 %v12689_v40, %v4703_v31  ;;  %v4700_v27 = vadd.f32 %v12688_v12, %v4685_v5  ;;  %v12715_v31 = vld [vmem:[%s19639_s23 + $0x28] sm:$0xff] }
 0xc32   : > { %14906 = vmatpush3.msra.mxu1 %v12701_v32  ;;  %v4723_v30 = vmul.f32 %v12689_v40, %v4707_v6  ;;  %v18545_v32 = vadd.f32 %v12690_v48, %v4722_v29  ;;  %v12740_v29 = vld [vmem:[%s19639_s23 + $0x40] sm:$0xff] }
 0xc33   : > { %v4704_v25 = vmax.f32 %v4696_v62, 0.0  ;;  %v18533_v24 = vadd.f32 %v12690_v48, %v4719_v20  ;;  %v4708_v28 = vmax.f32 %v4700_v27, 0.0 }
 0xc34   : > { %v18547_v3 = vadd.f32 %v12690_v48, %v4723_v30 }
 0xc35   : > { %v4720_v14 = vmul.f32 %v12689_v40, %v4704_v25  ;;  %14896 = vmatprep.mubr.msk.f32.mxu1 %vm4744_vm2, %v18533_v24  ;;  %v4724_v23 = vmul.f32 %v12689_v40, %v4708_v28 }
 0xc37   : > { %v18537_v39 = vadd.f32 %v12690_v48, %v4720_v14  ;;  %v18553_v4 = vadd.f32 %v12690_v48, %v4724_v23  ;;  %v12728_v14 = vld [vmem:[%s19639_s23 + $0x38] sm:$0xff] }
 0xc39   : > { %14897 = vmatmul.mubr.msk.f32.gmra.mxu1 %vm4744_vm2, %v18537_v39 }
 0xc3a   : > { %14899 = vmatprep.mubr.msk.f32.mxu1 %vm4744_vm2, %v18539_v15 }
 0xc3d   : > { %14900 = vmatmul.mubr.msk.f32.gmra.mxu1 %vm4744_vm2, %v18545_v32 }
 0xc3e   : > { %14902 = vmatprep.mubr.msk.f32.mxu1 %vm4744_vm2, %v18547_v3 }
 0xc41   : > { %14903 = vmatmul.mubr.msk.f32.gmra.mxu1 %vm4744_vm2, %v18553_v4 }
 0xc42   : > { %14907 = vmatprep.mubr.msk.f32.mxu1 %vm4744_vm2, %v18520_v54 }
 0xc45   : > { %14908 = vmatmul.mubr.msk.f32.vlgmr.msra.gmra.mxu1 %vm4744_vm2, %v18527_v8 }
 0xc46   : > { %14910 = vmatprep.mubr.msk.f32.mxu1 %vm4744_vm2, %v18533_v24 }
 0xc49   : > { %14911 = vmatmul.mubr.msk.f32.gmra.mxu1 %vm4744_vm2, %v18537_v39 }
 0xc4a   : > { %14913 = vmatprep.mubr.msk.f32.mxu1 %vm4744_vm2, %v18539_v15 }
 0xc4d   : > { %14914 = vmatmul.mubr.msk.f32.gmra.mxu1 %vm4744_vm2, %v18545_v32 }
 0xc4e   : > { %14916 = vmatprep.mubr.msk.f32.mxu1 %vm4744_vm2, %v18547_v3 }
 0xc51   : > { %14917 = vmatmul.mubr.msk.f32.gmra.mxu1 %vm4744_vm2, %v18553_v4 }
 0xc52   : > { %14954 = vmatprep.mubr.msk.f32.mxu1 %vm4984_vm3, %v4741_v44  ;;  %v12753_v44 = vld [vmem:[%s19639_s23 + $0x50] sm:$0xff] }
 0xcf1   : > { %v14895_v12 = vpop.f32.mrf.mxu1 }
 0xcf3   : > { %v4835_v22 = vpop.f32.mrf.mxu1 }
 0xcf9   : > { %v14898_v19 = vpop.f32.mrf.mxu1 }
 0xcfb   : > { %v4845_v56 = vpop.f32.mrf.mxu1 }
 0xcfd   : > { %v14901_v35 = vpop.f32.mrf.mxu1 }
 0xcff   : > { %v4855_v47 = vpop.f32.mrf.mxu1 }
 0xd01   : > { %v14904_v52 = vpop.f32.mrf.mxu1 }
 0xd02   : > { %14938 = vmatprep.subr.mxu1 %v14904_v52 }
 0xd03   : > { %v4865_v33 = vpop.f32.mrf.mxu1  ;;  %14939 = vmatpush3.msra.mxu1 %v14904_v52 }
 0xd04   : > { %14940 = vmatprep.subr.mxu1 %v4865_v33 }
 0xd05   : > { %v14909_v38 = vpop.f32.mrf.mxu1  ;;  %14941 = vmatpush3.msra.mxu1 %v4865_v33 }
 0xd06   : > { %14942 = vmatprep.subr.mxu1 %v14901_v35 }
 0xd07   : > { %v4945_v40 = vpop.f32.mrf.mxu1  ;;  %14943 = vmatpush3.msra.mxu1 %v14901_v35 }
 0xd08   : > { %14944 = vmatprep.subr.mxu1 %v4855_v47 }
 0xd09   : > { %v14912_v36 = vpop.f32.mrf.mxu1  ;;  %14945 = vmatpush3.msra.mxu1 %v4855_v47 }
 0xd0a   : > { %14946 = vmatprep.subr.mxu1 %v14898_v19 }
 0xd0b   : > { %v4955_v43 = vpop.f32.mrf.mxu1  ;;  %14947 = vmatpush3.msra.mxu1 %v14898_v19 }
 0xd0c   : > { %14948 = vmatprep.subr.mxu1 %v4845_v56 }
 0xd0d   : > { %v14915_v45 = vpop.f32.mrf.mxu1  ;;  %14949 = vmatpush3.msra.mxu1 %v4845_v56 }
 0xd0e   : > { %14950 = vmatprep.subr.mxu1 %v14895_v12 }
 0xd0f   : > { %v4965_v49 = vpop.f32.mrf.mxu1  ;;  %14951 = vmatpush3.msra.mxu1 %v14895_v12 }
 0xd10   : > { %14952 = vmatprep.subr.mxu1 %v4835_v22 }
 0xd11   : > { %v14918_v48 = vpop.f32.mrf.mxu1  ;;  %14953 = vmatpush3.msra.mxu1 %v4835_v22 }
 0xd12   : > { %14919 = vmatprep.subr.mxu0 %v14918_v48  ;;  %14955 = vmatmul.mubr.msk.f32.vlgmr.msra.gmra.mxu1 %vm4984_vm3, %v4742_v53 }
 0xd13   : > { %v4975_v60 = vpop.f32.mrf.mxu1  ;;  %14920 = vmatpush3.msra.mxu0 %v14918_v48  ;;  %14987 = vmatprep.mubr.msk.f32.mxu1 %vm4984_vm3, %v12714_v41 }
 0xd14   : > { %14921 = vmatprep.subr.mxu0 %v4975_v60 }
 0xd15   : > { %14922 = vmatpush3.msra.mxu0 %v4975_v60 }
 0xd16   : > { %14923 = vmatprep.subr.mxu0 %v14915_v45 }
 0xd17   : > { %14924 = vmatpush3.msra.mxu0 %v14915_v45 }
 0xd18   : > { %14925 = vmatprep.subr.mxu0 %v4965_v49 }
 0xd19   : > { %14926 = vmatpush3.msra.mxu0 %v4965_v49 }
 0xd1a   : > { %14927 = vmatprep.subr.mxu0 %v14912_v36 }
 0xd1b   : > { %14928 = vmatpush3.msra.mxu0 %v14912_v36 }
 0xd1c   : > { %14929 = vmatprep.subr.mxu0 %v4955_v43 }
 0xd1d   : > { %14930 = vmatpush3.msra.mxu0 %v4955_v43 }
 0xd1e   : > { %14931 = vmatprep.subr.mxu0 %v14909_v38 }
 0xd1f   : > { %14932 = vmatpush3.msra.mxu0 %v14909_v38  ;;  %v12754_v38 = vld [vmem:[%s19639_s23 + $0x58] sm:$0xff] }
 0xd20   : > { %14933 = vmatprep.subr.mxu0 %v4945_v40 }
 0xd21   : > { %14934 = vmatpush3.msra.mxu0 %v4945_v40  ;;  %v12766_v40 = vld [vmem:[%s19639_s23 + $0x60] sm:$0xff] }
 0xd22   : > { %14936 = vmatmul.mubr.msk.f32.vlgmr.msra.gmra.mxu0 %vm4984_vm3, %v12700_v55  ;;  %14957 = vmatprep.subr.mxu0 %v12716_v59 }
 0xd23   : > { %14959 = vmatprep.mubr.msk.f32.mxu0 %vm4744_vm2, %v18520_v54  ;;  %14958 = vmatpush3.msra.mxu0 %v12716_v59  ;;  %v12767_v59 = vld [vmem:[%s19639_s23 + $0x68] sm:$0xff] }
 0xd24   : > { %14990 = vmatprep.subr.mxu0 %v12729_v50 }
 0xd26   : > { %14960 = vmatmul.mubr.msk.f32.vlgmr.msra.gmra.mxu0 %vm4744_vm2, %v18527_v8 }
 0xd27   : > { %14962 = vmatprep.mubr.msk.f32.mxu0 %vm4744_vm2, %v18533_v24  ;;  %14991 = vmatpush3.msra.mxu0 %v12729_v50  ;;  %v12779_v50 = vld [vmem:[%s19639_s23 + $0x70] sm:$0xff] }
 0xd28   : > { %15023 = vmatprep.subr.mxu0 %v12742_v37 }
 0xd2a   : > { %14963 = vmatmul.mubr.msk.f32.gmra.mxu0 %vm4744_vm2, %v18537_v39 }
 0xd2b   : > { %14965 = vmatprep.mubr.msk.f32.mxu0 %vm4744_vm2, %v18539_v15 }
 0xd2e   : > { %14966 = vmatmul.mubr.msk.f32.gmra.mxu0 %vm4744_vm2, %v18545_v32 }
 0xd2f   : > { %14968 = vmatprep.mubr.msk.f32.mxu0 %vm4744_vm2, %v18547_v3 }
 0xd32   : > { %14969 = vmatmul.mubr.msk.f32.gmra.mxu0 %vm4744_vm2, %v18553_v4 }
 0xd33   : > { %14992 = vmatprep.mubr.msk.f32.mxu0 %vm4744_vm2, %v18520_v54 }
 0xd36   : > { %14993 = vmatmul.mubr.msk.f32.vlgmr.msra.gmra.mxu0 %vm4744_vm2, %v18527_v8 }
 0xd37   : > { %14995 = vmatprep.mubr.msk.f32.mxu0 %vm4744_vm2, %v18533_v24  ;;  %15024 = vmatpush3.msra.mxu0 %v12742_v37 }
 0xd38   : > { %15056 = vmatprep.subr.mxu0 %v12755_v18 }
 0xd3a   : > { %14996 = vmatmul.mubr.msk.f32.gmra.mxu0 %vm4744_vm2, %v18537_v39 }
 0xd3b   : > { %14998 = vmatprep.mubr.msk.f32.mxu0 %vm4744_vm2, %v18539_v15 }
 0xd3e   : > { %14999 = vmatmul.mubr.msk.f32.gmra.mxu0 %vm4744_vm2, %v18545_v32 }
 0xd3f   : > { %15001 = vmatprep.mubr.msk.f32.mxu0 %vm4744_vm2, %v18547_v3 }
 0xd42   : > { %15002 = vmatmul.mubr.msk.f32.gmra.mxu0 %vm4744_vm2, %v18553_v4 }
 0xd43   : > { %15025 = vmatprep.mubr.msk.f32.mxu0 %vm4744_vm2, %v18520_v54 }
 0xd46   : > { %15026 = vmatmul.mubr.msk.f32.vlgmr.msra.gmra.mxu0 %vm4744_vm2, %v18527_v8 }
 0xd47   : > { %15028 = vmatprep.mubr.msk.f32.mxu0 %vm4744_vm2, %v18533_v24  ;;  %15057 = vmatpush3.msra.mxu0 %v12755_v18 }
 0xd48   : > { %15089 = vmatprep.subr.mxu0 %v12768_v57 }
 0xd4a   : > { %15029 = vmatmul.mubr.msk.f32.gmra.mxu0 %vm4744_vm2, %v18537_v39 }
 0xd4b   : > { %15031 = vmatprep.mubr.msk.f32.mxu0 %vm4744_vm2, %v18539_v15 }
 0xd4e   : > { %15032 = vmatmul.mubr.msk.f32.gmra.mxu0 %vm4744_vm2, %v18545_v32 }
 0xd4f   : > { %15034 = vmatprep.mubr.msk.f32.mxu0 %vm4744_vm2, %v18547_v3 }
 0xd52   : > { %15035 = vmatmul.mubr.msk.f32.gmra.mxu0 %vm4744_vm2, %v18553_v4 }
 0xd53   : > { %15058 = vmatprep.mubr.msk.f32.mxu0 %vm4744_vm2, %v18520_v54 }
 0xd56   : > { %15059 = vmatmul.mubr.msk.f32.vlgmr.msra.gmra.mxu0 %vm4744_vm2, %v18527_v8 }
 0xd57   : > { %15061 = vmatprep.mubr.msk.f32.mxu0 %vm4744_vm2, %v18533_v24  ;;  %15090 = vmatpush3.msra.mxu0 %v12768_v57 }
 0xd58   : > { %15122 = vmatprep.subr.mxu0 %v12781_v61 }
 0xd5a   : > { %15062 = vmatmul.mubr.msk.f32.gmra.mxu0 %vm4744_vm2, %v18537_v39 }
 0xd5b   : > { %15064 = vmatprep.mubr.msk.f32.mxu0 %vm4744_vm2, %v18539_v15 }
 0xd5e   : > { %15065 = vmatmul.mubr.msk.f32.gmra.mxu0 %vm4744_vm2, %v18545_v32 }
 0xd5f   : > { %15067 = vmatprep.mubr.msk.f32.mxu0 %vm4744_vm2, %v18547_v3 }
 0xd62   : > { %15068 = vmatmul.mubr.msk.f32.gmra.mxu0 %vm4744_vm2, %v18553_v4 }
 0xd63   : > { %15091 = vmatprep.mubr.msk.f32.mxu0 %vm4744_vm2, %v18520_v54 }
 0xd66   : > { %15092 = vmatmul.mubr.msk.f32.vlgmr.msra.gmra.mxu0 %vm4744_vm2, %v18527_v8 }
 0xd67   : > { %15094 = vmatprep.mubr.msk.f32.mxu0 %vm4744_vm2, %v18533_v24  ;;  %15123 = vmatpush3.msra.mxu0 %v12781_v61 }
 0xd68   : > { %15155 = vmatprep.subr.mxu0 %v12794_v34 }
 0xd6a   : > { %15095 = vmatmul.mubr.msk.f32.gmra.mxu0 %vm4744_vm2, %v18537_v39 }
 0xd6b   : > { %15097 = vmatprep.mubr.msk.f32.mxu0 %vm4744_vm2, %v18539_v15 }
 0xd6e   : > { %15098 = vmatmul.mubr.msk.f32.gmra.mxu0 %vm4744_vm2, %v18545_v32 }
 0xd6f   : > { %15100 = vmatprep.mubr.msk.f32.mxu0 %vm4744_vm2, %v18547_v3 }
 0xd72   : > { %15101 = vmatmul.mubr.msk.f32.gmra.mxu0 %vm4744_vm2, %v18553_v4 }
 0xd73   : > { %15124 = vmatprep.mubr.msk.f32.mxu0 %vm4744_vm2, %v18520_v54 }
 0xd76   : > { %15125 = vmatmul.mubr.msk.f32.vlgmr.msra.gmra.mxu0 %vm4744_vm2, %v18527_v8 }
 0xd77   : > { %15127 = vmatprep.mubr.msk.f32.mxu0 %vm4744_vm2, %v18533_v24  ;;  %15156 = vmatpush3.msra.mxu0 %v12794_v34 }
 0xd7a   : > { %15128 = vmatmul.mubr.msk.f32.gmra.mxu0 %vm4744_vm2, %v18537_v39 }
 0xd7b   : > { %15130 = vmatprep.mubr.msk.f32.mxu0 %vm4744_vm2, %v18539_v15 }
 0xd7e   : > { %15131 = vmatmul.mubr.msk.f32.gmra.mxu0 %vm4744_vm2, %v18545_v32 }
 0xd7f   : > { %15133 = vmatprep.mubr.msk.f32.mxu0 %vm4744_vm2, %v18547_v3 }
 0xd82   : > { %15134 = vmatmul.mubr.msk.f32.gmra.mxu0 %vm4744_vm2, %v18553_v4 }
 0xd83   : > { %15157 = vmatprep.mubr.msk.f32.mxu0 %vm4744_vm2, %v18520_v54 }
 0xd86   : > { %15158 = vmatmul.mubr.msk.f32.vlgmr.msra.gmra.mxu0 %vm4744_vm2, %v18527_v8 }
 0xd87   : > { %15160 = vmatprep.mubr.msk.f32.mxu0 %vm4744_vm2, %v18533_v24 }
 0xd8a   : > { %15161 = vmatmul.mubr.msk.f32.gmra.mxu0 %vm4744_vm2, %v18537_v39 }
 0xd8b   : > { %15163 = vmatprep.mubr.msk.f32.mxu0 %vm4744_vm2, %v18539_v15 }
 0xd8e   : > { %15164 = vmatmul.mubr.msk.f32.gmra.mxu0 %vm4744_vm2, %v18545_v32 }
 0xd8f   : > { %15166 = vmatprep.mubr.msk.f32.mxu0 %vm4744_vm2, %v18547_v3 }
 0xd92   : > { %15167 = vmatmul.mubr.msk.f32.gmra.mxu0 %vm4744_vm2, %v18553_v4 }
 0xde2   : > { %v18702_v54 = vpop.f32.mrf.mxu0 }
 0xde4   : > { %v18704_v58 = vpop.f32.mrf.mxu0 }
 0xde6   : > { %v14961_v46 = vpop.f32.mrf.mxu0 }
 0xde8   : > { %v5218_v26 = vpop.f32.mrf.mxu0 }
 0xdea   : > { %v14964_v63 = vpop.f32.mrf.mxu0 }
 0xdec   : > { %v5228_v2 = vpop.f32.mrf.mxu0 }
 0xdee   : > { %v14967_v51 = vpop.f32.mrf.mxu0 }
 0xdf0   : > { %v5238_v42 = vpop.f32.mrf.mxu0 }
 0xdf2   : > { %v14970_v0 = vpop.f32.mrf.mxu0 }
 0xdf3   : > { %14971 = vmatprep.subr.mxu1 %v14970_v0 }
 0xdf4   : > { %v5248_v1 = vpop.f32.mrf.mxu0  ;;  %14972 = vmatpush3.msra.mxu1 %v14970_v0  ;;  %v12793_v0 = vld [vmem:[%s19639_s23 + $0x88] sm:$0xff] }
 0xdf5   : > { %14973 = vmatprep.subr.mxu1 %v5248_v1 }
 0xdf6   : > { %14974 = vmatpush3.msra.mxu1 %v5248_v1  ;;  %v14994_v7 = vpop.f32.mrf.mxu0  ;;  %v6531_v1 = vld [vmem:[%s19640_s4] sm:$0xff] }
 0xdf7   : > { %14975 = vmatprep.subr.mxu1 %v14967_v51  ;;  %15188 = vmatprep.subr.mxu0 %v6531_v1 }
 0xdf8   : > { %14976 = vmatpush3.msra.mxu1 %v14967_v51  ;;  %v5411_v8 = vpop.f32.mrf.mxu0  ;;  %15189 = vmatpush3.msra.mxu0 %v6531_v1 }
 0xdf9   : > { %14977 = vmatprep.subr.mxu1 %v5238_v42 }
 0xdfa   : > { %14978 = vmatpush3.msra.mxu1 %v5238_v42  ;;  %v14997_v9 = vpop.f32.mrf.mxu0 }
 0xdfb   : > { %14979 = vmatprep.subr.mxu1 %v14964_v63 }
 0xdfc   : > { %14980 = vmatpush3.msra.mxu1 %v14964_v63  ;;  %v5421_v11 = vpop.f32.mrf.mxu0  ;;  %v12780_v63 = vld [vmem:[%s19639_s23 + $0x78] sm:$0xff] }
 0xdfd   : > { %14981 = vmatprep.subr.mxu1 %v5228_v2 }
 0xdfe   : > { %14982 = vmatpush3.msra.mxu1 %v5228_v2  ;;  %v15000_v5 = vpop.f32.mrf.mxu0  ;;  %v12792_v2 = vld [vmem:[%s19639_s23 + $0x80] sm:$0xff] }
 0xdff   : > { %14983 = vmatprep.subr.mxu1 %v14961_v46 }
 0xe00   : > { %14984 = vmatpush3.msra.mxu1 %v14961_v46  ;;  %v5431_v13 = vpop.f32.mrf.mxu0 }
 0xe01   : > { %14985 = vmatprep.subr.mxu1 %v5218_v26 }
 0xe02   : > { %14986 = vmatpush3.msra.mxu1 %v5218_v26  ;;  %v15003_v62 = vpop.f32.mrf.mxu0 }
 0xe03   : > { %14988 = vmatmul.mubr.msk.f32.vlgmr.msra.gmra.mxu1 %vm4984_vm3, %v12715_v31  ;;  %15004 = vmatprep.subr.mxu1 %v15003_v62 }
 0xe04   : > { %v5441_v20 = vpop.f32.mrf.mxu0  ;;  %15005 = vmatpush3.msra.mxu1 %v15003_v62  ;;  %15020 = vmatprep.mubr.msk.f32.mxu1 %vm4984_vm3, %v12727_v16 }
 0xe05   : > { %15006 = vmatprep.subr.mxu1 %v5441_v20 }
 0xe06   : > { %15007 = vmatpush3.msra.mxu1 %v5441_v20  ;;  %v15027_v21 = vpop.f32.mrf.mxu0 }
 0xe07   : > { %15008 = vmatprep.subr.mxu1 %v15000_v5 }
 0xe08   : > { %15009 = vmatpush3.msra.mxu1 %v15000_v5  ;;  %v5604_v25 = vpop.f32.mrf.mxu0 }
 0xe09   : > { %15010 = vmatprep.subr.mxu1 %v5431_v13 }
 0xe0a   : > { %15011 = vmatpush3.msra.mxu1 %v5431_v13  ;;  %v15030_v27 = vpop.f32.mrf.mxu0 }
 0xe0b   : > { %15012 = vmatprep.subr.mxu1 %v14997_v9 }
 0xe0c   : > { %15013 = vmatpush3.msra.mxu1 %v14997_v9  ;;  %v5614_v10 = vpop.f32.mrf.mxu0 }
 0xe0d   : > { %15014 = vmatprep.subr.mxu1 %v5421_v11 }
 0xe0e   : > { %15015 = vmatpush3.msra.mxu1 %v5421_v11  ;;  %v15033_v24 = vpop.f32.mrf.mxu0 }
 0xe0f   : > { %15016 = vmatprep.subr.mxu1 %v14994_v7 }
 0xe10   : > { %15017 = vmatpush3.msra.mxu1 %v14994_v7  ;;  %v5624_v6 = vpop.f32.mrf.mxu0  ;;  %v12812_v7 = vld [vmem:[%s19640_s4 + $0x8] sm:$0xff] }
 0xe11   : > { %15018 = vmatprep.subr.mxu1 %v5411_v8 }
 0xe12   : > { %15019 = vmatpush3.msra.mxu1 %v5411_v8  ;;  %v15036_v39 = vpop.f32.mrf.mxu0  ;;  %v14956_v8 = vpop.f32.mrf.mxu1 }
 0xe13   : > { %15021 = vmatmul.mubr.msk.f32.vlgmr.msra.gmra.mxu1 %vm4984_vm3, %v12728_v14  ;;  %15037 = vmatprep.subr.mxu1 %v15036_v39 }
 0xe14   : > { %v5634_v28 = vpop.f32.mrf.mxu0  ;;  %15038 = vmatpush3.msra.mxu1 %v15036_v39  ;;  %15053 = vmatprep.mubr.msk.f32.mxu1 %vm4984_vm3, %v12740_v29  ;;  %v5138_v9 = vpop.f32.mrf.mxu1 }
 0xe15   : > { %15039 = vmatprep.subr.mxu1 %v5634_v28 }
 0xe16   : > { %15040 = vmatpush3.msra.mxu1 %v5634_v28  ;;  %v15060_v15 = vpop.f32.mrf.mxu0 }
 0xe17   : > { %15041 = vmatprep.subr.mxu1 %v15033_v24 }
 0xe18   : > { %15042 = vmatpush3.msra.mxu1 %v15033_v24  ;;  %v5797_v30 = vpop.f32.mrf.mxu0 }
 0xe19   : > { %15043 = vmatprep.subr.mxu1 %v5624_v6 }
 0xe1a   : > { %15044 = vmatpush3.msra.mxu1 %v5624_v6  ;;  %v15063_v32 = vpop.f32.mrf.mxu0 }
 0xe1b   : > { %15045 = vmatprep.subr.mxu1 %v15030_v27 }
 0xe1c   : > { %15046 = vmatpush3.msra.mxu1 %v15030_v27  ;;  %v5807_v23 = vpop.f32.mrf.mxu0 }
 0xe1d   : > { %15047 = vmatprep.subr.mxu1 %v5614_v10 }
 0xe1e   : > { %15048 = vmatpush3.msra.mxu1 %v5614_v10  ;;  %v15066_v3 = vpop.f32.mrf.mxu0  ;;  %v5139_v10 = vadd.f32 %v5138_v9, %v18704_v58 }
 0xe1f   : > { %15049 = vmatprep.subr.mxu1 %v15027_v21 }
 0xe20   : > { %15050 = vmatpush3.msra.mxu1 %v15027_v21  ;;  %v5817_v4 = vpop.f32.mrf.mxu0 }
 0xe21   : > { %15051 = vmatprep.subr.mxu1 %v5604_v25 }
 0xe22   : > { %15052 = vmatpush3.msra.mxu1 %v5604_v25  ;;  %v15069_v12 = vpop.f32.mrf.mxu0  ;;  %v5144_v25 = vadd.f32 %v14956_v8, %v18702_v54  ;;  %v12826_v8 = vld [vmem:[%s19641_s5 + $0x30] sm:$0xff] }
 0xe23   : > { %15054 = vmatmul.mubr.msk.f32.vlgmr.msra.gmra.mxu1 %vm4984_vm3, %v12741_v17  ;;  %15070 = vmatprep.subr.mxu1 %v15069_v12 }
 0xe24   : > { %v5827_v22 = vpop.f32.mrf.mxu0  ;;  %15071 = vmatpush3.msra.mxu1 %v15069_v12  ;;  %15086 = vmatprep.mubr.msk.f32.mxu1 %vm4984_vm3, %v12753_v44 }
 0xe25   : > { %15072 = vmatprep.subr.mxu1 %v5827_v22 }
 0xe26   : > { %15073 = vmatpush3.msra.mxu1 %v5827_v22  ;;  %v15093_v19 = vpop.f32.mrf.mxu0  ;;  %v12805_v22 = vld [vmem:[#allocation7] ss:$0 sm:$0xff] }
 0xe27   : > { %15074 = vmatprep.subr.mxu1 %v15066_v3 }
 0xe28   : > { %15075 = vmatpush3.msra.mxu1 %v15066_v3  ;;  %v5990_v56 = vpop.f32.mrf.mxu0 }
 0xe29   : > { %15076 = vmatprep.subr.mxu1 %v5817_v4 }
 0xe2a   : > { %15077 = vmatpush3.msra.mxu1 %v5817_v4  ;;  %v15096_v35 = vpop.f32.mrf.mxu0 }
 0xe2b   : > { %15078 = vmatprep.subr.mxu1 %v15063_v32 }
 0xe2c   : > { %15079 = vmatpush3.msra.mxu1 %v15063_v32  ;;  %v6000_v47 = vpop.f32.mrf.mxu0 }
 0xe2d   : > { %15080 = vmatprep.subr.mxu1 %v5807_v23 }
 0xe2e   : > { %15081 = vmatpush3.msra.mxu1 %v5807_v23  ;;  %v15099_v52 = vpop.f32.mrf.mxu0 }
 0xe2f   : > { %15082 = vmatprep.subr.mxu1 %v15060_v15 }
 0xe30   : > { %15083 = vmatpush3.msra.mxu1 %v15060_v15  ;;  %v6010_v33 = vpop.f32.mrf.mxu0 }
 0xe31   : > { %15084 = vmatprep.subr.mxu1 %v5797_v30 }
 0xe32   : > { %15085 = vmatpush3.msra.mxu1 %v5797_v30  ;;  %v15102_v36 = vpop.f32.mrf.mxu0 }
 0xe33   : > { %15087 = vmatmul.mubr.msk.f32.vlgmr.msra.gmra.mxu1 %vm4984_vm3, %v12754_v38  ;;  %15103 = vmatprep.subr.mxu1 %v15102_v36 }
 0xe34   : > { %v6020_v43 = vpop.f32.mrf.mxu0  ;;  %15104 = vmatpush3.msra.mxu1 %v15102_v36  ;;  %15119 = vmatprep.mubr.msk.f32.mxu1 %vm4984_vm3, %v12766_v40  ;;  %v12807_v36 = vld [vmem:[#allocation7 + $0x2] ss:$0 sm:$0xff] }
 0xe35   : > { %15105 = vmatprep.subr.mxu1 %v6020_v43 }
 0xe36   : > { %15106 = vmatpush3.msra.mxu1 %v6020_v43  ;;  %v15126_v45 = vpop.f32.mrf.mxu0 }
 0xe37   : > { %15107 = vmatprep.subr.mxu1 %v15099_v52 }
 0xe38   : > { %15108 = vmatpush3.msra.mxu1 %v15099_v52  ;;  %v6183_v49 = vpop.f32.mrf.mxu0  ;;  %v12806_v52 = vld [vmem:[#allocation7 + $0x1] ss:$0 sm:$0xff] }
 0xe39   : > { %15109 = vmatprep.subr.mxu1 %v6010_v33 }
 0xe3a   : > { %15110 = vmatpush3.msra.mxu1 %v6010_v33  ;;  %v15129_v53 = vpop.f32.mrf.mxu0 }
 0xe3b   : > { %15111 = vmatprep.subr.mxu1 %v15096_v35 }
 0xe3c   : > { %15112 = vmatpush3.msra.mxu1 %v15096_v35  ;;  %v6193_v48 = vpop.f32.mrf.mxu0 }
 0xe3d   : > { %15113 = vmatprep.subr.mxu1 %v6000_v47 }
 0xe3e   : > { %15114 = vmatpush3.msra.mxu1 %v6000_v47  ;;  %v15132_v60 = vpop.f32.mrf.mxu0 }
 0xe3f   : > { %15115 = vmatprep.subr.mxu1 %v15093_v19 }
 0xe40   : > { %15116 = vmatpush3.msra.mxu1 %v15093_v19  ;;  %v6203_v55 = vpop.f32.mrf.mxu0 }
 0xe41   : > { %15117 = vmatprep.subr.mxu1 %v5990_v56 }
 0xe42   : > { %15118 = vmatpush3.msra.mxu1 %v5990_v56  ;;  %v15135_v37 = vpop.f32.mrf.mxu0 }
 0xe43   : > { %15120 = vmatmul.mubr.msk.f32.vlgmr.msra.gmra.mxu1 %vm4984_vm3, %v12767_v59  ;;  %15136 = vmatprep.subr.mxu1 %v15135_v37 }
 0xe44   : > { %v6213_v18 = vpop.f32.mrf.mxu0  ;;  %15137 = vmatpush3.msra.mxu1 %v15135_v37  ;;  %15152 = vmatprep.mubr.msk.f32.mxu1 %vm4984_vm3, %v12779_v50  ;;  %v12811_v37 = vld [vmem:[%s19641_s5 + $0x18] sm:$0xff] }
 0xe45   : > { %15138 = vmatprep.subr.mxu1 %v6213_v18 }
 0xe46   : > { %15139 = vmatpush3.msra.mxu1 %v6213_v18  ;;  %v15159_v57 = vpop.f32.mrf.mxu0  ;;  %v6530_v18 = vld [vmem:[%s19641_s5 + $0x8] sm:$0xff] }
 0xe47   : > { %15140 = vmatprep.subr.mxu1 %v15132_v60 }
 0xe48   : > { %15141 = vmatpush3.msra.mxu1 %v15132_v60  ;;  %v6376_v61 = vpop.f32.mrf.mxu0 }
 0xe49   : > { %15142 = vmatprep.subr.mxu1 %v6203_v55 }
 0xe4a   : > { %15143 = vmatpush3.msra.mxu1 %v6203_v55  ;;  %v15162_v34 = vpop.f32.mrf.mxu0 }
 0xe4b   : > { %15144 = vmatprep.subr.mxu1 %v15129_v53 }
 0xe4c   : > { %15145 = vmatpush3.msra.mxu1 %v15129_v53  ;;  %v6386_v41 = vpop.f32.mrf.mxu0  ;;  %v12810_v53 = vld [vmem:[%s19641_s5 + $0x10] sm:$0xff] }
 0xe4d   : > { %15146 = vmatprep.subr.mxu1 %v6193_v48 }
 0xe4e   : > { %15147 = vmatpush3.msra.mxu1 %v6193_v48  ;;  %v15165_v46 = vpop.f32.mrf.mxu0  ;;  %v6529_v48 = vld [vmem:[%s19641_s5] sm:$0xff] }
 0xe4f   : > { %15148 = vmatprep.subr.mxu1 %v15126_v45 }
 0xe50   : > { %15149 = vmatpush3.msra.mxu1 %v15126_v45  ;;  %v6396_v26 = vpop.f32.mrf.mxu0 }
 0xe51   : > { %15150 = vmatprep.subr.mxu1 %v6183_v49 }
 0xe52   : > { %15151 = vmatpush3.msra.mxu1 %v6183_v49  ;;  %v15168_v51 = vpop.f32.mrf.mxu0 }
 0xe53   : > { %15153 = vmatmul.mubr.msk.f32.vlgmr.msra.gmra.mxu1 %vm4984_vm3, %v12780_v63  ;;  %15169 = vmatprep.subr.mxu1 %v15168_v51  ;;  %v12863_v63 = vld [vmem:[%s19640_s4 + $0x40] sm:$0xff] }
 0xe54   : > { %v6406_v42 = vpop.f32.mrf.mxu0  ;;  %15170 = vmatpush3.msra.mxu1 %v15168_v51  ;;  %15185 = vmatprep.mubr.msk.f32.mxu1 %vm4984_vm3, %v12792_v2  ;;  %v12819_v2 = vld [vmem:[%s19641_s5 + $0x20] sm:$0xff] }
 0xe55   : > { %15171 = vmatprep.subr.mxu1 %v6406_v42 }
 0xe56   : > { %15172 = vmatpush3.msra.mxu1 %v6406_v42 }
 0xe57   : > { %15173 = vmatprep.subr.mxu1 %v15165_v46 }
 0xe58   : > { %15174 = vmatpush3.msra.mxu1 %v15165_v46  ;;  %v12849_v46 = vld [vmem:[%s19640_s4 + $0x30] sm:$0xff] }
 0xe59   : > { %15175 = vmatprep.subr.mxu1 %v6396_v26 }
 0xe5a   : > { %15176 = vmatpush3.msra.mxu1 %v6396_v26  ;;  %v12856_v26 = vld [vmem:[%s19640_s4 + $0x38] sm:$0xff] }
 0xe5b   : > { %15177 = vmatprep.subr.mxu1 %v15162_v34 }
 0xe5c   : > { %15178 = vmatpush3.msra.mxu1 %v15162_v34  ;;  %v12835_v34 = vld [vmem:[%s19640_s4 + $0x20] sm:$0xff] }
 0xe5d   : > { %15179 = vmatprep.subr.mxu1 %v6386_v41 }
 0xe5e   : > { %15180 = vmatpush3.msra.mxu1 %v6386_v41  ;;  %v12842_v41 = vld [vmem:[%s19640_s4 + $0x28] sm:$0xff] }
 0xe5f   : > { %15181 = vmatprep.subr.mxu1 %v15159_v57 }
 0xe60   : > { %15182 = vmatpush3.msra.mxu1 %v15159_v57  ;;  %v12821_v57 = vld [vmem:[%s19640_s4 + $0x10] sm:$0xff] }
 0xe61   : > { %15183 = vmatprep.subr.mxu1 %v6376_v61 }
 0xe62   : > { %15184 = vmatpush3.msra.mxu1 %v6376_v61  ;;  %v12828_v61 = vld [vmem:[%s19640_s4 + $0x18] sm:$0xff]  ;;  %s1328_s4 = scalar_lea.vmem [#allocation34], %s17209_s2 }
 0xe63   : > { %15186 = vmatmul.mubr.msk.f32.vlgmr.msra.gmra.mxu1 %vm4984_vm3, %v12793_v0  ;;  %15193 = vmatprep.subr.mxu1 %v12812_v7 }
 0xe64   : > { %15194 = vmatpush3.msra.mxu1 %v12812_v7  ;;  %v12820_v7 = vld [vmem:[%s19641_s5 + $0x28] sm:$0xff] }
 0xec3   : > { %v14989_v11 = vpop.f32.mrf.mxu1 }
 0xec4   : > { %v5339_v24 = vadd.f32 %v14989_v11, %v5144_v25 }
 0xec5   : > { %v5329_v5 = vpop.f32.mrf.mxu1 }
 0xec6   : > { %v5338_v6 = vadd.f32 %v5329_v5, %v5139_v10  ;;  %v12827_v5 = vld [vmem:[%s19641_s5 + $0x38] sm:$0xff]  ;;  %v12847_v10 = vld [vmem:[%s19641_s5 + $0x60] sm:$0xff] }
 0xed3   : > { %v15022_v13 = vpop.f32.mrf.mxu1 }
 0xed4   : > { %v5532_v14 = vadd.f32 %v15022_v13, %v5339_v24  ;;  %v12833_v13 = vld [vmem:[%s19641_s5 + $0x40] sm:$0xff] }
 0xed5   : > { %v5522_v31 = vpop.f32.mrf.mxu1 }
 0xed6   : > { %v5531_v39 = vadd.f32 %v5522_v31, %v5338_v6 }
 0xee3   : > { %v15055_v16 = vpop.f32.mrf.mxu1 }
 0xee4   : > { %v5725_v28 = vadd.f32 %v15055_v16, %v5532_v14  ;;  %v12848_v14 = vld [vmem:[%s19641_s5 + $0x68] sm:$0xff] }
 0xee5   : > { %v5715_v62 = vpop.f32.mrf.mxu1 }
 0xee6   : > { %v5724_v30 = vadd.f32 %v5715_v62, %v5531_v39  ;;  %v12834_v62 = vld [vmem:[%s19641_s5 + $0x48] sm:$0xff] }
 0xef3   : > { %v15088_v20 = vpop.f32.mrf.mxu1 }
 0xef4   : > { %v5918_v32 = vadd.f32 %v15088_v20, %v5725_v28  ;;  %v12840_v20 = vld [vmem:[%s19641_s5 + $0x50] sm:$0xff] }
 0xef5   : > { %v5908_v21 = vpop.f32.mrf.mxu1 }
 0xef6   : > { %v5917_v23 = vadd.f32 %v5908_v21, %v5724_v30  ;;  %v12861_v30 = vld [vmem:[%s19641_s5 + $0x80] sm:$0xff] }
 0xf03   : > { %v15121_v27 = vpop.f32.mrf.mxu1 }
 0xf04   : > { %v6111_v3 = vadd.f32 %v15121_v27, %v5918_v32  ;;  %v12841_v27 = vld [vmem:[%s19641_s5 + $0x58] sm:$0xff] }
 0xf05   : > { %v6101_v29 = vpop.f32.mrf.mxu1 }
 0xf06   : > { %v6110_v17 = vadd.f32 %v6101_v29, %v5917_v23  ;;  %v12854_v29 = vld [vmem:[%s19641_s5 + $0x70] sm:$0xff] }
 0xf13   : > { %v15154_v15 = vpop.f32.mrf.mxu1 }
 0xf14   : > { %v6304_v44 = vadd.f32 %v15154_v15, %v6111_v3  ;;  %v12855_v15 = vld [vmem:[%s19641_s5 + $0x78] sm:$0xff]  ;;  %v12862_v3 = vld [vmem:[%s19641_s5 + $0x88] sm:$0xff]  ;;  %s11920_s5 = sshll.u32 %s1328_s4, 4  ;;  %s11921_s5 = int_to_ptr.vmem [resolvable:$true] %s11920_s5 }
 0xf15   : > { %v6294_v4 = vpop.f32.mrf.mxu1 }
 0xf16   : > { %v6303_v54 = vadd.f32 %v6294_v4, %v6110_v17  ;;  %v8030_v4 = vld [vmem:[%s19642_s3] sm:$0xff]  ;;  %v12875_v17 = vld [vmem:[%s19642_s3 + $0x8] sm:$0xff] }
 0xf23   : > { %v15187_v12 = vpop.f32.mrf.mxu1 }
 0xf24   : > { %v6497_v19 = vadd.f32 %v15187_v12, %v6304_v44 }
 0xf25   : > { %v6487_v56 = vpop.f32.mrf.mxu1 }
 0xf26   : > { %v6506_v58 = vadd.f32 %v12805_v22, %v6497_v19  ;;  %v6496_v35 = vadd.f32 %v6487_v56, %v6303_v54 }
 0xf28   : > { %v6508_v47 = vmax.f32 %v6506_v58, 0.0  ;;  %v6505_v33 = vadd.f32 %v12805_v22, %v6496_v35 }
 0xf2a   : > { %v6507_v38 = vmax.f32 %v6505_v33, 0.0  ;;  %v6518_v40 = vmul.f32 %v12806_v52, %v6508_v47 }
 0xf2c   : > { %v6517_v43 = vmul.f32 %v12806_v52, %v6507_v38  ;;  %v6528_v49 = vadd.f32 %v12807_v36, %v6518_v40 }
 0xf2e   : > { %v6527_v45 = vadd.f32 %v12807_v36, %v6517_v43 }
 0xf30   : > { %15190 = vmatprep.mubr.msk.f32.mxu0 %vm4744_vm2, %v6527_v45  ;;  %15195 = vmatprep.mubr.msk.f32.mxu1 %vm4744_vm2, %v6527_v45 }
 0xf31   : > { %15191 = vmatmul.mubr.msk.f32.vlgmr.msra.gmra.mxu0 %vm4744_vm2, %v6528_v49  ;;  %15196 = vmatmul.mubr.msk.f32.vlgmr.msra.gmra.mxu1 %vm4744_vm2, %v6528_v49 }
 0xf32   : > { %15202 = vmatprep.mubr.msk.f32.mxu0 %vm6693_vm4, %v12810_v53  ;;  %15209 = vmatprep.mubr.msk.f32.mxu1 %vm6693_vm4, %v6529_v48 }
 0xff1   : > { %v15192_v60 = vpop.f32.mrf.mxu0  ;;  %v15197_v55 = vpop.f32.mrf.mxu1 }
 0xff2   : > { %15198 = vmatprep.subr.mxu0 %v15197_v55  ;;  %15205 = vmatprep.subr.mxu1 %v15192_v60 }
 0xff3   : > { %v6604_v59 = vpop.f32.mrf.mxu0  ;;  %v6684_v50 = vpop.f32.mrf.mxu1  ;;  %15199 = vmatpush3.msra.mxu0 %v15197_v55  ;;  %15206 = vmatpush3.msra.mxu1 %v15192_v60 }
 0xff4   : > { %15200 = vmatprep.subr.mxu0 %v6684_v50  ;;  %15207 = vmatprep.subr.mxu1 %v6604_v59 }
 0xff5   : > { %15201 = vmatpush3.msra.mxu0 %v6684_v50  ;;  %15208 = vmatpush3.msra.mxu1 %v6604_v59 }
 0xff6   : > { %15203 = vmatmul.mubr.msk.f32.vlgmr.msra.gmra.mxu0 %vm6693_vm4, %v12811_v37  ;;  %15210 = vmatmul.mubr.msk.f32.vlgmr.msra.gmra.mxu1 %vm6693_vm4, %v6530_v18 }
 0xff7   : > { %15214 = vmatprep.mubr.msk.f32.mxu0 %vm4744_vm2, %v6527_v45  ;;  %15212 = vmatprep.subr.mxu0 %v12821_v57 }
 0xff8   : > { %15213 = vmatpush3.msra.mxu0 %v12821_v57  ;;  %15221 = vmatprep.mubr.msk.f32.mxu1 %vm6693_vm4, %v12819_v2 }
 0xff9   : > { %15224 = vmatprep.subr.mxu0 %v12828_v61 }
 0xffa   : > { %15215 = vmatmul.mubr.msk.f32.vlgmr.msra.gmra.mxu0 %vm4744_vm2, %v6528_v49 }
 0xffb   : > { %15226 = vmatprep.mubr.msk.f32.mxu0 %vm4744_vm2, %v6527_v45  ;;  %15225 = vmatpush3.msra.mxu0 %v12828_v61 }
 0xffc   : > { %15236 = vmatprep.subr.mxu0 %v12835_v34 }
 0xffe   : > { %15227 = vmatmul.mubr.msk.f32.vlgmr.msra.gmra.mxu0 %vm4744_vm2, %v6528_v49 }
 0xfff   : > { %15238 = vmatprep.mubr.msk.f32.mxu0 %vm4744_vm2, %v6527_v45  ;;  %15237 = vmatpush3.msra.mxu0 %v12835_v34 }
0x1000   : > { %15248 = vmatprep.subr.mxu0 %v12842_v41 }
0x1002   : > { %15239 = vmatmul.mubr.msk.f32.vlgmr.msra.gmra.mxu0 %vm4744_vm2, %v6528_v49 }
0x1003   : > { %15250 = vmatprep.mubr.msk.f32.mxu0 %vm4744_vm2, %v6527_v45  ;;  %15249 = vmatpush3.msra.mxu0 %v12842_v41  ;;  %v12868_v41 = vld [vmem:[#allocation8] ss:$0 sm:$0xff] }
0x1004   : > { %15260 = vmatprep.subr.mxu0 %v12849_v46 }
0x1006   : > { %15251 = vmatmul.mubr.msk.f32.vlgmr.msra.gmra.mxu0 %vm4744_vm2, %v6528_v49 }
0x1007   : > { %15262 = vmatprep.mubr.msk.f32.mxu0 %vm4744_vm2, %v6527_v45  ;;  %15261 = vmatpush3.msra.mxu0 %v12849_v46 }
0x1008   : > { %15272 = vmatprep.subr.mxu0 %v12856_v26 }
0x100a   : > { %15263 = vmatmul.mubr.msk.f32.vlgmr.msra.gmra.mxu0 %vm4744_vm2, %v6528_v49 }
0x100b   : > { %15274 = vmatprep.mubr.msk.f32.mxu0 %vm4744_vm2, %v6527_v45  ;;  %15273 = vmatpush3.msra.mxu0 %v12856_v26 }
0x100c   : > { %15284 = vmatprep.subr.mxu0 %v12863_v63 }
0x100e   : > { %15275 = vmatmul.mubr.msk.f32.vlgmr.msra.gmra.mxu0 %vm4744_vm2, %v6528_v49 }
0x100f   : > { %15286 = vmatprep.mubr.msk.f32.mxu0 %vm4744_vm2, %v6527_v45  ;;  %15285 = vmatpush3.msra.mxu0 %v12863_v63 }
0x1010   : > { %15296 = vmatprep.subr.mxu0 %v8030_v4 }
0x1012   : > { %15287 = vmatmul.mubr.msk.f32.vlgmr.msra.gmra.mxu0 %vm4744_vm2, %v6528_v49 }
0x1013   : > { %15297 = vmatpush3.msra.mxu0 %v8030_v4 }
0x10b6   : > { %v18771_v51 = vpop.f32.mrf.mxu0  ;;  %v15211_v44 = vpop.f32.mrf.mxu1 }
0x10b7   : > { %v6853_v47 = vadd.f32 %v15211_v44, %v18771_v51  ;;  %v12889_v44 = vld [vmem:[%s19643_s1 + $0x30] sm:$0xff] }
0x10b8   : > { %v18773_v42 = vpop.f32.mrf.mxu0  ;;  %v6847_v12 = vpop.f32.mrf.mxu1 }
0x10b9   : > { %v6848_v33 = vadd.f32 %v6847_v12, %v18773_v42 }
0x10ba   : > { %v15216_v0 = vpop.f32.mrf.mxu0 }
0x10bb   : > { %15217 = vmatprep.subr.mxu1 %v15216_v0 }
0x10bc   : > { %v6927_v1 = vpop.f32.mrf.mxu0  ;;  %15218 = vmatpush3.msra.mxu1 %v15216_v0  ;;  %v12869_v0 = vld [vmem:[#allocation8 + $0x1] ss:$0 sm:$0xff] }
0x10bd   : > { %15219 = vmatprep.subr.mxu1 %v6927_v1 }
0x10be   : > { %15220 = vmatpush3.msra.mxu1 %v6927_v1  ;;  %v15228_v9 = vpop.f32.mrf.mxu0 }
0x10bf   : > { %15222 = vmatmul.mubr.msk.f32.vlgmr.msra.gmra.mxu1 %vm6693_vm4, %v12820_v7  ;;  %15229 = vmatprep.subr.mxu1 %v15228_v9 }
0x10c0   : > { %v7090_v11 = vpop.f32.mrf.mxu0  ;;  %15230 = vmatpush3.msra.mxu1 %v15228_v9  ;;  %15233 = vmatprep.mubr.msk.f32.mxu1 %vm6693_vm4, %v12826_v8  ;;  %v12870_v9 = vld [vmem:[#allocation8 + $0x2] ss:$0 sm:$0xff] }
0x10c1   : > { %15231 = vmatprep.subr.mxu1 %v7090_v11 }
0x10c2   : > { %15232 = vmatpush3.msra.mxu1 %v7090_v11  ;;  %v15240_v31 = vpop.f32.mrf.mxu0 }
0x10c3   : > { %15234 = vmatmul.mubr.msk.f32.vlgmr.msra.gmra.mxu1 %vm6693_vm4, %v12827_v5  ;;  %15241 = vmatprep.subr.mxu1 %v15240_v31 }
0x10c4   : > { %v7253_v16 = vpop.f32.mrf.mxu0  ;;  %15242 = vmatpush3.msra.mxu1 %v15240_v31  ;;  %15245 = vmatprep.mubr.msk.f32.mxu1 %vm6693_vm4, %v12833_v13  ;;  %v12873_v31 = vld [vmem:[%s19643_s1 + $0x10] sm:$0xff] }
0x10c5   : > { %15243 = vmatprep.subr.mxu1 %v7253_v16 }
0x10c6   : > { %15244 = vmatpush3.msra.mxu1 %v7253_v16  ;;  %v15252_v21 = vpop.f32.mrf.mxu0  ;;  %v8028_v16 = vld [vmem:[%s19643_s1] sm:$0xff] }
0x10c7   : > { %15246 = vmatmul.mubr.msk.f32.vlgmr.msra.gmra.mxu1 %vm6693_vm4, %v12834_v62  ;;  %15253 = vmatprep.subr.mxu1 %v15252_v21 }
0x10c8   : > { %v7416_v25 = vpop.f32.mrf.mxu0  ;;  %15254 = vmatpush3.msra.mxu1 %v15252_v21  ;;  %15257 = vmatprep.mubr.msk.f32.mxu1 %vm6693_vm4, %v12840_v20 }
0x10c9   : > { %15255 = vmatprep.subr.mxu1 %v7416_v25 }
0x10ca   : > { %15256 = vmatpush3.msra.mxu1 %v7416_v25  ;;  %v15264_v24 = vpop.f32.mrf.mxu0 }
0x10cb   : > { %15258 = vmatmul.mubr.msk.f32.vlgmr.msra.gmra.mxu1 %vm6693_vm4, %v12841_v27  ;;  %15265 = vmatprep.subr.mxu1 %v15264_v24  ;;  %v12874_v27 = vld [vmem:[%s19643_s1 + $0x18] sm:$0xff] }
0x10cc   : > { %v7579_v6 = vpop.f32.mrf.mxu0  ;;  %15266 = vmatpush3.msra.mxu1 %v15264_v24  ;;  %15269 = vmatprep.mubr.msk.f32.mxu1 %vm6693_vm4, %v12847_v10  ;;  %v8029_v10 = vld [vmem:[%s19643_s1 + $0x8] sm:$0xff]  ;;  %v12884_v24 = vld [vmem:[%s19642_s3 + $0x10] sm:$0xff] }
0x10cd   : > { %15267 = vmatprep.subr.mxu1 %v7579_v6 }
0x10ce   : > { %15268 = vmatpush3.msra.mxu1 %v7579_v6  ;;  %v15276_v39 = vpop.f32.mrf.mxu0  ;;  %v12891_v6 = vld [vmem:[%s19642_s3 + $0x18] sm:$0xff] }
0x10cf   : > { %15270 = vmatmul.mubr.msk.f32.vlgmr.msra.gmra.mxu1 %vm6693_vm4, %v12848_v14  ;;  %15277 = vmatprep.subr.mxu1 %v15276_v39  ;;  %v12898_v14 = vld [vmem:[%s19642_s3 + $0x20] sm:$0xff] }
0x10d0   : > { %v7742_v28 = vpop.f32.mrf.mxu0  ;;  %15278 = vmatpush3.msra.mxu1 %v15276_v39  ;;  %15281 = vmatprep.mubr.msk.f32.mxu1 %vm6693_vm4, %v12854_v29  ;;  %v12905_v29 = vld [vmem:[%s19642_s3 + $0x28] sm:$0xff]  ;;  %v12912_v39 = vld [vmem:[%s19642_s3 + $0x30] sm:$0xff] }
0x10d1   : > { %15279 = vmatprep.subr.mxu1 %v7742_v28 }
0x10d2   : > { %15280 = vmatpush3.msra.mxu1 %v7742_v28  ;;  %v15288_v32 = vpop.f32.mrf.mxu0  ;;  %v12919_v28 = vld [vmem:[%s19642_s3 + $0x38] sm:$0xff] }
0x10d3   : > { %15282 = vmatmul.mubr.msk.f32.vlgmr.msra.gmra.mxu1 %vm6693_vm4, %v12855_v15  ;;  %15289 = vmatprep.subr.mxu1 %v15288_v32  ;;  %v12926_v15 = vld [vmem:[%s19642_s3 + $0x40] sm:$0xff]  ;;  %s13105_s3 = sshll.u32 %s16989_s26, 4 }
0x10d4   : > { %v7905_v23 = vpop.f32.mrf.mxu0  ;;  %15290 = vmatpush3.msra.mxu1 %v15288_v32  ;;  %15293 = vmatprep.mubr.msk.f32.mxu1 %vm6693_vm4, %v12861_v30  ;;  %v12882_v30 = vld [vmem:[%s19643_s1 + $0x20] sm:$0xff] }
0x10d5   : > { %15291 = vmatprep.subr.mxu1 %v7905_v23 }
0x10d6   : > { %15292 = vmatpush3.msra.mxu1 %v7905_v23 }
0x10d7   : > { %15294 = vmatmul.mubr.msk.f32.vlgmr.msra.gmra.mxu1 %vm6693_vm4, %v12862_v3  ;;  %15301 = vmatprep.subr.mxu1 %v12875_v17 }
0x10d8   : > { %15302 = vmatpush3.msra.mxu1 %v12875_v17  ;;  %v12883_v17 = vld [vmem:[%s19643_s1 + $0x28] sm:$0xff] }
0x117f   : > { %v15223_v22 = vpop.f32.mrf.mxu1 }
0x1180   : > { %v7018_v38 = vadd.f32 %v15223_v22, %v6853_v47  ;;  %v12903_v47 = vld [vmem:[%s19643_s1 + $0x50] sm:$0xff] }
0x1181   : > { %v7008_v54 = vpop.f32.mrf.mxu1 }
0x1182   : > { %v7017_v36 = vadd.f32 %v7008_v54, %v6848_v33  ;;  %v12890_v54 = vld [vmem:[%s19643_s1 + $0x38] sm:$0xff] }
0x1183   : > { %v15235_v19 = vpop.f32.mrf.mxu1 }
0x1184   : > { %v7181_v43 = vadd.f32 %v15235_v19, %v7018_v38  ;;  %v12896_v19 = vld [vmem:[%s19643_s1 + $0x40] sm:$0xff]  ;;  %v12904_v38 = vld [vmem:[%s19643_s1 + $0x58] sm:$0xff] }
0x1185   : > { %v7171_v56 = vpop.f32.mrf.mxu1 }
0x1186   : > { %v7180_v49 = vadd.f32 %v7171_v56, %v7017_v36 }
0x1187   : > { %v15247_v58 = vpop.f32.mrf.mxu1 }
0x1188   : > { %v7344_v53 = vadd.f32 %v15247_v58, %v7181_v43 }
0x1189   : > { %v7334_v35 = vpop.f32.mrf.mxu1 }
0x118a   : > { %v7343_v60 = vadd.f32 %v7334_v35, %v7180_v49  ;;  %v12897_v35 = vld [vmem:[%s19643_s1 + $0x48] sm:$0xff]  ;;  %v12917_v49 = vld [vmem:[%s19643_s1 + $0x70] sm:$0xff] }
0x118b   : > { %v15259_v52 = vpop.f32.mrf.mxu1 }
0x118c   : > { %v7507_v55 = vadd.f32 %v15259_v52, %v7344_v53 }
0x118d   : > { %v7497_v40 = vpop.f32.mrf.mxu1 }
0x118e   : > { %v7506_v50 = vadd.f32 %v7497_v40, %v7343_v60  ;;  %v12910_v40 = vld [vmem:[%s19643_s1 + $0x60] sm:$0xff]  ;;  %v12918_v60 = vld [vmem:[%s19643_s1 + $0x78] sm:$0xff] }
0x118f   : > { %v15271_v45 = vpop.f32.mrf.mxu1 }
0x1190   : > { %v7670_v37 = vadd.f32 %v15271_v45, %v7507_v55  ;;  %v12911_v45 = vld [vmem:[%s19643_s1 + $0x68] sm:$0xff]  ;;  %v12924_v55 = vld [vmem:[%s19643_s1 + $0x80] sm:$0xff] }
0x1191   : > { %v7660_v48 = vpop.f32.mrf.mxu1 }
0x1192   : > { %v7669_v57 = vadd.f32 %v7660_v48, %v7506_v50 }
0x1193   : > { %v15283_v59 = vpop.f32.mrf.mxu1 }
0x1194   : > { %v7833_v61 = vadd.f32 %v15283_v59, %v7670_v37  ;;  %v12925_v37 = vld [vmem:[%s19643_s1 + $0x88] sm:$0xff]  ;;  %s19647_s1 = scalar_lea.vmem [#allocation2], %s17209_s2 }
0x1195   : > { %v7823_v18 = vpop.f32.mrf.mxu1 }
0x1196   : > { %v7832_v46 = vadd.f32 %v7823_v18, %v7669_v57  ;;  %v9527_v18 = vld [vmem:[#allocation14] sm:$0xff]  ;;  %v9611_v57 = vld [vmem:[#allocation16] sm:$0xff] }
0x1197   : > { %v15295_v34 = vpop.f32.mrf.mxu1 }
0x1198   : > { %v7996_v26 = vadd.f32 %v15295_v34, %v7833_v61  ;;  %v16784_v61 = vmov 0.0  }
0x1199   : > { %v7986_v63 = vpop.f32.mrf.mxu1 }
0x119a   : > { %v8005_v2 = vadd.f32 %v12868_v41, %v7996_v26  ;;  %v7995_v51 = vadd.f32 %v7986_v63, %v7832_v46 }
0x119c   : > { %v8007_v42 = vmax.f32 %v8005_v2, 0.0  ;;  %v8004_v1 = vadd.f32 %v12868_v41, %v7995_v51 }
0x119e   : > { %v8006_v7 = vmax.f32 %v8004_v1, 0.0  ;;  %v8017_v8 = vmul.f32 %v12869_v0, %v8007_v42 }
0x11a0   : > { %v8016_v11 = vmul.f32 %v12869_v0, %v8006_v7  ;;  %v8027_v13 = vadd.f32 %v12870_v9, %v8017_v8 }
0x11a2   : > { %v8026_v5 = vadd.f32 %v12870_v9, %v8016_v11 }
0x11a4   : > { %15298 = vmatprep.mubr.msk.f32.mxu0 %vm4744_vm2, %v8026_v5  ;;  %15303 = vmatprep.mubr.msk.f32.mxu1 %vm4744_vm2, %v8026_v5 }
0x11a5   : > { %15299 = vmatmul.mubr.msk.f32.vlgmr.msra.gmra.mxu0 %vm4744_vm2, %v8027_v13  ;;  %15304 = vmatmul.mubr.msk.f32.vlgmr.msra.gmra.mxu1 %vm4744_vm2, %v8027_v13 }
0x11a6   : > { %15310 = vmatprep.mubr.msk.f32.mxu0 %vm6693_vm4, %v12873_v31  ;;  %15317 = vmatprep.mubr.msk.f32.mxu1 %vm6693_vm4, %v8028_v16 }
0x1265   : > { %v15300_v62 = vpop.f32.mrf.mxu0  ;;  %v15305_v20 = vpop.f32.mrf.mxu1 }
0x1266   : > { %15306 = vmatprep.subr.mxu0 %v15305_v20  ;;  %15313 = vmatprep.subr.mxu1 %v15300_v62 }
0x1267   : > { %v8103_v21 = vpop.f32.mrf.mxu0  ;;  %v8183_v25 = vpop.f32.mrf.mxu1  ;;  %15307 = vmatpush3.msra.mxu0 %v15305_v20  ;;  %15314 = vmatpush3.msra.mxu1 %v15300_v62 }
0x1268   : > { %15308 = vmatprep.subr.mxu0 %v8183_v25  ;;  %15315 = vmatprep.subr.mxu1 %v8103_v21 }
0x1269   : > { %15309 = vmatpush3.msra.mxu0 %v8183_v25  ;;  %15316 = vmatpush3.msra.mxu1 %v8103_v21 }
0x126a   : > { %15311 = vmatmul.mubr.msk.f32.vlgmr.msra.gmra.mxu0 %vm6693_vm4, %v12874_v27  ;;  %15318 = vmatmul.mubr.msk.f32.vlgmr.msra.gmra.mxu1 %vm6693_vm4, %v8029_v10 }
0x126b   : > { %15322 = vmatprep.mubr.msk.f32.mxu0 %vm4744_vm2, %v8026_v5  ;;  %15320 = vmatprep.subr.mxu0 %v12884_v24 }
0x126c   : > { %15321 = vmatpush3.msra.mxu0 %v12884_v24  ;;  %15329 = vmatprep.mubr.msk.f32.mxu1 %vm6693_vm4, %v12882_v30 }
0x126d   : > { %15332 = vmatprep.subr.mxu0 %v12891_v6 }
0x126e   : > { %15323 = vmatmul.mubr.msk.f32.vlgmr.msra.gmra.mxu0 %vm4744_vm2, %v8027_v13 }
0x126f   : > { %15334 = vmatprep.mubr.msk.f32.mxu0 %vm4744_vm2, %v8026_v5  ;;  %15333 = vmatpush3.msra.mxu0 %v12891_v6 }
0x1270   : > { %15344 = vmatprep.subr.mxu0 %v12898_v14 }
0x1272   : > { %15335 = vmatmul.mubr.msk.f32.vlgmr.msra.gmra.mxu0 %vm4744_vm2, %v8027_v13 }
0x1273   : > { %15346 = vmatprep.mubr.msk.f32.mxu0 %vm4744_vm2, %v8026_v5  ;;  %15345 = vmatpush3.msra.mxu0 %v12898_v14 }
0x1274   : > { %15356 = vmatprep.subr.mxu0 %v12905_v29 }
0x1276   : > { %15347 = vmatmul.mubr.msk.f32.vlgmr.msra.gmra.mxu0 %vm4744_vm2, %v8027_v13 }
0x1277   : > { %15358 = vmatprep.mubr.msk.f32.mxu0 %vm4744_vm2, %v8026_v5  ;;  %15357 = vmatpush3.msra.mxu0 %v12905_v29 }
0x1278   : > { %15368 = vmatprep.subr.mxu0 %v12912_v39 }
0x127a   : > { %15359 = vmatmul.mubr.msk.f32.vlgmr.msra.gmra.mxu0 %vm4744_vm2, %v8027_v13 }
0x127b   : > { %15370 = vmatprep.mubr.msk.f32.mxu0 %vm4744_vm2, %v8026_v5  ;;  %15369 = vmatpush3.msra.mxu0 %v12912_v39  ;;  %v12931_v39 = vld [vmem:[#allocation10] ss:$0 sm:$0xff] }
0x127c   : > { %15380 = vmatprep.subr.mxu0 %v12919_v28 }
0x127e   : > { %15371 = vmatmul.mubr.msk.f32.vlgmr.msra.gmra.mxu0 %vm4744_vm2, %v8027_v13 }
0x127f   : > { %15382 = vmatprep.mubr.msk.f32.mxu0 %vm4744_vm2, %v8026_v5  ;;  %15381 = vmatpush3.msra.mxu0 %v12919_v28 }
0x1280   : > { %15392 = vmatprep.subr.mxu0 %v12926_v15 }
0x1282   : > { %15383 = vmatmul.mubr.msk.f32.vlgmr.msra.gmra.mxu0 %vm4744_vm2, %v8027_v13 }
0x1283   : > { %15394 = vmatprep.mubr.msk.f32.mxu0 %vm4744_vm2, %v8026_v5  ;;  %15393 = vmatpush3.msra.mxu0 %v12926_v15 }
0x1284   : > { %15404 = vmatprep.subr.mxu0 %v9527_v18 }
0x1286   : > { %15395 = vmatmul.mubr.msk.f32.vlgmr.msra.gmra.mxu0 %vm4744_vm2, %v8027_v13 }
0x1287   : > { %15405 = vmatpush3.msra.mxu0 %v9527_v18  ;;  %v9798_v18 = vld [vmem:[%s19645_s8 + $0x10] sm:$0xff] }
0x1288   : > { %15414 = vmatprep.subr.mxu0 %v16784_v61 }
0x132a   : > { %v18840_v32 = vpop.f32.mrf.mxu0  ;;  %v15319_v34 = vpop.f32.mrf.mxu1 }
0x132b   : > { %v8351_v0 = vadd.f32 %v15319_v34, %v18840_v32  ;;  %v10541_v34 = vld [vmem:[#allocation17 + $0x18] sm:$0xff] }
0x132c   : > { %v18842_v23 = vpop.f32.mrf.mxu0  ;;  %v8345_v41 = vpop.f32.mrf.mxu1 }
0x132d   : > { %v8346_v7 = vadd.f32 %v8345_v41, %v18842_v23  ;;  %v9799_v41 = vld [vmem:[%s19645_s8 + $0x18] sm:$0xff] }
0x132e   : > { %v15324_v3 = vpop.f32.mrf.mxu0 }
0x132f   : > { %15325 = vmatprep.subr.mxu1 %v15324_v3 }
0x1330   : > { %v8425_v4 = vpop.f32.mrf.mxu0  ;;  %15326 = vmatpush3.msra.mxu1 %v15324_v3 }
0x1331   : > { %15327 = vmatprep.subr.mxu1 %v8425_v4 }
0x1332   : > { %15328 = vmatpush3.msra.mxu1 %v8425_v4  ;;  %v15336_v12 = vpop.f32.mrf.mxu0  ;;  %v12932_v4 = vld [vmem:[#allocation10 + $0x1] ss:$0 sm:$0xff] }
0x1333   : > { %15330 = vmatmul.mubr.msk.f32.vlgmr.msra.gmra.mxu1 %vm6693_vm4, %v12883_v17  ;;  %15337 = vmatprep.subr.mxu1 %v15336_v12 }
0x1334   : > { %v8588_v22 = vpop.f32.mrf.mxu0  ;;  %15338 = vmatpush3.msra.mxu1 %v15336_v12  ;;  %15341 = vmatprep.mubr.msk.f32.mxu1 %vm6693_vm4, %v12889_v44 }
0x1335   : > { %15339 = vmatprep.subr.mxu1 %v8588_v22 }
0x1336   : > { %15340 = vmatpush3.msra.mxu1 %v8588_v22  ;;  %v15348_v56 = vpop.f32.mrf.mxu0  ;;  %v12933_v22 = vld [vmem:[#allocation10 + $0x2] ss:$0 sm:$0xff] }
0x1337   : > { %15342 = vmatmul.mubr.msk.f32.vlgmr.msra.gmra.mxu1 %vm6693_vm4, %v12890_v54  ;;  %15349 = vmatprep.subr.mxu1 %v15348_v56 }
0x1338   : > { %v8751_v58 = vpop.f32.mrf.mxu0  ;;  %15350 = vmatpush3.msra.mxu1 %v15348_v56  ;;  %15353 = vmatprep.mubr.msk.f32.mxu1 %vm6693_vm4, %v12896_v19 }
0x1339   : > { %15351 = vmatprep.subr.mxu1 %v8751_v58 }
0x133a   : > { %15352 = vmatpush3.msra.mxu1 %v8751_v58  ;;  %v15360_v52 = vpop.f32.mrf.mxu0  ;;  %v9689_v58 = vld [vmem:[%s19644_s12] sm:$0xff]  ;;  %s19649_s12 = sld [smem:[#allocation71_spill]] }
0x133b   : > { %15354 = vmatmul.mubr.msk.f32.vlgmr.msra.gmra.mxu1 %vm6693_vm4, %v12897_v35  ;;  %15361 = vmatprep.subr.mxu1 %v15360_v52  ;;  %v9526_v35 = vld [vmem:[%s19647_s1] sm:$0x1]  ;;  %s19648_s1 = sld [smem:[#allocation64_spill]] }
0x133c   : > { %v8914_v33 = vpop.f32.mrf.mxu0  ;;  %15362 = vmatpush3.msra.mxu1 %v15360_v52  ;;  %15365 = vmatprep.mubr.msk.f32.mxu1 %vm6693_vm4, %v12903_v47  ;;  %v9796_v47 = vld [vmem:[%s19645_s8] sm:$0xff] }
0x133d   : > { %15363 = vmatprep.subr.mxu1 %v8914_v33  ;;  %v9764_v52 = vld [vmem:[%s19646_s9] sm:$0xff] }
0x133e   : > { %15364 = vmatpush3.msra.mxu1 %v8914_v33  ;;  %v15372_v36 = vpop.f32.mrf.mxu0  ;;  %v9529_v33 = vld [vmem:[#allocation11 + $0x8] sm:$0xff] }
0x133f   : > { %15366 = vmatmul.mubr.msk.f32.vlgmr.msra.gmra.mxu1 %vm6693_vm4, %v12904_v38  ;;  %15373 = vmatprep.subr.mxu1 %v15372_v36  ;;  %v9613_v38 = vld [vmem:[#allocation13 + $0x8] sm:$0xff] }
0x1340   : > { %v9077_v43 = vpop.f32.mrf.mxu0  ;;  %15374 = vmatpush3.msra.mxu1 %v15372_v36  ;;  %15377 = vmatprep.mubr.msk.f32.mxu1 %vm6693_vm4, %v12910_v40 }
0x1341   : > { %15375 = vmatprep.subr.mxu1 %v9077_v43 }
0x1342   : > { %15376 = vmatpush3.msra.mxu1 %v9077_v43  ;;  %v15384_v53 = vpop.f32.mrf.mxu0  ;;  %v9528_v43 = vld [vmem:[#allocation11] sm:$0xff] }
0x1343   : > { %15378 = vmatmul.mubr.msk.f32.vlgmr.msra.gmra.mxu1 %vm6693_vm4, %v12911_v45  ;;  %15385 = vmatprep.subr.mxu1 %v15384_v53  ;;  %v9612_v45 = vld [vmem:[#allocation13] sm:$0xff] }
0x1344   : > { %v9240_v48 = vpop.f32.mrf.mxu0  ;;  %15386 = vmatpush3.msra.mxu1 %v15384_v53  ;;  %15389 = vmatprep.mubr.msk.f32.mxu1 %vm6693_vm4, %v12917_v49 }
0x1345   : > { %15387 = vmatprep.subr.mxu1 %v9240_v48 }
0x1346   : > { %15388 = vmatpush3.msra.mxu1 %v9240_v48  ;;  %v15396_v59 = vpop.f32.mrf.mxu0 }
0x1347   : > { %15390 = vmatmul.mubr.msk.f32.vlgmr.msra.gmra.mxu1 %vm6693_vm4, %v12918_v60  ;;  %15397 = vmatprep.subr.mxu1 %v15396_v59 }
0x1348   : > { %v9403_v50 = vpop.f32.mrf.mxu0  ;;  %15398 = vmatpush3.msra.mxu1 %v15396_v59  ;;  %15401 = vmatprep.mubr.msk.f32.mxu1 %vm6693_vm4, %v12924_v55 }
0x1349   : > { %15399 = vmatprep.subr.mxu1 %v9403_v50 }
0x134a   : > { %15400 = vmatpush3.msra.mxu1 %v9403_v50  ;;  %v9797_v50 = vld [vmem:[%s19645_s8 + $0x8] sm:$0xff] }
0x134b   : > { %15402 = vmatmul.mubr.msk.f32.vlgmr.msra.gmra.mxu1 %vm6693_vm4, %v12925_v37  ;;  %15409 = vmatprep.subr.mxu1 %v9611_v57  ;;  %v9765_v37 = vld [vmem:[%s19646_s9 + $0x8] sm:$0xff] }
0x134c   : > { %15410 = vmatpush3.msra.mxu1 %v9611_v57  ;;  %v9766_v57 = vld [vmem:[%s19646_s9 + $0x10] sm:$0xff] }
0x13f3   : > { %v15331_v46 = vpop.f32.mrf.mxu1 }
0x13f4   : > { %v8516_v8 = vadd.f32 %v15331_v46, %v8351_v0  ;;  %v9767_v46 = vld [vmem:[%s19646_s9 + $0x18] sm:$0xff]  ;;  %v9802_v0 = vld [vmem:[%s19645_s8 + $0x30] sm:$0xff] }
0x13f5   : > { %v8506_v26 = vpop.f32.mrf.mxu1 }
0x13f6   : > { %v8515_v11 = vadd.f32 %v8506_v26, %v8346_v7  ;;  %v9800_v26 = vld [vmem:[%s19645_s8 + $0x20] sm:$0xff]  ;;  %v9803_v7 = vld [vmem:[%s19645_s8 + $0x38] sm:$0xff] }
0x13f7   : > { %v15343_v63 = vpop.f32.mrf.mxu1 }
0x13f8   : > { %v8679_v5 = vadd.f32 %v15343_v63, %v8516_v8  ;;  %v9768_v63 = vld [vmem:[%s19646_s9 + $0x20] sm:$0xff]  ;;  %v9771_v8 = vld [vmem:[%s19646_s9 + $0x38] sm:$0xff] }
0x13f9   : > { %v8669_v2 = vpop.f32.mrf.mxu1 }
0x13fa   : > { %v8678_v31 = vadd.f32 %v8669_v2, %v8515_v11  ;;  %v10540_v2 = vld [vmem:[#allocation17 + $0x10] sm:$0xff]  ;;  %v9772_v11 = vld [vmem:[%s19646_s9 + $0x40] sm:$0xff] }
0x13fb   : > { %v15355_v51 = vpop.f32.mrf.mxu1 }
0x13fc   : > { %v8842_v16 = vadd.f32 %v15355_v51, %v8679_v5  ;;  %v9801_v51 = vld [vmem:[%s19645_s8 + $0x28] sm:$0xff] }
0x13fd   : > { %v8832_v42 = vpop.f32.mrf.mxu1  ;;  %v9805_v5 = vld [vmem:[%s19645_s8 + $0x48] sm:$0xff] }
0x13fe   : > { %v8841_v20 = vadd.f32 %v8832_v42, %v8678_v31  ;;  %v9769_v42 = vld [vmem:[%s19646_s9 + $0x28] sm:$0xff]  ;;  %v9806_v31 = vld [vmem:[%s19645_s8 + $0x50] sm:$0xff] }
0x13ff   : > { %v15367_v1 = vpop.f32.mrf.mxu1 }
0x1400   : > { %v9005_v21 = vadd.f32 %v15367_v1, %v8842_v16  ;;  %v9770_v1 = vld [vmem:[%s19646_s9 + $0x30] sm:$0xff] }
0x1401   : > { %v8995_v9 = vpop.f32.mrf.mxu1  ;;  %v9774_v16 = vld [vmem:[%s19646_s9 + $0x50] sm:$0xff] }
0x1402   : > { %v9004_v27 = vadd.f32 %v8995_v9, %v8841_v20  ;;  %v9804_v9 = vld [vmem:[%s19645_s8 + $0x40] sm:$0xff]  ;;  %v9775_v20 = vld [vmem:[%s19646_s9 + $0x58] sm:$0xff] }
0x1403   : > { %v15379_v13 = vpop.f32.mrf.mxu1 }
0x1404   : > { %v9168_v10 = vadd.f32 %v15379_v13, %v9005_v21  ;;  %v9773_v13 = vld [vmem:[%s19646_s9 + $0x48] sm:$0xff]  ;;  %v9808_v21 = vld [vmem:[%s19645_s8 + $0x60] sm:$0xff] }
0x1405   : > { %v9158_v62 = vpop.f32.mrf.mxu1 }
0x1406   : > { %v9167_v6 = vadd.f32 %v9158_v62, %v9004_v27  ;;  %v9807_v62 = vld [vmem:[%s19645_s8 + $0x58] sm:$0xff]  ;;  %v9809_v27 = vld [vmem:[%s19645_s8 + $0x68] sm:$0xff] }
0x1407   : > { %v15391_v25 = vpop.f32.mrf.mxu1 }
0x1408   : > { %v9331_v14 = vadd.f32 %v15391_v25, %v9168_v10  ;;  %v9776_v25 = vld [vmem:[%s19646_s9 + $0x60] sm:$0xff]  ;;  %v9777_v10 = vld [vmem:[%s19646_s9 + $0x68] sm:$0xff] }
0x1409   : > { %v9321_v24 = vpop.f32.mrf.mxu1 }
0x140a   : > { %v9330_v28 = vadd.f32 %v9321_v24, %v9167_v6  ;;  %v9810_v24 = vld [vmem:[%s19645_s8 + $0x70] sm:$0xff] }
0x140b   : > { %v15403_v29 = vpop.f32.mrf.mxu1  ;;  %v9778_v6 = vld [vmem:[%s19646_s9 + $0x70] sm:$0xff] }
0x140c   : > { %v9494_v15 = vadd.f32 %v15403_v29, %v9331_v14  ;;  %v9811_v14 = vld [vmem:[%s19645_s8 + $0x78] sm:$0xff] }
0x140d   : > { %v9484_v30 = vpop.f32.mrf.mxu1  ;;  %v9779_v29 = vld [vmem:[%s19646_s9 + $0x78] sm:$0xff] }
0x140e   : > { %v9503_v32 = vadd.f32 %v12931_v39, %v9494_v15  ;;  %v9493_v23 = vadd.f32 %v9484_v30, %v9330_v28  ;;  %v9780_v28 = vld [vmem:[%s19646_s9 + $0x80] sm:$0xff]  ;;  %v9813_v15 = vld [vmem:[%s19645_s8 + $0x88] sm:$0xff] }
0x140f   : > { %v9781_v30 = vld [vmem:[%s19646_s9 + $0x88] sm:$0xff] }
0x1410   : > { %v9505_v3 = vmax.f32 %v9503_v32, 0.0  ;;  %v9502_v17 = vadd.f32 %v12931_v39, %v9493_v23  ;;  %v9812_v39 = vld [vmem:[%s19645_s8 + $0x80] sm:$0xff]  ;;  %v9814_v32 = vld [vmem:[%s19645_s8 + $0x90] sm:$0xff] }
0x1411   : > { %v9782_v23 = vld [vmem:[%s19646_s9 + $0x90] sm:$0xff] }
0x1412   : > { %v9504_v44 = vmax.f32 %v9502_v17, 0.0  ;;  %v9515_v12 = vmul.f32 %v12932_v4, %v9505_v3  ;;  %v9815_v3 = vld [vmem:[%s19645_s8 + $0x98] sm:$0xff]  ;;  %v9816_v17 = vld [vmem:[%s19645_s8 + $0xa0] sm:$0xff] }
0x1414   : > { %v9514_v54 = vmul.f32 %v12932_v4, %v9504_v44  ;;  %v9525_v56 = vadd.f32 %v12933_v22, %v9515_v12  ;;  %v9783_v4 = vld [vmem:[%s19646_s9 + $0x98] sm:$0xff]  ;;  %v9784_v44 = vld [vmem:[%s19646_s9 + $0xa0] sm:$0xff]  ;;  %v9817_v12 = vld [vmem:[%s19645_s8 + $0xa8] sm:$0xff] }
0x1416   : > { %v9524_v19 = vadd.f32 %v12933_v22, %v9514_v54  ;;  %v9785_v22 = vld [vmem:[%s19646_s9 + $0xa8] sm:$0xff]  ;;  %v9818_v54 = vld [vmem:[%s19645_s8 + $0xb0] sm:$0xff] }
0x1418   : > { %15406 = vmatprep.mubr.msk.f32.mxu0 %vm4744_vm2, %v9524_v19  ;;  %15411 = vmatprep.mubr.msk.f32.mxu1 %vm4744_vm2, %v9524_v19  ;;  %v9786_v19 = vld [vmem:[%s19646_s9 + $0xb0] sm:$0xff] }
0x1419   : > { %15407 = vmatmul.mubr.msk.f32.vlgmr.msra.gmra.mxu0 %vm4744_vm2, %v9525_v56  ;;  %15412 = vmatmul.mubr.msk.f32.vlgmr.msra.gmra.mxu1 %vm4744_vm2, %v9525_v56  ;;  %v9819_v56 = vld [vmem:[%s19645_s8 + $0xb8] sm:$0xff] }
0x141a   : > { %15415 = vmatpush3.msra.mxu0 %v9689_v58  ;;  %15416 = vmatprep.mubr.msk.f32.mxu0 %vm16785_vm5, %v16784_v61  ;;  %v9787_v58 = vld [vmem:[%s19646_s9 + $0xb8] sm:$0xff] }
0x141b   : > { %15423 = vmatprep.mubr.msk.f32.mxu1 %vm6693_vm4, %v9796_v47  ;;  %v9788_v47 = vld [vmem:[%s19646_s9 + $0xc0] sm:$0xff] }
0x141d   : > { %15417 = vmatmul.mubr.msk.f32.vlgmr.msra.gmra.mxu0 %vm4744_vm2, %v9526_v35  ;;  %v9820_v35 = vld [vmem:[%s19645_s8 + $0xc0] sm:$0xff] }
0x141e   : > { %15475 = vmatprep.mubr.msk.f32.mxu0 %vm6693_vm4, %v9764_v52  ;;  %v9821_v52 = vld [vmem:[%s19645_s8 + $0xc8] sm:$0xff] }
0x14d9   : > { %v15408_v40 = vpop.f32.mrf.mxu0  ;;  %v15413_v36 = vpop.f32.mrf.mxu1 }
0x14da   : > { %v9608_v49 = vadd.f32 %v15408_v40, %v9529_v33  ;;  %v9686_v53 = vadd.f32 %v15413_v36, %v9613_v38  ;;  %v9789_v33 = vld [vmem:[%s19646_s9 + $0xc8] sm:$0xff]  ;;  %v9822_v38 = vld [vmem:[%s19645_s8 + $0xd0] sm:$0xff]  ;;  %v9823_v36 = vld [vmem:[%s19645_s8 + $0xd8] sm:$0xff] }
0x14db   : > { %v9602_v48 = vpop.f32.mrf.mxu0  ;;  %v9680_v60 = vpop.f32.mrf.mxu1  ;;  %v9790_v40 = vld [vmem:[%s19646_s9 + $0xd0] sm:$0xff] }
0x14dc   : > { %v9603_v55 = vadd.f32 %v9602_v48, %v9528_v43  ;;  %v9681_v59 = vadd.f32 %v9680_v60, %v9612_v45  ;;  %15419 = vmatprep.subr.mxu1 %v9686_v53  ;;  %15471 = vmatprep.subr.mxu0 %v9608_v49  ;;  %v9791_v43 = vld [vmem:[%s19646_s9 + $0xd8] sm:$0xff]  ;;  %v9824_v45 = vld [vmem:[%s19645_s8 + $0xe0] sm:$0xff]  ;;  %v9793_v48 = vld [vmem:[%s19646_s9 + $0xe8] sm:$0xff] }
0x14dd   : > { %15420 = vmatpush3.msra.mxu1 %v9686_v53  ;;  %15472 = vmatpush3.msra.mxu0 %v9608_v49  ;;  %v9792_v49 = vld [vmem:[%s19646_s9 + $0xe0] sm:$0xff]  ;;  %v9825_v53 = vld [vmem:[%s19645_s8 + $0xe8] sm:$0xff]  ;;  %v9826_v60 = vld [vmem:[%s19645_s8 + $0xf0] sm:$0xff] }
0x14de   : > { %15421 = vmatprep.subr.mxu1 %v9681_v59  ;;  %15473 = vmatprep.subr.mxu0 %v9603_v55 }
0x14df   : > { %15422 = vmatpush3.msra.mxu1 %v9681_v59  ;;  %15474 = vmatpush3.msra.mxu0 %v9603_v55  ;;  %v9794_v55 = vld [vmem:[%s19646_s9 + $0xf0] sm:$0xff]  ;;  %v9827_v59 = vld [vmem:[%s19645_s8 + $0xf8] sm:$0xff]  ;;  %s16620_s8 = scalar_lea.vmem %s11921_s5, 16 }
0x14e0   : > { %15424 = vmatmul.mubr.msk.f32.vlgmr.msra.gmra.mxu1 %vm6693_vm4, %v9797_v50  ;;  %15476 = vmatmul.mubr.msk.f32.vlgmr.msra.gmra.mxu0 %vm6693_vm4, %v9765_v37  ;;  %v9795_v50 = vld [vmem:[%s19646_s9 + $0xf8] sm:$0xff]  ;;  %v9760_v37 = vpop.f32.mrf.mxu0  ;;  %p16621_p10 = scmp.ne.s32.totalorder %s11921_s5, %s16620_s8  ;;  %s16787_s9 = smov [#allocation34]  }
0x14e1   : > { %15426 = vmatprep.mubr.msk.f32.mxu1 %vm6693_vm4, %v9798_v18  ;;  %15478 = vmatprep.mubr.msk.f32.mxu0 %vm6693_vm4, %v9766_v57  ;;  %v10539_v57 = vld [vmem:[#allocation17 + $0x8] sm:$0xff]  ;;  %s16624_s11 = sshll.u32 %s16787_s9, 4  ;;  %s16625_s11 = int_to_ptr.vmem [resolvable:$false] %s16624_s11 }
0x14e2   : > { %15523 = vmatprep.subr.mxu1 %v10541_v34  ;;  %v15418_v18 = vpop.f32.mrf.mxu0  ;;  %p16622_p11 = pnand %p16621_p10, %p19651_p5  ;;  %s16626_s26 = scalar_lea.vmem %s16625_s11, 32 }
0x14e3   : > { %15524 = vmatpush3.msra.mxu1 %v10541_v34  ;;  %v10538_v34 = vld [vmem:[#allocation17] sm:$0xff]  ;;  %p16627_p1 = scmp.lt.s32.totalorder %s11921_s5, %s16625_s11  ;;  %p16628_p3 = scmp.lt.s32.totalorder %s16626_s26, %s16620_s8 }
0x14e4   : > { %15427 = vmatmul.mubr.msk.f32.gmra.mxu1 %vm6693_vm4, %v9799_v41  ;;  %15479 = vmatmul.mubr.msk.f32.gmra.mxu0 %vm6693_vm4, %v9767_v46  ;;  %v10906_v41 = vld [vmem:[#allocation20 + $0x18] sm:$0xff]  ;;  %v10905_v46 = vld [vmem:[#allocation20 + $0x10] sm:$0xff]  ;;  %p16623_p0 = pneg %p16622_p11 }
0x14e5   : > { %15429 = vmatprep.mubr.msk.f32.mxu1 %vm6693_vm4, %v9800_v26  ;;  %15481 = vmatprep.mubr.msk.f32.mxu0 %vm6693_vm4, %v9768_v63  ;;  %v10470_v26 = vlaneseq  ;;  %p16629_p12 = por %p16628_p3, %p16627_p1 }
0x14e6   : > { %15525 = vmatprep.subr.mxu1 %v10540_v2  ;;  %15579 = vmatprep.subr.mxu0 %v10906_v41 }
0x14e7   : > { %15526 = vmatpush3.msra.mxu1 %v10540_v2  ;;  %15580 = vmatpush3.msra.mxu0 %v10906_v41  ;;  %v10471_v63 = vshrl.u32 %v10470_v26, 7  ;;  %v9690_v2 = vld [vmem:[%s19648_s1] sm:$0x1]  ;;  %s19650_s1 = sld [smem:[#allocation72_spill]]  ;;  %p16630_p9 = pnand %p16629_p12, %p16623_p0 }
0x14e8   : > { %15430 = vmatmul.mubr.msk.f32.gmra.mxu1 %vm6693_vm4, %v9801_v51  ;;  %15482 = vmatmul.mubr.msk.f32.gmra.mxu0 %vm6693_vm4, %v9769_v42  ;;  %v9761_v51 = vadd.f32 %v9760_v37, %v9690_v2 }
0x14e9   : > { %15432 = vmatprep.mubr.msk.f32.mxu1 %vm6693_vm4, %v9802_v0  ;;  %15484 = vmatprep.mubr.msk.f32.mxu0 %vm6693_vm4, %v9770_v1  ;;  %v10472_v42 = vsub.s32 0, %v10471_v63 }
0x14ea   : > { %15527 = vmatprep.subr.mxu1 %v10539_v57  ;;  %15581 = vmatprep.subr.mxu0 %v10905_v46 }
0x14eb   : > { %15528 = vmatpush3.msra.mxu1 %v10539_v57  ;;  %15582 = vmatpush3.msra.mxu0 %v10905_v46 }
0x14ec   : > { %15433 = vmatmul.mubr.msk.f32.gmra.mxu1 %vm6693_vm4, %v9803_v7  ;;  %15485 = vmatmul.mubr.msk.f32.gmra.mxu0 %vm6693_vm4, %v9771_v8  ;;  %v19012_v8 = vrot.slane %v9761_v51, %v10472_v42 }
0x14ed   : > { %15435 = vmatprep.mubr.msk.f32.mxu1 %vm6693_vm4, %v9804_v9  ;;  %15487 = vmatprep.mubr.msk.f32.mxu0 %vm6693_vm4, %v9772_v11  ;;  %s19301_s6 = scalar_lea.hbm %s19650_s1, %s13105_s3 }
0x14ee   : > { %15529 = vmatprep.subr.mxu1 %v10538_v34 }
0x14ef   : > { %15530 = vmatpush3.msra.mxu1 %v10538_v34 }
0x14f0   : > { %15436 = vmatmul.mubr.msk.f32.gmra.mxu1 %vm6693_vm4, %v9805_v5  ;;  %15488 = vmatmul.mubr.msk.f32.gmra.mxu0 %vm6693_vm4, %v9773_v13 }
0x14f1   : > { %15438 = vmatprep.mubr.msk.f32.mxu1 %vm6693_vm4, %v9806_v31  ;;  %15490 = vmatprep.mubr.msk.f32.mxu0 %vm6693_vm4, %v9774_v16 }
0x14f4   : > { %15439 = vmatmul.mubr.msk.f32.gmra.mxu1 %vm6693_vm4, %v9807_v62  ;;  %15491 = vmatmul.mubr.msk.f32.gmra.mxu0 %vm6693_vm4, %v9775_v20 }
0x14f5   : > { %15441 = vmatprep.mubr.msk.f32.mxu1 %vm6693_vm4, %v9808_v21  ;;  %15493 = vmatprep.mubr.msk.f32.mxu0 %vm6693_vm4, %v9776_v25 }
0x14f8   : > { %15442 = vmatmul.mubr.msk.f32.gmra.mxu1 %vm6693_vm4, %v9809_v27  ;;  %15494 = vmatmul.mubr.msk.f32.gmra.mxu0 %vm6693_vm4, %v9777_v10 }
0x14f9   : > { %15444 = vmatprep.mubr.msk.f32.mxu1 %vm6693_vm4, %v9810_v24  ;;  %15496 = vmatprep.mubr.msk.f32.mxu0 %vm6693_vm4, %v9778_v6 }
0x14fc   : > { %15445 = vmatmul.mubr.msk.f32.gmra.mxu1 %vm6693_vm4, %v9811_v14  ;;  %15497 = vmatmul.mubr.msk.f32.gmra.mxu0 %vm6693_vm4, %v9779_v29 }
0x14fd   : > { %15447 = vmatprep.mubr.msk.f32.mxu1 %vm6693_vm4, %v9812_v39  ;;  %15499 = vmatprep.mubr.msk.f32.mxu0 %vm6693_vm4, %v9780_v28 }
0x1500   : > { %15448 = vmatmul.mubr.msk.f32.gmra.mxu1 %vm6693_vm4, %v9813_v15  ;;  %15500 = vmatmul.mubr.msk.f32.gmra.mxu0 %vm6693_vm4, %v9781_v30 }
0x1501   : > { %15450 = vmatprep.mubr.msk.f32.mxu1 %vm6693_vm4, %v9814_v32  ;;  %15502 = vmatprep.mubr.msk.f32.mxu0 %vm6693_vm4, %v9782_v23 }
0x1504   : > { %15451 = vmatmul.mubr.msk.f32.gmra.mxu1 %vm6693_vm4, %v9815_v3  ;;  %15503 = vmatmul.mubr.msk.f32.gmra.mxu0 %vm6693_vm4, %v9783_v4 }
0x1505   : > { %15453 = vmatprep.mubr.msk.f32.mxu1 %vm6693_vm4, %v9816_v17  ;;  %15505 = vmatprep.mubr.msk.f32.mxu0 %vm6693_vm4, %v9784_v44 }
0x1508   : > { %15454 = vmatmul.mubr.msk.f32.gmra.mxu1 %vm6693_vm4, %v9817_v12  ;;  %15506 = vmatmul.mubr.msk.f32.gmra.mxu0 %vm6693_vm4, %v9785_v22 }
0x1509   : > { %15456 = vmatprep.mubr.msk.f32.mxu1 %vm6693_vm4, %v9818_v54  ;;  %15508 = vmatprep.mubr.msk.f32.mxu0 %vm6693_vm4, %v9786_v19 }
0x150c   : > { %15457 = vmatmul.mubr.msk.f32.gmra.mxu1 %vm6693_vm4, %v9819_v56  ;;  %15509 = vmatmul.mubr.msk.f32.gmra.mxu0 %vm6693_vm4, %v9787_v58 }
0x150d   : > { %15459 = vmatprep.mubr.msk.f32.mxu1 %vm6693_vm4, %v9820_v35  ;;  %15511 = vmatprep.mubr.msk.f32.mxu0 %vm6693_vm4, %v9788_v47 }
0x1510   : > { %15460 = vmatmul.mubr.msk.f32.gmra.mxu1 %vm6693_vm4, %v9821_v52  ;;  %15512 = vmatmul.mubr.msk.f32.gmra.mxu0 %vm6693_vm4, %v9789_v33 }
0x1511   : > { %15462 = vmatprep.mubr.msk.f32.mxu1 %vm6693_vm4, %v9822_v38  ;;  %15514 = vmatprep.mubr.msk.f32.mxu0 %vm6693_vm4, %v9790_v40 }
0x1514   : > { %15463 = vmatmul.mubr.msk.f32.gmra.mxu1 %vm6693_vm4, %v9823_v36  ;;  %15515 = vmatmul.mubr.msk.f32.gmra.mxu0 %vm6693_vm4, %v9791_v43 }
0x1515   : > { %15465 = vmatprep.mubr.msk.f32.mxu1 %vm6693_vm4, %v9824_v45  ;;  %15517 = vmatprep.mubr.msk.f32.mxu0 %vm6693_vm4, %v9792_v49 }
0x1518   : > { %15466 = vmatmul.mubr.msk.f32.gmra.mxu1 %vm6693_vm4, %v9825_v53  ;;  %15518 = vmatmul.mubr.msk.f32.gmra.mxu0 %vm6693_vm4, %v9793_v48 }
0x1519   : > { %15468 = vmatprep.mubr.msk.f32.mxu1 %vm6693_vm4, %v9826_v60  ;;  %15520 = vmatprep.mubr.msk.f32.mxu0 %vm6693_vm4, %v9794_v55 }
0x151c   : > { %15469 = vmatmul.mubr.msk.f32.gmra.mxu1 %vm6693_vm4, %v9827_v59  ;;  %15521 = vmatmul.mubr.msk.f32.gmra.mxu0 %vm6693_vm4, %v9795_v50 }
0x15a0   : > { %v15425_v0 = vpop.f32.mrf.mxu1  ;;  %v15477_v1 = vpop.f32.mrf.mxu0 }
0x15a1   : > { %v10317_v7 = vadd.f32 %v15477_v1, %v15425_v0 }
0x15a2   : > { %v9990_v9 = vpop.f32.mrf.mxu1  ;;  %v10311_v11 = vpop.f32.mrf.mxu0 }
0x15a3   : > { %v10312_v5 = vadd.f32 %v10311_v11, %v9990_v9  ;;  %v10475_v13 = vadd.f32 %v19012_v8, %v10317_v7 }
0x15a4   : > { %v15428_v31 = vpop.f32.mrf.mxu1  ;;  %v15480_v16 = vpop.f32.mrf.mxu0 }
0x15a5   : > { %v10474_v62 = vadd.f32 %v19012_v8, %v10312_v5  ;;  %v10327_v20 = vadd.f32 %v15480_v16, %v15428_v31  ;;  %v10507_v24 = vmax.f32 %v10475_v13, 0.0 }
0x15a6   : > { %v10000_v21 = vpop.f32.mrf.mxu1  ;;  %v10321_v25 = vpop.f32.mrf.mxu0 }
0x15a7   : > { %v10506_v27 = vmax.f32 %v10474_v62, 0.0  ;;  %v10322_v10 = vadd.f32 %v10321_v25, %v10000_v21  ;;  %v10477_v6 = vadd.f32 %v19012_v8, %v10327_v20 }
0x15a8   : > { %v15431_v14 = vpop.f32.mrf.mxu1  ;;  %v15483_v29 = vpop.f32.mrf.mxu0 }
0x15a9   : > { %v10476_v39 = vadd.f32 %v19012_v8, %v10322_v10  ;;  %v10337_v28 = vadd.f32 %v15483_v29, %v15431_v14  ;;  %15531 = vmatprep.mubr.msk.f32.mxu1 %vm10549_vm6, %v10506_v27  ;;  %v10509_v3 = vmax.f32 %v10477_v6, 0.0 }
0x15aa   : > { %v10010_v15 = vpop.f32.mrf.mxu1  ;;  %v10331_v30 = vpop.f32.mrf.mxu0  ;;  %15532 = vmatmul.mubr.msk.f32.vlgmr.msra.gmra.mxu1 %vm10549_vm6, %v10507_v24 }
0x15ab   : > { %v10508_v32 = vmax.f32 %v10476_v39, 0.0  ;;  %v10332_v23 = vadd.f32 %v10331_v30, %v10010_v15  ;;  %v10479_v4 = vadd.f32 %v19012_v8, %v10337_v28 }
0x15ac   : > { %v15434_v17 = vpop.f32.mrf.mxu1  ;;  %v15486_v44 = vpop.f32.mrf.mxu0 }
0x15ad   : > { %v10478_v12 = vadd.f32 %v19012_v8, %v10332_v23  ;;  %v10347_v22 = vadd.f32 %v15486_v44, %v15434_v17  ;;  %15534 = vmatprep.mubr.msk.f32.mxu1 %vm10549_vm6, %v10508_v32  ;;  %v10511_v35 = vmax.f32 %v10479_v4, 0.0 }
0x15ae   : > { %v10020_v54 = vpop.f32.mrf.mxu1  ;;  %v10341_v19 = vpop.f32.mrf.mxu0  ;;  %15535 = vmatmul.mubr.msk.f32.gmra.mxu1 %vm10549_vm6, %v10509_v3 }
0x15af   : > { %v10510_v56 = vmax.f32 %v10478_v12, 0.0  ;;  %v10342_v58 = vadd.f32 %v10341_v19, %v10020_v54  ;;  %v10481_v47 = vadd.f32 %v19012_v8, %v10347_v22 }
0x15b0   : > { %v15437_v52 = vpop.f32.mrf.mxu1  ;;  %v15489_v33 = vpop.f32.mrf.mxu0 }
0x15b1   : > { %v10480_v38 = vadd.f32 %v19012_v8, %v10342_v58  ;;  %v10357_v40 = vadd.f32 %v15489_v33, %v15437_v52  ;;  %15537 = vmatprep.mubr.msk.f32.mxu1 %vm10549_vm6, %v10510_v56  ;;  %v10513_v53 = vmax.f32 %v10481_v47, 0.0 }
0x15b2   : > { %v10030_v36 = vpop.f32.mrf.mxu1  ;;  %v10351_v43 = vpop.f32.mrf.mxu0  ;;  %15538 = vmatmul.mubr.msk.f32.gmra.mxu1 %vm10549_vm6, %v10511_v35 }
0x15b3   : > { %v10512_v45 = vmax.f32 %v10480_v38, 0.0  ;;  %v10352_v49 = vadd.f32 %v10351_v43, %v10030_v36  ;;  %v10483_v48 = vadd.f32 %v19012_v8, %v10357_v40 }
0x15b4   : > { %v15440_v60 = vpop.f32.mrf.mxu1  ;;  %v15492_v55 = vpop.f32.mrf.mxu0 }
0x15b5   : > { %v10482_v59 = vadd.f32 %v19012_v8, %v10352_v49  ;;  %v10367_v50 = vadd.f32 %v15492_v55, %v15440_v60  ;;  %15540 = vmatprep.mubr.msk.f32.mxu1 %vm10549_vm6, %v10512_v45  ;;  %v10515_v41 = vmax.f32 %v10483_v48, 0.0 }
0x15b6   : > { %v10040_v37 = vpop.f32.mrf.mxu1  ;;  %v10361_v18 = vpop.f32.mrf.mxu0  ;;  %15541 = vmatmul.mubr.msk.f32.gmra.mxu1 %vm10549_vm6, %v10513_v53 }
0x15b7   : > { %v10514_v57 = vmax.f32 %v10482_v59, 0.0  ;;  %v10362_v34 = vadd.f32 %v10361_v18, %v10040_v37  ;;  %v10485_v46 = vadd.f32 %v19012_v8, %v10367_v50 }
0x15b8   : > { %v15443_v26 = vpop.f32.mrf.mxu1  ;;  %v15495_v63 = vpop.f32.mrf.mxu0 }
0x15b9   : > { %v10484_v2 = vadd.f32 %v19012_v8, %v10362_v34  ;;  %v10377_v51 = vadd.f32 %v15495_v63, %v15443_v26  ;;  %15543 = vmatprep.mubr.msk.f32.mxu1 %vm10549_vm6, %v10514_v57  ;;  %v10517_v9 = vmax.f32 %v10485_v46, 0.0 }
0x15ba   : > { %v10050_v42 = vpop.f32.mrf.mxu1  ;;  %v10371_v0 = vpop.f32.mrf.mxu0  ;;  %15544 = vmatmul.mubr.msk.f32.gmra.mxu1 %vm10549_vm6, %v10515_v41 }
0x15bb   : > { %v10516_v1 = vmax.f32 %v10484_v2, 0.0  ;;  %v10372_v7 = vadd.f32 %v10371_v0, %v10050_v42  ;;  %v10487_v11 = vadd.f32 %v19012_v8, %v10377_v51 }
0x15bc   : > { %v15446_v5 = vpop.f32.mrf.mxu1  ;;  %v15498_v13 = vpop.f32.mrf.mxu0 }
0x15bd   : > { %v10486_v31 = vadd.f32 %v19012_v8, %v10372_v7  ;;  %v10387_v16 = vadd.f32 %v15498_v13, %v15446_v5  ;;  %15546 = vmatprep.mubr.msk.f32.mxu1 %vm10549_vm6, %v10516_v1  ;;  %v10519_v27 = vmax.f32 %v10487_v11, 0.0 }
0x15be   : > { %v10060_v62 = vpop.f32.mrf.mxu1  ;;  %v10381_v20 = vpop.f32.mrf.mxu0  ;;  %15547 = vmatmul.mubr.msk.f32.gmra.mxu1 %vm10549_vm6, %v10517_v9 }
0x15bf   : > { %v10518_v21 = vmax.f32 %v10486_v31, 0.0  ;;  %v10382_v25 = vadd.f32 %v10381_v20, %v10060_v62  ;;  %v10489_v10 = vadd.f32 %v19012_v8, %v10387_v16 }
0x15c0   : > { %v15449_v24 = vpop.f32.mrf.mxu1  ;;  %v15501_v6 = vpop.f32.mrf.mxu0 }
0x15c1   : > { %v10488_v14 = vadd.f32 %v19012_v8, %v10382_v25  ;;  %v10397_v29 = vadd.f32 %v15501_v6, %v15449_v24  ;;  %15549 = vmatprep.mubr.msk.f32.mxu1 %vm10549_vm6, %v10518_v21  ;;  %v10521_v32 = vmax.f32 %v10489_v10, 0.0 }
0x15c2   : > { %v10070_v39 = vpop.f32.mrf.mxu1  ;;  %v10391_v28 = vpop.f32.mrf.mxu0  ;;  %15550 = vmatmul.mubr.msk.f32.gmra.mxu1 %vm10549_vm6, %v10519_v27 }
0x15c3   : > { %v10520_v15 = vmax.f32 %v10488_v14, 0.0  ;;  %v10392_v30 = vadd.f32 %v10391_v28, %v10070_v39  ;;  %v10491_v23 = vadd.f32 %v19012_v8, %v10397_v29 }
0x15c4   : > { %v15452_v3 = vpop.f32.mrf.mxu1  ;;  %v15504_v4 = vpop.f32.mrf.mxu0 }
0x15c5   : > { %v10490_v17 = vadd.f32 %v19012_v8, %v10392_v30  ;;  %v10407_v44 = vadd.f32 %v15504_v4, %v15452_v3  ;;  %15552 = vmatprep.mubr.msk.f32.mxu1 %vm10549_vm6, %v10520_v15  ;;  %v10523_v56 = vmax.f32 %v10491_v23, 0.0 }
0x15c6   : > { %v10080_v12 = vpop.f32.mrf.mxu1  ;;  %v10401_v22 = vpop.f32.mrf.mxu0  ;;  %15553 = vmatmul.mubr.msk.f32.gmra.mxu1 %vm10549_vm6, %v10521_v32 }
0x15c7   : > { %v10522_v54 = vmax.f32 %v10490_v17, 0.0  ;;  %v10402_v19 = vadd.f32 %v10401_v22, %v10080_v12  ;;  %v10493_v58 = vadd.f32 %v19012_v8, %v10407_v44 }
0x15c8   : > { %v15455_v35 = vpop.f32.mrf.mxu1  ;;  %v15507_v47 = vpop.f32.mrf.mxu0 }
0x15c9   : > { %v10492_v52 = vadd.f32 %v19012_v8, %v10402_v19  ;;  %v10417_v33 = vadd.f32 %v15507_v47, %v15455_v35  ;;  %15555 = vmatprep.mubr.msk.f32.mxu1 %vm10549_vm6, %v10522_v54  ;;  %v10525_v45 = vmax.f32 %v10493_v58, 0.0  ;;  %v10904_v47 = vld [vmem:[#allocation20 + $0x8] sm:$0xff] }
0x15ca   : > { %v10090_v38 = vpop.f32.mrf.mxu1  ;;  %v10411_v40 = vpop.f32.mrf.mxu0  ;;  %15556 = vmatmul.mubr.msk.f32.gmra.mxu1 %vm10549_vm6, %v10523_v56  ;;  %15583 = vmatprep.subr.mxu0 %v10904_v47 }
0x15cb   : > { %v10524_v36 = vmax.f32 %v10492_v52, 0.0  ;;  %v10412_v43 = vadd.f32 %v10411_v40, %v10090_v38  ;;  %v10495_v49 = vadd.f32 %v19012_v8, %v10417_v33  ;;  %15584 = vmatpush3.msra.mxu0 %v10904_v47  ;;  %v10903_v52 = vld [vmem:[#allocation20] sm:$0xff]  ;;  %v11269_v38 = vld [vmem:[#allocation23 + $0x10] sm:$0xff] }
0x15cc   : > { %v15458_v53 = vpop.f32.mrf.mxu1  ;;  %v15510_v48 = vpop.f32.mrf.mxu0  ;;  %15585 = vmatprep.subr.mxu0 %v10903_v52  ;;  %v11270_v33 = vld [vmem:[#allocation23 + $0x18] sm:$0xff] }
0x15cd   : > { %v10494_v60 = vadd.f32 %v19012_v8, %v10412_v43  ;;  %v10427_v55 = vadd.f32 %v15510_v48, %v15458_v53  ;;  %15558 = vmatprep.mubr.msk.f32.mxu1 %vm10549_vm6, %v10524_v36  ;;  %v10527_v57 = vmax.f32 %v10495_v49, 0.0  ;;  %15586 = vmatpush3.msra.mxu0 %v10903_v52 }
0x15ce   : > { %v10100_v59 = vpop.f32.mrf.mxu1  ;;  %v10421_v50 = vpop.f32.mrf.mxu0  ;;  %15559 = vmatmul.mubr.msk.f32.gmra.mxu1 %vm10549_vm6, %v10525_v45  ;;  %15635 = vmatprep.subr.mxu1 %v11270_v33 }
0x15cf   : > { %v10526_v37 = vmax.f32 %v10494_v60, 0.0  ;;  %v10422_v18 = vadd.f32 %v10421_v50, %v10100_v59  ;;  %v10497_v34 = vadd.f32 %v19012_v8, %v10427_v55  ;;  %15636 = vmatpush3.msra.mxu1 %v11270_v33 }
0x15d0   : > { %v15461_v41 = vpop.f32.mrf.mxu1  ;;  %v15513_v46 = vpop.f32.mrf.mxu0  ;;  %15637 = vmatprep.subr.mxu1 %v11269_v38 }
0x15d1   : > { %v10496_v26 = vadd.f32 %v19012_v8, %v10422_v18  ;;  %v10437_v63 = vadd.f32 %v15513_v46, %v15461_v41  ;;  %15561 = vmatprep.mubr.msk.f32.mxu1 %vm10549_vm6, %v10526_v37  ;;  %v10529_v1 = vmax.f32 %v10497_v34, 0.0  ;;  %15638 = vmatpush3.msra.mxu1 %v11269_v38 }
0x15d2   : > { %v10110_v2 = vpop.f32.mrf.mxu1  ;;  %v10431_v51 = vpop.f32.mrf.mxu0  ;;  %15562 = vmatmul.mubr.msk.f32.gmra.mxu1 %vm10549_vm6, %v10527_v57 }
0x15d3   : > { %v10528_v42 = vmax.f32 %v10496_v26, 0.0  ;;  %v10432_v0 = vadd.f32 %v10431_v51, %v10110_v2  ;;  %v10499_v7 = vadd.f32 %v19012_v8, %v10437_v63 }
0x15d4   : > { %v15464_v9 = vpop.f32.mrf.mxu1  ;;  %v15516_v11 = vpop.f32.mrf.mxu0 }
0x15d5   : > { %v10498_v5 = vadd.f32 %v19012_v8, %v10432_v0  ;;  %v10447_v13 = vadd.f32 %v15516_v11, %v15464_v9  ;;  %15564 = vmatprep.mubr.msk.f32.mxu1 %vm10549_vm6, %v10528_v42  ;;  %v10531_v21 = vmax.f32 %v10499_v7, 0.0 }
0x15d6   : > { %v10120_v31 = vpop.f32.mrf.mxu1  ;;  %v10441_v16 = vpop.f32.mrf.mxu0  ;;  %15565 = vmatmul.mubr.msk.f32.gmra.mxu1 %vm10549_vm6, %v10529_v1 }
0x15d7   : > { %v10530_v62 = vmax.f32 %v10498_v5, 0.0  ;;  %v10442_v20 = vadd.f32 %v10441_v16, %v10120_v31  ;;  %v10501_v25 = vadd.f32 %v19012_v8, %v10447_v13 }
0x15d8   : > { %v15467_v27 = vpop.f32.mrf.mxu1  ;;  %v15519_v10 = vpop.f32.mrf.mxu0 }
0x15d9   : > { %v10500_v24 = vadd.f32 %v19012_v8, %v10442_v20  ;;  %v10457_v6 = vadd.f32 %v15519_v10, %v15467_v27  ;;  %15567 = vmatprep.mubr.msk.f32.mxu1 %vm10549_vm6, %v10530_v62  ;;  %v10533_v15 = vmax.f32 %v10501_v25, 0.0 }
0x15da   : > { %v10130_v14 = vpop.f32.mrf.mxu1  ;;  %v10451_v29 = vpop.f32.mrf.mxu0  ;;  %15568 = vmatmul.mubr.msk.f32.gmra.mxu1 %vm10549_vm6, %v10531_v21 }
0x15db   : > { %v10532_v39 = vmax.f32 %v10500_v24, 0.0  ;;  %v10452_v28 = vadd.f32 %v10451_v29, %v10130_v14  ;;  %v10503_v30 = vadd.f32 %v19012_v8, %v10457_v6 }
0x15dc   : > { %v15470_v32 = vpop.f32.mrf.mxu1  ;;  %v15522_v23 = vpop.f32.mrf.mxu0 }
0x15dd   : > { %v10502_v3 = vadd.f32 %v19012_v8, %v10452_v28  ;;  %v10467_v4 = vadd.f32 %v15522_v23, %v15470_v32  ;;  %15570 = vmatprep.mubr.msk.f32.mxu1 %vm10549_vm6, %v10532_v39  ;;  %v10535_v54 = vmax.f32 %v10503_v30, 0.0 }
0x15de   : > { %v10140_v17 = vpop.f32.mrf.mxu1  ;;  %v10461_v44 = vpop.f32.mrf.mxu0  ;;  %15571 = vmatmul.mubr.msk.f32.gmra.mxu1 %vm10549_vm6, %v10533_v15 }
0x15df   : > { %v10534_v12 = vmax.f32 %v10502_v3, 0.0  ;;  %v10462_v22 = vadd.f32 %v10461_v44, %v10140_v17  ;;  %v10505_v19 = vadd.f32 %v19012_v8, %v10467_v4 }
0x15e1   : > { %v10504_v56 = vadd.f32 %v19012_v8, %v10462_v22  ;;  %15573 = vmatprep.mubr.msk.f32.mxu1 %vm10549_vm6, %v10534_v12  ;;  %v10537_v35 = vmax.f32 %v10505_v19, 0.0  ;;  %v19078_v8 = vld [vmem:[#allocation19] ss:$0 sm:$0xff] }
0x15e2   : > { %15574 = vmatmul.mubr.msk.f32.gmra.mxu1 %vm10549_vm6, %v10535_v54 }
0x15e3   : > { %v10536_v58 = vmax.f32 %v10504_v56, 0.0 }
0x15e5   : > { %15576 = vmatprep.mubr.msk.f32.mxu1 %vm10549_vm6, %v10536_v58 }
0x15e6   : > { %15577 = vmatmul.mubr.msk.f32.gmra.mxu1 %vm10549_vm6, %v10537_v35 }
0x166a   : > { %v15533_v40 = vpop.f32.mrf.mxu1 }
0x166b   : > { %v10718_v36 = vadd.f32 %v15533_v40, %v19078_v8 }
0x166c   : > { %v10712_v43 = vpop.f32.mrf.mxu1 }
0x166d   : > { %v10713_v45 = vadd.f32 %v19078_v8, %v10712_v43  ;;  %v10872_v48 = vmax.f32 %v10718_v36, 0.0 }
0x166e   : > { %v15536_v49 = vpop.f32.mrf.mxu1 }
0x166f   : > { %v10871_v53 = vmax.f32 %v10713_v45, 0.0  ;;  %v10728_v60 = vadd.f32 %v15536_v49, %v19078_v8 }
0x1670   : > { %v10722_v55 = vpop.f32.mrf.mxu1 }
0x1671   : > { %v10723_v59 = vadd.f32 %v19078_v8, %v10722_v55  ;;  %15587 = vmatprep.mubr.msk.f32.mxu0 %vm10549_vm6, %v10871_v53  ;;  %v10874_v18 = vmax.f32 %v10728_v60, 0.0 }
0x1672   : > { %v15539_v50 = vpop.f32.mrf.mxu1  ;;  %15588 = vmatmul.mubr.msk.f32.vlgmr.msra.gmra.mxu0 %vm10549_vm6, %v10872_v48 }
0x1673   : > { %v10873_v37 = vmax.f32 %v10723_v59, 0.0  ;;  %v10738_v57 = vadd.f32 %v15539_v50, %v19078_v8 }
0x1674   : > { %v10732_v34 = vpop.f32.mrf.mxu1 }
0x1675   : > { %v10733_v41 = vadd.f32 %v19078_v8, %v10732_v34  ;;  %15590 = vmatprep.mubr.msk.f32.mxu0 %vm10549_vm6, %v10873_v37  ;;  %v10876_v63 = vmax.f32 %v10738_v57, 0.0 }
0x1676   : > { %v15542_v46 = vpop.f32.mrf.mxu1  ;;  %15591 = vmatmul.mubr.msk.f32.gmra.mxu0 %vm10549_vm6, %v10874_v18 }
0x1677   : > { %v10875_v26 = vmax.f32 %v10733_v41, 0.0  ;;  %v10748_v2 = vadd.f32 %v15542_v46, %v19078_v8 }
0x1678   : > { %v10742_v51 = vpop.f32.mrf.mxu1 }
0x1679   : > { %v10743_v42 = vadd.f32 %v19078_v8, %v10742_v51  ;;  %15593 = vmatprep.mubr.msk.f32.mxu0 %vm10549_vm6, %v10875_v26  ;;  %v10878_v7 = vmax.f32 %v10748_v2, 0.0 }
0x167a   : > { %v15545_v0 = vpop.f32.mrf.mxu1  ;;  %15594 = vmatmul.mubr.msk.f32.gmra.mxu0 %vm10549_vm6, %v10876_v63 }
0x167b   : > { %v10877_v1 = vmax.f32 %v10743_v42, 0.0  ;;  %v10758_v9 = vadd.f32 %v15545_v0, %v19078_v8 }
0x167c   : > { %v10752_v11 = vpop.f32.mrf.mxu1 }
0x167d   : > { %v10753_v5 = vadd.f32 %v19078_v8, %v10752_v11  ;;  %15596 = vmatprep.mubr.msk.f32.mxu0 %vm10549_vm6, %v10877_v1  ;;  %v10880_v16 = vmax.f32 %v10758_v9, 0.0 }
0x167e   : > { %v15548_v13 = vpop.f32.mrf.mxu1  ;;  %15597 = vmatmul.mubr.msk.f32.gmra.mxu0 %vm10549_vm6, %v10878_v7 }
0x167f   : > { %v10879_v31 = vmax.f32 %v10753_v5, 0.0  ;;  %v10768_v62 = vadd.f32 %v15548_v13, %v19078_v8 }
0x1680   : > { %v10762_v20 = vpop.f32.mrf.mxu1 }
0x1681   : > { %v10763_v21 = vadd.f32 %v19078_v8, %v10762_v20  ;;  %15599 = vmatprep.mubr.msk.f32.mxu0 %vm10549_vm6, %v10879_v31  ;;  %v10882_v10 = vmax.f32 %v10768_v62, 0.0 }
0x1682   : > { %v15551_v25 = vpop.f32.mrf.mxu1  ;;  %15600 = vmatmul.mubr.msk.f32.gmra.mxu0 %vm10549_vm6, %v10880_v16 }
0x1683   : > { %v10881_v27 = vmax.f32 %v10763_v21, 0.0  ;;  %v10778_v24 = vadd.f32 %v15551_v25, %v19078_v8  ;;  %v11268_v25 = vld [vmem:[#allocation23 + $0x8] sm:$0xff] }
0x1684   : > { %v10772_v6 = vpop.f32.mrf.mxu1  ;;  %15639 = vmatprep.subr.mxu1 %v11268_v25 }
0x1685   : > { %v10773_v14 = vadd.f32 %v19078_v8, %v10772_v6  ;;  %15602 = vmatprep.mubr.msk.f32.mxu0 %vm10549_vm6, %v10881_v27  ;;  %v10884_v28 = vmax.f32 %v10778_v24, 0.0  ;;  %15640 = vmatpush3.msra.mxu1 %v11268_v25  ;;  %v11267_v27 = vld [vmem:[#allocation23] sm:$0xff] }
0x1686   : > { %v15554_v29 = vpop.f32.mrf.mxu1  ;;  %15603 = vmatmul.mubr.msk.f32.gmra.mxu0 %vm10549_vm6, %v10882_v10  ;;  %15641 = vmatprep.subr.mxu1 %v11267_v27  ;;  %v19144_v10 = vld [vmem:[#allocation22] ss:$0 sm:$0xff] }
0x1687   : > { %v10883_v39 = vmax.f32 %v10773_v14, 0.0  ;;  %v10788_v15 = vadd.f32 %v15554_v29, %v19078_v8  ;;  %15642 = vmatpush3.msra.mxu1 %v11267_v27 }
0x1688   : > { %v10782_v30 = vpop.f32.mrf.mxu1 }
0x1689   : > { %v10783_v32 = vadd.f32 %v19078_v8, %v10782_v30  ;;  %15605 = vmatprep.mubr.msk.f32.mxu0 %vm10549_vm6, %v10883_v39  ;;  %v10886_v4 = vmax.f32 %v10788_v15, 0.0 }
0x168a   : > { %v15557_v23 = vpop.f32.mrf.mxu1  ;;  %15606 = vmatmul.mubr.msk.f32.gmra.mxu0 %vm10549_vm6, %v10884_v28 }
0x168b   : > { %v10885_v3 = vmax.f32 %v10783_v32, 0.0  ;;  %v10798_v17 = vadd.f32 %v15557_v23, %v19078_v8 }
0x168c   : > { %v10792_v44 = vpop.f32.mrf.mxu1 }
0x168d   : > { %v10793_v12 = vadd.f32 %v19078_v8, %v10792_v44  ;;  %15608 = vmatprep.mubr.msk.f32.mxu0 %vm10549_vm6, %v10885_v3  ;;  %v10888_v19 = vmax.f32 %v10798_v17, 0.0 }
0x168e   : > { %v15560_v22 = vpop.f32.mrf.mxu1  ;;  %15609 = vmatmul.mubr.msk.f32.gmra.mxu0 %vm10549_vm6, %v10886_v4 }
0x168f   : > { %v10887_v54 = vmax.f32 %v10793_v12, 0.0  ;;  %v10808_v56 = vadd.f32 %v15560_v22, %v19078_v8 }
0x1690   : > { %v10802_v58 = vpop.f32.mrf.mxu1 }
0x1691   : > { %v10803_v35 = vadd.f32 %v19078_v8, %v10802_v58  ;;  %15611 = vmatprep.mubr.msk.f32.mxu0 %vm10549_vm6, %v10887_v54  ;;  %v10890_v33 = vmax.f32 %v10808_v56, 0.0 }
0x1692   : > { %v15563_v47 = vpop.f32.mrf.mxu1  ;;  %15612 = vmatmul.mubr.msk.f32.gmra.mxu0 %vm10549_vm6, %v10888_v19 }
0x1693   : > { %v10889_v52 = vmax.f32 %v10803_v35, 0.0  ;;  %v10818_v38 = vadd.f32 %v15563_v47, %v19078_v8 }
0x1694   : > { %v10812_v40 = vpop.f32.mrf.mxu1 }
0x1695   : > { %v10813_v36 = vadd.f32 %v19078_v8, %v10812_v40  ;;  %15614 = vmatprep.mubr.msk.f32.mxu0 %vm10549_vm6, %v10889_v52  ;;  %v10892_v49 = vmax.f32 %v10818_v38, 0.0 }
0x1696   : > { %v15566_v43 = vpop.f32.mrf.mxu1  ;;  %15615 = vmatmul.mubr.msk.f32.gmra.mxu0 %vm10549_vm6, %v10890_v33 }
0x1697   : > { %v10891_v45 = vmax.f32 %v10813_v36, 0.0  ;;  %v10828_v53 = vadd.f32 %v15566_v43, %v19078_v8 }
0x1698   : > { %v10822_v48 = vpop.f32.mrf.mxu1 }
0x1699   : > { %v10823_v60 = vadd.f32 %v19078_v8, %v10822_v48  ;;  %15617 = vmatprep.mubr.msk.f32.mxu0 %vm10549_vm6, %v10891_v45  ;;  %v10894_v50 = vmax.f32 %v10828_v53, 0.0 }
0x169a   : > { %v15569_v55 = vpop.f32.mrf.mxu1  ;;  %15618 = vmatmul.mubr.msk.f32.gmra.mxu0 %vm10549_vm6, %v10892_v49 }
0x169b   : > { %v10893_v59 = vmax.f32 %v10823_v60, 0.0  ;;  %v10838_v37 = vadd.f32 %v15569_v55, %v19078_v8 }
0x169c   : > { %v10832_v18 = vpop.f32.mrf.mxu1 }
0x169d   : > { %v10833_v57 = vadd.f32 %v19078_v8, %v10832_v18  ;;  %15620 = vmatprep.mubr.msk.f32.mxu0 %vm10549_vm6, %v10893_v59  ;;  %v10896_v46 = vmax.f32 %v10838_v37, 0.0 }
0x169e   : > { %v15572_v34 = vpop.f32.mrf.mxu1  ;;  %15621 = vmatmul.mubr.msk.f32.gmra.mxu0 %vm10549_vm6, %v10894_v50 }
0x169f   : > { %v10895_v41 = vmax.f32 %v10833_v57, 0.0  ;;  %v10848_v26 = vadd.f32 %v15572_v34, %v19078_v8 }
0x16a0   : > { %v10842_v63 = vpop.f32.mrf.mxu1 }
0x16a1   : > { %v10843_v2 = vadd.f32 %v19078_v8, %v10842_v63  ;;  %15623 = vmatprep.mubr.msk.f32.mxu0 %vm10549_vm6, %v10895_v41  ;;  %v10898_v0 = vmax.f32 %v10848_v26, 0.0 }
0x16a2   : > { %v15575_v51 = vpop.f32.mrf.mxu1  ;;  %15624 = vmatmul.mubr.msk.f32.gmra.mxu0 %vm10549_vm6, %v10896_v46 }
0x16a3   : > { %v10897_v42 = vmax.f32 %v10843_v2, 0.0  ;;  %v10858_v1 = vadd.f32 %v15575_v51, %v19078_v8 }
0x16a4   : > { %v10852_v7 = vpop.f32.mrf.mxu1 }
0x16a5   : > { %v10853_v9 = vadd.f32 %v19078_v8, %v10852_v7  ;;  %15626 = vmatprep.mubr.msk.f32.mxu0 %vm10549_vm6, %v10897_v42  ;;  %v10900_v13 = vmax.f32 %v10858_v1, 0.0 }
0x16a6   : > { %v15578_v11 = vpop.f32.mrf.mxu1  ;;  %15627 = vmatmul.mubr.msk.f32.gmra.mxu0 %vm10549_vm6, %v10898_v0 }
0x16a7   : > { %v10899_v5 = vmax.f32 %v10853_v9, 0.0  ;;  %v10868_v31 = vadd.f32 %v15578_v11, %v19078_v8 }
0x16a8   : > { %v10862_v16 = vpop.f32.mrf.mxu1 }
0x16a9   : > { %v10863_v62 = vadd.f32 %v19078_v8, %v10862_v16  ;;  %15629 = vmatprep.mubr.msk.f32.mxu0 %vm10549_vm6, %v10899_v5  ;;  %v10902_v21 = vmax.f32 %v10868_v31, 0.0 }
0x16aa   : > { %15630 = vmatmul.mubr.msk.f32.gmra.mxu0 %vm10549_vm6, %v10900_v13 }
0x16ab   : > { %v10901_v20 = vmax.f32 %v10863_v62, 0.0 }
0x16ad   : > { %15632 = vmatprep.mubr.msk.f32.mxu0 %vm10549_vm6, %v10901_v20 }
0x16ae   : > { %15633 = vmatmul.mubr.msk.f32.gmra.mxu0 %vm10549_vm6, %v10902_v21 }
0x1732   : > { %v15589_v24 = vpop.f32.mrf.mxu0 }
0x1733   : > { %v11082_v8 = vadd.f32 %v15589_v24, %v19144_v10 }
0x1734   : > { %v11076_v6 = vpop.f32.mrf.mxu0 }
0x1735   : > { %v11077_v14 = vadd.f32 %v19144_v10, %v11076_v6  ;;  %v11236_v28 = vmax.f32 %v11082_v8, 0.0 }
0x1736   : > { %v15592_v29 = vpop.f32.mrf.mxu0 }
0x1737   : > { %v11235_v39 = vmax.f32 %v11077_v14, 0.0  ;;  %v11092_v15 = vadd.f32 %v15592_v29, %v19144_v10 }
0x1738   : > { %v11086_v30 = vpop.f32.mrf.mxu0 }
0x1739   : > { %v11087_v32 = vadd.f32 %v19144_v10, %v11086_v30  ;;  %15643 = vmatprep.mubr.msk.f32.mxu1 %vm10549_vm6, %v11235_v39  ;;  %v11238_v4 = vmax.f32 %v11092_v15, 0.0 }
0x173a   : > { %v15595_v23 = vpop.f32.mrf.mxu0  ;;  %15644 = vmatmul.mubr.msk.f32.vlgmr.msra.gmra.mxu1 %vm10549_vm6, %v11236_v28 }
0x173b   : > { %v11237_v3 = vmax.f32 %v11087_v32, 0.0  ;;  %v11102_v17 = vadd.f32 %v15595_v23, %v19144_v10 }
0x173c   : > { %v11096_v44 = vpop.f32.mrf.mxu0 }
0x173d   : > { %v11097_v12 = vadd.f32 %v19144_v10, %v11096_v44  ;;  %15646 = vmatprep.mubr.msk.f32.mxu1 %vm10549_vm6, %v11237_v3  ;;  %v11240_v19 = vmax.f32 %v11102_v17, 0.0 }
0x173e   : > { %v15598_v22 = vpop.f32.mrf.mxu0  ;;  %15647 = vmatmul.mubr.msk.f32.gmra.mxu1 %vm10549_vm6, %v11238_v4 }
0x173f   : > { %v11239_v54 = vmax.f32 %v11097_v12, 0.0  ;;  %v11112_v56 = vadd.f32 %v15598_v22, %v19144_v10 }
0x1740   : > { %v11106_v58 = vpop.f32.mrf.mxu0 }
0x1741   : > { %v11107_v35 = vadd.f32 %v19144_v10, %v11106_v58  ;;  %15649 = vmatprep.mubr.msk.f32.mxu1 %vm10549_vm6, %v11239_v54  ;;  %v11242_v33 = vmax.f32 %v11112_v56, 0.0 }
0x1742   : > { %v15601_v47 = vpop.f32.mrf.mxu0  ;;  %15650 = vmatmul.mubr.msk.f32.gmra.mxu1 %vm10549_vm6, %v11240_v19 }
0x1743   : > { %v11241_v52 = vmax.f32 %v11107_v35, 0.0  ;;  %v11122_v38 = vadd.f32 %v15601_v47, %v19144_v10 }
0x1744   : > { %v11116_v40 = vpop.f32.mrf.mxu0 }
0x1745   : > { %v11117_v36 = vadd.f32 %v19144_v10, %v11116_v40  ;;  %15652 = vmatprep.mubr.msk.f32.mxu1 %vm10549_vm6, %v11241_v52  ;;  %v11244_v49 = vmax.f32 %v11122_v38, 0.0 }
0x1746   : > { %v15604_v43 = vpop.f32.mrf.mxu0  ;;  %15653 = vmatmul.mubr.msk.f32.gmra.mxu1 %vm10549_vm6, %v11242_v33 }
0x1747   : > { %v11243_v45 = vmax.f32 %v11117_v36, 0.0  ;;  %v11132_v53 = vadd.f32 %v15604_v43, %v19144_v10 }
0x1748   : > { %v11126_v48 = vpop.f32.mrf.mxu0 }
0x1749   : > { %v11127_v60 = vadd.f32 %v19144_v10, %v11126_v48  ;;  %15655 = vmatprep.mubr.msk.f32.mxu1 %vm10549_vm6, %v11243_v45  ;;  %v11246_v50 = vmax.f32 %v11132_v53, 0.0 }
0x174a   : > { %v15607_v55 = vpop.f32.mrf.mxu0  ;;  %15656 = vmatmul.mubr.msk.f32.gmra.mxu1 %vm10549_vm6, %v11244_v49 }
0x174b   : > { %v11245_v59 = vmax.f32 %v11127_v60, 0.0  ;;  %v11142_v37 = vadd.f32 %v15607_v55, %v19144_v10  ;;  %v16786_v55 = vmov 1.0  }
0x174c   : > { %v11136_v18 = vpop.f32.mrf.mxu0  ;;  %11663 = vmatprep.mubr.f32.mxu0 %v16786_v55 }
0x174d   : > { %v11137_v57 = vadd.f32 %v19144_v10, %v11136_v18  ;;  %15658 = vmatprep.mubr.msk.f32.mxu1 %vm10549_vm6, %v11245_v59  ;;  %v11248_v46 = vmax.f32 %v11142_v37, 0.0 }
0x174e   : > { %v15610_v34 = vpop.f32.mrf.mxu0  ;;  %15659 = vmatmul.mubr.msk.f32.gmra.mxu1 %vm10549_vm6, %v11246_v50 }
0x174f   : > { %v11247_v41 = vmax.f32 %v11137_v57, 0.0  ;;  %v11152_v26 = vadd.f32 %v15610_v34, %v19144_v10 }
0x1750   : > { %v11146_v63 = vpop.f32.mrf.mxu0 }
0x1751   : > { %v11147_v2 = vadd.f32 %v19144_v10, %v11146_v63  ;;  %15661 = vmatprep.mubr.msk.f32.mxu1 %vm10549_vm6, %v11247_v41  ;;  %v11250_v0 = vmax.f32 %v11152_v26, 0.0 }
0x1752   : > { %v15613_v51 = vpop.f32.mrf.mxu0  ;;  %15662 = vmatmul.mubr.msk.f32.gmra.mxu1 %vm10549_vm6, %v11248_v46 }
0x1753   : > { %v11249_v42 = vmax.f32 %v11147_v2, 0.0  ;;  %v11162_v1 = vadd.f32 %v15613_v51, %v19144_v10 }
0x1754   : > { %v11156_v7 = vpop.f32.mrf.mxu0 }
0x1755   : > { %v11157_v9 = vadd.f32 %v19144_v10, %v11156_v7  ;;  %15664 = vmatprep.mubr.msk.f32.mxu1 %vm10549_vm6, %v11249_v42  ;;  %v11252_v13 = vmax.f32 %v11162_v1, 0.0 }
0x1756   : > { %v15616_v11 = vpop.f32.mrf.mxu0  ;;  %15665 = vmatmul.mubr.msk.f32.gmra.mxu1 %vm10549_vm6, %v11250_v0 }
0x1757   : > { %v11251_v5 = vmax.f32 %v11157_v9, 0.0  ;;  %v11172_v31 = vadd.f32 %v15616_v11, %v19144_v10 }
0x1758   : > { %v11166_v16 = vpop.f32.mrf.mxu0 }
0x1759   : > { %v11167_v62 = vadd.f32 %v19144_v10, %v11166_v16  ;;  %15667 = vmatprep.mubr.msk.f32.mxu1 %vm10549_vm6, %v11251_v5  ;;  %v11254_v25 = vmax.f32 %v11172_v31, 0.0 }
0x175a   : > { %v15619_v20 = vpop.f32.mrf.mxu0  ;;  %15668 = vmatmul.mubr.msk.f32.gmra.mxu1 %vm10549_vm6, %v11252_v13 }
0x175b   : > { %v11253_v21 = vmax.f32 %v11167_v62, 0.0  ;;  %v11182_v27 = vadd.f32 %v15619_v20, %v19144_v10 }
0x175c   : > { %v11176_v24 = vpop.f32.mrf.mxu0 }
0x175d   : > { %v11177_v8 = vadd.f32 %v19144_v10, %v11176_v24  ;;  %15670 = vmatprep.mubr.msk.f32.mxu1 %vm10549_vm6, %v11253_v21  ;;  %v11256_v29 = vmax.f32 %v11182_v27, 0.0 }
0x175e   : > { %v15622_v6 = vpop.f32.mrf.mxu0  ;;  %15671 = vmatmul.mubr.msk.f32.gmra.mxu1 %vm10549_vm6, %v11254_v25 }
0x175f   : > { %v11255_v14 = vmax.f32 %v11177_v8, 0.0  ;;  %v11192_v39 = vadd.f32 %v15622_v6, %v19144_v10  ;;  %v19229_v6 = vld [vmem:[#allocation25] ss:$0 sm:$0xff] }
0x1760   : > { %v11186_v28 = vpop.f32.mrf.mxu0 }
0x1761   : > { %v11187_v15 = vadd.f32 %v19144_v10, %v11186_v28  ;;  %15673 = vmatprep.mubr.msk.f32.mxu1 %vm10549_vm6, %v11255_v14  ;;  %v11258_v23 = vmax.f32 %v11192_v39, 0.0 }
0x1762   : > { %v15625_v30 = vpop.f32.mrf.mxu0  ;;  %15674 = vmatmul.mubr.msk.f32.gmra.mxu1 %vm10549_vm6, %v11256_v29 }
0x1763   : > { %v11257_v32 = vmax.f32 %v11187_v15, 0.0  ;;  %v11202_v3 = vadd.f32 %v15625_v30, %v19144_v10 }
0x1764   : > { %v11196_v4 = vpop.f32.mrf.mxu0 }
0x1765   : > { %v11197_v17 = vadd.f32 %v19144_v10, %v11196_v4  ;;  %15676 = vmatprep.mubr.msk.f32.mxu1 %vm10549_vm6, %v11257_v32  ;;  %v11260_v22 = vmax.f32 %v11202_v3, 0.0 }
0x1766   : > { %v15628_v44 = vpop.f32.mrf.mxu0  ;;  %15677 = vmatmul.mubr.msk.f32.gmra.mxu1 %vm10549_vm6, %v11258_v23 }
0x1767   : > { %v11259_v12 = vmax.f32 %v11197_v17, 0.0  ;;  %v11212_v54 = vadd.f32 %v15628_v44, %v19144_v10 }
0x1768   : > { %v11206_v19 = vpop.f32.mrf.mxu0 }
0x1769   : > { %v11207_v56 = vadd.f32 %v19144_v10, %v11206_v19  ;;  %15679 = vmatprep.mubr.msk.f32.mxu1 %vm10549_vm6, %v11259_v12  ;;  %v11262_v47 = vmax.f32 %v11212_v54, 0.0 }
0x176a   : > { %v15631_v58 = vpop.f32.mrf.mxu0  ;;  %15680 = vmatmul.mubr.msk.f32.gmra.mxu1 %vm10549_vm6, %v11260_v22 }
0x176b   : > { %v11261_v35 = vmax.f32 %v11207_v56, 0.0  ;;  %v11222_v52 = vadd.f32 %v15631_v58, %v19144_v10 }
0x176c   : > { %v11216_v33 = vpop.f32.mrf.mxu0 }
0x176d   : > { %v11217_v38 = vadd.f32 %v19144_v10, %v11216_v33  ;;  %15682 = vmatprep.mubr.msk.f32.mxu1 %vm10549_vm6, %v11261_v35  ;;  %v11264_v43 = vmax.f32 %v11222_v52, 0.0 }
0x176e   : > { %v15634_v40 = vpop.f32.mrf.mxu0  ;;  %15683 = vmatmul.mubr.msk.f32.gmra.mxu1 %vm10549_vm6, %v11262_v47 }
0x176f   : > { %v11263_v36 = vmax.f32 %v11217_v38, 0.0  ;;  %v11232_v45 = vadd.f32 %v15634_v40, %v19144_v10 }
0x1770   : > { %v11226_v49 = vpop.f32.mrf.mxu0 }
0x1771   : > { %v11227_v53 = vadd.f32 %v19144_v10, %v11226_v49  ;;  %15685 = vmatprep.mubr.msk.f32.mxu1 %vm10549_vm6, %v11263_v36  ;;  %v11266_v60 = vmax.f32 %v11232_v45, 0.0 }
0x1772   : > { %15686 = vmatmul.mubr.msk.f32.gmra.mxu1 %vm10549_vm6, %v11264_v43 }
0x1773   : > { %v11265_v48 = vmax.f32 %v11227_v53, 0.0 }
0x1775   : > { %15688 = vmatprep.mubr.msk.f32.mxu1 %vm10549_vm6, %v11265_v48 }
0x1776   : > { %15689 = vmatmul.mubr.msk.f32.gmra.mxu1 %vm10549_vm6, %v11266_v60 }
0x17fa   : > { %v19211_v59 = vpop.f32.mrf.mxu1 }
0x17fc   : > { %v19213_v50 = vpop.f32.mrf.mxu1 }
0x17fe   : > { %v19215_v37 = vpop.f32.mrf.mxu1 }
0x17ff   : > { %v11456_v49 = vadd.f32 %v19215_v37, %v19229_v6 }
0x1800   : > { %v19217_v10 = vpop.f32.mrf.mxu1 }
0x1801   : > { %v11451_v48 = vadd.f32 %v19229_v6, %v19217_v10  ;;  %v11670_v10 = vld [vmem:[#allocation26 + $0x8] sm:$0xff] }
0x1802   : > { %v19219_v18 = vpop.f32.mrf.mxu1 }
0x1803   : > { %v11466_v40 = vadd.f32 %v19219_v18, %v19229_v6  ;;  %v11446_v18 = vadd.f32 %v19211_v59, %v19229_v6  ;;  %v11671_v59 = vld [vmem:[#allocation26 + $0x10] sm:$0xff] }
0x1804   : > { %v19221_v57 = vpop.f32.mrf.mxu1 }
0x1805   : > { %v11461_v43 = vadd.f32 %v19229_v6, %v19221_v57  ;;  %v11441_v57 = vadd.f32 %v19229_v6, %v19213_v50  ;;  %v11669_v50 = vld [vmem:[#allocation26] sm:$0xff] }
0x1806   : > { %v15654_v34 = vpop.f32.mrf.mxu1 }
0x1807   : > { %v11476_v47 = vadd.f32 %v15654_v34, %v19229_v6  ;;  %v11672_v34 = vld [vmem:[#allocation26 + $0x18] sm:$0xff] }
0x1808   : > { %v11470_v41 = vpop.f32.mrf.mxu1 }
0x1809   : > { %v11471_v33 = vadd.f32 %v19229_v6, %v11470_v41 }
0x180a   : > { %v15657_v46 = vpop.f32.mrf.mxu1 }
0x180b   : > { %v11486_v19 = vadd.f32 %v15657_v46, %v19229_v6 }
0x180c   : > { %v11480_v26 = vpop.f32.mrf.mxu1 }
0x180d   : > { %v11481_v58 = vadd.f32 %v19229_v6, %v11480_v26  ;;  %v11751_v26 = vld [vmem:[#allocation29 + $0x18] sm:$0xff] }
0x180e   : > { %v15660_v63 = vpop.f32.mrf.mxu1 }
0x180f   : > { %v11496_v44 = vadd.f32 %v15660_v63, %v19229_v6  ;;  %v11750_v63 = vld [vmem:[#allocation29 + $0x10] sm:$0xff] }
0x1810   : > { %v11490_v2 = vpop.f32.mrf.mxu1 }
0x1811   : > { %v11491_v22 = vadd.f32 %v19229_v6, %v11490_v2  ;;  %v11749_v2 = vld [vmem:[#allocation29 + $0x8] sm:$0xff] }
0x1812   : > { %v15663_v51 = vpop.f32.mrf.mxu1 }
0x1813   : > { %v11506_v23 = vadd.f32 %v15663_v51, %v19229_v6  ;;  %v11748_v51 = vld [vmem:[#allocation29] sm:$0xff] }
0x1814   : > { %v11500_v42 = vpop.f32.mrf.mxu1 }
0x1815   : > { %v11501_v4 = vadd.f32 %v19229_v6, %v11500_v42  ;;  %v11673_v42 = vld [vmem:[#allocation28] sm:$0x1] }
0x1816   : > { %v15666_v0 = vpop.f32.mrf.mxu1 }
0x1817   : > { %v11516_v39 = vadd.f32 %v15666_v0, %v19229_v6 }
0x1818   : > { %v11510_v1 = vpop.f32.mrf.mxu1 }
0x1819   : > { %v11511_v30 = vadd.f32 %v19229_v6, %v11510_v1 }
0x181a   : > { %v19223_v7 = vpop.f32.mrf.mxu1 }
0x181b   : > { %v11526_v60 = vadd.f32 %v19223_v7, %v19229_v6 }
0x181c   : > { %v19225_v9 = vpop.f32.mrf.mxu1 }
0x181d   : > { %v11521_v37 = vadd.f32 %v19229_v6, %v19225_v9 }
0x181e   : > { %v15672_v11 = vpop.f32.mrf.mxu1 }
0x181f   : > { %v11536_v45 = vadd.f32 %v15672_v11, %v19229_v6  ;;  %v11830_v11 = vld [vmem:[%s19649_s12 + $0x18] sm:$0xff] }
0x1820   : > { %v19227_v5 = vpop.f32.mrf.mxu1 }
0x1821   : > { %v11531_v53 = vadd.f32 %v19229_v6, %v19227_v5  ;;  %v11829_v5 = vld [vmem:[%s19649_s12 + $0x10] sm:$0xff] }
0x1822   : > { %v15675_v13 = vpop.f32.mrf.mxu1 }
0x1823   : > { %v11546_v38 = vadd.f32 %v15675_v13, %v19229_v6  ;;  %v11828_v13 = vld [vmem:[%s19649_s12 + $0x8] sm:$0xff] }
0x1824   : > { %v11540_v31 = vpop.f32.mrf.mxu1 }
0x1825   : > { %v11541_v36 = vadd.f32 %v19229_v6, %v11540_v31  ;;  %v11827_v31 = vld [vmem:[%s19649_s12] sm:$0xff] }
0x1826   : > { %v15678_v16 = vpop.f32.mrf.mxu1 }
0x1827   : > { %v11556_v35 = vadd.f32 %v15678_v16, %v19229_v6  ;;  %v11752_v16 = vld [vmem:[#allocation31] sm:$0x1] }
0x1828   : > { %v11550_v62 = vpop.f32.mrf.mxu1 }
0x1829   : > { %v11551_v52 = vadd.f32 %v19229_v6, %v11550_v62 }
0x182a   : > { %v15681_v20 = vpop.f32.mrf.mxu1 }
0x182b   : > { %v11566_v54 = vadd.f32 %v15681_v20, %v19229_v6 }
0x182c   : > { %v11560_v21 = vpop.f32.mrf.mxu1 }
0x182d   : > { %v11561_v56 = vadd.f32 %v19229_v6, %v11560_v21 }
0x182e   : > { %v15684_v25 = vpop.f32.mrf.mxu1 }
0x182f   : > { %v11576_v17 = vadd.f32 %v15684_v25, %v19229_v6 }
0x1830   : > { %v11570_v27 = vpop.f32.mrf.mxu1 }
0x1831   : > { %v11571_v12 = vadd.f32 %v19229_v6, %v11570_v27  ;;  %v11831_v27 = vld [vmem:[#allocation32] sm:$0x1] }
0x1832   : > { %v15687_v24 = vpop.f32.mrf.mxu1 }
0x1833   : > { %v11586_v32 = vadd.f32 %v15687_v24, %v19229_v6 }
0x1834   : > { %v11580_v8 = vpop.f32.mrf.mxu1 }
0x1835   : > { %v11581_v3 = vadd.f32 %v19229_v6, %v11580_v8 }
0x1836   : > { %v15690_v14 = vpop.f32.mrf.mxu1 }
0x1837   : > { %v11596_v29 = vadd.f32 %v15690_v14, %v19229_v6 }
0x1838   : > { %v11590_v28 = vpop.f32.mrf.mxu1 }
0x1839   : > { %v11591_v15 = vadd.f32 %v19229_v6, %v11590_v28  ;;  %14391 = vmatprep.subr.mxu0 %v11596_v29 }
0x183a   : > { %14392 = vmatpush3.msra.mxu0 %v11516_v39 }
0x183b   : > { %14393 = vmatprep.subr.mxu0 %v11591_v15 }
0x183c   : > { %14394 = vmatpush3.msra.mxu0 %v11511_v30 }
0x183d   : > { %14395 = vmatprep.subr.mxu0 %v11586_v32 }
0x183e   : > { %14396 = vmatpush3.msra.mxu0 %v11506_v23 }
0x183f   : > { %14397 = vmatprep.subr.mxu0 %v11581_v3 }
0x1840   : > { %14398 = vmatpush3.msra.mxu0 %v11501_v4 }
0x1841   : > { %14399 = vmatprep.subr.mxu0 %v11576_v17 }
0x1842   : > { %14400 = vmatpush3.msra.mxu0 %v11496_v44 }
0x1843   : > { %14401 = vmatprep.subr.mxu0 %v11571_v12 }
0x1844   : > { %14402 = vmatpush3.msra.mxu0 %v11491_v22 }
0x1845   : > { %14403 = vmatprep.subr.mxu0 %v11566_v54 }
0x1846   : > { %14404 = vmatpush3.msra.mxu0 %v11486_v19 }
0x1847   : > { %14405 = vmatprep.subr.mxu0 %v11561_v56 }
0x1848   : > { %14406 = vmatpush3.msra.mxu0 %v11481_v58 }
0x1849   : > { %14407 = vmatprep.subr.mxu0 %v11556_v35 }
0x184a   : > { %14408 = vmatpush3.msra.mxu0 %v11476_v47 }
0x184b   : > { %14409 = vmatprep.subr.mxu0 %v11551_v52 }
0x184c   : > { %14410 = vmatpush3.msra.mxu0 %v11471_v33 }
0x184d   : > { %14411 = vmatprep.subr.mxu0 %v11546_v38 }
0x184e   : > { %14412 = vmatpush3.msra.mxu0 %v11466_v40 }
0x184f   : > { %14413 = vmatprep.subr.mxu0 %v11541_v36 }
0x1850   : > { %14414 = vmatpush3.msra.mxu0 %v11461_v43 }
0x1851   : > { %14415 = vmatprep.subr.mxu0 %v11536_v45 }
0x1852   : > { %14416 = vmatpush3.msra.mxu0 %v11456_v49 }
0x1853   : > { %14417 = vmatprep.subr.mxu0 %v11531_v53 }
0x1854   : > { %14418 = vmatpush3.msra.mxu0 %v11451_v48 }
0x1855   : > { %14419 = vmatprep.subr.mxu0 %v11526_v60 }
0x1856   : > { %14420 = vmatpush3.msra.mxu0 %v11446_v18 }
0x1857   : > { %14421 = vmatprep.subr.mxu0 %v11521_v37 }
0x1858   : > { %14422 = vmatpush3.msra.mxu0 %v11441_v57 }
0x1859   : > { %11664 = vmatmul.mubr.f32.vlgmr.msra.gmra.mxu0 %v16786_v55  ;;  %15691 = vmatprep.subr.mxu0 %v16784_v61 }
0x185a   : > { %15692 = vmatpush3.msra.mxu0 %v11672_v34  ;;  %15699 = vmatprep.mubr.msk.f32.mxu0 %vm16785_vm5, %v16784_v61 }
0x185b   : > { %15693 = vmatprep.subr.mxu0 %v16784_v61 }
0x185c   : > { %15694 = vmatpush3.msra.mxu0 %v11671_v59 }
0x185d   : > { %15695 = vmatprep.subr.mxu0 %v16784_v61 }
0x185e   : > { %15696 = vmatpush3.msra.mxu0 %v11670_v10 }
0x185f   : > { %15697 = vmatprep.subr.mxu0 %v16784_v61 }
0x1860   : > { %15698 = vmatpush3.msra.mxu0 %v11669_v50 }
0x1861   : > { %15702 = vmatprep.subr.mxu0 %v16784_v61 }
0x1919   : > { %v14423_v55 = vpop.f32.mrf.mxu0 }
0x191b   : > { %v14424_v41 = vpop.f32.mrf.mxu0 }
0x191c   : > { %v14425_v46 = vadd.f32 %v14424_v41, %v14423_v55 }
0x191e   : > { %15700 = vmatmul.mubr.msk.f32.vlgmr.msra.gmra.mxu0 %vm10549_vm6, %v14425_v46 }
0x191f   : > { %15703 = vmatpush3.msra.mxu0 %v11751_v26  ;;  %15710 = vmatprep.mubr.msk.f32.mxu0 %vm16785_vm5, %v16784_v61 }
0x1920   : > { %15704 = vmatprep.subr.mxu0 %v16784_v61 }
0x1921   : > { %15705 = vmatpush3.msra.mxu0 %v11750_v63 }
0x1922   : > { %15706 = vmatprep.subr.mxu0 %v16784_v61 }
0x1923   : > { %15707 = vmatpush3.msra.mxu0 %v11749_v2 }
0x1924   : > { %15708 = vmatprep.subr.mxu0 %v16784_v61 }
0x1925   : > { %15709 = vmatpush3.msra.mxu0 %v11748_v51 }
0x1926   : > { %15713 = vmatprep.subr.mxu0 %v16784_v61 }
0x19de   : > { %v11743_v0 = vpop.f32.mrf.mxu0 }
0x19df   : > { %v11744_v1 = vadd.f32 %v11743_v0, %v11673_v42 }
0x19e0   : > { %v15701_v7 = vpop.f32.mrf.mxu0 }
0x19e1   : > { %v11747_v9 = vmax.f32 %v11744_v1, 0.0 }
0x19e3   : > { %15711 = vmatmul.mubr.msk.f32.vlgmr.msra.gmra.mxu0 %vm10549_vm6, %v11747_v9 }
0x19e4   : > { %15714 = vmatpush3.msra.mxu0 %v11830_v11  ;;  %15721 = vmatprep.mubr.msk.f32.mxu0 %vm16785_vm5, %v16784_v61 }
0x19e5   : > { %15715 = vmatprep.subr.mxu0 %v16784_v61 }
0x19e6   : > { %15716 = vmatpush3.msra.mxu0 %v11829_v5 }
0x19e7   : > { %15717 = vmatprep.subr.mxu0 %v16784_v61 }
0x19e8   : > { %15718 = vmatpush3.msra.mxu0 %v11828_v13 }
0x19e9   : > { %15719 = vmatprep.subr.mxu0 %v16784_v61 }
0x19ea   : > { %15720 = vmatpush3.msra.mxu0 %v11827_v31 }
0x1aa3   : > { %v11822_v62 = vpop.f32.mrf.mxu0 }
0x1aa4   : > { %v11823_v20 = vadd.f32 %v11822_v62, %v11752_v16 }
0x1aa5   : > { %v15712_v21 = vpop.f32.mrf.mxu0 }
0x1aa6   : > { %v11826_v25 = vmax.f32 %v11823_v20, 0.0 }
0x1aa8   : > { %15722 = vmatmul.mubr.msk.f32.vlgmr.msra.gmra.mxu0 %vm10549_vm6, %v11826_v25 }
0x1b68   : > { %v11901_v24 = vpop.f32.mrf.mxu0 }
0x1b69   : > { %v11902_v8 = vadd.f32 %v11901_v24, %v11831_v27 }
0x1b6a   : > { %v15723_v61 = vpop.f32.mrf.mxu0 }
0x1b6b   : > { %11906 = vst.msk [vmem:[%s1328_s4] sm:$0x1] %vm11905_vm7, %v11902_v8 }
0x1b6c   : > { %16633 = shalt.err (!%p16630_p9)
}
0x1b6d   : > { %s16634_s2 = scalar_lea.hbm %s19301_s6, 16  ;;  %s16638_s4 = scalar_lea.hbm %s19650_s1, 32 }
0x1b6e   : > { %p16635_p6 = scmp.ne.s32.totalorder %s19301_s6, %s16634_s2  ;;  %p16639_p4 = scmp.lt.s32.totalorder %s19301_s6, %s19650_s1 }
0x1b6f   : > { %p16640_p2 = scmp.lt.s32.totalorder %s16638_s4, %s16634_s2 }
0x1b70   : > { %p16636_p13 = pnand %p16635_p6, %p19651_p5 }
0x1b71   : > { %p16641_p8 = por %p16640_p2, %p16639_p4 }
0x1b72   : > { %p16637_p7 = pneg %p16636_p13 }
0x1b74   : > { %p16642_p10 = pnand %p16641_p8, %p16637_p7 }
0x1b76   : > { %16645 = shalt.err (!%p16642_p10)
}
0x1b77   : > { %15834 = dma.vmem_to_hbm [thread:$0]  (%p19651_p5), %s11921_s5, 16, %s19301_s6, %s11908_s7  }
0x1b78 PF: > { %s11932_s9 = sand.u32 1, %s16712_s15   ;;  %p19652_p11 = scmp.ne.s32.totalorder %s19481_s28, 0 }
0x1b79   : > { %p19653_p0 = scmp.ge.s32.totalorder %s16724_s18, 2  ;;  %s11933_s11 = scalar_lea.sflag [#allocation4], %s11932_s9 }
0x1b7b   : > { %p15899_p1 = pnand %p19653_p0, %p19652_p11 }
0x1b7d   : > { %p15900_p3 = pneg %p15899_p1 }
0x1b7f   : > { %16707 = dma.done.wait (%p15900_p3), %s11933_s11, 16  }
0x1b80   : > { %16709 = vsyncadd (%p15900_p3), %s11933_s11, 4294967280  ;;  %p92_p12 = scmp.ge.s32.totalorder %s17158_s29, 4   ;;  %s19654_s15 = smov %s16716_s16 }
0x1b81   : > { %s19655_s16 = smov %s16720_s0  ;;  %s19656_s0 = smov %s17170_s10 }
0x1b82   : > { %s19657_s18 = smov %s17158_s29  ;;  %94 = sbr.rel (!%p92_p12) target bundleno = 81 (0x51), region = 386 }
0x1b87   :  { %11937 = vsyncpa [#allocation3], 1 }
0x1b88   :  { %11939 = vsyncpa [#allocation3 + $0x1], 1 }
0x1b89   :  { %11940 = vsyncpa [#allocation6], 1 }
0x1b8a   :  { %11941 = vsyncpa [#allocation9], 1 }
0x1b8b   :  { %11942 = vsyncpa [#allocation12], 1 }
0x1b8c   :  { %11943 = vsyncpa [#allocation15], 1 }
0x1b8d   :  { %11944 = vsyncpa [#allocation18], 1 }
0x1b8e   :  { %11945 = vsyncpa [#allocation21], 1 }
0x1b8f   :  { %11946 = vsyncpa [#allocation24], 1 }
0x1b90   :  { %11947 = vsyncpa [#allocation27], 1 }
0x1b91   :  { %11948 = vsyncpa [#allocation30], 1 }
0x1b92   :  { %11949 = vsyncpa [#allocation33], 1 }
0x1b93   :  { %11950 = vsyncpa [#allocation4], 1 }
0x1b94   :  { %11952 = vsyncpa [#allocation4 + $0x1], 1 }

</bundles_post_ra>
